<compile_context>
chip_gen: v6e
topology: v6e:2x2x1
jax: 0.10.0
libtpu: 0.0.40
codegen_flags: <defaults>
</compile_context>

<pallas_src>
import functools

import numpy as np

import jax
import jax.numpy as jnp
from jax import lax
from jax.experimental import pallas as pl
from jax.experimental.pallas import tpu as pltpu


# ----------------------------- in-kernel helpers --------------------------------

def _layernorm(x, w, b, eps):
    # biased-variance LayerNorm over the last axis (matches torch.nn.LayerNorm).
    mu = jnp.mean(x, axis=-1, keepdims=True)
    xc = x - mu
    var = jnp.mean(xc * xc, axis=-1, keepdims=True)
    return xc * lax.rsqrt(var + eps) * w + b


def _erf_f32(x):
    # XLA's float32 rational approximation of erf, built only from mul/add (+ one EUP
    # reciprocal), so it lowers in Mosaic unconditionally.
    alpha = (0.00022905065861350646, 0.0034082910107109506, 0.050955695062380861,
             0.18520832239976145, 1.128379143519084)
    beta = (-1.1791602954361697e-07, 2.3547966471313185e-05, 0.0010179625278914885,
            0.014070470171167667, 0.11098505178285362, 0.49746925110067538, 1.0)
    x = jnp.clip(x, -4.0, 4.0)
    x2 = x * x
    p = x2 * alpha[0] + alpha[1]
    for c in alpha[2:]:
        p = p * x2 + c
    q = x2 * beta[0] + beta[1]
    for c in beta[2:]:
        q = q * x2 + c
    # EUP approx reciprocal instead of a VALU divide (~1e-3 rel tolerance vs exact erf).
    return (x * p) * pl.reciprocal(q, approx=True)


def _gelu_erf(x):
    # exact-erf-style GELU (nn.GELU default), with the division moved to the EUP.
    return 0.5 * x * (1.0 + _erf_f32(x * 0.7071067811865476))


# ----------------------------- fused block kernel -------------------------------

def _msblock_kernel(x_ref, gq_ref, gkv_ref, gsk_ref, minf_ref,
                    n1w_ref, n1b_ref, qkvw_ref, qkvb_ref,
                    wq_ref, wkv_ref, lnc_ref, lna_ref,
                    nqw_ref, nqb_ref, nkw_ref, nkb_ref, nvw_ref, nvb_ref,
                    relrep_ref, relmask_ref, wrel_ref,
                    pw_ref, pb_ref, n2w_ref, n2b_ref,
                    f1w_ref, f1b_ref, f2w_ref, f2b_ref,
                    o_ref, att_scr, skip_scr, *,
                    bt, n_tok, num_heads, head_dim, lq, lk,
                    taps_q, taps_kv, taps_sk, scale, eps):
    att_dim = num_heads * head_dim
    f32 = jnp.float32
    bf16 = jnp.bfloat16

    # ---- norm1 + fused qkv projection, batched over the bt images of this grid step ----
    x_all = x_ref[...].astype(f32)                                        # (bt*N, dim)
    xn = _layernorm(x_all, n1w_ref[...], n1b_ref[...], eps)
    qkv = jnp.dot(xn.astype(bf16), qkvw_ref[...],
                  preferred_element_type=f32) + qkvb_ref[...]             # (bt*N, 3*att_dim)

    gq = gq_ref[...]
    gkv = gkv_ref[...]
    gsk = gsk_ref[...]
    wq = wq_ref[...]
    wkv = wkv_ref[...]
    minf = minf_ref[...]
    lnc = lnc_ref[...]
    lna = lna_ref[...]
    relrep = relrep_ref[...]
    relmask = relmask_ref[...]
    wrel = wrel_ref[...]

    def grouped_ln(t, w_row, b_row):
        # per-head LayerNorm for BOTH heads in one lane-packed pass; the group mean /
        # variance reductions run as (L, att_dim) @ (att_dim, att_dim) matmuls on the MXU.
        tc = jnp.dot(t, lnc, preferred_element_type=f32)                  # x - per-head mean
        var = jnp.dot(tc * tc, lna, preferred_element_type=f32)           # per-head variance
        return tc * lax.rsqrt(var + eps) * w_row + b_row

    # TODO(synk): the 0/1 gather matmuls (and the packed rel-pos weight) do not scale to
    # production MViT shapes (H=W=56); they would need strided-slice pooling + tiled rel-pos.
    for b in range(bt):
        r0 = b * n_tok
        qkv_b = qkv[r0:r0 + n_tok, :]
        x_b = x_all[r0:r0 + n_tok, :]

        # pooling gathers: q, (k|v fused along lanes), and the max-pool shortcut taps
        q_taps = jnp.dot(gq, qkv_b[:, 0:att_dim], preferred_element_type=f32)
        kv_taps = jnp.dot(gkv, qkv_b[:, att_dim:3 * att_dim], preferred_element_type=f32)
        x_taps = jnp.dot(gsk, x_b, preferred_element_type=f32)

        # strided depthwise pooling conv == per-tap weighted sum (k and v in one pass)
        q_pool = q_taps[0:lq, :] * wq[0]
        for t in range(1, taps_q):
            q_pool = q_pool + q_taps[t * lq:(t + 1) * lq, :] * wq[t]
        kv_pool = kv_taps[0:lk, :] * wkv[0]
        for t in range(1, taps_kv):
            kv_pool = kv_pool + kv_taps[t * lk:(t + 1) * lk, :] * wkv[t]

        # shortcut max-pool of the raw input tokens (additive -1e30 marks padded taps)
        skip = x_taps[0:lq, :] + minf[0]
        for t in range(1, taps_sk):
            skip = jnp.maximum(skip, x_taps[t * lq:(t + 1) * lq, :] + minf[t])
        skip_scr[b * lq:(b + 1) * lq, :] = skip

        qn = grouped_ln(q_pool, nqw_ref[...], nqb_ref[...])               # (lq, att_dim)
        kn = grouped_ln(kv_pool[:, 0:att_dim], nkw_ref[...], nkb_ref[...])
        vn = grouped_ln(kv_pool[:, att_dim:2 * att_dim], nvw_ref[...], nvb_ref[...])

        # decomposed relative-position bias for BOTH heads via two MXU matmuls:
        #   replicate qn over the (q_h + q_w) blocks with a 0/1 matmul, mask per-row block
        #   selection, then one packed matmul gives bias[l, h*lk + m].
        qn_rep = jnp.dot(qn, relrep, preferred_element_type=f32)          # (lq, blk*att_dim)
        bias_all = jnp.dot(qn_rep * relmask, wrel,
                           preferred_element_type=f32)                    # (lq, heads*lk)

        for h in range(num_heads):
            c0 = h * head_dim
            qh = qn[:, c0:c0 + head_dim]
            kh = kn[:, c0:c0 + head_dim]
            vh = vn[:, c0:c0 + head_dim]
            scores = lax.dot_general(qh * scale, kh, (((1,), (1,)), ((), ())),
                                     preferred_element_type=f32)          # (lq, lk)
            logits = scores + bias_all[:, h * lk:(h + 1) * lk]
            m = jnp.max(logits, axis=-1, keepdims=True)
            p = jnp.exp(logits - m)
            inv = pl.reciprocal(jnp.sum(p, axis=-1, keepdims=True), approx=True)
            # "+ q" residual, written straight into the lane slice of the VMEM scratch
            att_scr[b * lq:(b + 1) * lq, c0:c0 + head_dim] = (
                jnp.dot(p * inv, vh, preferred_element_type=f32) + qh)

    # ---- proj + max-pool shortcut + norm2 + MLP, batched over all bt images ----
    att = att_scr[...]                                                    # (bt*lq, att_dim)
    x_blk = jnp.dot(att.astype(bf16), pw_ref[...],
                    preferred_element_type=f32) + pb_ref[...]
    x1 = skip_scr[...] + x_blk                                            # drop_path(p=0) == id

    x1n = _layernorm(x1, n2w_ref[...], n2b_ref[...], eps)
    hid = jnp.dot(x1n.astype(bf16), f1w_ref[...],
                  preferred_element_type=f32) + f1b_ref[...]
    hid = _gelu_erf(hid)
    mlp = jnp.dot(hid.astype(bf16), f2w_ref[...],
                  preferred_element_type=f32) + f2b_ref[...]
    o_ref[...] = (x1 + mlp).astype(o_ref.dtype)                           # proj_mlp is None


# ----------------------------- host-side (one-time) glue -------------------------

def _make_gather(H, W, kernel, stride, padding):
    """0/1 matrices mapping input tokens to every k*k tap of each output token."""
    kh, kw = kernel
    oh = (H + 2 * padding[0] - kh) // stride[0] + 1
    ow = (W + 2 * padding[1] - kw) // stride[1] + 1
    n_taps = kh * kw
    g = np.zeros((n_taps, oh * ow, H * W), np.float32)
    valid = np.zeros((n_taps, oh * ow), np.float32)
    for ki in range(kh):
        for kj in range(kw):
            t = ki * kw + kj
            for oi in range(oh):
                for oj in range(ow):
                    ii = oi * stride[0] + ki - padding[0]
                    jj = oj * stride[1] + kj - padding[1]
                    if 0 <= ii < H and 0 <= jj < W:
                        g[t, oi * ow + oj, ii * W + jj] = 1.0
                        valid[t, oi * ow + oj] = 1.0
    return g.reshape(n_taps * oh * ow, H * W), valid, (oh, ow), n_taps


def build_block_operands(params, hw_shape, *, num_heads, kernel_q, kernel_kv,
                         stride_q, stride_kv, eps=1e-5):
    """Precompute every kernel operand that does not depend on the activations."""
    H, W = hw_shape
    att_dim = params["qkv_w"].shape[1] // 3
    head_dim = att_dim // num_heads

    pad_q = (kernel_q[0] // 2, kernel_q[1] // 2)
    pad_kv = (kernel_kv[0] // 2, kernel_kv[1] // 2)
    kernel_sk = tuple(s + 1 if s > 1 else s for s in stride_q)
    pad_sk = (kernel_sk[0] // 2, kernel_sk[1] // 2)

    gq, _, q_shape, taps_q = _make_gather(H, W, kernel_q, stride_q, pad_q)
    gkv, _, k_shape, taps_kv = _make_gather(H, W, kernel_kv, stride_kv, pad_kv)
    gsk, valid_sk, sk_shape, taps_sk = _make_gather(H, W, kernel_sk, stride_q, pad_sk)
    assert sk_shape == q_shape
    lq = q_shape[0] * q_shape[1]
    lk = k_shape[0] * k_shape[1]
    minf = np.where(valid_sk > 0.5, 0.0, -1e30).astype(np.float32).reshape(taps_sk, lq, 1)

    # decomposed relative-position bias, packed for both heads:
    #   bias[l, h*lk+m] = sum_c qn[l, h*hd+c] * (Rh[qh(l), kh(m), c] + Rw[qw(l), kw(m), c])
    q_h, q_w = q_shape
    k_h, k_w = k_shape
    q_h_ratio = max(k_h / q_h, 1.0)
    k_h_ratio = max(q_h / k_h, 1.0)
    q_w_ratio = max(k_w / q_w, 1.0)
    k_w_ratio = max(q_w / k_w, 1.0)
    dist_h = (np.arange(q_h)[:, None] * q_h_ratio
              - np.arange(k_h)[None, :] * k_h_ratio + (k_h - 1) * k_h_ratio).astype(np.int64)
    dist_w = (np.arange(q_w)[:, None] * q_w_ratio
              - np.arange(k_w)[None, :] * k_w_ratio + (k_w - 1) * k_w_ratio).astype(np.int64)
    rel_h = np.asarray(params["rel_pos_h"])[dist_h]                 # (q_h, k_h, hd)
    rel_w = np.asarray(params["rel_pos_w"])[dist_w]                 # (q_w, k_w, hd)

    n_rel_blk = q_h + q_w
    relrep = np.tile(np.eye(att_dim, dtype=np.float32), (1, n_rel_blk))   # (att, blk*att)
    relmask = np.zeros((lq, n_rel_blk * att_dim), np.float32)
    for l in range(lq):
        qh_l, qw_l = divmod(l, q_w)
        relmask[l, qh_l * att_dim:(qh_l + 1) * att_dim] = 1.0
        relmask[l, (q_h + qw_l) * att_dim:(q_h + qw_l + 1) * att_dim] = 1.0
    wrel = np.zeros((n_rel_blk * att_dim, num_heads * lk), np.float32)
    for h in range(num_heads):
        for m in range(lk):
            kh_m, kw_m = divmod(m, k_w)
            col = h * lk + m
            for blk in range(q_h):
                r = blk * att_dim + h * head_dim
                wrel[r:r + head_dim, col] = rel_h[blk, kh_m]
            for blk in range(q_w):
                r = (q_h + blk) * att_dim + h * head_dim
                wrel[r:r + head_dim, col] = rel_w[blk, kw_m]

    # grouped (per-head, lane-packed) LayerNorm reduction matrices
    lna = np.zeros((att_dim, att_dim), np.float32)
    for h in range(num_heads):
        lna[h * head_dim:(h + 1) * head_dim, h * head_dim:(h + 1) * head_dim] = 1.0 / head_dim
    lnc = np.eye(att_dim, dtype=np.float32) - lna

    def row(v):
        return jnp.asarray(v).reshape(1, -1)

    def tile_head(v):
        return jnp.asarray(np.tile(np.asarray(v).reshape(-1), num_heads)).reshape(1, -1)

    def tile_w(w, taps):
        # (kh, kw, hd) depthwise weights -> (taps, 1, att_dim) replicated per head
        # (heads are folded into batch through the shared head_dim-channel depthwise conv).
        return jnp.asarray(np.tile(np.asarray(w).reshape(taps, head_dim),
                                   (1, num_heads)).reshape(taps, 1, att_dim))

    bf16 = jnp.bfloat16
    wkv = jnp.concatenate([tile_w(params["pool_k_w"], taps_kv),
                           tile_w(params["pool_v_w"], taps_kv)], axis=-1)  # (taps,1,2*att)

    ops = {
        "gq": jnp.asarray(gq), "gkv": jnp.asarray(gkv), "gsk": jnp.asarray(gsk),
        "minf": jnp.asarray(minf),
        "n1w": row(params["norm1_w"]), "n1b": row(params["norm1_b"]),
        "qkvw": jnp.asarray(params["qkv_w"], bf16), "qkvb": row(params["qkv_b"]),
        "wq": tile_w(params["pool_q_w"], taps_q), "wkv": wkv,
        "lnc": jnp.asarray(lnc), "lna": jnp.asarray(lna),
        "nqw": tile_head(params["norm_q_w"]), "nqb": tile_head(params["norm_q_b"]),
        "nkw": tile_head(params["norm_k_w"]), "nkb": tile_head(params["norm_k_b"]),
        "nvw": tile_head(params["norm_v_w"]), "nvb": tile_head(params["norm_v_b"]),
        "relrep": jnp.asarray(relrep), "relmask": jnp.asarray(relmask),
        "wrel": jnp.asarray(wrel),
        "pw": jnp.asarray(params["proj_w"], bf16), "pb": row(params["proj_b"]),
        "n2w": row(params["norm2_w"]), "n2b": row(params["norm2_b"]),
        "f1w": jnp.asarray(params["fc1_w"], bf16), "f1b": row(params["fc1_b"]),
        "f2w": jnp.asarray(params["fc2_w"], bf16), "f2b": row(params["fc2_b"]),
    }
    meta = {"num_heads": num_heads, "head_dim": head_dim, "lq": lq, "lk": lk,
            "n_tok": H * W, "taps_q": taps_q, "taps_kv": taps_kv, "taps_sk": taps_sk,
            "scale": head_dim ** -0.5, "eps": eps, "q_shape": q_shape}
    return ops, meta


_OPERAND_ORDER = ("gq", "gkv", "gsk", "minf",
                  "n1w", "n1b", "qkvw", "qkvb",
                  "wq", "wkv", "lnc", "lna",
                  "nqw", "nqb", "nkw", "nkb", "nvw", "nvb",
                  "relrep", "relmask", "wrel",
                  "pw", "pb", "n2w", "n2b",
                  "f1w", "f1b", "f2w", "f2b")


def multiscale_block_forward(x, ops, meta, *, batch_tile=None):
    """Fused MultiScaleBlock forward. Returns (B, Lq, dim_out); new hw = meta['q_shape']."""
    B, N, dim = x.shape
    lq = meta["lq"]
    att_dim = meta["num_heads"] * meta["head_dim"]
    dim_out = ops["f2w"].shape[1]

    bt = batch_tile if batch_tile is not None else min(B, 4)
    assert B % bt == 0, (B, bt)

    kernel = functools.partial(
        _msblock_kernel,
        bt=bt, n_tok=N, num_heads=meta["num_heads"], head_dim=meta["head_dim"],
        lq=lq, lk=meta["lk"],
        taps_q=meta["taps_q"], taps_kv=meta["taps_kv"], taps_sk=meta["taps_sk"],
        scale=meta["scale"], eps=meta["eps"])

    weights = [ops[name] for name in _OPERAND_ORDER]

    def const_spec(a):
        zeros = (0,) * a.ndim
        return pl.BlockSpec(a.shape, lambda b, z=zeros: z)

    in_specs = ([pl.BlockSpec((bt * N, dim), lambda b: (b, 0))]
                + [const_spec(a) for a in weights])

    x_flat = x.reshape(B * N, dim)
    out = pl.pallas_call(
        kernel,
        out_shape=jax.ShapeDtypeStruct((B * lq, dim_out), x.dtype),
        grid=(B // bt,),
        in_specs=in_specs,
        out_specs=pl.BlockSpec((bt * lq, dim_out), lambda b: (b, 0)),
        scratch_shapes=[pltpu.VMEM((bt * lq, att_dim), jnp.float32),
                        pltpu.VMEM((bt * lq, dim), jnp.float32)],
        compiler_params=pltpu.CompilerParams(
            dimension_semantics=("parallel",),
            vmem_limit_bytes=32 * 1024 * 1024),
    )(x_flat, *weights)
    return out.reshape(B, lq, dim_out)


# ----------------------------- parameters ---------------------------------------

def init_params(key, *, dim, dim_out, num_heads, input_size, mlp_ratio,
                stride_q, stride_kv, kernel_q, kernel_kv):
    att_dim = dim                     # dim_mul_in_att = False
    head_dim = att_dim // num_heads
    hidden = int(att_dim * mlp_ratio)
    q_h, q_w = input_size[0] // stride_q[0], input_size[1] // stride_q[1]
    kv_h, kv_w = input_size[0] // stride_kv[0], input_size[1] // stride_kv[1]
    rel_h_dim = 2 * max(q_h, kv_h) - 1
    rel_w_dim = 2 * max(q_w, kv_w) - 1
    ks = jax.random.split(key, 13)
    r = lambda k, s: 0.02 * jax.random.normal(k, s, jnp.float32)
    ones = lambda s: jnp.ones(s, jnp.float32)
    zeros = lambda s: jnp.zeros(s, jnp.float32)
    return {
        "norm1_w": ones((dim,)), "norm1_b": zeros((dim,)),
        "qkv_w": r(ks[0], (dim, 3 * att_dim)), "qkv_b": r(ks[1], (3 * att_dim,)),
        "proj_w": r(ks[2], (att_dim, att_dim)), "proj_b": r(ks[3], (att_dim,)),
        "pool_q_w": r(ks[4], (kernel_q[0], kernel_q[1], head_dim)),
        "pool_k_w": r(ks[5], (kernel_kv[0], kernel_kv[1], head_dim)),
        "pool_v_w": r(ks[6], (kernel_kv[0], kernel_kv[1], head_dim)),
        "norm_q_w": ones((head_dim,)), "norm_q_b": zeros((head_dim,)),
        "norm_k_w": ones((head_dim,)), "norm_k_b": zeros((head_dim,)),
        "norm_v_w": ones((head_dim,)), "norm_v_b": zeros((head_dim,)),
        "rel_pos_h": r(ks[7], (rel_h_dim, head_dim)),
        "rel_pos_w": r(ks[8], (rel_w_dim, head_dim)),
        "norm2_w": ones((att_dim,)), "norm2_b": zeros((att_dim,)),
        "fc1_w": r(ks[9], (att_dim, hidden)), "fc1_b": r(ks[10], (hidden,)),
        "fc2_w": r(ks[11], (hidden, dim_out)), "fc2_b": r(ks[12], (dim_out,)),
    }


# ----------------------------- main ----------------------------------------------

if __name__ == "__main__":
    # B=8 with 4 images per grid step -> good MXU fill per step AND >=2 "parallel" steps
    # so v7x can put one step on each TensorCore.
    B, H, W = 8, 8, 8
    dim = dim_out = 32
    num_heads = 2
    mlp_ratio = 4.0
    kernel_q = kernel_kv = (3, 3)
    stride_q = stride_kv = (2, 2)

    key = jax.random.PRNGKey(0)
    kx, kp = jax.random.split(key)
    x = jax.random.normal(kx, (B, H * W, dim), jnp.float32)
    params = init_params(kp, dim=dim, dim_out=dim_out, num_heads=num_heads,
                         input_size=(H, W), mlp_ratio=mlp_ratio,
                         stride_q=stride_q, stride_kv=stride_kv,
                         kernel_q=kernel_q, kernel_kv=kernel_kv)

    # one-time, shape-static operand preparation (hoisted out of the per-step forward)
    ops, meta = build_block_operands(params, (H, W), num_heads=num_heads,
                                     kernel_q=kernel_q, kernel_kv=kernel_kv,
                                     stride_q=stride_q, stride_kv=stride_kv)

    fwd = jax.jit(functools.partial(multiscale_block_forward, meta=meta, batch_tile=4))
    out = jax.block_until_ready(fwd(x, ops))
    hw_new = meta["q_shape"]

    assert out.shape == (B, (H // stride_q[0]) * (W // stride_q[1]), dim_out), out.shape
    assert hw_new == (H // stride_q[0], W // stride_q[1]), hw_new
    assert bool(jnp.all(jnp.isfinite(out)))
    print("KERNEL_OK")
</pallas_src>

<mosaic_0001>
module attributes {stable_mosaic.version = 11 : i64} {
  func.func @_msblock_kernel(%arg0: i32, %arg1: memref<256x32xf32, #tpu.memory_space<vmem>>, %arg2: memref<144x64xf32, #tpu.memory_space<vmem>>, %arg3: memref<144x64xf32, #tpu.memory_space<vmem>>, %arg4: memref<144x64xf32, #tpu.memory_space<vmem>>, %arg5: memref<9x16x1xf32, #tpu.memory_space<vmem>>, %arg6: memref<1x32xf32, #tpu.memory_space<vmem>>, %arg7: memref<1x32xf32, #tpu.memory_space<vmem>>, %arg8: memref<32x96xbf16, #tpu.memory_space<vmem>>, %arg9: memref<1x96xf32, #tpu.memory_space<vmem>>, %arg10: memref<9x1x32xf32, #tpu.memory_space<vmem>>, %arg11: memref<9x1x64xf32, #tpu.memory_space<vmem>>, %arg12: memref<32x32xf32, #tpu.memory_space<vmem>>, %arg13: memref<32x32xf32, #tpu.memory_space<vmem>>, %arg14: memref<1x32xf32, #tpu.memory_space<vmem>>, %arg15: memref<1x32xf32, #tpu.memory_space<vmem>>, %arg16: memref<1x32xf32, #tpu.memory_space<vmem>>, %arg17: memref<1x32xf32, #tpu.memory_space<vmem>>, %arg18: memref<1x32xf32, #tpu.memory_space<vmem>>, %arg19: memref<1x32xf32, #tpu.memory_space<vmem>>, %arg20: memref<32x256xf32, #tpu.memory_space<vmem>>, %arg21: memref<16x256xf32, #tpu.memory_space<vmem>>, %arg22: memref<256x32xf32, #tpu.memory_space<vmem>>, %arg23: memref<32x32xbf16, #tpu.memory_space<vmem>>, %arg24: memref<1x32xf32, #tpu.memory_space<vmem>>, %arg25: memref<1x32xf32, #tpu.memory_space<vmem>>, %arg26: memref<1x32xf32, #tpu.memory_space<vmem>>, %arg27: memref<32x128xbf16, #tpu.memory_space<vmem>>, %arg28: memref<1x128xf32, #tpu.memory_space<vmem>>, %arg29: memref<128x32xbf16, #tpu.memory_space<vmem>>, %arg30: memref<1x32xf32, #tpu.memory_space<vmem>>, %arg31: memref<64x32xf32, #tpu.memory_space<vmem>>, %arg32: memref<64x32xf32, #tpu.memory_space<vmem>>, %arg33: memref<64x32xf32, #tpu.memory_space<vmem>>) attributes {dimension_semantics = [#tpu.dimension_semantics<parallel>], iteration_bounds = array<i64: 2>, scalar_prefetch = 0 : i64, scratch_operands = 2 : i64, tpu.core_type = #tpu.core_type<tc>, window_params = [{transform_indices = @transform_0, window_bounds = array<i64: 256, 32>}, {pipeline_mode = #tpu.pipeline_mode<synchronous>, transform_indices = @transform_1, window_bounds = array<i64: 144, 64>}, {pipeline_mode = #tpu.pipeline_mode<synchronous>, transform_indices = @transform_2, window_bounds = array<i64: 144, 64>}, {pipeline_mode = #tpu.pipeline_mode<synchronous>, transform_indices = @transform_3, window_bounds = array<i64: 144, 64>}, {pipeline_mode = #tpu.pipeline_mode<synchronous>, transform_indices = @transform_4, window_bounds = array<i64: 9, 16, 1>}, {pipeline_mode = #tpu.pipeline_mode<synchronous>, transform_indices = @transform_5, window_bounds = array<i64: 1, 32>}, {pipeline_mode = #tpu.pipeline_mode<synchronous>, transform_indices = @transform_6, window_bounds = array<i64: 1, 32>}, {pipeline_mode = #tpu.pipeline_mode<synchronous>, transform_indices = @transform_7, window_bounds = array<i64: 32, 96>}, {pipeline_mode = #tpu.pipeline_mode<synchronous>, transform_indices = @transform_8, window_bounds = array<i64: 1, 96>}, {pipeline_mode = #tpu.pipeline_mode<synchronous>, transform_indices = @transform_9, window_bounds = array<i64: 9, 1, 32>}, {pipeline_mode = #tpu.pipeline_mode<synchronous>, transform_indices = @transform_10, window_bounds = array<i64: 9, 1, 64>}, {pipeline_mode = #tpu.pipeline_mode<synchronous>, transform_indices = @transform_11, window_bounds = array<i64: 32, 32>}, {pipeline_mode = #tpu.pipeline_mode<synchronous>, transform_indices = @transform_12, window_bounds = array<i64: 32, 32>}, {pipeline_mode = #tpu.pipeline_mode<synchronous>, transform_indices = @transform_13, window_bounds = array<i64: 1, 32>}, {pipeline_mode = #tpu.pipeline_mode<synchronous>, transform_indices = @transform_14, window_bounds = array<i64: 1, 32>}, {pipeline_mode = #tpu.pipeline_mode<synchronous>, transform_indices = @transform_15, window_bounds = array<i64: 1, 32>}, {pipeline_mode = #tpu.pipeline_mode<synchronous>, transform_indices = @transform_16, window_bounds = array<i64: 1, 32>}, {pipeline_mode = #tpu.pipeline_mode<synchronous>, transform_indices = @transform_17, window_bounds = array<i64: 1, 32>}, {pipeline_mode = #tpu.pipeline_mode<synchronous>, transform_indices = @transform_18, window_bounds = array<i64: 1, 32>}, {pipeline_mode = #tpu.pipeline_mode<synchronous>, transform_indices = @transform_19, window_bounds = array<i64: 32, 256>}, {pipeline_mode = #tpu.pipeline_mode<synchronous>, transform_indices = @transform_20, window_bounds = array<i64: 16, 256>}, {pipeline_mode = #tpu.pipeline_mode<synchronous>, transform_indices = @transform_21, window_bounds = array<i64: 256, 32>}, {pipeline_mode = #tpu.pipeline_mode<synchronous>, transform_indices = @transform_22, window_bounds = array<i64: 32, 32>}, {pipeline_mode = #tpu.pipeline_mode<synchronous>, transform_indices = @transform_23, window_bounds = array<i64: 1, 32>}, {pipeline_mode = #tpu.pipeline_mode<synchronous>, transform_indices = @transform_24, window_bounds = array<i64: 1, 32>}, {pipeline_mode = #tpu.pipeline_mode<synchronous>, transform_indices = @transform_25, window_bounds = array<i64: 1, 32>}, {pipeline_mode = #tpu.pipeline_mode<synchronous>, transform_indices = @transform_26, window_bounds = array<i64: 32, 128>}, {pipeline_mode = #tpu.pipeline_mode<synchronous>, transform_indices = @transform_27, window_bounds = array<i64: 1, 128>}, {pipeline_mode = #tpu.pipeline_mode<synchronous>, transform_indices = @transform_28, window_bounds = array<i64: 128, 32>}, {pipeline_mode = #tpu.pipeline_mode<synchronous>, transform_indices = @transform_29, window_bounds = array<i64: 1, 32>}, {transform_indices = @transform_30, window_bounds = array<i64: 64, 32>}]} {
    %c0 = arith.constant 0 : index
    %c0_0 = arith.constant 0 : index
    %0 = vector.load %arg1[%c0, %c0_0] : memref<256x32xf32, #tpu.memory_space<vmem>>, vector<256x32xf32>
    %c0_1 = arith.constant 0 : index
    %c0_2 = arith.constant 0 : index
    %1 = vector.load %arg6[%c0_1, %c0_2] : memref<1x32xf32, #tpu.memory_space<vmem>>, vector<1x32xf32>
    %c0_3 = arith.constant 0 : index
    %c0_4 = arith.constant 0 : index
    %2 = vector.load %arg7[%c0_3, %c0_4] : memref<1x32xf32, #tpu.memory_space<vmem>>, vector<1x32xf32>
    %cst = arith.constant dense<0.000000e+00> : vector<256xf32>
    %3 = vector.multi_reduction <add>, %0, %cst [1] : vector<256x32xf32> to vector<256xf32>
    %4 = vector.shape_cast %3 : vector<256xf32> to vector<256x1xf32>
    %cst_5 = arith.constant 3.200000e+01 : f32
    %5 = vector.broadcast %cst_5 : f32 to vector<256x1xf32>
    %6 = arith.divf %4, %5 : vector<256x1xf32>
    %7 = vector.broadcast %6 : vector<256x1xf32> to vector<256x32xf32>
    %8 = arith.subf %0, %7 : vector<256x32xf32>
    %9 = arith.mulf %8, %8 : vector<256x32xf32>
    %cst_6 = arith.constant dense<0.000000e+00> : vector<256xf32>
    %10 = vector.multi_reduction <add>, %9, %cst_6 [1] : vector<256x32xf32> to vector<256xf32>
    %11 = vector.shape_cast %10 : vector<256xf32> to vector<256x1xf32>
    %cst_7 = arith.constant 3.200000e+01 : f32
    %12 = vector.broadcast %cst_7 : f32 to vector<256x1xf32>
    %13 = arith.divf %11, %12 : vector<256x1xf32>
    %cst_8 = arith.constant 9.99999974E-6 : f32
    %14 = vector.broadcast %cst_8 : f32 to vector<256x1xf32>
    %15 = arith.addf %13, %14 : vector<256x1xf32>
    %16 = math.rsqrt %15 : vector<256x1xf32>
    %17 = vector.broadcast %16 : vector<256x1xf32> to vector<256x32xf32>
    %18 = arith.mulf %8, %17 : vector<256x32xf32>
    %19 = vector.broadcast %1 : vector<1x32xf32> to vector<256x32xf32>
    %20 = arith.mulf %18, %19 : vector<256x32xf32>
    %21 = vector.broadcast %2 : vector<1x32xf32> to vector<256x32xf32>
    %22 = arith.addf %20, %21 : vector<256x32xf32>
    %23 = arith.truncf %22 : vector<256x32xf32> to vector<256x32xbf16>
    %c0_9 = arith.constant 0 : index
    %c0_10 = arith.constant 0 : index
    %24 = vector.load %arg8[%c0_9, %c0_10] : memref<32x96xbf16, #tpu.memory_space<vmem>>, vector<32x96xbf16>
    %cst_11 = arith.constant dense<0.000000e+00> : vector<256x96xf32>
    %25 = tpu.matmul %23, %24, %cst_11 {dimension_numbers = #tpu.dot_dimension_numbers<[1], [0], [0], [1], [0, 0, 1, 1], [], []>} : vector<256x32xbf16>, vector<32x96xbf16>, vector<256x96xf32> -> vector<256x96xf32>
    %c0_12 = arith.constant 0 : index
    %c0_13 = arith.constant 0 : index
    %26 = vector.load %arg9[%c0_12, %c0_13] : memref<1x96xf32, #tpu.memory_space<vmem>>, vector<1x96xf32>
    %27 = vector.broadcast %26 : vector<1x96xf32> to vector<256x96xf32>
    %28 = arith.addf %25, %27 : vector<256x96xf32>
    %c0_14 = arith.constant 0 : index
    %c0_15 = arith.constant 0 : index
    %29 = vector.load %arg2[%c0_14, %c0_15] : memref<144x64xf32, #tpu.memory_space<vmem>>, vector<144x64xf32>
    %c0_16 = arith.constant 0 : index
    %c0_17 = arith.constant 0 : index
    %30 = vector.load %arg3[%c0_16, %c0_17] : memref<144x64xf32, #tpu.memory_space<vmem>>, vector<144x64xf32>
    %c0_18 = arith.constant 0 : index
    %c0_19 = arith.constant 0 : index
    %31 = vector.load %arg4[%c0_18, %c0_19] : memref<144x64xf32, #tpu.memory_space<vmem>>, vector<144x64xf32>
    %c0_20 = arith.constant 0 : index
    %c0_21 = arith.constant 0 : index
    %c0_22 = arith.constant 0 : index
    %32 = vector.load %arg10[%c0_20, %c0_21, %c0_22] : memref<9x1x32xf32, #tpu.memory_space<vmem>>, vector<9x1x32xf32>
    %c0_23 = arith.constant 0 : index
    %c0_24 = arith.constant 0 : index
    %c0_25 = arith.constant 0 : index
    %33 = vector.load %arg11[%c0_23, %c0_24, %c0_25] : memref<9x1x64xf32, #tpu.memory_space<vmem>>, vector<9x1x64xf32>
    %c0_26 = arith.constant 0 : index
    %c0_27 = arith.constant 0 : index
    %c0_28 = arith.constant 0 : index
    %34 = vector.load %arg5[%c0_26, %c0_27, %c0_28] : memref<9x16x1xf32, #tpu.memory_space<vmem>>, vector<9x16x1xf32>
    %c0_29 = arith.constant 0 : index
    %c0_30 = arith.constant 0 : index
    %35 = vector.load %arg12[%c0_29, %c0_30] : memref<32x32xf32, #tpu.memory_space<vmem>>, vector<32x32xf32>
    %c0_31 = arith.constant 0 : index
    %c0_32 = arith.constant 0 : index
    %36 = vector.load %arg13[%c0_31, %c0_32] : memref<32x32xf32, #tpu.memory_space<vmem>>, vector<32x32xf32>
    %c0_33 = arith.constant 0 : index
    %c0_34 = arith.constant 0 : index
    %37 = vector.load %arg20[%c0_33, %c0_34] : memref<32x256xf32, #tpu.memory_space<vmem>>, vector<32x256xf32>
    %c0_35 = arith.constant 0 : index
    %c0_36 = arith.constant 0 : index
    %38 = vector.load %arg21[%c0_35, %c0_36] : memref<16x256xf32, #tpu.memory_space<vmem>>, vector<16x256xf32>
    %c0_37 = arith.constant 0 : index
    %c0_38 = arith.constant 0 : index
    %39 = vector.load %arg22[%c0_37, %c0_38] : memref<256x32xf32, #tpu.memory_space<vmem>>, vector<256x32xf32>
    %40 = vector.extract_strided_slice %28 {offsets = [0, 0], sizes = [64, 96], strides = [1, 1]} : vector<256x96xf32> to vector<64x96xf32>
    %41 = vector.extract_strided_slice %0 {offsets = [0, 0], sizes = [64, 32], strides = [1, 1]} : vector<256x32xf32> to vector<64x32xf32>
    %42 = vector.extract_strided_slice %40 {offsets = [0, 0], sizes = [64, 32], strides = [1, 1]} : vector<64x96xf32> to vector<64x32xf32>
    %cst_39 = arith.constant dense<0.000000e+00> : vector<144x32xf32>
    %43 = tpu.matmul %29, %42, %cst_39 {dimension_numbers = #tpu.dot_dimension_numbers<[1], [0], [0], [1], [0, 0, 1, 1], [], []>} : vector<144x64xf32>, vector<64x32xf32>, vector<144x32xf32> -> vector<144x32xf32>
    %44 = vector.extract_strided_slice %40 {offsets = [0, 32], sizes = [64, 64], strides = [1, 1]} : vector<64x96xf32> to vector<64x64xf32>
    %cst_40 = arith.constant dense<0.000000e+00> : vector<144x64xf32>
    %45 = tpu.matmul %30, %44, %cst_40 {dimension_numbers = #tpu.dot_dimension_numbers<[1], [0], [0], [1], [0, 0, 1, 1], [], []>} : vector<144x64xf32>, vector<64x64xf32>, vector<144x64xf32> -> vector<144x64xf32>
    %cst_41 = arith.constant dense<0.000000e+00> : vector<144x32xf32>
    %46 = tpu.matmul %31, %41, %cst_41 {dimension_numbers = #tpu.dot_dimension_numbers<[1], [0], [0], [1], [0, 0, 1, 1], [], []>} : vector<144x64xf32>, vector<64x32xf32>, vector<144x32xf32> -> vector<144x32xf32>
    %47 = vector.extract_strided_slice %43 {offsets = [0, 0], sizes = [16, 32], strides = [1, 1]} : vector<144x32xf32> to vector<16x32xf32>
    %48 = vector.extract_strided_slice %32 {offsets = [0, 0, 0], sizes = [1, 1, 32], strides = [1, 1, 1]} : vector<9x1x32xf32> to vector<1x1x32xf32>
    %49 = vector.shape_cast %48 : vector<1x1x32xf32> to vector<1x32xf32>
    %50 = vector.broadcast %49 : vector<1x32xf32> to vector<16x32xf32>
    %51 = arith.mulf %47, %50 : vector<16x32xf32>
    %52 = vector.extract_strided_slice %43 {offsets = [16, 0], sizes = [16, 32], strides = [1, 1]} : vector<144x32xf32> to vector<16x32xf32>
    %53 = vector.extract_strided_slice %32 {offsets = [1, 0, 0], sizes = [1, 1, 32], strides = [1, 1, 1]} : vector<9x1x32xf32> to vector<1x1x32xf32>
    %54 = vector.shape_cast %53 : vector<1x1x32xf32> to vector<1x32xf32>
    %55 = vector.broadcast %54 : vector<1x32xf32> to vector<16x32xf32>
    %56 = arith.mulf %52, %55 : vector<16x32xf32>
    %57 = arith.addf %51, %56 : vector<16x32xf32>
    %58 = vector.extract_strided_slice %43 {offsets = [32, 0], sizes = [16, 32], strides = [1, 1]} : vector<144x32xf32> to vector<16x32xf32>
    %59 = vector.extract_strided_slice %32 {offsets = [2, 0, 0], sizes = [1, 1, 32], strides = [1, 1, 1]} : vector<9x1x32xf32> to vector<1x1x32xf32>
    %60 = vector.shape_cast %59 : vector<1x1x32xf32> to vector<1x32xf32>
    %61 = vector.broadcast %60 : vector<1x32xf32> to vector<16x32xf32>
    %62 = arith.mulf %58, %61 : vector<16x32xf32>
    %63 = arith.addf %57, %62 : vector<16x32xf32>
    %64 = vector.extract_strided_slice %43 {offsets = [48, 0], sizes = [16, 32], strides = [1, 1]} : vector<144x32xf32> to vector<16x32xf32>
    %65 = vector.extract_strided_slice %32 {offsets = [3, 0, 0], sizes = [1, 1, 32], strides = [1, 1, 1]} : vector<9x1x32xf32> to vector<1x1x32xf32>
    %66 = vector.shape_cast %65 : vector<1x1x32xf32> to vector<1x32xf32>
    %67 = vector.broadcast %66 : vector<1x32xf32> to vector<16x32xf32>
    %68 = arith.mulf %64, %67 : vector<16x32xf32>
    %69 = arith.addf %63, %68 : vector<16x32xf32>
    %70 = vector.extract_strided_slice %43 {offsets = [64, 0], sizes = [16, 32], strides = [1, 1]} : vector<144x32xf32> to vector<16x32xf32>
    %71 = vector.extract_strided_slice %32 {offsets = [4, 0, 0], sizes = [1, 1, 32], strides = [1, 1, 1]} : vector<9x1x32xf32> to vector<1x1x32xf32>
    %72 = vector.shape_cast %71 : vector<1x1x32xf32> to vector<1x32xf32>
    %73 = vector.broadcast %72 : vector<1x32xf32> to vector<16x32xf32>
    %74 = arith.mulf %70, %73 : vector<16x32xf32>
    %75 = arith.addf %69, %74 : vector<16x32xf32>
    %76 = vector.extract_strided_slice %43 {offsets = [80, 0], sizes = [16, 32], strides = [1, 1]} : vector<144x32xf32> to vector<16x32xf32>
    %77 = vector.extract_strided_slice %32 {offsets = [5, 0, 0], sizes = [1, 1, 32], strides = [1, 1, 1]} : vector<9x1x32xf32> to vector<1x1x32xf32>
    %78 = vector.shape_cast %77 : vector<1x1x32xf32> to vector<1x32xf32>
    %79 = vector.broadcast %78 : vector<1x32xf32> to vector<16x32xf32>
    %80 = arith.mulf %76, %79 : vector<16x32xf32>
    %81 = arith.addf %75, %80 : vector<16x32xf32>
    %82 = vector.extract_strided_slice %43 {offsets = [96, 0], sizes = [16, 32], strides = [1, 1]} : vector<144x32xf32> to vector<16x32xf32>
    %83 = vector.extract_strided_slice %32 {offsets = [6, 0, 0], sizes = [1, 1, 32], strides = [1, 1, 1]} : vector<9x1x32xf32> to vector<1x1x32xf32>
    %84 = vector.shape_cast %83 : vector<1x1x32xf32> to vector<1x32xf32>
    %85 = vector.broadcast %84 : vector<1x32xf32> to vector<16x32xf32>
    %86 = arith.mulf %82, %85 : vector<16x32xf32>
    %87 = arith.addf %81, %86 : vector<16x32xf32>
    %88 = vector.extract_strided_slice %43 {offsets = [112, 0], sizes = [16, 32], strides = [1, 1]} : vector<144x32xf32> to vector<16x32xf32>
    %89 = vector.extract_strided_slice %32 {offsets = [7, 0, 0], sizes = [1, 1, 32], strides = [1, 1, 1]} : vector<9x1x32xf32> to vector<1x1x32xf32>
    %90 = vector.shape_cast %89 : vector<1x1x32xf32> to vector<1x32xf32>
    %91 = vector.broadcast %90 : vector<1x32xf32> to vector<16x32xf32>
    %92 = arith.mulf %88, %91 : vector<16x32xf32>
    %93 = arith.addf %87, %92 : vector<16x32xf32>
    %94 = vector.extract_strided_slice %43 {offsets = [128, 0], sizes = [16, 32], strides = [1, 1]} : vector<144x32xf32> to vector<16x32xf32>
    %95 = vector.extract_strided_slice %32 {offsets = [8, 0, 0], sizes = [1, 1, 32], strides = [1, 1, 1]} : vector<9x1x32xf32> to vector<1x1x32xf32>
    %96 = vector.shape_cast %95 : vector<1x1x32xf32> to vector<1x32xf32>
    %97 = vector.broadcast %96 : vector<1x32xf32> to vector<16x32xf32>
    %98 = arith.mulf %94, %97 : vector<16x32xf32>
    %99 = arith.addf %93, %98 : vector<16x32xf32>
    %100 = vector.extract_strided_slice %45 {offsets = [0, 0], sizes = [16, 64], strides = [1, 1]} : vector<144x64xf32> to vector<16x64xf32>
    %101 = vector.extract_strided_slice %33 {offsets = [0, 0, 0], sizes = [1, 1, 64], strides = [1, 1, 1]} : vector<9x1x64xf32> to vector<1x1x64xf32>
    %102 = vector.shape_cast %101 : vector<1x1x64xf32> to vector<1x64xf32>
    %103 = vector.broadcast %102 : vector<1x64xf32> to vector<16x64xf32>
    %104 = arith.mulf %100, %103 : vector<16x64xf32>
    %105 = vector.extract_strided_slice %45 {offsets = [16, 0], sizes = [16, 64], strides = [1, 1]} : vector<144x64xf32> to vector<16x64xf32>
    %106 = vector.extract_strided_slice %33 {offsets = [1, 0, 0], sizes = [1, 1, 64], strides = [1, 1, 1]} : vector<9x1x64xf32> to vector<1x1x64xf32>
    %107 = vector.shape_cast %106 : vector<1x1x64xf32> to vector<1x64xf32>
    %108 = vector.broadcast %107 : vector<1x64xf32> to vector<16x64xf32>
    %109 = arith.mulf %105, %108 : vector<16x64xf32>
    %110 = arith.addf %104, %109 : vector<16x64xf32>
    %111 = vector.extract_strided_slice %45 {offsets = [32, 0], sizes = [16, 64], strides = [1, 1]} : vector<144x64xf32> to vector<16x64xf32>
    %112 = vector.extract_strided_slice %33 {offsets = [2, 0, 0], sizes = [1, 1, 64], strides = [1, 1, 1]} : vector<9x1x64xf32> to vector<1x1x64xf32>
    %113 = vector.shape_cast %112 : vector<1x1x64xf32> to vector<1x64xf32>
    %114 = vector.broadcast %113 : vector<1x64xf32> to vector<16x64xf32>
    %115 = arith.mulf %111, %114 : vector<16x64xf32>
    %116 = arith.addf %110, %115 : vector<16x64xf32>
    %117 = vector.extract_strided_slice %45 {offsets = [48, 0], sizes = [16, 64], strides = [1, 1]} : vector<144x64xf32> to vector<16x64xf32>
    %118 = vector.extract_strided_slice %33 {offsets = [3, 0, 0], sizes = [1, 1, 64], strides = [1, 1, 1]} : vector<9x1x64xf32> to vector<1x1x64xf32>
    %119 = vector.shape_cast %118 : vector<1x1x64xf32> to vector<1x64xf32>
    %120 = vector.broadcast %119 : vector<1x64xf32> to vector<16x64xf32>
    %121 = arith.mulf %117, %120 : vector<16x64xf32>
    %122 = arith.addf %116, %121 : vector<16x64xf32>
    %123 = vector.extract_strided_slice %45 {offsets = [64, 0], sizes = [16, 64], strides = [1, 1]} : vector<144x64xf32> to vector<16x64xf32>
    %124 = vector.extract_strided_slice %33 {offsets = [4, 0, 0], sizes = [1, 1, 64], strides = [1, 1, 1]} : vector<9x1x64xf32> to vector<1x1x64xf32>
    %125 = vector.shape_cast %124 : vector<1x1x64xf32> to vector<1x64xf32>
    %126 = vector.broadcast %125 : vector<1x64xf32> to vector<16x64xf32>
    %127 = arith.mulf %123, %126 : vector<16x64xf32>
    %128 = arith.addf %122, %127 : vector<16x64xf32>
    %129 = vector.extract_strided_slice %45 {offsets = [80, 0], sizes = [16, 64], strides = [1, 1]} : vector<144x64xf32> to vector<16x64xf32>
    %130 = vector.extract_strided_slice %33 {offsets = [5, 0, 0], sizes = [1, 1, 64], strides = [1, 1, 1]} : vector<9x1x64xf32> to vector<1x1x64xf32>
    %131 = vector.shape_cast %130 : vector<1x1x64xf32> to vector<1x64xf32>
    %132 = vector.broadcast %131 : vector<1x64xf32> to vector<16x64xf32>
    %133 = arith.mulf %129, %132 : vector<16x64xf32>
    %134 = arith.addf %128, %133 : vector<16x64xf32>
    %135 = vector.extract_strided_slice %45 {offsets = [96, 0], sizes = [16, 64], strides = [1, 1]} : vector<144x64xf32> to vector<16x64xf32>
    %136 = vector.extract_strided_slice %33 {offsets = [6, 0, 0], sizes = [1, 1, 64], strides = [1, 1, 1]} : vector<9x1x64xf32> to vector<1x1x64xf32>
    %137 = vector.shape_cast %136 : vector<1x1x64xf32> to vector<1x64xf32>
    %138 = vector.broadcast %137 : vector<1x64xf32> to vector<16x64xf32>
    %139 = arith.mulf %135, %138 : vector<16x64xf32>
    %140 = arith.addf %134, %139 : vector<16x64xf32>
    %141 = vector.extract_strided_slice %45 {offsets = [112, 0], sizes = [16, 64], strides = [1, 1]} : vector<144x64xf32> to vector<16x64xf32>
    %142 = vector.extract_strided_slice %33 {offsets = [7, 0, 0], sizes = [1, 1, 64], strides = [1, 1, 1]} : vector<9x1x64xf32> to vector<1x1x64xf32>
    %143 = vector.shape_cast %142 : vector<1x1x64xf32> to vector<1x64xf32>
    %144 = vector.broadcast %143 : vector<1x64xf32> to vector<16x64xf32>
    %145 = arith.mulf %141, %144 : vector<16x64xf32>
    %146 = arith.addf %140, %145 : vector<16x64xf32>
    %147 = vector.extract_strided_slice %45 {offsets = [128, 0], sizes = [16, 64], strides = [1, 1]} : vector<144x64xf32> to vector<16x64xf32>
    %148 = vector.extract_strided_slice %33 {offsets = [8, 0, 0], sizes = [1, 1, 64], strides = [1, 1, 1]} : vector<9x1x64xf32> to vector<1x1x64xf32>
    %149 = vector.shape_cast %148 : vector<1x1x64xf32> to vector<1x64xf32>
    %150 = vector.broadcast %149 : vector<1x64xf32> to vector<16x64xf32>
    %151 = arith.mulf %147, %150 : vector<16x64xf32>
    %152 = arith.addf %146, %151 : vector<16x64xf32>
    %153 = vector.extract_strided_slice %46 {offsets = [0, 0], sizes = [16, 32], strides = [1, 1]} : vector<144x32xf32> to vector<16x32xf32>
    %154 = vector.extract_strided_slice %34 {offsets = [0, 0, 0], sizes = [1, 16, 1], strides = [1, 1, 1]} : vector<9x16x1xf32> to vector<1x16x1xf32>
    %155 = vector.shape_cast %154 : vector<1x16x1xf32> to vector<16x1xf32>
    %156 = vector.broadcast %155 : vector<16x1xf32> to vector<16x32xf32>
    %157 = arith.addf %153, %156 : vector<16x32xf32>
    %158 = vector.extract_strided_slice %46 {offsets = [16, 0], sizes = [16, 32], strides = [1, 1]} : vector<144x32xf32> to vector<16x32xf32>
    %159 = vector.extract_strided_slice %34 {offsets = [1, 0, 0], sizes = [1, 16, 1], strides = [1, 1, 1]} : vector<9x16x1xf32> to vector<1x16x1xf32>
    %160 = vector.shape_cast %159 : vector<1x16x1xf32> to vector<16x1xf32>
    %161 = vector.broadcast %160 : vector<16x1xf32> to vector<16x32xf32>
    %162 = arith.addf %158, %161 : vector<16x32xf32>
    %163 = arith.maximumf %157, %162 : vector<16x32xf32>
    %164 = vector.extract_strided_slice %46 {offsets = [32, 0], sizes = [16, 32], strides = [1, 1]} : vector<144x32xf32> to vector<16x32xf32>
    %165 = vector.extract_strided_slice %34 {offsets = [2, 0, 0], sizes = [1, 16, 1], strides = [1, 1, 1]} : vector<9x16x1xf32> to vector<1x16x1xf32>
    %166 = vector.shape_cast %165 : vector<1x16x1xf32> to vector<16x1xf32>
    %167 = vector.broadcast %166 : vector<16x1xf32> to vector<16x32xf32>
    %168 = arith.addf %164, %167 : vector<16x32xf32>
    %169 = arith.maximumf %163, %168 : vector<16x32xf32>
    %170 = vector.extract_strided_slice %46 {offsets = [48, 0], sizes = [16, 32], strides = [1, 1]} : vector<144x32xf32> to vector<16x32xf32>
    %171 = vector.extract_strided_slice %34 {offsets = [3, 0, 0], sizes = [1, 16, 1], strides = [1, 1, 1]} : vector<9x16x1xf32> to vector<1x16x1xf32>
    %172 = vector.shape_cast %171 : vector<1x16x1xf32> to vector<16x1xf32>
    %173 = vector.broadcast %172 : vector<16x1xf32> to vector<16x32xf32>
    %174 = arith.addf %170, %173 : vector<16x32xf32>
    %175 = arith.maximumf %169, %174 : vector<16x32xf32>
    %176 = vector.extract_strided_slice %46 {offsets = [64, 0], sizes = [16, 32], strides = [1, 1]} : vector<144x32xf32> to vector<16x32xf32>
    %177 = vector.extract_strided_slice %34 {offsets = [4, 0, 0], sizes = [1, 16, 1], strides = [1, 1, 1]} : vector<9x16x1xf32> to vector<1x16x1xf32>
    %178 = vector.shape_cast %177 : vector<1x16x1xf32> to vector<16x1xf32>
    %179 = vector.broadcast %178 : vector<16x1xf32> to vector<16x32xf32>
    %180 = arith.addf %176, %179 : vector<16x32xf32>
    %181 = arith.maximumf %175, %180 : vector<16x32xf32>
    %182 = vector.extract_strided_slice %46 {offsets = [80, 0], sizes = [16, 32], strides = [1, 1]} : vector<144x32xf32> to vector<16x32xf32>
    %183 = vector.extract_strided_slice %34 {offsets = [5, 0, 0], sizes = [1, 16, 1], strides = [1, 1, 1]} : vector<9x16x1xf32> to vector<1x16x1xf32>
    %184 = vector.shape_cast %183 : vector<1x16x1xf32> to vector<16x1xf32>
    %185 = vector.broadcast %184 : vector<16x1xf32> to vector<16x32xf32>
    %186 = arith.addf %182, %185 : vector<16x32xf32>
    %187 = arith.maximumf %181, %186 : vector<16x32xf32>
    %188 = vector.extract_strided_slice %46 {offsets = [96, 0], sizes = [16, 32], strides = [1, 1]} : vector<144x32xf32> to vector<16x32xf32>
    %189 = vector.extract_strided_slice %34 {offsets = [6, 0, 0], sizes = [1, 16, 1], strides = [1, 1, 1]} : vector<9x16x1xf32> to vector<1x16x1xf32>
    %190 = vector.shape_cast %189 : vector<1x16x1xf32> to vector<16x1xf32>
    %191 = vector.broadcast %190 : vector<16x1xf32> to vector<16x32xf32>
    %192 = arith.addf %188, %191 : vector<16x32xf32>
    %193 = arith.maximumf %187, %192 : vector<16x32xf32>
    %194 = vector.extract_strided_slice %46 {offsets = [112, 0], sizes = [16, 32], strides = [1, 1]} : vector<144x32xf32> to vector<16x32xf32>
    %195 = vector.extract_strided_slice %34 {offsets = [7, 0, 0], sizes = [1, 16, 1], strides = [1, 1, 1]} : vector<9x16x1xf32> to vector<1x16x1xf32>
    %196 = vector.shape_cast %195 : vector<1x16x1xf32> to vector<16x1xf32>
    %197 = vector.broadcast %196 : vector<16x1xf32> to vector<16x32xf32>
    %198 = arith.addf %194, %197 : vector<16x32xf32>
    %199 = arith.maximumf %193, %198 : vector<16x32xf32>
    %200 = vector.extract_strided_slice %46 {offsets = [128, 0], sizes = [16, 32], strides = [1, 1]} : vector<144x32xf32> to vector<16x32xf32>
    %201 = vector.extract_strided_slice %34 {offsets = [8, 0, 0], sizes = [1, 16, 1], strides = [1, 1, 1]} : vector<9x16x1xf32> to vector<1x16x1xf32>
    %202 = vector.shape_cast %201 : vector<1x16x1xf32> to vector<16x1xf32>
    %203 = vector.broadcast %202 : vector<16x1xf32> to vector<16x32xf32>
    %204 = arith.addf %200, %203 : vector<16x32xf32>
    %205 = arith.maximumf %199, %204 : vector<16x32xf32>
    %c0_42 = arith.constant 0 : index
    %c0_43 = arith.constant 0 : index
    %206 = vector.load %arg33[%c0_42, %c0_43] : memref<64x32xf32, #tpu.memory_space<vmem>>, vector<16x32xf32>
    tpu.vector_store %arg33[%c0_42, %c0_43], %205 {strides = array<i32>} : memref<64x32xf32, #tpu.memory_space<vmem>>, vector<16x32xf32>,
    %c0_44 = arith.constant 0 : index
    %c0_45 = arith.constant 0 : index
    %207 = vector.load %arg14[%c0_44, %c0_45] : memref<1x32xf32, #tpu.memory_space<vmem>>, vector<1x32xf32>
    %c0_46 = arith.constant 0 : index
    %c0_47 = arith.constant 0 : index
    %208 = vector.load %arg15[%c0_46, %c0_47] : memref<1x32xf32, #tpu.memory_space<vmem>>, vector<1x32xf32>
    %cst_48 = arith.constant dense<0.000000e+00> : vector<16x32xf32>
    %209 = tpu.matmul %99, %35, %cst_48 {dimension_numbers = #tpu.dot_dimension_numbers<[1], [0], [0], [1], [0, 0, 1, 1], [], []>} : vector<16x32xf32>, vector<32x32xf32>, vector<16x32xf32> -> vector<16x32xf32>
    %210 = arith.mulf %209, %209 : vector<16x32xf32>
    %cst_49 = arith.constant dense<0.000000e+00> : vector<16x32xf32>
    %211 = tpu.matmul %210, %36, %cst_49 {dimension_numbers = #tpu.dot_dimension_numbers<[1], [0], [0], [1], [0, 0, 1, 1], [], []>} : vector<16x32xf32>, vector<32x32xf32>, vector<16x32xf32> -> vector<16x32xf32>
    %cst_50 = arith.constant 9.99999974E-6 : f32
    %212 = vector.broadcast %cst_50 : f32 to vector<16x32xf32>
    %213 = arith.addf %211, %212 : vector<16x32xf32>
    %214 = math.rsqrt %213 : vector<16x32xf32>
    %215 = arith.mulf %209, %214 : vector<16x32xf32>
    %216 = vector.broadcast %207 : vector<1x32xf32> to vector<16x32xf32>
    %217 = arith.mulf %215, %216 : vector<16x32xf32>
    %218 = vector.broadcast %208 : vector<1x32xf32> to vector<16x32xf32>
    %219 = arith.addf %217, %218 : vector<16x32xf32>
    %220 = vector.extract_strided_slice %152 {offsets = [0, 0], sizes = [16, 32], strides = [1, 1]} : vector<16x64xf32> to vector<16x32xf32>
    %c0_51 = arith.constant 0 : index
    %c0_52 = arith.constant 0 : index
    %221 = vector.load %arg16[%c0_51, %c0_52] : memref<1x32xf32, #tpu.memory_space<vmem>>, vector<1x32xf32>
    %c0_53 = arith.constant 0 : index
    %c0_54 = arith.constant 0 : index
    %222 = vector.load %arg17[%c0_53, %c0_54] : memref<1x32xf32, #tpu.memory_space<vmem>>, vector<1x32xf32>
    %cst_55 = arith.constant dense<0.000000e+00> : vector<16x32xf32>
    %223 = tpu.matmul %220, %35, %cst_55 {dimension_numbers = #tpu.dot_dimension_numbers<[1], [0], [0], [1], [0, 0, 1, 1], [], []>} : vector<16x32xf32>, vector<32x32xf32>, vector<16x32xf32> -> vector<16x32xf32>
    %224 = arith.mulf %223, %223 : vector<16x32xf32>
    %cst_56 = arith.constant dense<0.000000e+00> : vector<16x32xf32>
    %225 = tpu.matmul %224, %36, %cst_56 {dimension_numbers = #tpu.dot_dimension_numbers<[1], [0], [0], [1], [0, 0, 1, 1], [], []>} : vector<16x32xf32>, vector<32x32xf32>, vector<16x32xf32> -> vector<16x32xf32>
    %cst_57 = arith.constant 9.99999974E-6 : f32
    %226 = vector.broadcast %cst_57 : f32 to vector<16x32xf32>
    %227 = arith.addf %225, %226 : vector<16x32xf32>
    %228 = math.rsqrt %227 : vector<16x32xf32>
    %229 = arith.mulf %223, %228 : vector<16x32xf32>
    %230 = vector.broadcast %221 : vector<1x32xf32> to vector<16x32xf32>
    %231 = arith.mulf %229, %230 : vector<16x32xf32>
    %232 = vector.broadcast %222 : vector<1x32xf32> to vector<16x32xf32>
    %233 = arith.addf %231, %232 : vector<16x32xf32>
    %234 = vector.extract_strided_slice %152 {offsets = [0, 32], sizes = [16, 32], strides = [1, 1]} : vector<16x64xf32> to vector<16x32xf32>
    %c0_58 = arith.constant 0 : index
    %c0_59 = arith.constant 0 : index
    %235 = vector.load %arg18[%c0_58, %c0_59] : memref<1x32xf32, #tpu.memory_space<vmem>>, vector<1x32xf32>
    %c0_60 = arith.constant 0 : index
    %c0_61 = arith.constant 0 : index
    %236 = vector.load %arg19[%c0_60, %c0_61] : memref<1x32xf32, #tpu.memory_space<vmem>>, vector<1x32xf32>
    %cst_62 = arith.constant dense<0.000000e+00> : vector<16x32xf32>
    %237 = tpu.matmul %234, %35, %cst_62 {dimension_numbers = #tpu.dot_dimension_numbers<[1], [0], [0], [1], [0, 0, 1, 1], [], []>} : vector<16x32xf32>, vector<32x32xf32>, vector<16x32xf32> -> vector<16x32xf32>
    %238 = arith.mulf %237, %237 : vector<16x32xf32>
    %cst_63 = arith.constant dense<0.000000e+00> : vector<16x32xf32>
    %239 = tpu.matmul %238, %36, %cst_63 {dimension_numbers = #tpu.dot_dimension_numbers<[1], [0], [0], [1], [0, 0, 1, 1], [], []>} : vector<16x32xf32>, vector<32x32xf32>, vector<16x32xf32> -> vector<16x32xf32>
    %cst_64 = arith.constant 9.99999974E-6 : f32
    %240 = vector.broadcast %cst_64 : f32 to vector<16x32xf32>
    %241 = arith.addf %239, %240 : vector<16x32xf32>
    %242 = math.rsqrt %241 : vector<16x32xf32>
    %243 = arith.mulf %237, %242 : vector<16x32xf32>
    %244 = vector.broadcast %235 : vector<1x32xf32> to vector<16x32xf32>
    %245 = arith.mulf %243, %244 : vector<16x32xf32>
    %246 = vector.broadcast %236 : vector<1x32xf32> to vector<16x32xf32>
    %247 = arith.addf %245, %246 : vector<16x32xf32>
    %cst_65 = arith.constant dense<0.000000e+00> : vector<16x256xf32>
    %248 = tpu.matmul %219, %37, %cst_65 {dimension_numbers = #tpu.dot_dimension_numbers<[1], [0], [0], [1], [0, 0, 1, 1], [], []>} : vector<16x32xf32>, vector<32x256xf32>, vector<16x256xf32> -> vector<16x256xf32>
    %249 = arith.mulf %248, %38 : vector<16x256xf32>
    %cst_66 = arith.constant dense<0.000000e+00> : vector<16x32xf32>
    %250 = tpu.matmul %249, %39, %cst_66 {dimension_numbers = #tpu.dot_dimension_numbers<[1], [0], [0], [1], [0, 0, 1, 1], [], []>} : vector<16x256xf32>, vector<256x32xf32>, vector<16x32xf32> -> vector<16x32xf32>
    %251 = vector.extract_strided_slice %219 {offsets = [0, 0], sizes = [16, 16], strides = [1, 1]} : vector<16x32xf32> to vector<16x16xf32>
    %252 = vector.extract_strided_slice %233 {offsets = [0, 0], sizes = [16, 16], strides = [1, 1]} : vector<16x32xf32> to vector<16x16xf32>
    %253 = vector.extract_strided_slice %247 {offsets = [0, 0], sizes = [16, 16], strides = [1, 1]} : vector<16x32xf32> to vector<16x16xf32>
    %cst_67 = arith.constant 2.500000e-01 : f32
    %254 = vector.broadcast %cst_67 : f32 to vector<16x16xf32>
    %255 = arith.mulf %251, %254 : vector<16x16xf32>
    %cst_68 = arith.constant dense<0.000000e+00> : vector<16x16xf32>
    %256 = tpu.matmul %255, %252, %cst_68 {dimension_numbers = #tpu.dot_dimension_numbers<[1], [1], [0], [0], [0, 0, 1, 0], [], []>} : vector<16x16xf32>, vector<16x16xf32>, vector<16x16xf32> -> vector<16x16xf32>
    %257 = vector.extract_strided_slice %250 {offsets = [0, 0], sizes = [16, 16], strides = [1, 1]} : vector<16x32xf32> to vector<16x16xf32>
    %258 = arith.addf %256, %257 : vector<16x16xf32>
    %cst_69 = arith.constant dense<0xFF800000> : vector<16xf32>
    %259 = vector.multi_reduction <maximumf>, %258, %cst_69 [1] : vector<16x16xf32> to vector<16xf32>
    %260 = vector.shape_cast %259 : vector<16xf32> to vector<16x1xf32>
    %261 = vector.broadcast %260 : vector<16x1xf32> to vector<16x16xf32>
    %262 = arith.subf %258, %261 : vector<16x16xf32>
    %263 = math.exp %262 : vector<16x16xf32>
    %cst_70 = arith.constant dense<0.000000e+00> : vector<16xf32>
    %264 = vector.multi_reduction <add>, %263, %cst_70 [1] : vector<16x16xf32> to vector<16xf32>
    %265 = vector.shape_cast %264 : vector<16xf32> to vector<16x1xf32>
    %266 = tpu.reciprocal %265 {approx = true} : vector<16x1xf32> -> vector<16x1xf32>
    %267 = vector.broadcast %266 : vector<16x1xf32> to vector<16x16xf32>
    %268 = arith.mulf %263, %267 : vector<16x16xf32>
    %cst_71 = arith.constant dense<0.000000e+00> : vector<16x16xf32>
    %269 = tpu.matmul %268, %253, %cst_71 {dimension_numbers = #tpu.dot_dimension_numbers<[1], [0], [0], [1], [0, 0, 1, 1], [], []>} : vector<16x16xf32>, vector<16x16xf32>, vector<16x16xf32> -> vector<16x16xf32>
    %270 = arith.addf %269, %251 : vector<16x16xf32>
    %c0_72 = arith.constant 0 : index
    %c0_73 = arith.constant 0 : index
    %271 = vector.load %arg32[%c0_72, %c0_73] : memref<64x32xf32, #tpu.memory_space<vmem>>, vector<16x16xf32>
    tpu.vector_store %arg32[%c0_72, %c0_73], %270 {strides = array<i32>} : memref<64x32xf32, #tpu.memory_space<vmem>>, vector<16x16xf32>,
    %272 = vector.extract_strided_slice %219 {offsets = [0, 16], sizes = [16, 16], strides = [1, 1]} : vector<16x32xf32> to vector<16x16xf32>
    %273 = vector.extract_strided_slice %233 {offsets = [0, 16], sizes = [16, 16], strides = [1, 1]} : vector<16x32xf32> to vector<16x16xf32>
    %274 = vector.extract_strided_slice %247 {offsets = [0, 16], sizes = [16, 16], strides = [1, 1]} : vector<16x32xf32> to vector<16x16xf32>
    %cst_74 = arith.constant 2.500000e-01 : f32
    %275 = vector.broadcast %cst_74 : f32 to vector<16x16xf32>
    %276 = arith.mulf %272, %275 : vector<16x16xf32>
    %cst_75 = arith.constant dense<0.000000e+00> : vector<16x16xf32>
    %277 = tpu.matmul %276, %273, %cst_75 {dimension_numbers = #tpu.dot_dimension_numbers<[1], [1], [0], [0], [0, 0, 1, 0], [], []>} : vector<16x16xf32>, vector<16x16xf32>, vector<16x16xf32> -> vector<16x16xf32>
    %278 = vector.extract_strided_slice %250 {offsets = [0, 16], sizes = [16, 16], strides = [1, 1]} : vector<16x32xf32> to vector<16x16xf32>
    %279 = arith.addf %277, %278 : vector<16x16xf32>
    %cst_76 = arith.constant dense<0xFF800000> : vector<16xf32>
    %280 = vector.multi_reduction <maximumf>, %279, %cst_76 [1] : vector<16x16xf32> to vector<16xf32>
    %281 = vector.shape_cast %280 : vector<16xf32> to vector<16x1xf32>
    %282 = vector.broadcast %281 : vector<16x1xf32> to vector<16x16xf32>
    %283 = arith.subf %279, %282 : vector<16x16xf32>
    %284 = math.exp %283 : vector<16x16xf32>
    %cst_77 = arith.constant dense<0.000000e+00> : vector<16xf32>
    %285 = vector.multi_reduction <add>, %284, %cst_77 [1] : vector<16x16xf32> to vector<16xf32>
    %286 = vector.shape_cast %285 : vector<16xf32> to vector<16x1xf32>
    %287 = tpu.reciprocal %286 {approx = true} : vector<16x1xf32> -> vector<16x1xf32>
    %288 = vector.broadcast %287 : vector<16x1xf32> to vector<16x16xf32>
    %289 = arith.mulf %284, %288 : vector<16x16xf32>
    %cst_78 = arith.constant dense<0.000000e+00> : vector<16x16xf32>
    %290 = tpu.matmul %289, %274, %cst_78 {dimension_numbers = #tpu.dot_dimension_numbers<[1], [0], [0], [1], [0, 0, 1, 1], [], []>} : vector<16x16xf32>, vector<16x16xf32>, vector<16x16xf32> -> vector<16x16xf32>
    %291 = arith.addf %290, %272 : vector<16x16xf32>
    %c0_79 = arith.constant 0 : index
    %c16 = arith.constant 16 : index
    %292 = vector.load %arg32[%c0_79, %c16] : memref<64x32xf32, #tpu.memory_space<vmem>>, vector<16x16xf32>
    tpu.vector_store %arg32[%c0_79, %c16], %291 {strides = array<i32>} : memref<64x32xf32, #tpu.memory_space<vmem>>, vector<16x16xf32>,
    %293 = vector.extract_strided_slice %28 {offsets = [64, 0], sizes = [64, 96], strides = [1, 1]} : vector<256x96xf32> to vector<64x96xf32>
    %294 = vector.extract_strided_slice %0 {offsets = [64, 0], sizes = [64, 32], strides = [1, 1]} : vector<256x32xf32> to vector<64x32xf32>
    %295 = vector.extract_strided_slice %293 {offsets = [0, 0], sizes = [64, 32], strides = [1, 1]} : vector<64x96xf32> to vector<64x32xf32>
    %cst_80 = arith.constant dense<0.000000e+00> : vector<144x32xf32>
    %296 = tpu.matmul %29, %295, %cst_80 {dimension_numbers = #tpu.dot_dimension_numbers<[1], [0], [0], [1], [0, 0, 1, 1], [], []>} : vector<144x64xf32>, vector<64x32xf32>, vector<144x32xf32> -> vector<144x32xf32>
    %297 = vector.extract_strided_slice %293 {offsets = [0, 32], sizes = [64, 64], strides = [1, 1]} : vector<64x96xf32> to vector<64x64xf32>
    %cst_81 = arith.constant dense<0.000000e+00> : vector<144x64xf32>
    %298 = tpu.matmul %30, %297, %cst_81 {dimension_numbers = #tpu.dot_dimension_numbers<[1], [0], [0], [1], [0, 0, 1, 1], [], []>} : vector<144x64xf32>, vector<64x64xf32>, vector<144x64xf32> -> vector<144x64xf32>
    %cst_82 = arith.constant dense<0.000000e+00> : vector<144x32xf32>
    %299 = tpu.matmul %31, %294, %cst_82 {dimension_numbers = #tpu.dot_dimension_numbers<[1], [0], [0], [1], [0, 0, 1, 1], [], []>} : vector<144x64xf32>, vector<64x32xf32>, vector<144x32xf32> -> vector<144x32xf32>
    %300 = vector.extract_strided_slice %296 {offsets = [0, 0], sizes = [16, 32], strides = [1, 1]} : vector<144x32xf32> to vector<16x32xf32>
    %301 = vector.extract_strided_slice %32 {offsets = [0, 0, 0], sizes = [1, 1, 32], strides = [1, 1, 1]} : vector<9x1x32xf32> to vector<1x1x32xf32>
    %302 = vector.shape_cast %301 : vector<1x1x32xf32> to vector<1x32xf32>
    %303 = vector.broadcast %302 : vector<1x32xf32> to vector<16x32xf32>
    %304 = arith.mulf %300, %303 : vector<16x32xf32>
    %305 = vector.extract_strided_slice %296 {offsets = [16, 0], sizes = [16, 32], strides = [1, 1]} : vector<144x32xf32> to vector<16x32xf32>
    %306 = vector.extract_strided_slice %32 {offsets = [1, 0, 0], sizes = [1, 1, 32], strides = [1, 1, 1]} : vector<9x1x32xf32> to vector<1x1x32xf32>
    %307 = vector.shape_cast %306 : vector<1x1x32xf32> to vector<1x32xf32>
    %308 = vector.broadcast %307 : vector<1x32xf32> to vector<16x32xf32>
    %309 = arith.mulf %305, %308 : vector<16x32xf32>
    %310 = arith.addf %304, %309 : vector<16x32xf32>
    %311 = vector.extract_strided_slice %296 {offsets = [32, 0], sizes = [16, 32], strides = [1, 1]} : vector<144x32xf32> to vector<16x32xf32>
    %312 = vector.extract_strided_slice %32 {offsets = [2, 0, 0], sizes = [1, 1, 32], strides = [1, 1, 1]} : vector<9x1x32xf32> to vector<1x1x32xf32>
    %313 = vector.shape_cast %312 : vector<1x1x32xf32> to vector<1x32xf32>
    %314 = vector.broadcast %313 : vector<1x32xf32> to vector<16x32xf32>
    %315 = arith.mulf %311, %314 : vector<16x32xf32>
    %316 = arith.addf %310, %315 : vector<16x32xf32>
    %317 = vector.extract_strided_slice %296 {offsets = [48, 0], sizes = [16, 32], strides = [1, 1]} : vector<144x32xf32> to vector<16x32xf32>
    %318 = vector.extract_strided_slice %32 {offsets = [3, 0, 0], sizes = [1, 1, 32], strides = [1, 1, 1]} : vector<9x1x32xf32> to vector<1x1x32xf32>
    %319 = vector.shape_cast %318 : vector<1x1x32xf32> to vector<1x32xf32>
    %320 = vector.broadcast %319 : vector<1x32xf32> to vector<16x32xf32>
    %321 = arith.mulf %317, %320 : vector<16x32xf32>
    %322 = arith.addf %316, %321 : vector<16x32xf32>
    %323 = vector.extract_strided_slice %296 {offsets = [64, 0], sizes = [16, 32], strides = [1, 1]} : vector<144x32xf32> to vector<16x32xf32>
    %324 = vector.extract_strided_slice %32 {offsets = [4, 0, 0], sizes = [1, 1, 32], strides = [1, 1, 1]} : vector<9x1x32xf32> to vector<1x1x32xf32>
    %325 = vector.shape_cast %324 : vector<1x1x32xf32> to vector<1x32xf32>
    %326 = vector.broadcast %325 : vector<1x32xf32> to vector<16x32xf32>
    %327 = arith.mulf %323, %326 : vector<16x32xf32>
    %328 = arith.addf %322, %327 : vector<16x32xf32>
    %329 = vector.extract_strided_slice %296 {offsets = [80, 0], sizes = [16, 32], strides = [1, 1]} : vector<144x32xf32> to vector<16x32xf32>
    %330 = vector.extract_strided_slice %32 {offsets = [5, 0, 0], sizes = [1, 1, 32], strides = [1, 1, 1]} : vector<9x1x32xf32> to vector<1x1x32xf32>
    %331 = vector.shape_cast %330 : vector<1x1x32xf32> to vector<1x32xf32>
    %332 = vector.broadcast %331 : vector<1x32xf32> to vector<16x32xf32>
    %333 = arith.mulf %329, %332 : vector<16x32xf32>
    %334 = arith.addf %328, %333 : vector<16x32xf32>
    %335 = vector.extract_strided_slice %296 {offsets = [96, 0], sizes = [16, 32], strides = [1, 1]} : vector<144x32xf32> to vector<16x32xf32>
    %336 = vector.extract_strided_slice %32 {offsets = [6, 0, 0], sizes = [1, 1, 32], strides = [1, 1, 1]} : vector<9x1x32xf32> to vector<1x1x32xf32>
    %337 = vector.shape_cast %336 : vector<1x1x32xf32> to vector<1x32xf32>
    %338 = vector.broadcast %337 : vector<1x32xf32> to vector<16x32xf32>
    %339 = arith.mulf %335, %338 : vector<16x32xf32>
    %340 = arith.addf %334, %339 : vector<16x32xf32>
    %341 = vector.extract_strided_slice %296 {offsets = [112, 0], sizes = [16, 32], strides = [1, 1]} : vector<144x32xf32> to vector<16x32xf32>
    %342 = vector.extract_strided_slice %32 {offsets = [7, 0, 0], sizes = [1, 1, 32], strides = [1, 1, 1]} : vector<9x1x32xf32> to vector<1x1x32xf32>
    %343 = vector.shape_cast %342 : vector<1x1x32xf32> to vector<1x32xf32>
    %344 = vector.broadcast %343 : vector<1x32xf32> to vector<16x32xf32>
    %345 = arith.mulf %341, %344 : vector<16x32xf32>
    %346 = arith.addf %340, %345 : vector<16x32xf32>
    %347 = vector.extract_strided_slice %296 {offsets = [128, 0], sizes = [16, 32], strides = [1, 1]} : vector<144x32xf32> to vector<16x32xf32>
    %348 = vector.extract_strided_slice %32 {offsets = [8, 0, 0], sizes = [1, 1, 32], strides = [1, 1, 1]} : vector<9x1x32xf32> to vector<1x1x32xf32>
    %349 = vector.shape_cast %348 : vector<1x1x32xf32> to vector<1x32xf32>
    %350 = vector.broadcast %349 : vector<1x32xf32> to vector<16x32xf32>
    %351 = arith.mulf %347, %350 : vector<16x32xf32>
    %352 = arith.addf %346, %351 : vector<16x32xf32>
    %353 = vector.extract_strided_slice %298 {offsets = [0, 0], sizes = [16, 64], strides = [1, 1]} : vector<144x64xf32> to vector<16x64xf32>
    %354 = vector.extract_strided_slice %33 {offsets = [0, 0, 0], sizes = [1, 1, 64], strides = [1, 1, 1]} : vector<9x1x64xf32> to vector<1x1x64xf32>
    %355 = vector.shape_cast %354 : vector<1x1x64xf32> to vector<1x64xf32>
    %356 = vector.broadcast %355 : vector<1x64xf32> to vector<16x64xf32>
    %357 = arith.mulf %353, %356 : vector<16x64xf32>
    %358 = vector.extract_strided_slice %298 {offsets = [16, 0], sizes = [16, 64], strides = [1, 1]} : vector<144x64xf32> to vector<16x64xf32>
    %359 = vector.extract_strided_slice %33 {offsets = [1, 0, 0], sizes = [1, 1, 64], strides = [1, 1, 1]} : vector<9x1x64xf32> to vector<1x1x64xf32>
    %360 = vector.shape_cast %359 : vector<1x1x64xf32> to vector<1x64xf32>
    %361 = vector.broadcast %360 : vector<1x64xf32> to vector<16x64xf32>
    %362 = arith.mulf %358, %361 : vector<16x64xf32>
    %363 = arith.addf %357, %362 : vector<16x64xf32>
    %364 = vector.extract_strided_slice %298 {offsets = [32, 0], sizes = [16, 64], strides = [1, 1]} : vector<144x64xf32> to vector<16x64xf32>
    %365 = vector.extract_strided_slice %33 {offsets = [2, 0, 0], sizes = [1, 1, 64], strides = [1, 1, 1]} : vector<9x1x64xf32> to vector<1x1x64xf32>
    %366 = vector.shape_cast %365 : vector<1x1x64xf32> to vector<1x64xf32>
    %367 = vector.broadcast %366 : vector<1x64xf32> to vector<16x64xf32>
    %368 = arith.mulf %364, %367 : vector<16x64xf32>
    %369 = arith.addf %363, %368 : vector<16x64xf32>
    %370 = vector.extract_strided_slice %298 {offsets = [48, 0], sizes = [16, 64], strides = [1, 1]} : vector<144x64xf32> to vector<16x64xf32>
    %371 = vector.extract_strided_slice %33 {offsets = [3, 0, 0], sizes = [1, 1, 64], strides = [1, 1, 1]} : vector<9x1x64xf32> to vector<1x1x64xf32>
    %372 = vector.shape_cast %371 : vector<1x1x64xf32> to vector<1x64xf32>
    %373 = vector.broadcast %372 : vector<1x64xf32> to vector<16x64xf32>
    %374 = arith.mulf %370, %373 : vector<16x64xf32>
    %375 = arith.addf %369, %374 : vector<16x64xf32>
    %376 = vector.extract_strided_slice %298 {offsets = [64, 0], sizes = [16, 64], strides = [1, 1]} : vector<144x64xf32> to vector<16x64xf32>
    %377 = vector.extract_strided_slice %33 {offsets = [4, 0, 0], sizes = [1, 1, 64], strides = [1, 1, 1]} : vector<9x1x64xf32> to vector<1x1x64xf32>
    %378 = vector.shape_cast %377 : vector<1x1x64xf32> to vector<1x64xf32>
    %379 = vector.broadcast %378 : vector<1x64xf32> to vector<16x64xf32>
    %380 = arith.mulf %376, %379 : vector<16x64xf32>
    %381 = arith.addf %375, %380 : vector<16x64xf32>
    %382 = vector.extract_strided_slice %298 {offsets = [80, 0], sizes = [16, 64], strides = [1, 1]} : vector<144x64xf32> to vector<16x64xf32>
    %383 = vector.extract_strided_slice %33 {offsets = [5, 0, 0], sizes = [1, 1, 64], strides = [1, 1, 1]} : vector<9x1x64xf32> to vector<1x1x64xf32>
    %384 = vector.shape_cast %383 : vector<1x1x64xf32> to vector<1x64xf32>
    %385 = vector.broadcast %384 : vector<1x64xf32> to vector<16x64xf32>
    %386 = arith.mulf %382, %385 : vector<16x64xf32>
    %387 = arith.addf %381, %386 : vector<16x64xf32>
    %388 = vector.extract_strided_slice %298 {offsets = [96, 0], sizes = [16, 64], strides = [1, 1]} : vector<144x64xf32> to vector<16x64xf32>
    %389 = vector.extract_strided_slice %33 {offsets = [6, 0, 0], sizes = [1, 1, 64], strides = [1, 1, 1]} : vector<9x1x64xf32> to vector<1x1x64xf32>
    %390 = vector.shape_cast %389 : vector<1x1x64xf32> to vector<1x64xf32>
    %391 = vector.broadcast %390 : vector<1x64xf32> to vector<16x64xf32>
    %392 = arith.mulf %388, %391 : vector<16x64xf32>
    %393 = arith.addf %387, %392 : vector<16x64xf32>
    %394 = vector.extract_strided_slice %298 {offsets = [112, 0], sizes = [16, 64], strides = [1, 1]} : vector<144x64xf32> to vector<16x64xf32>
    %395 = vector.extract_strided_slice %33 {offsets = [7, 0, 0], sizes = [1, 1, 64], strides = [1, 1, 1]} : vector<9x1x64xf32> to vector<1x1x64xf32>
    %396 = vector.shape_cast %395 : vector<1x1x64xf32> to vector<1x64xf32>
    %397 = vector.broadcast %396 : vector<1x64xf32> to vector<16x64xf32>
    %398 = arith.mulf %394, %397 : vector<16x64xf32>
    %399 = arith.addf %393, %398 : vector<16x64xf32>
    %400 = vector.extract_strided_slice %298 {offsets = [128, 0], sizes = [16, 64], strides = [1, 1]} : vector<144x64xf32> to vector<16x64xf32>
    %401 = vector.extract_strided_slice %33 {offsets = [8, 0, 0], sizes = [1, 1, 64], strides = [1, 1, 1]} : vector<9x1x64xf32> to vector<1x1x64xf32>
    %402 = vector.shape_cast %401 : vector<1x1x64xf32> to vector<1x64xf32>
    %403 = vector.broadcast %402 : vector<1x64xf32> to vector<16x64xf32>
    %404 = arith.mulf %400, %403 : vector<16x64xf32>
    %405 = arith.addf %399, %404 : vector<16x64xf32>
    %406 = vector.extract_strided_slice %299 {offsets = [0, 0], sizes = [16, 32], strides = [1, 1]} : vector<144x32xf32> to vector<16x32xf32>
    %407 = vector.extract_strided_slice %34 {offsets = [0, 0, 0], sizes = [1, 16, 1], strides = [1, 1, 1]} : vector<9x16x1xf32> to vector<1x16x1xf32>
    %408 = vector.shape_cast %407 : vector<1x16x1xf32> to vector<16x1xf32>
    %409 = vector.broadcast %408 : vector<16x1xf32> to vector<16x32xf32>
    %410 = arith.addf %406, %409 : vector<16x32xf32>
    %411 = vector.extract_strided_slice %299 {offsets = [16, 0], sizes = [16, 32], strides = [1, 1]} : vector<144x32xf32> to vector<16x32xf32>
    %412 = vector.extract_strided_slice %34 {offsets = [1, 0, 0], sizes = [1, 16, 1], strides = [1, 1, 1]} : vector<9x16x1xf32> to vector<1x16x1xf32>
    %413 = vector.shape_cast %412 : vector<1x16x1xf32> to vector<16x1xf32>
    %414 = vector.broadcast %413 : vector<16x1xf32> to vector<16x32xf32>
    %415 = arith.addf %411, %414 : vector<16x32xf32>
    %416 = arith.maximumf %410, %415 : vector<16x32xf32>
    %417 = vector.extract_strided_slice %299 {offsets = [32, 0], sizes = [16, 32], strides = [1, 1]} : vector<144x32xf32> to vector<16x32xf32>
    %418 = vector.extract_strided_slice %34 {offsets = [2, 0, 0], sizes = [1, 16, 1], strides = [1, 1, 1]} : vector<9x16x1xf32> to vector<1x16x1xf32>
    %419 = vector.shape_cast %418 : vector<1x16x1xf32> to vector<16x1xf32>
    %420 = vector.broadcast %419 : vector<16x1xf32> to vector<16x32xf32>
    %421 = arith.addf %417, %420 : vector<16x32xf32>
    %422 = arith.maximumf %416, %421 : vector<16x32xf32>
    %423 = vector.extract_strided_slice %299 {offsets = [48, 0], sizes = [16, 32], strides = [1, 1]} : vector<144x32xf32> to vector<16x32xf32>
    %424 = vector.extract_strided_slice %34 {offsets = [3, 0, 0], sizes = [1, 16, 1], strides = [1, 1, 1]} : vector<9x16x1xf32> to vector<1x16x1xf32>
    %425 = vector.shape_cast %424 : vector<1x16x1xf32> to vector<16x1xf32>
    %426 = vector.broadcast %425 : vector<16x1xf32> to vector<16x32xf32>
    %427 = arith.addf %423, %426 : vector<16x32xf32>
    %428 = arith.maximumf %422, %427 : vector<16x32xf32>
    %429 = vector.extract_strided_slice %299 {offsets = [64, 0], sizes = [16, 32], strides = [1, 1]} : vector<144x32xf32> to vector<16x32xf32>
    %430 = vector.extract_strided_slice %34 {offsets = [4, 0, 0], sizes = [1, 16, 1], strides = [1, 1, 1]} : vector<9x16x1xf32> to vector<1x16x1xf32>
    %431 = vector.shape_cast %430 : vector<1x16x1xf32> to vector<16x1xf32>
    %432 = vector.broadcast %431 : vector<16x1xf32> to vector<16x32xf32>
    %433 = arith.addf %429, %432 : vector<16x32xf32>
    %434 = arith.maximumf %428, %433 : vector<16x32xf32>
    %435 = vector.extract_strided_slice %299 {offsets = [80, 0], sizes = [16, 32], strides = [1, 1]} : vector<144x32xf32> to vector<16x32xf32>
    %436 = vector.extract_strided_slice %34 {offsets = [5, 0, 0], sizes = [1, 16, 1], strides = [1, 1, 1]} : vector<9x16x1xf32> to vector<1x16x1xf32>
    %437 = vector.shape_cast %436 : vector<1x16x1xf32> to vector<16x1xf32>
    %438 = vector.broadcast %437 : vector<16x1xf32> to vector<16x32xf32>
    %439 = arith.addf %435, %438 : vector<16x32xf32>
    %440 = arith.maximumf %434, %439 : vector<16x32xf32>
    %441 = vector.extract_strided_slice %299 {offsets = [96, 0], sizes = [16, 32], strides = [1, 1]} : vector<144x32xf32> to vector<16x32xf32>
    %442 = vector.extract_strided_slice %34 {offsets = [6, 0, 0], sizes = [1, 16, 1], strides = [1, 1, 1]} : vector<9x16x1xf32> to vector<1x16x1xf32>
    %443 = vector.shape_cast %442 : vector<1x16x1xf32> to vector<16x1xf32>
    %444 = vector.broadcast %443 : vector<16x1xf32> to vector<16x32xf32>
    %445 = arith.addf %441, %444 : vector<16x32xf32>
    %446 = arith.maximumf %440, %445 : vector<16x32xf32>
    %447 = vector.extract_strided_slice %299 {offsets = [112, 0], sizes = [16, 32], strides = [1, 1]} : vector<144x32xf32> to vector<16x32xf32>
    %448 = vector.extract_strided_slice %34 {offsets = [7, 0, 0], sizes = [1, 16, 1], strides = [1, 1, 1]} : vector<9x16x1xf32> to vector<1x16x1xf32>
    %449 = vector.shape_cast %448 : vector<1x16x1xf32> to vector<16x1xf32>
    %450 = vector.broadcast %449 : vector<16x1xf32> to vector<16x32xf32>
    %451 = arith.addf %447, %450 : vector<16x32xf32>
    %452 = arith.maximumf %446, %451 : vector<16x32xf32>
    %453 = vector.extract_strided_slice %299 {offsets = [128, 0], sizes = [16, 32], strides = [1, 1]} : vector<144x32xf32> to vector<16x32xf32>
    %454 = vector.extract_strided_slice %34 {offsets = [8, 0, 0], sizes = [1, 16, 1], strides = [1, 1, 1]} : vector<9x16x1xf32> to vector<1x16x1xf32>
    %455 = vector.shape_cast %454 : vector<1x16x1xf32> to vector<16x1xf32>
    %456 = vector.broadcast %455 : vector<16x1xf32> to vector<16x32xf32>
    %457 = arith.addf %453, %456 : vector<16x32xf32>
    %458 = arith.maximumf %452, %457 : vector<16x32xf32>
    %c16_83 = arith.constant 16 : index
    %c0_84 = arith.constant 0 : index
    %459 = vector.load %arg33[%c16_83, %c0_84] : memref<64x32xf32, #tpu.memory_space<vmem>>, vector<16x32xf32>
    tpu.vector_store %arg33[%c16_83, %c0_84], %458 {strides = array<i32>} : memref<64x32xf32, #tpu.memory_space<vmem>>, vector<16x32xf32>,
    %c0_85 = arith.constant 0 : index
    %c0_86 = arith.constant 0 : index
    %460 = vector.load %arg14[%c0_85, %c0_86] : memref<1x32xf32, #tpu.memory_space<vmem>>, vector<1x32xf32>
    %c0_87 = arith.constant 0 : index
    %c0_88 = arith.constant 0 : index
    %461 = vector.load %arg15[%c0_87, %c0_88] : memref<1x32xf32, #tpu.memory_space<vmem>>, vector<1x32xf32>
    %cst_89 = arith.constant dense<0.000000e+00> : vector<16x32xf32>
    %462 = tpu.matmul %352, %35, %cst_89 {dimension_numbers = #tpu.dot_dimension_numbers<[1], [0], [0], [1], [0, 0, 1, 1], [], []>} : vector<16x32xf32>, vector<32x32xf32>, vector<16x32xf32> -> vector<16x32xf32>
    %463 = arith.mulf %462, %462 : vector<16x32xf32>
    %cst_90 = arith.constant dense<0.000000e+00> : vector<16x32xf32>
    %464 = tpu.matmul %463, %36, %cst_90 {dimension_numbers = #tpu.dot_dimension_numbers<[1], [0], [0], [1], [0, 0, 1, 1], [], []>} : vector<16x32xf32>, vector<32x32xf32>, vector<16x32xf32> -> vector<16x32xf32>
    %cst_91 = arith.constant 9.99999974E-6 : f32
    %465 = vector.broadcast %cst_91 : f32 to vector<16x32xf32>
    %466 = arith.addf %464, %465 : vector<16x32xf32>
    %467 = math.rsqrt %466 : vector<16x32xf32>
    %468 = arith.mulf %462, %467 : vector<16x32xf32>
    %469 = vector.broadcast %460 : vector<1x32xf32> to vector<16x32xf32>
    %470 = arith.mulf %468, %469 : vector<16x32xf32>
    %471 = vector.broadcast %461 : vector<1x32xf32> to vector<16x32xf32>
    %472 = arith.addf %470, %471 : vector<16x32xf32>
    %473 = vector.extract_strided_slice %405 {offsets = [0, 0], sizes = [16, 32], strides = [1, 1]} : vector<16x64xf32> to vector<16x32xf32>
    %c0_92 = arith.constant 0 : index
    %c0_93 = arith.constant 0 : index
    %474 = vector.load %arg16[%c0_92, %c0_93] : memref<1x32xf32, #tpu.memory_space<vmem>>, vector<1x32xf32>
    %c0_94 = arith.constant 0 : index
    %c0_95 = arith.constant 0 : index
    %475 = vector.load %arg17[%c0_94, %c0_95] : memref<1x32xf32, #tpu.memory_space<vmem>>, vector<1x32xf32>
    %cst_96 = arith.constant dense<0.000000e+00> : vector<16x32xf32>
    %476 = tpu.matmul %473, %35, %cst_96 {dimension_numbers = #tpu.dot_dimension_numbers<[1], [0], [0], [1], [0, 0, 1, 1], [], []>} : vector<16x32xf32>, vector<32x32xf32>, vector<16x32xf32> -> vector<16x32xf32>
    %477 = arith.mulf %476, %476 : vector<16x32xf32>
    %cst_97 = arith.constant dense<0.000000e+00> : vector<16x32xf32>
    %478 = tpu.matmul %477, %36, %cst_97 {dimension_numbers = #tpu.dot_dimension_numbers<[1], [0], [0], [1], [0, 0, 1, 1], [], []>} : vector<16x32xf32>, vector<32x32xf32>, vector<16x32xf32> -> vector<16x32xf32>
    %cst_98 = arith.constant 9.99999974E-6 : f32
    %479 = vector.broadcast %cst_98 : f32 to vector<16x32xf32>
    %480 = arith.addf %478, %479 : vector<16x32xf32>
    %481 = math.rsqrt %480 : vector<16x32xf32>
    %482 = arith.mulf %476, %481 : vector<16x32xf32>
    %483 = vector.broadcast %474 : vector<1x32xf32> to vector<16x32xf32>
    %484 = arith.mulf %482, %483 : vector<16x32xf32>
    %485 = vector.broadcast %475 : vector<1x32xf32> to vector<16x32xf32>
    %486 = arith.addf %484, %485 : vector<16x32xf32>
    %487 = vector.extract_strided_slice %405 {offsets = [0, 32], sizes = [16, 32], strides = [1, 1]} : vector<16x64xf32> to vector<16x32xf32>
    %c0_99 = arith.constant 0 : index
    %c0_100 = arith.constant 0 : index
    %488 = vector.load %arg18[%c0_99, %c0_100] : memref<1x32xf32, #tpu.memory_space<vmem>>, vector<1x32xf32>
    %c0_101 = arith.constant 0 : index
    %c0_102 = arith.constant 0 : index
    %489 = vector.load %arg19[%c0_101, %c0_102] : memref<1x32xf32, #tpu.memory_space<vmem>>, vector<1x32xf32>
    %cst_103 = arith.constant dense<0.000000e+00> : vector<16x32xf32>
    %490 = tpu.matmul %487, %35, %cst_103 {dimension_numbers = #tpu.dot_dimension_numbers<[1], [0], [0], [1], [0, 0, 1, 1], [], []>} : vector<16x32xf32>, vector<32x32xf32>, vector<16x32xf32> -> vector<16x32xf32>
    %491 = arith.mulf %490, %490 : vector<16x32xf32>
    %cst_104 = arith.constant dense<0.000000e+00> : vector<16x32xf32>
    %492 = tpu.matmul %491, %36, %cst_104 {dimension_numbers = #tpu.dot_dimension_numbers<[1], [0], [0], [1], [0, 0, 1, 1], [], []>} : vector<16x32xf32>, vector<32x32xf32>, vector<16x32xf32> -> vector<16x32xf32>
    %cst_105 = arith.constant 9.99999974E-6 : f32
    %493 = vector.broadcast %cst_105 : f32 to vector<16x32xf32>
    %494 = arith.addf %492, %493 : vector<16x32xf32>
    %495 = math.rsqrt %494 : vector<16x32xf32>
    %496 = arith.mulf %490, %495 : vector<16x32xf32>
    %497 = vector.broadcast %488 : vector<1x32xf32> to vector<16x32xf32>
    %498 = arith.mulf %496, %497 : vector<16x32xf32>
    %499 = vector.broadcast %489 : vector<1x32xf32> to vector<16x32xf32>
    %500 = arith.addf %498, %499 : vector<16x32xf32>
    %cst_106 = arith.constant dense<0.000000e+00> : vector<16x256xf32>
    %501 = tpu.matmul %472, %37, %cst_106 {dimension_numbers = #tpu.dot_dimension_numbers<[1], [0], [0], [1], [0, 0, 1, 1], [], []>} : vector<16x32xf32>, vector<32x256xf32>, vector<16x256xf32> -> vector<16x256xf32>
    %502 = arith.mulf %501, %38 : vector<16x256xf32>
    %cst_107 = arith.constant dense<0.000000e+00> : vector<16x32xf32>
    %503 = tpu.matmul %502, %39, %cst_107 {dimension_numbers = #tpu.dot_dimension_numbers<[1], [0], [0], [1], [0, 0, 1, 1], [], []>} : vector<16x256xf32>, vector<256x32xf32>, vector<16x32xf32> -> vector<16x32xf32>
    %504 = vector.extract_strided_slice %472 {offsets = [0, 0], sizes = [16, 16], strides = [1, 1]} : vector<16x32xf32> to vector<16x16xf32>
    %505 = vector.extract_strided_slice %486 {offsets = [0, 0], sizes = [16, 16], strides = [1, 1]} : vector<16x32xf32> to vector<16x16xf32>
    %506 = vector.extract_strided_slice %500 {offsets = [0, 0], sizes = [16, 16], strides = [1, 1]} : vector<16x32xf32> to vector<16x16xf32>
    %cst_108 = arith.constant 2.500000e-01 : f32
    %507 = vector.broadcast %cst_108 : f32 to vector<16x16xf32>
    %508 = arith.mulf %504, %507 : vector<16x16xf32>
    %cst_109 = arith.constant dense<0.000000e+00> : vector<16x16xf32>
    %509 = tpu.matmul %508, %505, %cst_109 {dimension_numbers = #tpu.dot_dimension_numbers<[1], [1], [0], [0], [0, 0, 1, 0], [], []>} : vector<16x16xf32>, vector<16x16xf32>, vector<16x16xf32> -> vector<16x16xf32>
    %510 = vector.extract_strided_slice %503 {offsets = [0, 0], sizes = [16, 16], strides = [1, 1]} : vector<16x32xf32> to vector<16x16xf32>
    %511 = arith.addf %509, %510 : vector<16x16xf32>
    %cst_110 = arith.constant dense<0xFF800000> : vector<16xf32>
    %512 = vector.multi_reduction <maximumf>, %511, %cst_110 [1] : vector<16x16xf32> to vector<16xf32>
    %513 = vector.shape_cast %512 : vector<16xf32> to vector<16x1xf32>
    %514 = vector.broadcast %513 : vector<16x1xf32> to vector<16x16xf32>
    %515 = arith.subf %511, %514 : vector<16x16xf32>
    %516 = math.exp %515 : vector<16x16xf32>
    %cst_111 = arith.constant dense<0.000000e+00> : vector<16xf32>
    %517 = vector.multi_reduction <add>, %516, %cst_111 [1] : vector<16x16xf32> to vector<16xf32>
    %518 = vector.shape_cast %517 : vector<16xf32> to vector<16x1xf32>
    %519 = tpu.reciprocal %518 {approx = true} : vector<16x1xf32> -> vector<16x1xf32>
    %520 = vector.broadcast %519 : vector<16x1xf32> to vector<16x16xf32>
    %521 = arith.mulf %516, %520 : vector<16x16xf32>
    %cst_112 = arith.constant dense<0.000000e+00> : vector<16x16xf32>
    %522 = tpu.matmul %521, %506, %cst_112 {dimension_numbers = #tpu.dot_dimension_numbers<[1], [0], [0], [1], [0, 0, 1, 1], [], []>} : vector<16x16xf32>, vector<16x16xf32>, vector<16x16xf32> -> vector<16x16xf32>
    %523 = arith.addf %522, %504 : vector<16x16xf32>
    %c16_113 = arith.constant 16 : index
    %c0_114 = arith.constant 0 : index
    %524 = vector.load %arg32[%c16_113, %c0_114] : memref<64x32xf32, #tpu.memory_space<vmem>>, vector<16x16xf32>
    tpu.vector_store %arg32[%c16_113, %c0_114], %523 {strides = array<i32>} : memref<64x32xf32, #tpu.memory_space<vmem>>, vector<16x16xf32>,
    %525 = vector.extract_strided_slice %472 {offsets = [0, 16], sizes = [16, 16], strides = [1, 1]} : vector<16x32xf32> to vector<16x16xf32>
    %526 = vector.extract_strided_slice %486 {offsets = [0, 16], sizes = [16, 16], strides = [1, 1]} : vector<16x32xf32> to vector<16x16xf32>
    %527 = vector.extract_strided_slice %500 {offsets = [0, 16], sizes = [16, 16], strides = [1, 1]} : vector<16x32xf32> to vector<16x16xf32>
    %cst_115 = arith.constant 2.500000e-01 : f32
    %528 = vector.broadcast %cst_115 : f32 to vector<16x16xf32>
    %529 = arith.mulf %525, %528 : vector<16x16xf32>
    %cst_116 = arith.constant dense<0.000000e+00> : vector<16x16xf32>
    %530 = tpu.matmul %529, %526, %cst_116 {dimension_numbers = #tpu.dot_dimension_numbers<[1], [1], [0], [0], [0, 0, 1, 0], [], []>} : vector<16x16xf32>, vector<16x16xf32>, vector<16x16xf32> -> vector<16x16xf32>
    %531 = vector.extract_strided_slice %503 {offsets = [0, 16], sizes = [16, 16], strides = [1, 1]} : vector<16x32xf32> to vector<16x16xf32>
    %532 = arith.addf %530, %531 : vector<16x16xf32>
    %cst_117 = arith.constant dense<0xFF800000> : vector<16xf32>
    %533 = vector.multi_reduction <maximumf>, %532, %cst_117 [1] : vector<16x16xf32> to vector<16xf32>
    %534 = vector.shape_cast %533 : vector<16xf32> to vector<16x1xf32>
    %535 = vector.broadcast %534 : vector<16x1xf32> to vector<16x16xf32>
    %536 = arith.subf %532, %535 : vector<16x16xf32>
    %537 = math.exp %536 : vector<16x16xf32>
    %cst_118 = arith.constant dense<0.000000e+00> : vector<16xf32>
    %538 = vector.multi_reduction <add>, %537, %cst_118 [1] : vector<16x16xf32> to vector<16xf32>
    %539 = vector.shape_cast %538 : vector<16xf32> to vector<16x1xf32>
    %540 = tpu.reciprocal %539 {approx = true} : vector<16x1xf32> -> vector<16x1xf32>
    %541 = vector.broadcast %540 : vector<16x1xf32> to vector<16x16xf32>
    %542 = arith.mulf %537, %541 : vector<16x16xf32>
    %cst_119 = arith.constant dense<0.000000e+00> : vector<16x16xf32>
    %543 = tpu.matmul %542, %527, %cst_119 {dimension_numbers = #tpu.dot_dimension_numbers<[1], [0], [0], [1], [0, 0, 1, 1], [], []>} : vector<16x16xf32>, vector<16x16xf32>, vector<16x16xf32> -> vector<16x16xf32>
    %544 = arith.addf %543, %525 : vector<16x16xf32>
    %c16_120 = arith.constant 16 : index
    %c16_121 = arith.constant 16 : index
    %545 = vector.load %arg32[%c16_120, %c16_121] : memref<64x32xf32, #tpu.memory_space<vmem>>, vector<16x16xf32>
    tpu.vector_store %arg32[%c16_120, %c16_121], %544 {strides = array<i32>} : memref<64x32xf32, #tpu.memory_space<vmem>>, vector<16x16xf32>,
    %546 = vector.extract_strided_slice %28 {offsets = [128, 0], sizes = [64, 96], strides = [1, 1]} : vector<256x96xf32> to vector<64x96xf32>
    %547 = vector.extract_strided_slice %0 {offsets = [128, 0], sizes = [64, 32], strides = [1, 1]} : vector<256x32xf32> to vector<64x32xf32>
    %548 = vector.extract_strided_slice %546 {offsets = [0, 0], sizes = [64, 32], strides = [1, 1]} : vector<64x96xf32> to vector<64x32xf32>
    %cst_122 = arith.constant dense<0.000000e+00> : vector<144x32xf32>
    %549 = tpu.matmul %29, %548, %cst_122 {dimension_numbers = #tpu.dot_dimension_numbers<[1], [0], [0], [1], [0, 0, 1, 1], [], []>} : vector<144x64xf32>, vector<64x32xf32>, vector<144x32xf32> -> vector<144x32xf32>
    %550 = vector.extract_strided_slice %546 {offsets = [0, 32], sizes = [64, 64], strides = [1, 1]} : vector<64x96xf32> to vector<64x64xf32>
    %cst_123 = arith.constant dense<0.000000e+00> : vector<144x64xf32>
    %551 = tpu.matmul %30, %550, %cst_123 {dimension_numbers = #tpu.dot_dimension_numbers<[1], [0], [0], [1], [0, 0, 1, 1], [], []>} : vector<144x64xf32>, vector<64x64xf32>, vector<144x64xf32> -> vector<144x64xf32>
    %cst_124 = arith.constant dense<0.000000e+00> : vector<144x32xf32>
    %552 = tpu.matmul %31, %547, %cst_124 {dimension_numbers = #tpu.dot_dimension_numbers<[1], [0], [0], [1], [0, 0, 1, 1], [], []>} : vector<144x64xf32>, vector<64x32xf32>, vector<144x32xf32> -> vector<144x32xf32>
    %553 = vector.extract_strided_slice %549 {offsets = [0, 0], sizes = [16, 32], strides = [1, 1]} : vector<144x32xf32> to vector<16x32xf32>
    %554 = vector.extract_strided_slice %32 {offsets = [0, 0, 0], sizes = [1, 1, 32], strides = [1, 1, 1]} : vector<9x1x32xf32> to vector<1x1x32xf32>
    %555 = vector.shape_cast %554 : vector<1x1x32xf32> to vector<1x32xf32>
    %556 = vector.broadcast %555 : vector<1x32xf32> to vector<16x32xf32>
    %557 = arith.mulf %553, %556 : vector<16x32xf32>
    %558 = vector.extract_strided_slice %549 {offsets = [16, 0], sizes = [16, 32], strides = [1, 1]} : vector<144x32xf32> to vector<16x32xf32>
    %559 = vector.extract_strided_slice %32 {offsets = [1, 0, 0], sizes = [1, 1, 32], strides = [1, 1, 1]} : vector<9x1x32xf32> to vector<1x1x32xf32>
    %560 = vector.shape_cast %559 : vector<1x1x32xf32> to vector<1x32xf32>
    %561 = vector.broadcast %560 : vector<1x32xf32> to vector<16x32xf32>
    %562 = arith.mulf %558, %561 : vector<16x32xf32>
    %563 = arith.addf %557, %562 : vector<16x32xf32>
    %564 = vector.extract_strided_slice %549 {offsets = [32, 0], sizes = [16, 32], strides = [1, 1]} : vector<144x32xf32> to vector<16x32xf32>
    %565 = vector.extract_strided_slice %32 {offsets = [2, 0, 0], sizes = [1, 1, 32], strides = [1, 1, 1]} : vector<9x1x32xf32> to vector<1x1x32xf32>
    %566 = vector.shape_cast %565 : vector<1x1x32xf32> to vector<1x32xf32>
    %567 = vector.broadcast %566 : vector<1x32xf32> to vector<16x32xf32>
    %568 = arith.mulf %564, %567 : vector<16x32xf32>
    %569 = arith.addf %563, %568 : vector<16x32xf32>
    %570 = vector.extract_strided_slice %549 {offsets = [48, 0], sizes = [16, 32], strides = [1, 1]} : vector<144x32xf32> to vector<16x32xf32>
    %571 = vector.extract_strided_slice %32 {offsets = [3, 0, 0], sizes = [1, 1, 32], strides = [1, 1, 1]} : vector<9x1x32xf32> to vector<1x1x32xf32>
    %572 = vector.shape_cast %571 : vector<1x1x32xf32> to vector<1x32xf32>
    %573 = vector.broadcast %572 : vector<1x32xf32> to vector<16x32xf32>
    %574 = arith.mulf %570, %573 : vector<16x32xf32>
    %575 = arith.addf %569, %574 : vector<16x32xf32>
    %576 = vector.extract_strided_slice %549 {offsets = [64, 0], sizes = [16, 32], strides = [1, 1]} : vector<144x32xf32> to vector<16x32xf32>
    %577 = vector.extract_strided_slice %32 {offsets = [4, 0, 0], sizes = [1, 1, 32], strides = [1, 1, 1]} : vector<9x1x32xf32> to vector<1x1x32xf32>
    %578 = vector.shape_cast %577 : vector<1x1x32xf32> to vector<1x32xf32>
    %579 = vector.broadcast %578 : vector<1x32xf32> to vector<16x32xf32>
    %580 = arith.mulf %576, %579 : vector<16x32xf32>
    %581 = arith.addf %575, %580 : vector<16x32xf32>
    %582 = vector.extract_strided_slice %549 {offsets = [80, 0], sizes = [16, 32], strides = [1, 1]} : vector<144x32xf32> to vector<16x32xf32>
    %583 = vector.extract_strided_slice %32 {offsets = [5, 0, 0], sizes = [1, 1, 32], strides = [1, 1, 1]} : vector<9x1x32xf32> to vector<1x1x32xf32>
    %584 = vector.shape_cast %583 : vector<1x1x32xf32> to vector<1x32xf32>
    %585 = vector.broadcast %584 : vector<1x32xf32> to vector<16x32xf32>
    %586 = arith.mulf %582, %585 : vector<16x32xf32>
    %587 = arith.addf %581, %586 : vector<16x32xf32>
    %588 = vector.extract_strided_slice %549 {offsets = [96, 0], sizes = [16, 32], strides = [1, 1]} : vector<144x32xf32> to vector<16x32xf32>
    %589 = vector.extract_strided_slice %32 {offsets = [6, 0, 0], sizes = [1, 1, 32], strides = [1, 1, 1]} : vector<9x1x32xf32> to vector<1x1x32xf32>
    %590 = vector.shape_cast %589 : vector<1x1x32xf32> to vector<1x32xf32>
    %591 = vector.broadcast %590 : vector<1x32xf32> to vector<16x32xf32>
    %592 = arith.mulf %588, %591 : vector<16x32xf32>
    %593 = arith.addf %587, %592 : vector<16x32xf32>
    %594 = vector.extract_strided_slice %549 {offsets = [112, 0], sizes = [16, 32], strides = [1, 1]} : vector<144x32xf32> to vector<16x32xf32>
    %595 = vector.extract_strided_slice %32 {offsets = [7, 0, 0], sizes = [1, 1, 32], strides = [1, 1, 1]} : vector<9x1x32xf32> to vector<1x1x32xf32>
    %596 = vector.shape_cast %595 : vector<1x1x32xf32> to vector<1x32xf32>
    %597 = vector.broadcast %596 : vector<1x32xf32> to vector<16x32xf32>
    %598 = arith.mulf %594, %597 : vector<16x32xf32>
    %599 = arith.addf %593, %598 : vector<16x32xf32>
    %600 = vector.extract_strided_slice %549 {offsets = [128, 0], sizes = [16, 32], strides = [1, 1]} : vector<144x32xf32> to vector<16x32xf32>
    %601 = vector.extract_strided_slice %32 {offsets = [8, 0, 0], sizes = [1, 1, 32], strides = [1, 1, 1]} : vector<9x1x32xf32> to vector<1x1x32xf32>
    %602 = vector.shape_cast %601 : vector<1x1x32xf32> to vector<1x32xf32>
    %603 = vector.broadcast %602 : vector<1x32xf32> to vector<16x32xf32>
    %604 = arith.mulf %600, %603 : vector<16x32xf32>
    %605 = arith.addf %599, %604 : vector<16x32xf32>
    %606 = vector.extract_strided_slice %551 {offsets = [0, 0], sizes = [16, 64], strides = [1, 1]} : vector<144x64xf32> to vector<16x64xf32>
    %607 = vector.extract_strided_slice %33 {offsets = [0, 0, 0], sizes = [1, 1, 64], strides = [1, 1, 1]} : vector<9x1x64xf32> to vector<1x1x64xf32>
    %608 = vector.shape_cast %607 : vector<1x1x64xf32> to vector<1x64xf32>
    %609 = vector.broadcast %608 : vector<1x64xf32> to vector<16x64xf32>
    %610 = arith.mulf %606, %609 : vector<16x64xf32>
    %611 = vector.extract_strided_slice %551 {offsets = [16, 0], sizes = [16, 64], strides = [1, 1]} : vector<144x64xf32> to vector<16x64xf32>
    %612 = vector.extract_strided_slice %33 {offsets = [1, 0, 0], sizes = [1, 1, 64], strides = [1, 1, 1]} : vector<9x1x64xf32> to vector<1x1x64xf32>
    %613 = vector.shape_cast %612 : vector<1x1x64xf32> to vector<1x64xf32>
    %614 = vector.broadcast %613 : vector<1x64xf32> to vector<16x64xf32>
    %615 = arith.mulf %611, %614 : vector<16x64xf32>
    %616 = arith.addf %610, %615 : vector<16x64xf32>
    %617 = vector.extract_strided_slice %551 {offsets = [32, 0], sizes = [16, 64], strides = [1, 1]} : vector<144x64xf32> to vector<16x64xf32>
    %618 = vector.extract_strided_slice %33 {offsets = [2, 0, 0], sizes = [1, 1, 64], strides = [1, 1, 1]} : vector<9x1x64xf32> to vector<1x1x64xf32>
    %619 = vector.shape_cast %618 : vector<1x1x64xf32> to vector<1x64xf32>
    %620 = vector.broadcast %619 : vector<1x64xf32> to vector<16x64xf32>
    %621 = arith.mulf %617, %620 : vector<16x64xf32>
    %622 = arith.addf %616, %621 : vector<16x64xf32>
    %623 = vector.extract_strided_slice %551 {offsets = [48, 0], sizes = [16, 64], strides = [1, 1]} : vector<144x64xf32> to vector<16x64xf32>
    %624 = vector.extract_strided_slice %33 {offsets = [3, 0, 0], sizes = [1, 1, 64], strides = [1, 1, 1]} : vector<9x1x64xf32> to vector<1x1x64xf32>
    %625 = vector.shape_cast %624 : vector<1x1x64xf32> to vector<1x64xf32>
    %626 = vector.broadcast %625 : vector<1x64xf32> to vector<16x64xf32>
    %627 = arith.mulf %623, %626 : vector<16x64xf32>
    %628 = arith.addf %622, %627 : vector<16x64xf32>
    %629 = vector.extract_strided_slice %551 {offsets = [64, 0], sizes = [16, 64], strides = [1, 1]} : vector<144x64xf32> to vector<16x64xf32>
    %630 = vector.extract_strided_slice %33 {offsets = [4, 0, 0], sizes = [1, 1, 64], strides = [1, 1, 1]} : vector<9x1x64xf32> to vector<1x1x64xf32>
    %631 = vector.shape_cast %630 : vector<1x1x64xf32> to vector<1x64xf32>
    %632 = vector.broadcast %631 : vector<1x64xf32> to vector<16x64xf32>
    %633 = arith.mulf %629, %632 : vector<16x64xf32>
    %634 = arith.addf %628, %633 : vector<16x64xf32>
    %635 = vector.extract_strided_slice %551 {offsets = [80, 0], sizes = [16, 64], strides = [1, 1]} : vector<144x64xf32> to vector<16x64xf32>
    %636 = vector.extract_strided_slice %33 {offsets = [5, 0, 0], sizes = [1, 1, 64], strides = [1, 1, 1]} : vector<9x1x64xf32> to vector<1x1x64xf32>
    %637 = vector.shape_cast %636 : vector<1x1x64xf32> to vector<1x64xf32>
    %638 = vector.broadcast %637 : vector<1x64xf32> to vector<16x64xf32>
    %639 = arith.mulf %635, %638 : vector<16x64xf32>
    %640 = arith.addf %634, %639 : vector<16x64xf32>
    %641 = vector.extract_strided_slice %551 {offsets = [96, 0], sizes = [16, 64], strides = [1, 1]} : vector<144x64xf32> to vector<16x64xf32>
    %642 = vector.extract_strided_slice %33 {offsets = [6, 0, 0], sizes = [1, 1, 64], strides = [1, 1, 1]} : vector<9x1x64xf32> to vector<1x1x64xf32>
    %643 = vector.shape_cast %642 : vector<1x1x64xf32> to vector<1x64xf32>
    %644 = vector.broadcast %643 : vector<1x64xf32> to vector<16x64xf32>
    %645 = arith.mulf %641, %644 : vector<16x64xf32>
    %646 = arith.addf %640, %645 : vector<16x64xf32>
    %647 = vector.extract_strided_slice %551 {offsets = [112, 0], sizes = [16, 64], strides = [1, 1]} : vector<144x64xf32> to vector<16x64xf32>
    %648 = vector.extract_strided_slice %33 {offsets = [7, 0, 0], sizes = [1, 1, 64], strides = [1, 1, 1]} : vector<9x1x64xf32> to vector<1x1x64xf32>
    %649 = vector.shape_cast %648 : vector<1x1x64xf32> to vector<1x64xf32>
    %650 = vector.broadcast %649 : vector<1x64xf32> to vector<16x64xf32>
    %651 = arith.mulf %647, %650 : vector<16x64xf32>
    %652 = arith.addf %646, %651 : vector<16x64xf32>
    %653 = vector.extract_strided_slice %551 {offsets = [128, 0], sizes = [16, 64], strides = [1, 1]} : vector<144x64xf32> to vector<16x64xf32>
    %654 = vector.extract_strided_slice %33 {offsets = [8, 0, 0], sizes = [1, 1, 64], strides = [1, 1, 1]} : vector<9x1x64xf32> to vector<1x1x64xf32>
    %655 = vector.shape_cast %654 : vector<1x1x64xf32> to vector<1x64xf32>
    %656 = vector.broadcast %655 : vector<1x64xf32> to vector<16x64xf32>
    %657 = arith.mulf %653, %656 : vector<16x64xf32>
    %658 = arith.addf %652, %657 : vector<16x64xf32>
    %659 = vector.extract_strided_slice %552 {offsets = [0, 0], sizes = [16, 32], strides = [1, 1]} : vector<144x32xf32> to vector<16x32xf32>
    %660 = vector.extract_strided_slice %34 {offsets = [0, 0, 0], sizes = [1, 16, 1], strides = [1, 1, 1]} : vector<9x16x1xf32> to vector<1x16x1xf32>
    %661 = vector.shape_cast %660 : vector<1x16x1xf32> to vector<16x1xf32>
    %662 = vector.broadcast %661 : vector<16x1xf32> to vector<16x32xf32>
    %663 = arith.addf %659, %662 : vector<16x32xf32>
    %664 = vector.extract_strided_slice %552 {offsets = [16, 0], sizes = [16, 32], strides = [1, 1]} : vector<144x32xf32> to vector<16x32xf32>
    %665 = vector.extract_strided_slice %34 {offsets = [1, 0, 0], sizes = [1, 16, 1], strides = [1, 1, 1]} : vector<9x16x1xf32> to vector<1x16x1xf32>
    %666 = vector.shape_cast %665 : vector<1x16x1xf32> to vector<16x1xf32>
    %667 = vector.broadcast %666 : vector<16x1xf32> to vector<16x32xf32>
    %668 = arith.addf %664, %667 : vector<16x32xf32>
    %669 = arith.maximumf %663, %668 : vector<16x32xf32>
    %670 = vector.extract_strided_slice %552 {offsets = [32, 0], sizes = [16, 32], strides = [1, 1]} : vector<144x32xf32> to vector<16x32xf32>
    %671 = vector.extract_strided_slice %34 {offsets = [2, 0, 0], sizes = [1, 16, 1], strides = [1, 1, 1]} : vector<9x16x1xf32> to vector<1x16x1xf32>
    %672 = vector.shape_cast %671 : vector<1x16x1xf32> to vector<16x1xf32>
    %673 = vector.broadcast %672 : vector<16x1xf32> to vector<16x32xf32>
    %674 = arith.addf %670, %673 : vector<16x32xf32>
    %675 = arith.maximumf %669, %674 : vector<16x32xf32>
    %676 = vector.extract_strided_slice %552 {offsets = [48, 0], sizes = [16, 32], strides = [1, 1]} : vector<144x32xf32> to vector<16x32xf32>
    %677 = vector.extract_strided_slice %34 {offsets = [3, 0, 0], sizes = [1, 16, 1], strides = [1, 1, 1]} : vector<9x16x1xf32> to vector<1x16x1xf32>
    %678 = vector.shape_cast %677 : vector<1x16x1xf32> to vector<16x1xf32>
    %679 = vector.broadcast %678 : vector<16x1xf32> to vector<16x32xf32>
    %680 = arith.addf %676, %679 : vector<16x32xf32>
    %681 = arith.maximumf %675, %680 : vector<16x32xf32>
    %682 = vector.extract_strided_slice %552 {offsets = [64, 0], sizes = [16, 32], strides = [1, 1]} : vector<144x32xf32> to vector<16x32xf32>
    %683 = vector.extract_strided_slice %34 {offsets = [4, 0, 0], sizes = [1, 16, 1], strides = [1, 1, 1]} : vector<9x16x1xf32> to vector<1x16x1xf32>
    %684 = vector.shape_cast %683 : vector<1x16x1xf32> to vector<16x1xf32>
    %685 = vector.broadcast %684 : vector<16x1xf32> to vector<16x32xf32>
    %686 = arith.addf %682, %685 : vector<16x32xf32>
    %687 = arith.maximumf %681, %686 : vector<16x32xf32>
    %688 = vector.extract_strided_slice %552 {offsets = [80, 0], sizes = [16, 32], strides = [1, 1]} : vector<144x32xf32> to vector<16x32xf32>
    %689 = vector.extract_strided_slice %34 {offsets = [5, 0, 0], sizes = [1, 16, 1], strides = [1, 1, 1]} : vector<9x16x1xf32> to vector<1x16x1xf32>
    %690 = vector.shape_cast %689 : vector<1x16x1xf32> to vector<16x1xf32>
    %691 = vector.broadcast %690 : vector<16x1xf32> to vector<16x32xf32>
    %692 = arith.addf %688, %691 : vector<16x32xf32>
    %693 = arith.maximumf %687, %692 : vector<16x32xf32>
    %694 = vector.extract_strided_slice %552 {offsets = [96, 0], sizes = [16, 32], strides = [1, 1]} : vector<144x32xf32> to vector<16x32xf32>
    %695 = vector.extract_strided_slice %34 {offsets = [6, 0, 0], sizes = [1, 16, 1], strides = [1, 1, 1]} : vector<9x16x1xf32> to vector<1x16x1xf32>
    %696 = vector.shape_cast %695 : vector<1x16x1xf32> to vector<16x1xf32>
    %697 = vector.broadcast %696 : vector<16x1xf32> to vector<16x32xf32>
    %698 = arith.addf %694, %697 : vector<16x32xf32>
    %699 = arith.maximumf %693, %698 : vector<16x32xf32>
    %700 = vector.extract_strided_slice %552 {offsets = [112, 0], sizes = [16, 32], strides = [1, 1]} : vector<144x32xf32> to vector<16x32xf32>
    %701 = vector.extract_strided_slice %34 {offsets = [7, 0, 0], sizes = [1, 16, 1], strides = [1, 1, 1]} : vector<9x16x1xf32> to vector<1x16x1xf32>
    %702 = vector.shape_cast %701 : vector<1x16x1xf32> to vector<16x1xf32>
    %703 = vector.broadcast %702 : vector<16x1xf32> to vector<16x32xf32>
    %704 = arith.addf %700, %703 : vector<16x32xf32>
    %705 = arith.maximumf %699, %704 : vector<16x32xf32>
    %706 = vector.extract_strided_slice %552 {offsets = [128, 0], sizes = [16, 32], strides = [1, 1]} : vector<144x32xf32> to vector<16x32xf32>
    %707 = vector.extract_strided_slice %34 {offsets = [8, 0, 0], sizes = [1, 16, 1], strides = [1, 1, 1]} : vector<9x16x1xf32> to vector<1x16x1xf32>
    %708 = vector.shape_cast %707 : vector<1x16x1xf32> to vector<16x1xf32>
    %709 = vector.broadcast %708 : vector<16x1xf32> to vector<16x32xf32>
    %710 = arith.addf %706, %709 : vector<16x32xf32>
    %711 = arith.maximumf %705, %710 : vector<16x32xf32>
    %c32 = arith.constant 32 : index
    %c0_125 = arith.constant 0 : index
    %712 = vector.load %arg33[%c32, %c0_125] : memref<64x32xf32, #tpu.memory_space<vmem>>, vector<16x32xf32>
    tpu.vector_store %arg33[%c32, %c0_125], %711 {strides = array<i32>} : memref<64x32xf32, #tpu.memory_space<vmem>>, vector<16x32xf32>,
    %c0_126 = arith.constant 0 : index
    %c0_127 = arith.constant 0 : index
    %713 = vector.load %arg14[%c0_126, %c0_127] : memref<1x32xf32, #tpu.memory_space<vmem>>, vector<1x32xf32>
    %c0_128 = arith.constant 0 : index
    %c0_129 = arith.constant 0 : index
    %714 = vector.load %arg15[%c0_128, %c0_129] : memref<1x32xf32, #tpu.memory_space<vmem>>, vector<1x32xf32>
    %cst_130 = arith.constant dense<0.000000e+00> : vector<16x32xf32>
    %715 = tpu.matmul %605, %35, %cst_130 {dimension_numbers = #tpu.dot_dimension_numbers<[1], [0], [0], [1], [0, 0, 1, 1], [], []>} : vector<16x32xf32>, vector<32x32xf32>, vector<16x32xf32> -> vector<16x32xf32>
    %716 = arith.mulf %715, %715 : vector<16x32xf32>
    %cst_131 = arith.constant dense<0.000000e+00> : vector<16x32xf32>
    %717 = tpu.matmul %716, %36, %cst_131 {dimension_numbers = #tpu.dot_dimension_numbers<[1], [0], [0], [1], [0, 0, 1, 1], [], []>} : vector<16x32xf32>, vector<32x32xf32>, vector<16x32xf32> -> vector<16x32xf32>
    %cst_132 = arith.constant 9.99999974E-6 : f32
    %718 = vector.broadcast %cst_132 : f32 to vector<16x32xf32>
    %719 = arith.addf %717, %718 : vector<16x32xf32>
    %720 = math.rsqrt %719 : vector<16x32xf32>
    %721 = arith.mulf %715, %720 : vector<16x32xf32>
    %722 = vector.broadcast %713 : vector<1x32xf32> to vector<16x32xf32>
    %723 = arith.mulf %721, %722 : vector<16x32xf32>
    %724 = vector.broadcast %714 : vector<1x32xf32> to vector<16x32xf32>
    %725 = arith.addf %723, %724 : vector<16x32xf32>
    %726 = vector.extract_strided_slice %658 {offsets = [0, 0], sizes = [16, 32], strides = [1, 1]} : vector<16x64xf32> to vector<16x32xf32>
    %c0_133 = arith.constant 0 : index
    %c0_134 = arith.constant 0 : index
    %727 = vector.load %arg16[%c0_133, %c0_134] : memref<1x32xf32, #tpu.memory_space<vmem>>, vector<1x32xf32>
    %c0_135 = arith.constant 0 : index
    %c0_136 = arith.constant 0 : index
    %728 = vector.load %arg17[%c0_135, %c0_136] : memref<1x32xf32, #tpu.memory_space<vmem>>, vector<1x32xf32>
    %cst_137 = arith.constant dense<0.000000e+00> : vector<16x32xf32>
    %729 = tpu.matmul %726, %35, %cst_137 {dimension_numbers = #tpu.dot_dimension_numbers<[1], [0], [0], [1], [0, 0, 1, 1], [], []>} : vector<16x32xf32>, vector<32x32xf32>, vector<16x32xf32> -> vector<16x32xf32>
    %730 = arith.mulf %729, %729 : vector<16x32xf32>
    %cst_138 = arith.constant dense<0.000000e+00> : vector<16x32xf32>
    %731 = tpu.matmul %730, %36, %cst_138 {dimension_numbers = #tpu.dot_dimension_numbers<[1], [0], [0], [1], [0, 0, 1, 1], [], []>} : vector<16x32xf32>, vector<32x32xf32>, vector<16x32xf32> -> vector<16x32xf32>
    %cst_139 = arith.constant 9.99999974E-6 : f32
    %732 = vector.broadcast %cst_139 : f32 to vector<16x32xf32>
    %733 = arith.addf %731, %732 : vector<16x32xf32>
    %734 = math.rsqrt %733 : vector<16x32xf32>
    %735 = arith.mulf %729, %734 : vector<16x32xf32>
    %736 = vector.broadcast %727 : vector<1x32xf32> to vector<16x32xf32>
    %737 = arith.mulf %735, %736 : vector<16x32xf32>
    %738 = vector.broadcast %728 : vector<1x32xf32> to vector<16x32xf32>
    %739 = arith.addf %737, %738 : vector<16x32xf32>
    %740 = vector.extract_strided_slice %658 {offsets = [0, 32], sizes = [16, 32], strides = [1, 1]} : vector<16x64xf32> to vector<16x32xf32>
    %c0_140 = arith.constant 0 : index
    %c0_141 = arith.constant 0 : index
    %741 = vector.load %arg18[%c0_140, %c0_141] : memref<1x32xf32, #tpu.memory_space<vmem>>, vector<1x32xf32>
    %c0_142 = arith.constant 0 : index
    %c0_143 = arith.constant 0 : index
    %742 = vector.load %arg19[%c0_142, %c0_143] : memref<1x32xf32, #tpu.memory_space<vmem>>, vector<1x32xf32>
    %cst_144 = arith.constant dense<0.000000e+00> : vector<16x32xf32>
    %743 = tpu.matmul %740, %35, %cst_144 {dimension_numbers = #tpu.dot_dimension_numbers<[1], [0], [0], [1], [0, 0, 1, 1], [], []>} : vector<16x32xf32>, vector<32x32xf32>, vector<16x32xf32> -> vector<16x32xf32>
    %744 = arith.mulf %743, %743 : vector<16x32xf32>
    %cst_145 = arith.constant dense<0.000000e+00> : vector<16x32xf32>
    %745 = tpu.matmul %744, %36, %cst_145 {dimension_numbers = #tpu.dot_dimension_numbers<[1], [0], [0], [1], [0, 0, 1, 1], [], []>} : vector<16x32xf32>, vector<32x32xf32>, vector<16x32xf32> -> vector<16x32xf32>
    %cst_146 = arith.constant 9.99999974E-6 : f32
    %746 = vector.broadcast %cst_146 : f32 to vector<16x32xf32>
    %747 = arith.addf %745, %746 : vector<16x32xf32>
    %748 = math.rsqrt %747 : vector<16x32xf32>
    %749 = arith.mulf %743, %748 : vector<16x32xf32>
    %750 = vector.broadcast %741 : vector<1x32xf32> to vector<16x32xf32>
    %751 = arith.mulf %749, %750 : vector<16x32xf32>
    %752 = vector.broadcast %742 : vector<1x32xf32> to vector<16x32xf32>
    %753 = arith.addf %751, %752 : vector<16x32xf32>
    %cst_147 = arith.constant dense<0.000000e+00> : vector<16x256xf32>
    %754 = tpu.matmul %725, %37, %cst_147 {dimension_numbers = #tpu.dot_dimension_numbers<[1], [0], [0], [1], [0, 0, 1, 1], [], []>} : vector<16x32xf32>, vector<32x256xf32>, vector<16x256xf32> -> vector<16x256xf32>
    %755 = arith.mulf %754, %38 : vector<16x256xf32>
    %cst_148 = arith.constant dense<0.000000e+00> : vector<16x32xf32>
    %756 = tpu.matmul %755, %39, %cst_148 {dimension_numbers = #tpu.dot_dimension_numbers<[1], [0], [0], [1], [0, 0, 1, 1], [], []>} : vector<16x256xf32>, vector<256x32xf32>, vector<16x32xf32> -> vector<16x32xf32>
    %757 = vector.extract_strided_slice %725 {offsets = [0, 0], sizes = [16, 16], strides = [1, 1]} : vector<16x32xf32> to vector<16x16xf32>
    %758 = vector.extract_strided_slice %739 {offsets = [0, 0], sizes = [16, 16], strides = [1, 1]} : vector<16x32xf32> to vector<16x16xf32>
    %759 = vector.extract_strided_slice %753 {offsets = [0, 0], sizes = [16, 16], strides = [1, 1]} : vector<16x32xf32> to vector<16x16xf32>
    %cst_149 = arith.constant 2.500000e-01 : f32
    %760 = vector.broadcast %cst_149 : f32 to vector<16x16xf32>
    %761 = arith.mulf %757, %760 : vector<16x16xf32>
    %cst_150 = arith.constant dense<0.000000e+00> : vector<16x16xf32>
    %762 = tpu.matmul %761, %758, %cst_150 {dimension_numbers = #tpu.dot_dimension_numbers<[1], [1], [0], [0], [0, 0, 1, 0], [], []>} : vector<16x16xf32>, vector<16x16xf32>, vector<16x16xf32> -> vector<16x16xf32>
    %763 = vector.extract_strided_slice %756 {offsets = [0, 0], sizes = [16, 16], strides = [1, 1]} : vector<16x32xf32> to vector<16x16xf32>
    %764 = arith.addf %762, %763 : vector<16x16xf32>
    %cst_151 = arith.constant dense<0xFF800000> : vector<16xf32>
    %765 = vector.multi_reduction <maximumf>, %764, %cst_151 [1] : vector<16x16xf32> to vector<16xf32>
    %766 = vector.shape_cast %765 : vector<16xf32> to vector<16x1xf32>
    %767 = vector.broadcast %766 : vector<16x1xf32> to vector<16x16xf32>
    %768 = arith.subf %764, %767 : vector<16x16xf32>
    %769 = math.exp %768 : vector<16x16xf32>
    %cst_152 = arith.constant dense<0.000000e+00> : vector<16xf32>
    %770 = vector.multi_reduction <add>, %769, %cst_152 [1] : vector<16x16xf32> to vector<16xf32>
    %771 = vector.shape_cast %770 : vector<16xf32> to vector<16x1xf32>
    %772 = tpu.reciprocal %771 {approx = true} : vector<16x1xf32> -> vector<16x1xf32>
    %773 = vector.broadcast %772 : vector<16x1xf32> to vector<16x16xf32>
    %774 = arith.mulf %769, %773 : vector<16x16xf32>
    %cst_153 = arith.constant dense<0.000000e+00> : vector<16x16xf32>
    %775 = tpu.matmul %774, %759, %cst_153 {dimension_numbers = #tpu.dot_dimension_numbers<[1], [0], [0], [1], [0, 0, 1, 1], [], []>} : vector<16x16xf32>, vector<16x16xf32>, vector<16x16xf32> -> vector<16x16xf32>
    %776 = arith.addf %775, %757 : vector<16x16xf32>
    %c32_154 = arith.constant 32 : index
    %c0_155 = arith.constant 0 : index
    %777 = vector.load %arg32[%c32_154, %c0_155] : memref<64x32xf32, #tpu.memory_space<vmem>>, vector<16x16xf32>
    tpu.vector_store %arg32[%c32_154, %c0_155], %776 {strides = array<i32>} : memref<64x32xf32, #tpu.memory_space<vmem>>, vector<16x16xf32>,
    %778 = vector.extract_strided_slice %725 {offsets = [0, 16], sizes = [16, 16], strides = [1, 1]} : vector<16x32xf32> to vector<16x16xf32>
    %779 = vector.extract_strided_slice %739 {offsets = [0, 16], sizes = [16, 16], strides = [1, 1]} : vector<16x32xf32> to vector<16x16xf32>
    %780 = vector.extract_strided_slice %753 {offsets = [0, 16], sizes = [16, 16], strides = [1, 1]} : vector<16x32xf32> to vector<16x16xf32>
    %cst_156 = arith.constant 2.500000e-01 : f32
    %781 = vector.broadcast %cst_156 : f32 to vector<16x16xf32>
    %782 = arith.mulf %778, %781 : vector<16x16xf32>
    %cst_157 = arith.constant dense<0.000000e+00> : vector<16x16xf32>
    %783 = tpu.matmul %782, %779, %cst_157 {dimension_numbers = #tpu.dot_dimension_numbers<[1], [1], [0], [0], [0, 0, 1, 0], [], []>} : vector<16x16xf32>, vector<16x16xf32>, vector<16x16xf32> -> vector<16x16xf32>
    %784 = vector.extract_strided_slice %756 {offsets = [0, 16], sizes = [16, 16], strides = [1, 1]} : vector<16x32xf32> to vector<16x16xf32>
    %785 = arith.addf %783, %784 : vector<16x16xf32>
    %cst_158 = arith.constant dense<0xFF800000> : vector<16xf32>
    %786 = vector.multi_reduction <maximumf>, %785, %cst_158 [1] : vector<16x16xf32> to vector<16xf32>
    %787 = vector.shape_cast %786 : vector<16xf32> to vector<16x1xf32>
    %788 = vector.broadcast %787 : vector<16x1xf32> to vector<16x16xf32>
    %789 = arith.subf %785, %788 : vector<16x16xf32>
    %790 = math.exp %789 : vector<16x16xf32>
    %cst_159 = arith.constant dense<0.000000e+00> : vector<16xf32>
    %791 = vector.multi_reduction <add>, %790, %cst_159 [1] : vector<16x16xf32> to vector<16xf32>
    %792 = vector.shape_cast %791 : vector<16xf32> to vector<16x1xf32>
    %793 = tpu.reciprocal %792 {approx = true} : vector<16x1xf32> -> vector<16x1xf32>
    %794 = vector.broadcast %793 : vector<16x1xf32> to vector<16x16xf32>
    %795 = arith.mulf %790, %794 : vector<16x16xf32>
    %cst_160 = arith.constant dense<0.000000e+00> : vector<16x16xf32>
    %796 = tpu.matmul %795, %780, %cst_160 {dimension_numbers = #tpu.dot_dimension_numbers<[1], [0], [0], [1], [0, 0, 1, 1], [], []>} : vector<16x16xf32>, vector<16x16xf32>, vector<16x16xf32> -> vector<16x16xf32>
    %797 = arith.addf %796, %778 : vector<16x16xf32>
    %c32_161 = arith.constant 32 : index
    %c16_162 = arith.constant 16 : index
    %798 = vector.load %arg32[%c32_161, %c16_162] : memref<64x32xf32, #tpu.memory_space<vmem>>, vector<16x16xf32>
    tpu.vector_store %arg32[%c32_161, %c16_162], %797 {strides = array<i32>} : memref<64x32xf32, #tpu.memory_space<vmem>>, vector<16x16xf32>,
    %799 = vector.extract_strided_slice %28 {offsets = [192, 0], sizes = [64, 96], strides = [1, 1]} : vector<256x96xf32> to vector<64x96xf32>
    %800 = vector.extract_strided_slice %0 {offsets = [192, 0], sizes = [64, 32], strides = [1, 1]} : vector<256x32xf32> to vector<64x32xf32>
    %801 = vector.extract_strided_slice %799 {offsets = [0, 0], sizes = [64, 32], strides = [1, 1]} : vector<64x96xf32> to vector<64x32xf32>
    %cst_163 = arith.constant dense<0.000000e+00> : vector<144x32xf32>
    %802 = tpu.matmul %29, %801, %cst_163 {dimension_numbers = #tpu.dot_dimension_numbers<[1], [0], [0], [1], [0, 0, 1, 1], [], []>} : vector<144x64xf32>, vector<64x32xf32>, vector<144x32xf32> -> vector<144x32xf32>
    %803 = vector.extract_strided_slice %799 {offsets = [0, 32], sizes = [64, 64], strides = [1, 1]} : vector<64x96xf32> to vector<64x64xf32>
    %cst_164 = arith.constant dense<0.000000e+00> : vector<144x64xf32>
    %804 = tpu.matmul %30, %803, %cst_164 {dimension_numbers = #tpu.dot_dimension_numbers<[1], [0], [0], [1], [0, 0, 1, 1], [], []>} : vector<144x64xf32>, vector<64x64xf32>, vector<144x64xf32> -> vector<144x64xf32>
    %cst_165 = arith.constant dense<0.000000e+00> : vector<144x32xf32>
    %805 = tpu.matmul %31, %800, %cst_165 {dimension_numbers = #tpu.dot_dimension_numbers<[1], [0], [0], [1], [0, 0, 1, 1], [], []>} : vector<144x64xf32>, vector<64x32xf32>, vector<144x32xf32> -> vector<144x32xf32>
    %806 = vector.extract_strided_slice %802 {offsets = [0, 0], sizes = [16, 32], strides = [1, 1]} : vector<144x32xf32> to vector<16x32xf32>
    %807 = vector.extract_strided_slice %32 {offsets = [0, 0, 0], sizes = [1, 1, 32], strides = [1, 1, 1]} : vector<9x1x32xf32> to vector<1x1x32xf32>
    %808 = vector.shape_cast %807 : vector<1x1x32xf32> to vector<1x32xf32>
    %809 = vector.broadcast %808 : vector<1x32xf32> to vector<16x32xf32>
    %810 = arith.mulf %806, %809 : vector<16x32xf32>
    %811 = vector.extract_strided_slice %802 {offsets = [16, 0], sizes = [16, 32], strides = [1, 1]} : vector<144x32xf32> to vector<16x32xf32>
    %812 = vector.extract_strided_slice %32 {offsets = [1, 0, 0], sizes = [1, 1, 32], strides = [1, 1, 1]} : vector<9x1x32xf32> to vector<1x1x32xf32>
    %813 = vector.shape_cast %812 : vector<1x1x32xf32> to vector<1x32xf32>
    %814 = vector.broadcast %813 : vector<1x32xf32> to vector<16x32xf32>
    %815 = arith.mulf %811, %814 : vector<16x32xf32>
    %816 = arith.addf %810, %815 : vector<16x32xf32>
    %817 = vector.extract_strided_slice %802 {offsets = [32, 0], sizes = [16, 32], strides = [1, 1]} : vector<144x32xf32> to vector<16x32xf32>
    %818 = vector.extract_strided_slice %32 {offsets = [2, 0, 0], sizes = [1, 1, 32], strides = [1, 1, 1]} : vector<9x1x32xf32> to vector<1x1x32xf32>
    %819 = vector.shape_cast %818 : vector<1x1x32xf32> to vector<1x32xf32>
    %820 = vector.broadcast %819 : vector<1x32xf32> to vector<16x32xf32>
    %821 = arith.mulf %817, %820 : vector<16x32xf32>
    %822 = arith.addf %816, %821 : vector<16x32xf32>
    %823 = vector.extract_strided_slice %802 {offsets = [48, 0], sizes = [16, 32], strides = [1, 1]} : vector<144x32xf32> to vector<16x32xf32>
    %824 = vector.extract_strided_slice %32 {offsets = [3, 0, 0], sizes = [1, 1, 32], strides = [1, 1, 1]} : vector<9x1x32xf32> to vector<1x1x32xf32>
    %825 = vector.shape_cast %824 : vector<1x1x32xf32> to vector<1x32xf32>
    %826 = vector.broadcast %825 : vector<1x32xf32> to vector<16x32xf32>
    %827 = arith.mulf %823, %826 : vector<16x32xf32>
    %828 = arith.addf %822, %827 : vector<16x32xf32>
    %829 = vector.extract_strided_slice %802 {offsets = [64, 0], sizes = [16, 32], strides = [1, 1]} : vector<144x32xf32> to vector<16x32xf32>
    %830 = vector.extract_strided_slice %32 {offsets = [4, 0, 0], sizes = [1, 1, 32], strides = [1, 1, 1]} : vector<9x1x32xf32> to vector<1x1x32xf32>
    %831 = vector.shape_cast %830 : vector<1x1x32xf32> to vector<1x32xf32>
    %832 = vector.broadcast %831 : vector<1x32xf32> to vector<16x32xf32>
    %833 = arith.mulf %829, %832 : vector<16x32xf32>
    %834 = arith.addf %828, %833 : vector<16x32xf32>
    %835 = vector.extract_strided_slice %802 {offsets = [80, 0], sizes = [16, 32], strides = [1, 1]} : vector<144x32xf32> to vector<16x32xf32>
    %836 = vector.extract_strided_slice %32 {offsets = [5, 0, 0], sizes = [1, 1, 32], strides = [1, 1, 1]} : vector<9x1x32xf32> to vector<1x1x32xf32>
    %837 = vector.shape_cast %836 : vector<1x1x32xf32> to vector<1x32xf32>
    %838 = vector.broadcast %837 : vector<1x32xf32> to vector<16x32xf32>
    %839 = arith.mulf %835, %838 : vector<16x32xf32>
    %840 = arith.addf %834, %839 : vector<16x32xf32>
    %841 = vector.extract_strided_slice %802 {offsets = [96, 0], sizes = [16, 32], strides = [1, 1]} : vector<144x32xf32> to vector<16x32xf32>
    %842 = vector.extract_strided_slice %32 {offsets = [6, 0, 0], sizes = [1, 1, 32], strides = [1, 1, 1]} : vector<9x1x32xf32> to vector<1x1x32xf32>
    %843 = vector.shape_cast %842 : vector<1x1x32xf32> to vector<1x32xf32>
    %844 = vector.broadcast %843 : vector<1x32xf32> to vector<16x32xf32>
    %845 = arith.mulf %841, %844 : vector<16x32xf32>
    %846 = arith.addf %840, %845 : vector<16x32xf32>
    %847 = vector.extract_strided_slice %802 {offsets = [112, 0], sizes = [16, 32], strides = [1, 1]} : vector<144x32xf32> to vector<16x32xf32>
    %848 = vector.extract_strided_slice %32 {offsets = [7, 0, 0], sizes = [1, 1, 32], strides = [1, 1, 1]} : vector<9x1x32xf32> to vector<1x1x32xf32>
    %849 = vector.shape_cast %848 : vector<1x1x32xf32> to vector<1x32xf32>
    %850 = vector.broadcast %849 : vector<1x32xf32> to vector<16x32xf32>
    %851 = arith.mulf %847, %850 : vector<16x32xf32>
    %852 = arith.addf %846, %851 : vector<16x32xf32>
    %853 = vector.extract_strided_slice %802 {offsets = [128, 0], sizes = [16, 32], strides = [1, 1]} : vector<144x32xf32> to vector<16x32xf32>
    %854 = vector.extract_strided_slice %32 {offsets = [8, 0, 0], sizes = [1, 1, 32], strides = [1, 1, 1]} : vector<9x1x32xf32> to vector<1x1x32xf32>
    %855 = vector.shape_cast %854 : vector<1x1x32xf32> to vector<1x32xf32>
    %856 = vector.broadcast %855 : vector<1x32xf32> to vector<16x32xf32>
    %857 = arith.mulf %853, %856 : vector<16x32xf32>
    %858 = arith.addf %852, %857 : vector<16x32xf32>
    %859 = vector.extract_strided_slice %804 {offsets = [0, 0], sizes = [16, 64], strides = [1, 1]} : vector<144x64xf32> to vector<16x64xf32>
    %860 = vector.extract_strided_slice %33 {offsets = [0, 0, 0], sizes = [1, 1, 64], strides = [1, 1, 1]} : vector<9x1x64xf32> to vector<1x1x64xf32>
    %861 = vector.shape_cast %860 : vector<1x1x64xf32> to vector<1x64xf32>
    %862 = vector.broadcast %861 : vector<1x64xf32> to vector<16x64xf32>
    %863 = arith.mulf %859, %862 : vector<16x64xf32>
    %864 = vector.extract_strided_slice %804 {offsets = [16, 0], sizes = [16, 64], strides = [1, 1]} : vector<144x64xf32> to vector<16x64xf32>
    %865 = vector.extract_strided_slice %33 {offsets = [1, 0, 0], sizes = [1, 1, 64], strides = [1, 1, 1]} : vector<9x1x64xf32> to vector<1x1x64xf32>
    %866 = vector.shape_cast %865 : vector<1x1x64xf32> to vector<1x64xf32>
    %867 = vector.broadcast %866 : vector<1x64xf32> to vector<16x64xf32>
    %868 = arith.mulf %864, %867 : vector<16x64xf32>
    %869 = arith.addf %863, %868 : vector<16x64xf32>
    %870 = vector.extract_strided_slice %804 {offsets = [32, 0], sizes = [16, 64], strides = [1, 1]} : vector<144x64xf32> to vector<16x64xf32>
    %871 = vector.extract_strided_slice %33 {offsets = [2, 0, 0], sizes = [1, 1, 64], strides = [1, 1, 1]} : vector<9x1x64xf32> to vector<1x1x64xf32>
    %872 = vector.shape_cast %871 : vector<1x1x64xf32> to vector<1x64xf32>
    %873 = vector.broadcast %872 : vector<1x64xf32> to vector<16x64xf32>
    %874 = arith.mulf %870, %873 : vector<16x64xf32>
    %875 = arith.addf %869, %874 : vector<16x64xf32>
    %876 = vector.extract_strided_slice %804 {offsets = [48, 0], sizes = [16, 64], strides = [1, 1]} : vector<144x64xf32> to vector<16x64xf32>
    %877 = vector.extract_strided_slice %33 {offsets = [3, 0, 0], sizes = [1, 1, 64], strides = [1, 1, 1]} : vector<9x1x64xf32> to vector<1x1x64xf32>
    %878 = vector.shape_cast %877 : vector<1x1x64xf32> to vector<1x64xf32>
    %879 = vector.broadcast %878 : vector<1x64xf32> to vector<16x64xf32>
    %880 = arith.mulf %876, %879 : vector<16x64xf32>
    %881 = arith.addf %875, %880 : vector<16x64xf32>
    %882 = vector.extract_strided_slice %804 {offsets = [64, 0], sizes = [16, 64], strides = [1, 1]} : vector<144x64xf32> to vector<16x64xf32>
    %883 = vector.extract_strided_slice %33 {offsets = [4, 0, 0], sizes = [1, 1, 64], strides = [1, 1, 1]} : vector<9x1x64xf32> to vector<1x1x64xf32>
    %884 = vector.shape_cast %883 : vector<1x1x64xf32> to vector<1x64xf32>
    %885 = vector.broadcast %884 : vector<1x64xf32> to vector<16x64xf32>
    %886 = arith.mulf %882, %885 : vector<16x64xf32>
    %887 = arith.addf %881, %886 : vector<16x64xf32>
    %888 = vector.extract_strided_slice %804 {offsets = [80, 0], sizes = [16, 64], strides = [1, 1]} : vector<144x64xf32> to vector<16x64xf32>
    %889 = vector.extract_strided_slice %33 {offsets = [5, 0, 0], sizes = [1, 1, 64], strides = [1, 1, 1]} : vector<9x1x64xf32> to vector<1x1x64xf32>
    %890 = vector.shape_cast %889 : vector<1x1x64xf32> to vector<1x64xf32>
    %891 = vector.broadcast %890 : vector<1x64xf32> to vector<16x64xf32>
    %892 = arith.mulf %888, %891 : vector<16x64xf32>
    %893 = arith.addf %887, %892 : vector<16x64xf32>
    %894 = vector.extract_strided_slice %804 {offsets = [96, 0], sizes = [16, 64], strides = [1, 1]} : vector<144x64xf32> to vector<16x64xf32>
    %895 = vector.extract_strided_slice %33 {offsets = [6, 0, 0], sizes = [1, 1, 64], strides = [1, 1, 1]} : vector<9x1x64xf32> to vector<1x1x64xf32>
    %896 = vector.shape_cast %895 : vector<1x1x64xf32> to vector<1x64xf32>
    %897 = vector.broadcast %896 : vector<1x64xf32> to vector<16x64xf32>
    %898 = arith.mulf %894, %897 : vector<16x64xf32>
    %899 = arith.addf %893, %898 : vector<16x64xf32>
    %900 = vector.extract_strided_slice %804 {offsets = [112, 0], sizes = [16, 64], strides = [1, 1]} : vector<144x64xf32> to vector<16x64xf32>
    %901 = vector.extract_strided_slice %33 {offsets = [7, 0, 0], sizes = [1, 1, 64], strides = [1, 1, 1]} : vector<9x1x64xf32> to vector<1x1x64xf32>
    %902 = vector.shape_cast %901 : vector<1x1x64xf32> to vector<1x64xf32>
    %903 = vector.broadcast %902 : vector<1x64xf32> to vector<16x64xf32>
    %904 = arith.mulf %900, %903 : vector<16x64xf32>
    %905 = arith.addf %899, %904 : vector<16x64xf32>
    %906 = vector.extract_strided_slice %804 {offsets = [128, 0], sizes = [16, 64], strides = [1, 1]} : vector<144x64xf32> to vector<16x64xf32>
    %907 = vector.extract_strided_slice %33 {offsets = [8, 0, 0], sizes = [1, 1, 64], strides = [1, 1, 1]} : vector<9x1x64xf32> to vector<1x1x64xf32>
    %908 = vector.shape_cast %907 : vector<1x1x64xf32> to vector<1x64xf32>
    %909 = vector.broadcast %908 : vector<1x64xf32> to vector<16x64xf32>
    %910 = arith.mulf %906, %909 : vector<16x64xf32>
    %911 = arith.addf %905, %910 : vector<16x64xf32>
    %912 = vector.extract_strided_slice %805 {offsets = [0, 0], sizes = [16, 32], strides = [1, 1]} : vector<144x32xf32> to vector<16x32xf32>
    %913 = vector.extract_strided_slice %34 {offsets = [0, 0, 0], sizes = [1, 16, 1], strides = [1, 1, 1]} : vector<9x16x1xf32> to vector<1x16x1xf32>
    %914 = vector.shape_cast %913 : vector<1x16x1xf32> to vector<16x1xf32>
    %915 = vector.broadcast %914 : vector<16x1xf32> to vector<16x32xf32>
    %916 = arith.addf %912, %915 : vector<16x32xf32>
    %917 = vector.extract_strided_slice %805 {offsets = [16, 0], sizes = [16, 32], strides = [1, 1]} : vector<144x32xf32> to vector<16x32xf32>
    %918 = vector.extract_strided_slice %34 {offsets = [1, 0, 0], sizes = [1, 16, 1], strides = [1, 1, 1]} : vector<9x16x1xf32> to vector<1x16x1xf32>
    %919 = vector.shape_cast %918 : vector<1x16x1xf32> to vector<16x1xf32>
    %920 = vector.broadcast %919 : vector<16x1xf32> to vector<16x32xf32>
    %921 = arith.addf %917, %920 : vector<16x32xf32>
    %922 = arith.maximumf %916, %921 : vector<16x32xf32>
    %923 = vector.extract_strided_slice %805 {offsets = [32, 0], sizes = [16, 32], strides = [1, 1]} : vector<144x32xf32> to vector<16x32xf32>
    %924 = vector.extract_strided_slice %34 {offsets = [2, 0, 0], sizes = [1, 16, 1], strides = [1, 1, 1]} : vector<9x16x1xf32> to vector<1x16x1xf32>
    %925 = vector.shape_cast %924 : vector<1x16x1xf32> to vector<16x1xf32>
    %926 = vector.broadcast %925 : vector<16x1xf32> to vector<16x32xf32>
    %927 = arith.addf %923, %926 : vector<16x32xf32>
    %928 = arith.maximumf %922, %927 : vector<16x32xf32>
    %929 = vector.extract_strided_slice %805 {offsets = [48, 0], sizes = [16, 32], strides = [1, 1]} : vector<144x32xf32> to vector<16x32xf32>
    %930 = vector.extract_strided_slice %34 {offsets = [3, 0, 0], sizes = [1, 16, 1], strides = [1, 1, 1]} : vector<9x16x1xf32> to vector<1x16x1xf32>
    %931 = vector.shape_cast %930 : vector<1x16x1xf32> to vector<16x1xf32>
    %932 = vector.broadcast %931 : vector<16x1xf32> to vector<16x32xf32>
    %933 = arith.addf %929, %932 : vector<16x32xf32>
    %934 = arith.maximumf %928, %933 : vector<16x32xf32>
    %935 = vector.extract_strided_slice %805 {offsets = [64, 0], sizes = [16, 32], strides = [1, 1]} : vector<144x32xf32> to vector<16x32xf32>
    %936 = vector.extract_strided_slice %34 {offsets = [4, 0, 0], sizes = [1, 16, 1], strides = [1, 1, 1]} : vector<9x16x1xf32> to vector<1x16x1xf32>
    %937 = vector.shape_cast %936 : vector<1x16x1xf32> to vector<16x1xf32>
    %938 = vector.broadcast %937 : vector<16x1xf32> to vector<16x32xf32>
    %939 = arith.addf %935, %938 : vector<16x32xf32>
    %940 = arith.maximumf %934, %939 : vector<16x32xf32>
    %941 = vector.extract_strided_slice %805 {offsets = [80, 0], sizes = [16, 32], strides = [1, 1]} : vector<144x32xf32> to vector<16x32xf32>
    %942 = vector.extract_strided_slice %34 {offsets = [5, 0, 0], sizes = [1, 16, 1], strides = [1, 1, 1]} : vector<9x16x1xf32> to vector<1x16x1xf32>
    %943 = vector.shape_cast %942 : vector<1x16x1xf32> to vector<16x1xf32>
    %944 = vector.broadcast %943 : vector<16x1xf32> to vector<16x32xf32>
    %945 = arith.addf %941, %944 : vector<16x32xf32>
    %946 = arith.maximumf %940, %945 : vector<16x32xf32>
    %947 = vector.extract_strided_slice %805 {offsets = [96, 0], sizes = [16, 32], strides = [1, 1]} : vector<144x32xf32> to vector<16x32xf32>
    %948 = vector.extract_strided_slice %34 {offsets = [6, 0, 0], sizes = [1, 16, 1], strides = [1, 1, 1]} : vector<9x16x1xf32> to vector<1x16x1xf32>
    %949 = vector.shape_cast %948 : vector<1x16x1xf32> to vector<16x1xf32>
    %950 = vector.broadcast %949 : vector<16x1xf32> to vector<16x32xf32>
    %951 = arith.addf %947, %950 : vector<16x32xf32>
    %952 = arith.maximumf %946, %951 : vector<16x32xf32>
    %953 = vector.extract_strided_slice %805 {offsets = [112, 0], sizes = [16, 32], strides = [1, 1]} : vector<144x32xf32> to vector<16x32xf32>
    %954 = vector.extract_strided_slice %34 {offsets = [7, 0, 0], sizes = [1, 16, 1], strides = [1, 1, 1]} : vector<9x16x1xf32> to vector<1x16x1xf32>
    %955 = vector.shape_cast %954 : vector<1x16x1xf32> to vector<16x1xf32>
    %956 = vector.broadcast %955 : vector<16x1xf32> to vector<16x32xf32>
    %957 = arith.addf %953, %956 : vector<16x32xf32>
    %958 = arith.maximumf %952, %957 : vector<16x32xf32>
    %959 = vector.extract_strided_slice %805 {offsets = [128, 0], sizes = [16, 32], strides = [1, 1]} : vector<144x32xf32> to vector<16x32xf32>
    %960 = vector.extract_strided_slice %34 {offsets = [8, 0, 0], sizes = [1, 16, 1], strides = [1, 1, 1]} : vector<9x16x1xf32> to vector<1x16x1xf32>
    %961 = vector.shape_cast %960 : vector<1x16x1xf32> to vector<16x1xf32>
    %962 = vector.broadcast %961 : vector<16x1xf32> to vector<16x32xf32>
    %963 = arith.addf %959, %962 : vector<16x32xf32>
    %964 = arith.maximumf %958, %963 : vector<16x32xf32>
    %c48 = arith.constant 48 : index
    %c0_166 = arith.constant 0 : index
    %965 = vector.load %arg33[%c48, %c0_166] : memref<64x32xf32, #tpu.memory_space<vmem>>, vector<16x32xf32>
    tpu.vector_store %arg33[%c48, %c0_166], %964 {strides = array<i32>} : memref<64x32xf32, #tpu.memory_space<vmem>>, vector<16x32xf32>,
    %c0_167 = arith.constant 0 : index
    %c0_168 = arith.constant 0 : index
    %966 = vector.load %arg14[%c0_167, %c0_168] : memref<1x32xf32, #tpu.memory_space<vmem>>, vector<1x32xf32>
    %c0_169 = arith.constant 0 : index
    %c0_170 = arith.constant 0 : index
    %967 = vector.load %arg15[%c0_169, %c0_170] : memref<1x32xf32, #tpu.memory_space<vmem>>, vector<1x32xf32>
    %cst_171 = arith.constant dense<0.000000e+00> : vector<16x32xf32>
    %968 = tpu.matmul %858, %35, %cst_171 {dimension_numbers = #tpu.dot_dimension_numbers<[1], [0], [0], [1], [0, 0, 1, 1], [], []>} : vector<16x32xf32>, vector<32x32xf32>, vector<16x32xf32> -> vector<16x32xf32>
    %969 = arith.mulf %968, %968 : vector<16x32xf32>
    %cst_172 = arith.constant dense<0.000000e+00> : vector<16x32xf32>
    %970 = tpu.matmul %969, %36, %cst_172 {dimension_numbers = #tpu.dot_dimension_numbers<[1], [0], [0], [1], [0, 0, 1, 1], [], []>} : vector<16x32xf32>, vector<32x32xf32>, vector<16x32xf32> -> vector<16x32xf32>
    %cst_173 = arith.constant 9.99999974E-6 : f32
    %971 = vector.broadcast %cst_173 : f32 to vector<16x32xf32>
    %972 = arith.addf %970, %971 : vector<16x32xf32>
    %973 = math.rsqrt %972 : vector<16x32xf32>
    %974 = arith.mulf %968, %973 : vector<16x32xf32>
    %975 = vector.broadcast %966 : vector<1x32xf32> to vector<16x32xf32>
    %976 = arith.mulf %974, %975 : vector<16x32xf32>
    %977 = vector.broadcast %967 : vector<1x32xf32> to vector<16x32xf32>
    %978 = arith.addf %976, %977 : vector<16x32xf32>
    %979 = vector.extract_strided_slice %911 {offsets = [0, 0], sizes = [16, 32], strides = [1, 1]} : vector<16x64xf32> to vector<16x32xf32>
    %c0_174 = arith.constant 0 : index
    %c0_175 = arith.constant 0 : index
    %980 = vector.load %arg16[%c0_174, %c0_175] : memref<1x32xf32, #tpu.memory_space<vmem>>, vector<1x32xf32>
    %c0_176 = arith.constant 0 : index
    %c0_177 = arith.constant 0 : index
    %981 = vector.load %arg17[%c0_176, %c0_177] : memref<1x32xf32, #tpu.memory_space<vmem>>, vector<1x32xf32>
    %cst_178 = arith.constant dense<0.000000e+00> : vector<16x32xf32>
    %982 = tpu.matmul %979, %35, %cst_178 {dimension_numbers = #tpu.dot_dimension_numbers<[1], [0], [0], [1], [0, 0, 1, 1], [], []>} : vector<16x32xf32>, vector<32x32xf32>, vector<16x32xf32> -> vector<16x32xf32>
    %983 = arith.mulf %982, %982 : vector<16x32xf32>
    %cst_179 = arith.constant dense<0.000000e+00> : vector<16x32xf32>
    %984 = tpu.matmul %983, %36, %cst_179 {dimension_numbers = #tpu.dot_dimension_numbers<[1], [0], [0], [1], [0, 0, 1, 1], [], []>} : vector<16x32xf32>, vector<32x32xf32>, vector<16x32xf32> -> vector<16x32xf32>
    %cst_180 = arith.constant 9.99999974E-6 : f32
    %985 = vector.broadcast %cst_180 : f32 to vector<16x32xf32>
    %986 = arith.addf %984, %985 : vector<16x32xf32>
    %987 = math.rsqrt %986 : vector<16x32xf32>
    %988 = arith.mulf %982, %987 : vector<16x32xf32>
    %989 = vector.broadcast %980 : vector<1x32xf32> to vector<16x32xf32>
    %990 = arith.mulf %988, %989 : vector<16x32xf32>
    %991 = vector.broadcast %981 : vector<1x32xf32> to vector<16x32xf32>
    %992 = arith.addf %990, %991 : vector<16x32xf32>
    %993 = vector.extract_strided_slice %911 {offsets = [0, 32], sizes = [16, 32], strides = [1, 1]} : vector<16x64xf32> to vector<16x32xf32>
    %c0_181 = arith.constant 0 : index
    %c0_182 = arith.constant 0 : index
    %994 = vector.load %arg18[%c0_181, %c0_182] : memref<1x32xf32, #tpu.memory_space<vmem>>, vector<1x32xf32>
    %c0_183 = arith.constant 0 : index
    %c0_184 = arith.constant 0 : index
    %995 = vector.load %arg19[%c0_183, %c0_184] : memref<1x32xf32, #tpu.memory_space<vmem>>, vector<1x32xf32>
    %cst_185 = arith.constant dense<0.000000e+00> : vector<16x32xf32>
    %996 = tpu.matmul %993, %35, %cst_185 {dimension_numbers = #tpu.dot_dimension_numbers<[1], [0], [0], [1], [0, 0, 1, 1], [], []>} : vector<16x32xf32>, vector<32x32xf32>, vector<16x32xf32> -> vector<16x32xf32>
    %997 = arith.mulf %996, %996 : vector<16x32xf32>
    %cst_186 = arith.constant dense<0.000000e+00> : vector<16x32xf32>
    %998 = tpu.matmul %997, %36, %cst_186 {dimension_numbers = #tpu.dot_dimension_numbers<[1], [0], [0], [1], [0, 0, 1, 1], [], []>} : vector<16x32xf32>, vector<32x32xf32>, vector<16x32xf32> -> vector<16x32xf32>
    %cst_187 = arith.constant 9.99999974E-6 : f32
    %999 = vector.broadcast %cst_187 : f32 to vector<16x32xf32>
    %1000 = arith.addf %998, %999 : vector<16x32xf32>
    %1001 = math.rsqrt %1000 : vector<16x32xf32>
    %1002 = arith.mulf %996, %1001 : vector<16x32xf32>
    %1003 = vector.broadcast %994 : vector<1x32xf32> to vector<16x32xf32>
    %1004 = arith.mulf %1002, %1003 : vector<16x32xf32>
    %1005 = vector.broadcast %995 : vector<1x32xf32> to vector<16x32xf32>
    %1006 = arith.addf %1004, %1005 : vector<16x32xf32>
    %cst_188 = arith.constant dense<0.000000e+00> : vector<16x256xf32>
    %1007 = tpu.matmul %978, %37, %cst_188 {dimension_numbers = #tpu.dot_dimension_numbers<[1], [0], [0], [1], [0, 0, 1, 1], [], []>} : vector<16x32xf32>, vector<32x256xf32>, vector<16x256xf32> -> vector<16x256xf32>
    %1008 = arith.mulf %1007, %38 : vector<16x256xf32>
    %cst_189 = arith.constant dense<0.000000e+00> : vector<16x32xf32>
    %1009 = tpu.matmul %1008, %39, %cst_189 {dimension_numbers = #tpu.dot_dimension_numbers<[1], [0], [0], [1], [0, 0, 1, 1], [], []>} : vector<16x256xf32>, vector<256x32xf32>, vector<16x32xf32> -> vector<16x32xf32>
    %1010 = vector.extract_strided_slice %978 {offsets = [0, 0], sizes = [16, 16], strides = [1, 1]} : vector<16x32xf32> to vector<16x16xf32>
    %1011 = vector.extract_strided_slice %992 {offsets = [0, 0], sizes = [16, 16], strides = [1, 1]} : vector<16x32xf32> to vector<16x16xf32>
    %1012 = vector.extract_strided_slice %1006 {offsets = [0, 0], sizes = [16, 16], strides = [1, 1]} : vector<16x32xf32> to vector<16x16xf32>
    %cst_190 = arith.constant 2.500000e-01 : f32
    %1013 = vector.broadcast %cst_190 : f32 to vector<16x16xf32>
    %1014 = arith.mulf %1010, %1013 : vector<16x16xf32>
    %cst_191 = arith.constant dense<0.000000e+00> : vector<16x16xf32>
    %1015 = tpu.matmul %1014, %1011, %cst_191 {dimension_numbers = #tpu.dot_dimension_numbers<[1], [1], [0], [0], [0, 0, 1, 0], [], []>} : vector<16x16xf32>, vector<16x16xf32>, vector<16x16xf32> -> vector<16x16xf32>
    %1016 = vector.extract_strided_slice %1009 {offsets = [0, 0], sizes = [16, 16], strides = [1, 1]} : vector<16x32xf32> to vector<16x16xf32>
    %1017 = arith.addf %1015, %1016 : vector<16x16xf32>
    %cst_192 = arith.constant dense<0xFF800000> : vector<16xf32>
    %1018 = vector.multi_reduction <maximumf>, %1017, %cst_192 [1] : vector<16x16xf32> to vector<16xf32>
    %1019 = vector.shape_cast %1018 : vector<16xf32> to vector<16x1xf32>
    %1020 = vector.broadcast %1019 : vector<16x1xf32> to vector<16x16xf32>
    %1021 = arith.subf %1017, %1020 : vector<16x16xf32>
    %1022 = math.exp %1021 : vector<16x16xf32>
    %cst_193 = arith.constant dense<0.000000e+00> : vector<16xf32>
    %1023 = vector.multi_reduction <add>, %1022, %cst_193 [1] : vector<16x16xf32> to vector<16xf32>
    %1024 = vector.shape_cast %1023 : vector<16xf32> to vector<16x1xf32>
    %1025 = tpu.reciprocal %1024 {approx = true} : vector<16x1xf32> -> vector<16x1xf32>
    %1026 = vector.broadcast %1025 : vector<16x1xf32> to vector<16x16xf32>
    %1027 = arith.mulf %1022, %1026 : vector<16x16xf32>
    %cst_194 = arith.constant dense<0.000000e+00> : vector<16x16xf32>
    %1028 = tpu.matmul %1027, %1012, %cst_194 {dimension_numbers = #tpu.dot_dimension_numbers<[1], [0], [0], [1], [0, 0, 1, 1], [], []>} : vector<16x16xf32>, vector<16x16xf32>, vector<16x16xf32> -> vector<16x16xf32>
    %1029 = arith.addf %1028, %1010 : vector<16x16xf32>
    %c48_195 = arith.constant 48 : index
    %c0_196 = arith.constant 0 : index
    %1030 = vector.load %arg32[%c48_195, %c0_196] : memref<64x32xf32, #tpu.memory_space<vmem>>, vector<16x16xf32>
    tpu.vector_store %arg32[%c48_195, %c0_196], %1029 {strides = array<i32>} : memref<64x32xf32, #tpu.memory_space<vmem>>, vector<16x16xf32>,
    %1031 = vector.extract_strided_slice %978 {offsets = [0, 16], sizes = [16, 16], strides = [1, 1]} : vector<16x32xf32> to vector<16x16xf32>
    %1032 = vector.extract_strided_slice %992 {offsets = [0, 16], sizes = [16, 16], strides = [1, 1]} : vector<16x32xf32> to vector<16x16xf32>
    %1033 = vector.extract_strided_slice %1006 {offsets = [0, 16], sizes = [16, 16], strides = [1, 1]} : vector<16x32xf32> to vector<16x16xf32>
    %cst_197 = arith.constant 2.500000e-01 : f32
    %1034 = vector.broadcast %cst_197 : f32 to vector<16x16xf32>
    %1035 = arith.mulf %1031, %1034 : vector<16x16xf32>
    %cst_198 = arith.constant dense<0.000000e+00> : vector<16x16xf32>
    %1036 = tpu.matmul %1035, %1032, %cst_198 {dimension_numbers = #tpu.dot_dimension_numbers<[1], [1], [0], [0], [0, 0, 1, 0], [], []>} : vector<16x16xf32>, vector<16x16xf32>, vector<16x16xf32> -> vector<16x16xf32>
    %1037 = vector.extract_strided_slice %1009 {offsets = [0, 16], sizes = [16, 16], strides = [1, 1]} : vector<16x32xf32> to vector<16x16xf32>
    %1038 = arith.addf %1036, %1037 : vector<16x16xf32>
    %cst_199 = arith.constant dense<0xFF800000> : vector<16xf32>
    %1039 = vector.multi_reduction <maximumf>, %1038, %cst_199 [1] : vector<16x16xf32> to vector<16xf32>
    %1040 = vector.shape_cast %1039 : vector<16xf32> to vector<16x1xf32>
    %1041 = vector.broadcast %1040 : vector<16x1xf32> to vector<16x16xf32>
    %1042 = arith.subf %1038, %1041 : vector<16x16xf32>
    %1043 = math.exp %1042 : vector<16x16xf32>
    %cst_200 = arith.constant dense<0.000000e+00> : vector<16xf32>
    %1044 = vector.multi_reduction <add>, %1043, %cst_200 [1] : vector<16x16xf32> to vector<16xf32>
    %1045 = vector.shape_cast %1044 : vector<16xf32> to vector<16x1xf32>
    %1046 = tpu.reciprocal %1045 {approx = true} : vector<16x1xf32> -> vector<16x1xf32>
    %1047 = vector.broadcast %1046 : vector<16x1xf32> to vector<16x16xf32>
    %1048 = arith.mulf %1043, %1047 : vector<16x16xf32>
    %cst_201 = arith.constant dense<0.000000e+00> : vector<16x16xf32>
    %1049 = tpu.matmul %1048, %1033, %cst_201 {dimension_numbers = #tpu.dot_dimension_numbers<[1], [0], [0], [1], [0, 0, 1, 1], [], []>} : vector<16x16xf32>, vector<16x16xf32>, vector<16x16xf32> -> vector<16x16xf32>
    %1050 = arith.addf %1049, %1031 : vector<16x16xf32>
    %c48_202 = arith.constant 48 : index
    %c16_203 = arith.constant 16 : index
    %1051 = vector.load %arg32[%c48_202, %c16_203] : memref<64x32xf32, #tpu.memory_space<vmem>>, vector<16x16xf32>
    tpu.vector_store %arg32[%c48_202, %c16_203], %1050 {strides = array<i32>} : memref<64x32xf32, #tpu.memory_space<vmem>>, vector<16x16xf32>,
    %c0_204 = arith.constant 0 : index
    %c0_205 = arith.constant 0 : index
    %1052 = vector.load %arg32[%c0_204, %c0_205] : memref<64x32xf32, #tpu.memory_space<vmem>>, vector<64x32xf32>
    %1053 = arith.truncf %1052 : vector<64x32xf32> to vector<64x32xbf16>
    %c0_206 = arith.constant 0 : index
    %c0_207 = arith.constant 0 : index
    %1054 = vector.load %arg23[%c0_206, %c0_207] : memref<32x32xbf16, #tpu.memory_space<vmem>>, vector<32x32xbf16>
    %cst_208 = arith.constant dense<0.000000e+00> : vector<64x32xf32>
    %1055 = tpu.matmul %1053, %1054, %cst_208 {dimension_numbers = #tpu.dot_dimension_numbers<[1], [0], [0], [1], [0, 0, 1, 1], [], []>} : vector<64x32xbf16>, vector<32x32xbf16>, vector<64x32xf32> -> vector<64x32xf32>
    %c0_209 = arith.constant 0 : index
    %c0_210 = arith.constant 0 : index
    %1056 = vector.load %arg24[%c0_209, %c0_210] : memref<1x32xf32, #tpu.memory_space<vmem>>, vector<1x32xf32>
    %1057 = vector.broadcast %1056 : vector<1x32xf32> to vector<64x32xf32>
    %1058 = arith.addf %1055, %1057 : vector<64x32xf32>
    %c0_211 = arith.constant 0 : index
    %c0_212 = arith.constant 0 : index
    %1059 = vector.load %arg33[%c0_211, %c0_212] : memref<64x32xf32, #tpu.memory_space<vmem>>, vector<64x32xf32>
    %1060 = arith.addf %1059, %1058 : vector<64x32xf32>
    %c0_213 = arith.constant 0 : index
    %c0_214 = arith.constant 0 : index
    %1061 = vector.load %arg25[%c0_213, %c0_214] : memref<1x32xf32, #tpu.memory_space<vmem>>, vector<1x32xf32>
    %c0_215 = arith.constant 0 : index
    %c0_216 = arith.constant 0 : index
    %1062 = vector.load %arg26[%c0_215, %c0_216] : memref<1x32xf32, #tpu.memory_space<vmem>>, vector<1x32xf32>
    %cst_217 = arith.constant dense<0.000000e+00> : vector<64xf32>
    %1063 = vector.multi_reduction <add>, %1060, %cst_217 [1] : vector<64x32xf32> to vector<64xf32>
    %1064 = vector.shape_cast %1063 : vector<64xf32> to vector<64x1xf32>
    %cst_218 = arith.constant 3.200000e+01 : f32
    %1065 = vector.broadcast %cst_218 : f32 to vector<64x1xf32>
    %1066 = arith.divf %1064, %1065 : vector<64x1xf32>
    %1067 = vector.broadcast %1066 : vector<64x1xf32> to vector<64x32xf32>
    %1068 = arith.subf %1060, %1067 : vector<64x32xf32>
    %1069 = arith.mulf %1068, %1068 : vector<64x32xf32>
    %cst_219 = arith.constant dense<0.000000e+00> : vector<64xf32>
    %1070 = vector.multi_reduction <add>, %1069, %cst_219 [1] : vector<64x32xf32> to vector<64xf32>
    %1071 = vector.shape_cast %1070 : vector<64xf32> to vector<64x1xf32>
    %cst_220 = arith.constant 3.200000e+01 : f32
    %1072 = vector.broadcast %cst_220 : f32 to vector<64x1xf32>
    %1073 = arith.divf %1071, %1072 : vector<64x1xf32>
    %cst_221 = arith.constant 9.99999974E-6 : f32
    %1074 = vector.broadcast %cst_221 : f32 to vector<64x1xf32>
    %1075 = arith.addf %1073, %1074 : vector<64x1xf32>
    %1076 = math.rsqrt %1075 : vector<64x1xf32>
    %1077 = vector.broadcast %1076 : vector<64x1xf32> to vector<64x32xf32>
    %1078 = arith.mulf %1068, %1077 : vector<64x32xf32>
    %1079 = vector.broadcast %1061 : vector<1x32xf32> to vector<64x32xf32>
    %1080 = arith.mulf %1078, %1079 : vector<64x32xf32>
    %1081 = vector.broadcast %1062 : vector<1x32xf32> to vector<64x32xf32>
    %1082 = arith.addf %1080, %1081 : vector<64x32xf32>
    %1083 = arith.truncf %1082 : vector<64x32xf32> to vector<64x32xbf16>
    %c0_222 = arith.constant 0 : index
    %c0_223 = arith.constant 0 : index
    %1084 = vector.load %arg27[%c0_222, %c0_223] : memref<32x128xbf16, #tpu.memory_space<vmem>>, vector<32x128xbf16>
    %cst_224 = arith.constant dense<0.000000e+00> : vector<64x128xf32>
    %1085 = tpu.matmul %1083, %1084, %cst_224 {dimension_numbers = #tpu.dot_dimension_numbers<[1], [0], [0], [1], [0, 0, 1, 1], [], []>} : vector<64x32xbf16>, vector<32x128xbf16>, vector<64x128xf32> -> vector<64x128xf32>
    %c0_225 = arith.constant 0 : index
    %c0_226 = arith.constant 0 : index
    %1086 = vector.load %arg28[%c0_225, %c0_226] : memref<1x128xf32, #tpu.memory_space<vmem>>, vector<1x128xf32>
    %1087 = vector.broadcast %1086 : vector<1x128xf32> to vector<64x128xf32>
    %1088 = arith.addf %1085, %1087 : vector<64x128xf32>
    %cst_227 = arith.constant 5.000000e-01 : f32
    %1089 = vector.broadcast %cst_227 : f32 to vector<64x128xf32>
    %1090 = arith.mulf %1089, %1088 : vector<64x128xf32>
    %cst_228 = arith.constant 0.707106769 : f32
    %1091 = vector.broadcast %cst_228 : f32 to vector<64x128xf32>
    %1092 = arith.mulf %1088, %1091 : vector<64x128xf32>
    %cst_229 = arith.constant -4.000000e+00 : f32
    %cst_230 = arith.constant 4.000000e+00 : f32
    %1093 = vector.broadcast %cst_229 : f32 to vector<64x128xf32>
    %1094 = arith.maximumf %1093, %1092 : vector<64x128xf32>
    %1095 = vector.broadcast %cst_230 : f32 to vector<64x128xf32>
    %1096 = arith.minimumf %1095, %1094 : vector<64x128xf32>
    %1097 = arith.mulf %1096, %1096 : vector<64x128xf32>
    %cst_231 = arith.constant 2.29050653E-4 : f32
    %1098 = vector.broadcast %cst_231 : f32 to vector<64x128xf32>
    %1099 = arith.mulf %1097, %1098 : vector<64x128xf32>
    %cst_232 = arith.constant 0.00340829091 : f32
    %1100 = vector.broadcast %cst_232 : f32 to vector<64x128xf32>
    %1101 = arith.addf %1099, %1100 : vector<64x128xf32>
    %1102 = arith.mulf %1101, %1097 : vector<64x128xf32>
    %cst_233 = arith.constant 0.0509556942 : f32
    %1103 = vector.broadcast %cst_233 : f32 to vector<64x128xf32>
    %1104 = arith.addf %1102, %1103 : vector<64x128xf32>
    %1105 = arith.mulf %1104, %1097 : vector<64x128xf32>
    %cst_234 = arith.constant 0.185208321 : f32
    %1106 = vector.broadcast %cst_234 : f32 to vector<64x128xf32>
    %1107 = arith.addf %1105, %1106 : vector<64x128xf32>
    %1108 = arith.mulf %1107, %1097 : vector<64x128xf32>
    %cst_235 = arith.constant 1.12837911 : f32
    %1109 = vector.broadcast %cst_235 : f32 to vector<64x128xf32>
    %1110 = arith.addf %1108, %1109 : vector<64x128xf32>
    %cst_236 = arith.constant -1.17916031E-7 : f32
    %1111 = vector.broadcast %cst_236 : f32 to vector<64x128xf32>
    %1112 = arith.mulf %1097, %1111 : vector<64x128xf32>
    %cst_237 = arith.constant 2.35479656E-5 : f32
    %1113 = vector.broadcast %cst_237 : f32 to vector<64x128xf32>
    %1114 = arith.addf %1112, %1113 : vector<64x128xf32>
    %1115 = arith.mulf %1114, %1097 : vector<64x128xf32>
    %cst_238 = arith.constant 0.00101796258 : f32
    %1116 = vector.broadcast %cst_238 : f32 to vector<64x128xf32>
    %1117 = arith.addf %1115, %1116 : vector<64x128xf32>
    %1118 = arith.mulf %1117, %1097 : vector<64x128xf32>
    %cst_239 = arith.constant 0.0140704699 : f32
    %1119 = vector.broadcast %cst_239 : f32 to vector<64x128xf32>
    %1120 = arith.addf %1118, %1119 : vector<64x128xf32>
    %1121 = arith.mulf %1120, %1097 : vector<64x128xf32>
    %cst_240 = arith.constant 0.110985048 : f32
    %1122 = vector.broadcast %cst_240 : f32 to vector<64x128xf32>
    %1123 = arith.addf %1121, %1122 : vector<64x128xf32>
    %1124 = arith.mulf %1123, %1097 : vector<64x128xf32>
    %cst_241 = arith.constant 0.497469246 : f32
    %1125 = vector.broadcast %cst_241 : f32 to vector<64x128xf32>
    %1126 = arith.addf %1124, %1125 : vector<64x128xf32>
    %1127 = arith.mulf %1126, %1097 : vector<64x128xf32>
    %cst_242 = arith.constant 1.000000e+00 : f32
    %1128 = vector.broadcast %cst_242 : f32 to vector<64x128xf32>
    %1129 = arith.addf %1127, %1128 : vector<64x128xf32>
    %1130 = arith.mulf %1096, %1110 : vector<64x128xf32>
    %1131 = tpu.reciprocal %1129 {approx = true} : vector<64x128xf32> -> vector<64x128xf32>
    %1132 = arith.mulf %1130, %1131 : vector<64x128xf32>
    %cst_243 = arith.constant 1.000000e+00 : f32
    %1133 = vector.broadcast %cst_243 : f32 to vector<64x128xf32>
    %1134 = arith.addf %1133, %1132 : vector<64x128xf32>
    %1135 = arith.mulf %1090, %1134 : vector<64x128xf32>
    %1136 = arith.truncf %1135 : vector<64x128xf32> to vector<64x128xbf16>
    %c0_244 = arith.constant 0 : index
    %c0_245 = arith.constant 0 : index
    %1137 = vector.load %arg29[%c0_244, %c0_245] : memref<128x32xbf16, #tpu.memory_space<vmem>>, vector<128x32xbf16>
    %cst_246 = arith.constant dense<0.000000e+00> : vector<64x32xf32>
    %1138 = tpu.matmul %1136, %1137, %cst_246 {dimension_numbers = #tpu.dot_dimension_numbers<[1], [0], [0], [1], [0, 0, 1, 1], [], []>} : vector<64x128xbf16>, vector<128x32xbf16>, vector<64x32xf32> -> vector<64x32xf32>
    %c0_247 = arith.constant 0 : index
    %c0_248 = arith.constant 0 : index
    %1139 = vector.load %arg30[%c0_247, %c0_248] : memref<1x32xf32, #tpu.memory_space<vmem>>, vector<1x32xf32>
    %1140 = vector.broadcast %1139 : vector<1x32xf32> to vector<64x32xf32>
    %1141 = arith.addf %1138, %1140 : vector<64x32xf32>
    %1142 = arith.addf %1060, %1141 : vector<64x32xf32>
    %c0_249 = arith.constant 0 : index
    %c0_250 = arith.constant 0 : index
    %1143 = vector.load %arg31[%c0_249, %c0_250] : memref<64x32xf32, #tpu.memory_space<vmem>>, vector<64x32xf32>
    tpu.vector_store %arg31[%c0_249, %c0_250], %1142 {strides = array<i32>} : memref<64x32xf32, #tpu.memory_space<vmem>>, vector<64x32xf32>,
    return
  }
  func.func @transform_0(%arg0: i32) -> (i32, i32) {
    %c0_i32 = arith.constant 0 : i32
    %c0_i32_0 = arith.constant 0 : i32
    return %arg0, %c0_i32 : i32, i32
  }
  func.func @transform_1(%arg0: i32) -> (i32, i32) {
    %c0_i32 = arith.constant 0 : i32
    %c0_i32_0 = arith.constant 0 : i32
    %c0_i32_1 = arith.constant 0 : i32
    return %c0_i32, %c0_i32_0 : i32, i32
  }
  func.func @transform_2(%arg0: i32) -> (i32, i32) {
    %c0_i32 = arith.constant 0 : i32
    %c0_i32_0 = arith.constant 0 : i32
    %c0_i32_1 = arith.constant 0 : i32
    return %c0_i32, %c0_i32_0 : i32, i32
  }
  func.func @transform_3(%arg0: i32) -> (i32, i32) {
    %c0_i32 = arith.constant 0 : i32
    %c0_i32_0 = arith.constant 0 : i32
    %c0_i32_1 = arith.constant 0 : i32
    return %c0_i32, %c0_i32_0 : i32, i32
  }
  func.func @transform_4(%arg0: i32) -> (i32, i32, i32) {
    %c0_i32 = arith.constant 0 : i32
    %c0_i32_0 = arith.constant 0 : i32
    %c0_i32_1 = arith.constant 0 : i32
    %c0_i32_2 = arith.constant 0 : i32
    return %c0_i32, %c0_i32_0, %c0_i32_1 : i32, i32, i32
  }
  func.func @transform_5(%arg0: i32) -> (i32, i32) {
    %c0_i32 = arith.constant 0 : i32
    %c0_i32_0 = arith.constant 0 : i32
    %c0_i32_1 = arith.constant 0 : i32
    return %c0_i32, %c0_i32_0 : i32, i32
  }
  func.func @transform_6(%arg0: i32) -> (i32, i32) {
    %c0_i32 = arith.constant 0 : i32
    %c0_i32_0 = arith.constant 0 : i32
    %c0_i32_1 = arith.constant 0 : i32
    return %c0_i32, %c0_i32_0 : i32, i32
  }
  func.func @transform_7(%arg0: i32) -> (i32, i32) {
    %c0_i32 = arith.constant 0 : i32
    %c0_i32_0 = arith.constant 0 : i32
    %c0_i32_1 = arith.constant 0 : i32
    return %c0_i32, %c0_i32_0 : i32, i32
  }
  func.func @transform_8(%arg0: i32) -> (i32, i32) {
    %c0_i32 = arith.constant 0 : i32
    %c0_i32_0 = arith.constant 0 : i32
    %c0_i32_1 = arith.constant 0 : i32
    return %c0_i32, %c0_i32_0 : i32, i32
  }
  func.func @transform_9(%arg0: i32) -> (i32, i32, i32) {
    %c0_i32 = arith.constant 0 : i32
    %c0_i32_0 = arith.constant 0 : i32
    %c0_i32_1 = arith.constant 0 : i32
    %c0_i32_2 = arith.constant 0 : i32
    return %c0_i32, %c0_i32_0, %c0_i32_1 : i32, i32, i32
  }
  func.func @transform_10(%arg0: i32) -> (i32, i32, i32) {
    %c0_i32 = arith.constant 0 : i32
    %c0_i32_0 = arith.constant 0 : i32
    %c0_i32_1 = arith.constant 0 : i32
    %c0_i32_2 = arith.constant 0 : i32
    return %c0_i32, %c0_i32_0, %c0_i32_1 : i32, i32, i32
  }
  func.func @transform_11(%arg0: i32) -> (i32, i32) {
    %c0_i32 = arith.constant 0 : i32
    %c0_i32_0 = arith.constant 0 : i32
    %c0_i32_1 = arith.constant 0 : i32
    return %c0_i32, %c0_i32_0 : i32, i32
  }
  func.func @transform_12(%arg0: i32) -> (i32, i32) {
    %c0_i32 = arith.constant 0 : i32
    %c0_i32_0 = arith.constant 0 : i32
    %c0_i32_1 = arith.constant 0 : i32
    return %c0_i32, %c0_i32_0 : i32, i32
  }
  func.func @transform_13(%arg0: i32) -> (i32, i32) {
    %c0_i32 = arith.constant 0 : i32
    %c0_i32_0 = arith.constant 0 : i32
    %c0_i32_1 = arith.constant 0 : i32
    return %c0_i32, %c0_i32_0 : i32, i32
  }
  func.func @transform_14(%arg0: i32) -> (i32, i32) {
    %c0_i32 = arith.constant 0 : i32
    %c0_i32_0 = arith.constant 0 : i32
    %c0_i32_1 = arith.constant 0 : i32
    return %c0_i32, %c0_i32_0 : i32, i32
  }
  func.func @transform_15(%arg0: i32) -> (i32, i32) {
    %c0_i32 = arith.constant 0 : i32
    %c0_i32_0 = arith.constant 0 : i32
    %c0_i32_1 = arith.constant 0 : i32
    return %c0_i32, %c0_i32_0 : i32, i32
  }
  func.func @transform_16(%arg0: i32) -> (i32, i32) {
    %c0_i32 = arith.constant 0 : i32
    %c0_i32_0 = arith.constant 0 : i32
    %c0_i32_1 = arith.constant 0 : i32
    return %c0_i32, %c0_i32_0 : i32, i32
  }
  func.func @transform_17(%arg0: i32) -> (i32, i32) {
    %c0_i32 = arith.constant 0 : i32
    %c0_i32_0 = arith.constant 0 : i32
    %c0_i32_1 = arith.constant 0 : i32
    return %c0_i32, %c0_i32_0 : i32, i32
  }
  func.func @transform_18(%arg0: i32) -> (i32, i32) {
    %c0_i32 = arith.constant 0 : i32
    %c0_i32_0 = arith.constant 0 : i32
    %c0_i32_1 = arith.constant 0 : i32
    return %c0_i32, %c0_i32_0 : i32, i32
  }
  func.func @transform_19(%arg0: i32) -> (i32, i32) {
    %c0_i32 = arith.constant 0 : i32
    %c0_i32_0 = arith.constant 0 : i32
    %c0_i32_1 = arith.constant 0 : i32
    return %c0_i32, %c0_i32_0 : i32, i32
  }
  func.func @transform_20(%arg0: i32) -> (i32, i32) {
    %c0_i32 = arith.constant 0 : i32
    %c0_i32_0 = arith.constant 0 : i32
    %c0_i32_1 = arith.constant 0 : i32
    return %c0_i32, %c0_i32_0 : i32, i32
  }
  func.func @transform_21(%arg0: i32) -> (i32, i32) {
    %c0_i32 = arith.constant 0 : i32
    %c0_i32_0 = arith.constant 0 : i32
    %c0_i32_1 = arith.constant 0 : i32
    return %c0_i32, %c0_i32_0 : i32, i32
  }
  func.func @transform_22(%arg0: i32) -> (i32, i32) {
    %c0_i32 = arith.constant 0 : i32
    %c0_i32_0 = arith.constant 0 : i32
    %c0_i32_1 = arith.constant 0 : i32
    return %c0_i32, %c0_i32_0 : i32, i32
  }
  func.func @transform_23(%arg0: i32) -> (i32, i32) {
    %c0_i32 = arith.constant 0 : i32
    %c0_i32_0 = arith.constant 0 : i32
    %c0_i32_1 = arith.constant 0 : i32
    return %c0_i32, %c0_i32_0 : i32, i32
  }
  func.func @transform_24(%arg0: i32) -> (i32, i32) {
    %c0_i32 = arith.constant 0 : i32
    %c0_i32_0 = arith.constant 0 : i32
    %c0_i32_1 = arith.constant 0 : i32
    return %c0_i32, %c0_i32_0 : i32, i32
  }
  func.func @transform_25(%arg0: i32) -> (i32, i32) {
    %c0_i32 = arith.constant 0 : i32
    %c0_i32_0 = arith.constant 0 : i32
    %c0_i32_1 = arith.constant 0 : i32
    return %c0_i32, %c0_i32_0 : i32, i32
  }
  func.func @transform_26(%arg0: i32) -> (i32, i32) {
    %c0_i32 = arith.constant 0 : i32
    %c0_i32_0 = arith.constant 0 : i32
    %c0_i32_1 = arith.constant 0 : i32
    return %c0_i32, %c0_i32_0 : i32, i32
  }
  func.func @transform_27(%arg0: i32) -> (i32, i32) {
    %c0_i32 = arith.constant 0 : i32
    %c0_i32_0 = arith.constant 0 : i32
    %c0_i32_1 = arith.constant 0 : i32
    return %c0_i32, %c0_i32_0 : i32, i32
  }
  func.func @transform_28(%arg0: i32) -> (i32, i32) {
    %c0_i32 = arith.constant 0 : i32
    %c0_i32_0 = arith.constant 0 : i32
    %c0_i32_1 = arith.constant 0 : i32
    return %c0_i32, %c0_i32_0 : i32, i32
  }
  func.func @transform_29(%arg0: i32) -> (i32, i32) {
    %c0_i32 = arith.constant 0 : i32
    %c0_i32_0 = arith.constant 0 : i32
    %c0_i32_1 = arith.constant 0 : i32
    return %c0_i32, %c0_i32_0 : i32, i32
  }
  func.func @transform_30(%arg0: i32) -> (i32, i32) {
    %c0_i32 = arith.constant 0 : i32
    %c0_i32_0 = arith.constant 0 : i32
    return %arg0, %c0_i32 : i32, i32
  }
}

</mosaic_0001>

<bundles_post_ra>
// kernel: multiscale_block_forward.1
= control target key start
LH: loop header
LB: loop body
LE: loop exit
PB: predicated region body
PF: predicated region fallthrough
CT: control target
= control target key end

     0   :  { %s12884_s6 = smov 1   ;;  %s12885_s10 = smov 2   ;;  %s16106_s0 = inlined_call_operand.smem [shape: u32[31], index: -1, kind: input, shape index: {}] }
   0x1   :  { %s12930_s5 = sld [smem:[%s16106_s0]]   ;;  %s12886_s14 = smov 3  }
   0x2   :  { %s12935_s9 = sld [smem:[%s16106_s0 + %s12884_s6]]   ;;  %s12887_s18 = smov 4  }
   0x3   :  { %s12940_s13 = sld [smem:[%s16106_s0 + %s12885_s10]]   ;;  %s12888_s22 = smov 5  }
   0x4   :  { %s12945_s17 = sld [smem:[%s16106_s0 + %s12886_s14]]   ;;  %s12889_s26 = smov 6  }
   0x5   :  { %s12950_s21 = sld [smem:[%s16106_s0 + %s12887_s18]]   ;;  %s12890_s30 = smov 7  }
   0x6   :  { %s12955_s25 = sld [smem:[%s16106_s0 + %s12888_s22]]   ;;  %s12891_s4 = smov 8  }
   0x7   :  { %16133 = sst [smem:[#allocation7_spill]] %s12930_s5  ;;  %s12892_s10 = smov 9  }
   0x8   :  { %s12960_s29 = sld [smem:[%s16106_s0 + %s12889_s26]]   ;;  %s12893_s15 = smov 10  }
   0x9   :  { %s12965_s3 = sld [smem:[%s16106_s0 + %s12890_s30]]   ;;  %s12894_s20 = smov 11  }
   0xa   :  { %s12970_s8 = sld [smem:[%s16106_s0 + %s12891_s4]]   ;;  %s12895_s26 = smov 12  }
   0xb   :  { %16134 = sst [smem:[#allocation8_spill]] %s12950_s21  ;;  %s12896_s1 = smov 13  }
   0xc   :  { %16135 = sst [smem:[#allocation9_spill]] %s12955_s25  ;;  %s12897_s7 = smov 14  }
   0xd   :  { %s12975_s14 = sld [smem:[%s16106_s0 + %s12892_s10]]   ;;  %s12899_s22 = smov 16  }
   0xe   :  { %16136 = sst [smem:[#allocation10_spill]] %s12960_s29  ;;  %s12900_s28 = smov 17  }
   0xf   :  { %16137 = sst [smem:[#allocation11_spill]] %s12965_s3 }
  0x10   :  { %16138 = sst [smem:[#allocation12_spill]] %s12970_s8 }
  0x11   :  { %s12980_s19 = sld [smem:[%s16106_s0 + %s12893_s15]]   ;;  %s12898_s15 = smov 15  }
  0x12   :  { %s12985_s24 = sld [smem:[%s16106_s0 + %s12894_s20]]  }
  0x13   :  { %s12990_s30 = sld [smem:[%s16106_s0 + %s12895_s26]]  }
  0x14   :  { %s12995_s6 = sld [smem:[%s16106_s0 + %s12896_s1]]  }
  0x15   :  { %s13000_s12 = sld [smem:[%s16106_s0 + %s12897_s7]]   ;;  %s12901_s7 = smov 18  }
  0x16   :  { %s13005_s20 = sld [smem:[%s16106_s0 + %s12898_s15]]   ;;  %s12902_s15 = smov 19  }
  0x17   :  { %s13010_s27 = sld [smem:[%s16106_s0 + %s12899_s22]]   ;;  %s12903_s22 = smov 20  }
  0x18   :  { %s13015_s4 = sld [smem:[%s16106_s0 + %s12900_s28]]   ;;  %s12904_s28 = smov 21  }
  0x19   :  { %s13020_s21 = sld [smem:[%s16106_s0 + %s12901_s7]]   ;;  %s12905_s7 = smov 22  }
  0x1a   :  { %16139 = sst [smem:[#allocation13_spill]] %s12995_s6 }
  0x1b   :  { %16140 = sst [smem:[#allocation14_spill]] %s13000_s12 }
  0x1c   :  { %16141 = sst [smem:[#allocation15_spill]] %s13005_s20 }
  0x1d   :  { %16142 = sst [smem:[#allocation16_spill]] %s13010_s27 }
  0x1e   :  { %16143 = sst [smem:[#allocation17_spill]] %s13015_s4 }
  0x1f   :  { %16144 = sst [smem:[#allocation18_spill]] %s13020_s21 }
  0x20   :  { %s13025_s20 = sld [smem:[%s16106_s0 + %s12902_s15]]   ;;  %s12906_s15 = smov 23  }
  0x21   :  { %s13030_s27 = sld [smem:[%s16106_s0 + %s12903_s22]]   ;;  %s12907_s22 = smov 24  }
  0x22   :  { %s13035_s4 = sld [smem:[%s16106_s0 + %s12904_s28]]   ;;  %s12908_s28 = smov 25  }
  0x23   :  { %s13040_s21 = sld [smem:[%s16106_s0 + %s12905_s7]]   ;;  %s12909_s7 = smov 26  }
  0x24   :  { %s13045_s12 = sld [smem:[%s16106_s0 + %s12906_s15]]   ;;  %s12910_s15 = smov 27  }
  0x25   :  { %s13055_s6 = sld [smem:[%s16106_s0 + %s12908_s28]]   ;;  %s12912_s28 = smov 29  }
  0x27   :  { %16145 = sst [smem:[#allocation19_spill]] %s13030_s27 }
  0x28   :  { %16146 = sst [smem:[#allocation20_spill]] %s13035_s4 }
  0x29   :  { %16147 = sst [smem:[#allocation21_spill]] %s13040_s21 }
  0x2a   :  { %16148 = sst [smem:[#allocation22_spill]] %s13045_s12 }
  0x2b   :  { %s13050_s27 = sld [smem:[%s16106_s0 + %s12907_s22]]   ;;  %s12911_s22 = smov 28  }
  0x2c   :  { %16150 = sst [smem:[#allocation24_spill]] %s13055_s6 }
  0x2d   :  { %s13060_s21 = sld [smem:[%s16106_s0 + %s12909_s7]]   ;;  %s12913_s7 = smov 30  }
  0x2e   :  { %s13065_s12 = sld [smem:[%s16106_s0 + %s12910_s15]]  }
  0x2f   :  { %s13075_s6 = sld [smem:[%s16106_s0 + %s12912_s28]]  }
  0x31   :  { %16149 = sst [smem:[#allocation23_spill]] %s13050_s27 }
  0x32   :  { %s13070_s27 = sld [smem:[%s16106_s0 + %s12911_s22]]  }
  0x33   :  { %16151 = sst [smem:[#allocation25_spill]] %s13060_s21 }
  0x34   :  { %s13080_s21 = sld [smem:[%s16106_s0 + %s12913_s7]]  }
  0x35   :  { %16152 = sst [smem:[#allocation26_spill]] %s13075_s6 }
  0x36   :  { %66 = vsyncpa [#allocation5], 0 }
  0x37   :  { %68 = vsyncpa [#allocation5 + $0x1], 0  ;;  %s13082_s15 = smov 0   ;;  %s13084_s16 = smov 0  }
  0x38   :  { %s13086_s18 = smov 0   ;;  %s13088_s22 = smov 0  }
  0x39 LB: > { %s16153_s8 = sld [smem:[#allocation12_spill]]  ;;  %s13103_s0 = sadd.s32 4294967295, %s12882_s22   ;;  %s12870_s15 = sphi %s13082_s15, %s16301_s15   ;;  %s12882_s22 = sphi %s13088_s22, %s16303_s22   ;;  %s12878_s18 = sphi %s13086_s18, %s16300_s18   ;;  %s12874_s16 = sphi %s13084_s16, %s16302_s16  }
  0x3a   : > { %s16154_s4 = sld [smem:[#allocation20_spill]]  ;;  %s10054_s23 = sadd.s32 4294967294, %s12882_s22  }
  0x3b   : > { %s16155_s29 = sld [smem:[#allocation10_spill]]  ;;  %s13107_s26 = sadd.s32 1, %s12882_s22  }
  0x3c   : > { %s16156_s25 = sld [smem:[#allocation9_spill]]  ;;  %s716_s28 = sadd.s32 1, %s12878_s18 }
  0x3d   : > { %s16157_s3 = sld [smem:[#allocation11_spill]]  ;;  %s713_s1 = ssub.s32 %s12882_s22, %s13107_s26 }
  0x3e   : > { %16158 = sst [smem:[#allocation27_spill]] %s12878_s18  ;;  %p726_p0 = scmp.ne.s32.totalorder %s12878_s18, %s12874_s16 }
  0x3f   : > { %p714_p1 = scmp.eq.s32.totalorder %s713_s1, 0  ;;  %p727_p2 = scmp.eq.s32.totalorder %s13103_s0, 1 }
  0x40   : > { %p732_p3 = scmp.ne.s32.totalorder %s12874_s16, %s12870_s15  ;;  %p733_p4 = scmp.eq.s32.totalorder %s10054_s23, 1 }
  0x41   : > { %s13118_s2 = scalar_select %p714_p1, %s12878_s18, %s716_s28  }
  0x42   : > { %p13120_p5 = por %p727_p2, %p726_p0  ;;  %p13124_p6 = por %p733_p4, %p732_p3 }
  0x43   : > { %16159 = sst [smem:[#allocation28_spill]] %s13118_s2  ;;  %p10057_p7 = scmp.ge.s32.totalorder %s12882_s22, 1 }
  0x44   : > { %p847_p8 = scmp.lt.s32.totalorder %s12882_s22, 3 }
  0x46   : > { %p848_p9 = pnand %p10057_p7, %p847_p8 }
  0x48   : > { %851 = sbr.rel (%p848_p9) target bundleno = 9774 (0x262e), region = 140 }
  0x4d   : > { %s16162_s5 = sld [smem:[#allocation7_spill]]  ;;  %s10059_s11 = sshll.u32 %s13103_s0, 5  ;;  %vm967_vm0 = vcmask 261120   ;;  %v12251_v56 = vld [vmem:[%s16157_s3 + $0x8] sm:$0xff]   ;;  %v12252_v57 = vld [vmem:[%s16157_s3] sm:$0xff]   ;;  %vm1851_vm1 = vcmask 523264  }
  0x4e   : > { %p926_p10 = scmp.lt.s32.totalorder %s10059_s11, 63  ;;  %11197 = vmatprep.subr.bf16.mxu0 %v12251_v56  ;;  %s16119_s1 = smov 96   ;;  %vm3537_vm2 = vcmask 130048   ;;  %vm3954_vm3 = vcmask 261248  }
  0x4f   : > { %11198 = vmatpush3.bf16.msra.mxu0 %v12251_v56  ;;  %s16196_s3 = sld [smem:[#allocation15_spill]]  ;;  %s12916_s2 = smov 112  }
  0x50   : > { %s16305_s11 = smov (!%p926_p10, %s10059_s11), 63  ;;  %11199 = vmatprep.subr.bf16.mxu0 %v12252_v57  ;;  %s16200_s18 = smov 96  }
  0x51   : > { %s10060_s23 = sshll.u32 %s16305_s11, 3  ;;  %s16163_s11 = sld [smem:[#allocation13_spill]] }
  0x52   : > { %s16297_s6 = sld [smem:[#allocation26_spill]] }
  0x53   : > { %s13132_s28 = scalar_lea.vmem %s16162_s5, %s10060_s23  ;;  %11200 = vmatpush3.bf16.msra.mxu0 %v12252_v57  ;;  %s16164_s23 = sld [smem:[#allocation14_spill]] }
  0x54   : > { %v13135_v0 = vld [vmem:[%s13132_s28] sm:$0xff]  ;;  %v13138_v1 = vld [vmem:[%s13132_s28 + $0x10] sm:$0xff]  ;;  %v13141_v2 = vld [vmem:[%s13132_s28 + $0x8] sm:$0xff]  ;;  %s16197_s5 = sld [smem:[#allocation16_spill]] }
  0x55   : > { %v968_v3 = vsel %vm967_vm0, %v13135_v0, 0.0  ;;  %v974_v4 = vsel %vm967_vm0, %v13138_v1, 0.0  ;;  %v13148_v5 = vld [vmem:[%s13132_s28 + $0x18] sm:$0xff]  ;;  %v971_v6 = vsel %vm967_vm0, %v13141_v2, 0.0  ;;  %v13153_v7 = vld [vmem:[%s13132_s28 + $0x20] sm:$0xff]  ;;  %v13158_v9 = vld [vmem:[%s13132_s28 + $0x28] sm:$0xff] }
  0x56   : > { %969 = vadd.xlane.f32.xlu0 %v968_v3  ;;  %975 = vadd.xlane.f32.xlu1 %v974_v4  ;;  %v977_v8 = vsel %vm967_vm0, %v13148_v5, 0.0  ;;  %v980_v10 = vsel %vm967_vm0, %v13153_v7, 0.0  ;;  %v983_v11 = vsel %vm967_vm0, %v13158_v9, 0.0  ;;  %v13165_v12 = vld [vmem:[%s13132_s28 + $0x30] sm:$0xff]  ;;  %v13168_v13 = vld [vmem:[%s13132_s28 + $0x38] sm:$0xff] }
  0x57   : > { %v986_v14 = vsel %vm967_vm0, %v13165_v12, 0.0  ;;  %v989_v15 = vsel %vm967_vm0, %v13168_v13, 0.0  ;;  %11319 = vmatprep.subr.mxu0 %v13168_v13 }
  0x5a   : > { %972 = vadd.xlane.f32.xlu0 %v971_v6  ;;  %978 = vadd.xlane.f32.xlu1 %v977_v8 }
  0x5e   : > { %981 = vadd.xlane.f32.xlu0 %v980_v10  ;;  %984 = vadd.xlane.f32.xlu1 %v983_v11 }
  0x62   : > { %987 = vadd.xlane.f32.xlu0 %v986_v14  ;;  %990 = vadd.xlane.f32.xlu1 %v989_v15 }
  0xdf   : > { %v970_v16 = vpop.xlane.xlu0 %969  ;;  %v976_v17 = vpop.xlane.xlu1 %975 }
  0xe0   : > { %v1065_v18 = vmul.f32 0.03125, %v970_v16  ;;  %v1067_v19 = vmul.f32 0.03125, %v976_v17 }
  0xe2   : > { %v13175_v20 = vsub.f32 %v13135_v0, %v1065_v18  ;;  %v13178_v21 = vsub.f32 %v13138_v1, %v1067_v19 }
  0xe3   : > { %v973_v22 = vpop.xlane.xlu0 %972  ;;  %v979_v23 = vpop.xlane.xlu1 %978 }
  0xe4   : > { %v1066_v24 = vmul.f32 0.03125, %v973_v22  ;;  %v1068_v25 = vmul.f32 0.03125, %v979_v23  ;;  %v1129_v26 = vmul.f32 %v13175_v20, %v13175_v20  ;;  %v1131_v27 = vmul.f32 %v13178_v21, %v13178_v21 }
  0xe6   : > { %v13185_v28 = vsub.f32 %v13141_v2, %v1066_v24  ;;  %v13188_v29 = vsub.f32 %v13148_v5, %v1068_v25  ;;  %v1161_v30 = vsel %vm967_vm0, %v1129_v26, 0.0  ;;  %v1167_v33 = vsel %vm967_vm0, %v1131_v27, 0.0 }
  0xe7   : > { %1162 = vadd.xlane.f32.xlu0 %v1161_v30  ;;  %v982_v31 = vpop.xlane.xlu0 %981  ;;  %v985_v32 = vpop.xlane.xlu1 %984 }
  0xe8   : > { %v1069_v34 = vmul.f32 0.03125, %v982_v31  ;;  %v1070_v35 = vmul.f32 0.03125, %v985_v32  ;;  %v1130_v36 = vmul.f32 %v13185_v28, %v13185_v28  ;;  %v1132_v37 = vmul.f32 %v13188_v29, %v13188_v29  ;;  %v10061_v32 = vld [vmem:[%s16156_s25] ss:$0 sm:$0xff] }
  0xea   : > { %v13197_v38 = vsub.f32 %v13153_v7, %v1069_v34  ;;  %v13200_v39 = vsub.f32 %v13158_v9, %v1070_v35  ;;  %v1164_v40 = vsel %vm967_vm0, %v1130_v36, 0.0  ;;  %v1170_v43 = vsel %vm967_vm0, %v1132_v37, 0.0  ;;  %v10062_v37 = vld [vmem:[%s16155_s29] ss:$0 sm:$0xff] }
  0xeb   : > { %1168 = vadd.xlane.f32.xlu0 %v1167_v33  ;;  %1165 = vadd.xlane.f32.xlu1 %v1164_v40  ;;  %v988_v41 = vpop.xlane.xlu0 %987  ;;  %v991_v42 = vpop.xlane.xlu1 %990 }
  0xec   : > { %v1071_v44 = vmul.f32 0.03125, %v988_v41  ;;  %v1072_v45 = vmul.f32 0.03125, %v991_v42  ;;  %v1133_v46 = vmul.f32 %v13197_v38, %v13197_v38  ;;  %v1134_v47 = vmul.f32 %v13200_v39, %v13200_v39 }
  0xee   : > { %v13209_v48 = vsub.f32 %v13165_v12, %v1071_v44  ;;  %v13212_v49 = vsub.f32 %v13168_v13, %v1072_v45  ;;  %v1173_v50 = vsel %vm967_vm0, %v1133_v46, 0.0  ;;  %v1176_v51 = vsel %vm967_vm0, %v1134_v47, 0.0 }
  0xef   : > { %1171 = vadd.xlane.f32.xlu1 %v1170_v43  ;;  %1174 = vadd.xlane.f32.xlu0 %v1173_v50 }
  0xf0   : > { %v1135_v52 = vmul.f32 %v13209_v48, %v13209_v48  ;;  %v1136_v53 = vmul.f32 %v13212_v49, %v13212_v49 }
  0xf2   : > { %v1179_v54 = vsel %vm967_vm0, %v1135_v52, 0.0  ;;  %v1182_v55 = vsel %vm967_vm0, %v1136_v53, 0.0 }
  0xf3   : > { %1177 = vadd.xlane.f32.xlu1 %v1176_v51  ;;  %1180 = vadd.xlane.f32.xlu0 %v1179_v54 }
  0xf7   : > { %1183 = vadd.xlane.f32.xlu1 %v1182_v55 }
 0x170   : > { %v1163_v58 = vpop.xlane.xlu0 %1162 }
 0x171   : > { %v1257_v59 = vmul.f32 0.03125, %v1163_v58 }
 0x173   : > { %v1289_v60 = vadd.f32 1e-05, %v1257_v59 }
 0x174   : > { %v1166_v61 = vpop.xlane.xlu1 %1165  ;;  %v1169_v62 = vpop.xlane.xlu0 %1168 }
 0x175   : > { %12265 = vrsqrt.f32 %v1289_v60  ;;  %v1258_v63 = vmul.f32 0.03125, %v1166_v61  ;;  %v1259_v3 = vmul.f32 0.03125, %v1169_v62 }
 0x177   : > { %v1290_v4 = vadd.f32 1e-05, %v1258_v63  ;;  %v1291_v6 = vadd.f32 1e-05, %v1259_v3 }
 0x178   : > { %v1172_v8 = vpop.xlane.xlu1 %1171  ;;  %v1175_v10 = vpop.xlane.xlu0 %1174 }
 0x179   : > { %12267 = vrsqrt.f32 %v1290_v4  ;;  %v1260_v11 = vmul.f32 0.03125, %v1172_v8  ;;  %v1261_v14 = vmul.f32 0.03125, %v1175_v10 }
 0x17a   : > { %12269 = vrsqrt.f32 %v1291_v6 }
 0x17b   : > { %v1292_v15 = vadd.f32 1e-05, %v1260_v11  ;;  %v1293_v16 = vadd.f32 1e-05, %v1261_v14 }
 0x17c   : > { %v1178_v17 = vpop.xlane.xlu1 %1177  ;;  %v1181_v18 = vpop.xlane.xlu0 %1180 }
 0x17d   : > { %12271 = vrsqrt.f32 %v1292_v15  ;;  %v1262_v19 = vmul.f32 0.03125, %v1178_v17  ;;  %v1263_v22 = vmul.f32 0.03125, %v1181_v18  ;;  %v1710_v18 = vld [vmem:[%s12935_s9 + $0x8] sm:$0xff] }
 0x17e   : > { %12273 = vrsqrt.f32 %v1293_v16 }
 0x17f   : > { %v1294_v23 = vadd.f32 1e-05, %v1262_v19  ;;  %v1295_v24 = vadd.f32 1e-05, %v1263_v22  ;;  %v1711_v19 = vld [vmem:[%s12935_s9 + $0x10] sm:$0xff]  ;;  %v1712_v22 = vld [vmem:[%s12935_s9 + $0x18] sm:$0xff] }
 0x180   : > { %v1184_v25 = vpop.xlane.xlu1 %1183 }
 0x181   : > { %12275 = vrsqrt.f32 %v1294_v23  ;;  %v1264_v26 = vmul.f32 0.03125, %v1184_v25  ;;  %v1713_v23 = vld [vmem:[%s12935_s9 + $0x20] sm:$0xff]  ;;  %v1715_v25 = vld [vmem:[%s12935_s9 + $0x30] sm:$0xff] }
 0x182   : > { %v12266_v27 = vpop.eup %12265  ;;  %12277 = vrsqrt.f32 %v1295_v24  ;;  %v1714_v24 = vld [vmem:[%s12935_s9 + $0x28] sm:$0xff] }
 0x183   : > { %v1296_v30 = vadd.f32 1e-05, %v1264_v26  ;;  %v1353_v31 = vmul.f32 %v12266_v27, %v13175_v20  ;;  %v1716_v26 = vld [vmem:[%s12935_s9 + $0x38] sm:$0xff]  ;;  %v1717_v27 = vld [vmem:[%s12935_s9 + $0x40] sm:$0xff] }
 0x185   : > { %12279 = vrsqrt.f32 %v1296_v30  ;;  %v1391_v36 = vmul.f32 %v10061_v32, %v1353_v31  ;;  %v1718_v30 = vld [vmem:[%s12935_s9 + $0x48] sm:$0xff]  ;;  %v1719_v31 = vld [vmem:[%s12935_s9 + $0x50] sm:$0xff] }
 0x186   : > { %v12268_v33 = vpop.eup %12267 }
 0x187   : > { %v12270_v34 = vpop.eup %12269  ;;  %v1354_v35 = vmul.f32 %v12268_v33, %v13185_v28  ;;  %v1429_v44 = vadd.f32 %v10062_v37, %v1391_v36  ;;  %v13287_v33 = vld [vmem:[%s13132_s28 + $0x40] sm:$0xff]  ;;  %v1722_v36 = vld [vmem:[%s12935_s9 + $0x68] sm:$0xff] }
 0x188   : > { %v1355_v40 = vmul.f32 %v12270_v34, %v13178_v21  ;;  %v1721_v34 = vld [vmem:[%s12935_s9 + $0x60] sm:$0xff] }
 0x189   : > { %v1392_v41 = vmul.f32 %v10061_v32, %v1354_v35  ;;  %v992_v35 = vsel %vm967_vm0, %v13287_v33, 0.0 }
 0x18a   : > { %v12272_v42 = vpop.eup %12271  ;;  %v1393_v47 = vmul.f32 %v10061_v32, %v1355_v40  ;;  %v1723_v40 = vld [vmem:[%s12935_s9 + $0x70] sm:$0xff] }
 0x18b   : > { %v12274_v43 = vpop.eup %12273  ;;  %v1430_v45 = vadd.f32 %v10062_v37, %v1392_v41  ;;  %v1356_v46 = vmul.f32 %v12272_v42, %v13188_v29  ;;  %v1724_v42 = vld [vmem:[%s12935_s9 + $0x78] sm:$0xff] }
 0x18c   : > { %v1357_v20 = vmul.f32 %v12274_v43, %v13197_v38  ;;  %v1431_v28 = vadd.f32 %v10062_v37, %v1393_v47  ;;  %v13305_v43 = vld [vmem:[%s13132_s28 + $0x58] sm:$0xff]  ;;  %v1726_v47 = vld [vmem:[%s12935_s9 + $0x88] sm:$0xff] }
 0x18d   : > { %v1461_v50 = vpack.c.bf16 %v1430_v45, %v1429_v44  ;;  %v1394_v51 = vmul.f32 %v10061_v32, %v1356_v46  ;;  %v1725_v44 = vld [vmem:[%s12935_s9 + $0x80] sm:$0xff]  ;;  %v13310_v45 = vld [vmem:[%s13132_s28 + $0x48] sm:$0xff]  ;;  %v1001_v46 = vsel %vm967_vm0, %v13305_v43, 0.0 }
 0x18e   : > { %v12276_v52 = vpop.eup %12275  ;;  %v1395_v55 = vmul.f32 %v10061_v32, %v1357_v20  ;;  %v13317_v20 = vld [vmem:[%s13132_s28 + $0x60] sm:$0xff] }
 0x18f   : > { %v12278_v53 = vpop.eup %12277  ;;  %11201 = vmatprep.mubr.msk.bf16.mxu0 %vm967_vm0, %v1461_v50  ;;  %v1432_v54 = vadd.f32 %v10062_v37, %v1394_v51  ;;  %v1358_v21 = vmul.f32 %v12276_v52, %v13200_v39  ;;  %v1727_v50 = vld [vmem:[%s12940_s13] sm:$0xff]  ;;  %v995_v51 = vsel %vm967_vm0, %v13310_v45, 0.0  ;;  %v1004_v52 = vsel %vm967_vm0, %v13317_v20, 0.0 }
 0x190   : > { %v1359_v56 = vmul.f32 %v12278_v53, %v13209_v48  ;;  %v1433_v29 = vadd.f32 %v10062_v37, %v1395_v55  ;;  %v13326_v53 = vld [vmem:[%s13132_s28 + $0x68] sm:$0xff]  ;;  %v13337_v55 = vld [vmem:[%s13132_s28 + $0x78] sm:$0xff] }
 0x191   : > { %v1462_v57 = vpack.c.bf16 %v1432_v54, %v1431_v28  ;;  %v1396_v58 = vmul.f32 %v10061_v32, %v1358_v21  ;;  %v13329_v28 = vld [vmem:[%s13132_s28 + $0x70] sm:$0xff]  ;;  %v1007_v54 = vsel %vm967_vm0, %v13326_v53, 0.0 }
 0x192   : > { %v12280_v59 = vpop.eup %12279  ;;  %v1397_v61 = vmul.f32 %v10061_v32, %v1359_v56  ;;  %v1010_v21 = vsel %vm967_vm0, %v13329_v28, 0.0  ;;  %v13340_v56 = vld [vmem:[%s13132_s28 + $0x80] sm:$0xff] }
 0x193   : > { %11202 = vmatmul.mubr.msk.bf16.vlgmr.msra.gmra.mxu0 %vm967_vm0, %v1462_v57  ;;  %v1434_v38 = vadd.f32 %v10062_v37, %v1396_v58  ;;  %v1360_v60 = vmul.f32 %v12280_v59, %v13212_v49  ;;  %v10063_v49 = vld [vmem:[%s16153_s8] ss:$0 sm:$0xff]  ;;  %v1013_v57 = vsel %vm967_vm0, %v13337_v55, 0.0  ;;  %v1016_v58 = vsel %vm967_vm0, %v13340_v56, 0.0  ;;  %v13347_v59 = vld [vmem:[%s13132_s28 + $0x88] sm:$0xff] }
 0x194   : > { %11320 = vmatpush3.msra.mxu0 %v13168_v13  ;;  %v1435_v39 = vadd.f32 %v10062_v37, %v1397_v61  ;;  %v13357_v61 = vld [vmem:[%s13132_s28 + $0x98] sm:$0xff] }
 0x195   : > { %v1463_v62 = vpack.c.bf16 %v1434_v38, %v1433_v29  ;;  %v1398_v63 = vmul.f32 %v10061_v32, %v1360_v60  ;;  %11321 = vmatprep.subr.mxu0 %v13165_v12  ;;  %v1720_v32 = vld [vmem:[%s12935_s9 + $0x58] sm:$0xff]  ;;  %v13350_v29 = vld [vmem:[%s13132_s28 + $0x90] sm:$0xff]  ;;  %v1019_v38 = vsel %vm967_vm0, %v13347_v59, 0.0 }
 0x196   : > { %11322 = vmatpush3.msra.mxu0 %v13165_v12  ;;  %v1022_v60 = vsel %vm967_vm0, %v13350_v29, 0.0 }
 0x197   : > { %11205 = vmatprep.mubr.msk.bf16.mxu0 %vm967_vm0, %v1463_v62  ;;  %v1436_v48 = vadd.f32 %v10062_v37, %v1398_v63  ;;  %11323 = vmatprep.subr.mxu0 %v13158_v9  ;;  %v13296_v37 = vld [vmem:[%s13132_s28 + $0x50] sm:$0xff]  ;;  %v13360_v62 = vld [vmem:[%s13132_s28 + $0xa0] sm:$0xff]  ;;  %v1025_v63 = vsel %vm967_vm0, %v13357_v61, 0.0 }
 0x198   : > { %11324 = vmatpush3.msra.mxu0 %v13158_v9  ;;  %v998_v41 = vsel %vm967_vm0, %v13296_v37, 0.0 }
 0x199   : > { %v1464_v3 = vpack.c.bf16 %v1436_v48, %v1435_v39  ;;  %11325 = vmatprep.subr.mxu0 %v13153_v7  ;;  %v1028_v39 = vsel %vm967_vm0, %v13360_v62, 0.0  ;;  %v13367_v48 = vld [vmem:[%s13132_s28 + $0xa8] sm:$0xff] }
 0x19a   : > { %11326 = vmatpush3.msra.mxu0 %v13153_v7  ;;  %v1709_v7 = vld [vmem:[%s12935_s9] sm:$0xff] }
 0x19b   : > { %11206 = vmatmul.mubr.msk.bf16.gmra.mxu0 %vm967_vm0, %v1464_v3  ;;  %11327 = vmatprep.subr.mxu0 %v13148_v5  ;;  %v13370_v3 = vld [vmem:[%s13132_s28 + $0xb0] sm:$0xff] }
 0x19c   : > { %11328 = vmatpush3.msra.mxu0 %v13148_v5  ;;  %11249 = vmatprep.mubr.msk.f32.mxu1 %vm1851_vm1, %v1709_v7  ;;  %v1031_v7 = vsel %vm967_vm0, %v13367_v48, 0.0 }
 0x19d   : > { %11329 = vmatprep.subr.mxu0 %v13138_v1 }
 0x19e   : > { %11330 = vmatpush3.msra.mxu0 %v13138_v1 }
 0x19f   : > { %11331 = vmatprep.subr.mxu0 %v13141_v2 }
 0x1a0   : > { %11332 = vmatpush3.msra.mxu0 %v13141_v2 }
 0x1a1   : > { %11333 = vmatprep.subr.mxu0 %v13135_v0 }
 0x1a2   : > { %11334 = vmatpush3.msra.mxu0 %v13135_v0 }
 0x253   : > { %v11203_v9 = vpop.f32.mrf.mxu0 }
 0x254   : > { %v1591_v16 = vadd.f32 %v11203_v9, %v10063_v49  ;;  %v1034_v9 = vsel %vm967_vm0, %v13370_v3, 0.0 }
 0x255   : > { %v1582_v12 = vpop.f32.mrf.mxu0 }
 0x256   : > { %v1583_v17 = vadd.f32 %v10063_v49, %v1582_v12  ;;  %v13377_v12 = vld [vmem:[%s13132_s28 + $0xb8] sm:$0xff] }
 0x257   : > { %v11204_v13 = vpop.f32.mrf.mxu0 }
 0x258   : > { %v1594_v0 = vadd.f32 %v11204_v13, %v10063_v49  ;;  %v13380_v13 = vld [vmem:[%s13132_s28 + $0xc0] sm:$0xff] }
 0x259   : > { %v1585_v5 = vpop.f32.mrf.mxu0 }
 0x25a   : > { %v1586_v15 = vadd.f32 %v10063_v49, %v1585_v5  ;;  %v1037_v5 = vsel %vm967_vm0, %v13377_v12, 0.0 }
 0x25b   : > { %v11207_v4 = vpop.f32.mrf.mxu0 }
 0x25c   : > { %v1607_v6 = vadd.f32 %v11207_v4, %v10063_v49  ;;  %v13387_v4 = vld [vmem:[%s13132_s28 + $0xc8] sm:$0xff] }
 0x25d   : > { %v1598_v1 = vpop.f32.mrf.mxu0 }
 0x25e   : > { %2081 = vrot.lane.b32.xlu1 %v1607_v6, %s16119_s1  ;;  %v1599_v14 = vadd.f32 %v10063_v49, %v1598_v1  ;;  %v1043_v1 = vsel %vm967_vm0, %v13387_v4, 0.0 }
 0x25f   : > { %v11208_v2 = vpop.f32.mrf.mxu0 }
 0x260   : > { %v1610_v8 = vadd.f32 %v11208_v2, %v10063_v49 }
 0x261   : > { %v1601_v10 = vpop.f32.mrf.mxu0 }
 0x262   : > { %v1602_v11 = vadd.f32 %v10063_v49, %v1601_v10  ;;  %2083 = vrot.lane.b32.xlu0 %v1610_v8, %s16119_s1  ;;  %11233 = vmatprep.subr.mxu1 %v1610_v8  ;;  %v1040_v49 = vsel %vm967_vm0, %v13380_v13, 0.0  ;;  %v13400_v10 = vld [vmem:[%s13132_s28 + $0xe0] sm:$0xff] }
 0x263   : > { %11234 = vmatpush3.msra.mxu1 %v1610_v8  ;;  %v13397_v8 = vld [vmem:[%s13132_s28 + $0xd8] sm:$0xff] }
 0x264   : > { %11235 = vmatprep.subr.mxu1 %v1607_v6  ;;  %2079 = vrot.lane.b32.xlu1 %v1602_v11, %s16119_s1 }
 0x265   : > { %11236 = vmatpush3.msra.mxu1 %v1607_v6  ;;  %v13390_v6 = vld [vmem:[%s13132_s28 + $0xd0] sm:$0xff] }
 0x266   : > { %2075 = vrot.lane.b32.xlu0 %v1594_v0, %s16119_s1  ;;  %11237 = vmatprep.subr.mxu1 %v1602_v11  ;;  %v1046_v2 = vsel %vm967_vm0, %v13390_v6, 0.0 }
 0x267   : > { %11238 = vmatpush3.msra.mxu1 %v1602_v11  ;;  %v1049_v11 = vsel %vm967_vm0, %v13397_v8, 0.0 }
 0x268   : > { %2077 = vrot.lane.b32.xlu1 %v1599_v14, %s16119_s1  ;;  %11239 = vmatprep.subr.mxu1 %v1599_v14 }
 0x269   : > { %11240 = vmatpush3.msra.mxu1 %v1599_v14  ;;  %v13407_v14 = vld [vmem:[%s13132_s28 + $0xe8] sm:$0xff] }
 0x26a   : > { %2071 = vrot.lane.b32.xlu0 %v1586_v15, %s16119_s1  ;;  %11241 = vmatprep.subr.mxu1 %v1594_v0 }
 0x26b   : > { %11242 = vmatpush3.msra.mxu1 %v1594_v0  ;;  %v1052_v0 = vsel %vm967_vm0, %v13400_v10, 0.0 }
 0x26c   : > { %2073 = vrot.lane.b32.xlu1 %v1591_v16, %s16119_s1  ;;  %11243 = vmatprep.subr.mxu1 %v1591_v16 }
 0x26d   : > { %11244 = vmatpush3.msra.mxu1 %v1591_v16  ;;  %v1055_v16 = vsel %vm967_vm0, %v13407_v14, 0.0 }
 0x26e   : > { %11245 = vmatprep.subr.mxu1 %v1586_v15 }
 0x26f   : > { %11246 = vmatpush3.msra.mxu1 %v1586_v15  ;;  %v13410_v15 = vld [vmem:[%s13132_s28 + $0xf0] sm:$0xff] }
 0x270   : > { %2069 = vrot.lane.b32.xlu1 %v1583_v17, %s16119_s1  ;;  %11247 = vmatprep.subr.mxu1 %v1583_v17 }
 0x271   : > { %11248 = vmatpush3.msra.mxu1 %v1583_v17  ;;  %v1058_v17 = vsel %vm967_vm0, %v13410_v15, 0.0 }
 0x272   : > { %11250 = vmatmul.mubr.msk.f32.vlgmr.msra.gmra.mxu1 %vm1851_vm1, %v1710_v18  ;;  %v13417_v18 = vld [vmem:[%s13132_s28 + $0xf8] sm:$0xff] }
 0x273   : > { %11252 = vmatprep.mubr.msk.f32.mxu1 %vm1851_vm1, %v1711_v19  ;;  %v1061_v19 = vsel %vm967_vm0, %v13417_v18, 0.0 }
 0x276   : > { %11253 = vmatmul.mubr.msk.f32.gmra.mxu1 %vm1851_vm1, %v1712_v22 }
 0x277   : > { %11255 = vmatprep.mubr.msk.f32.mxu1 %vm1851_vm1, %v1713_v23 }
 0x27a   : > { %11256 = vmatmul.mubr.msk.f32.gmra.mxu1 %vm1851_vm1, %v1714_v24 }
 0x27b   : > { %11258 = vmatprep.mubr.msk.f32.mxu1 %vm1851_vm1, %v1715_v25 }
 0x27e   : > { %11259 = vmatmul.mubr.msk.f32.gmra.mxu1 %vm1851_vm1, %v1716_v26 }
 0x27f   : > { %11261 = vmatprep.mubr.msk.f32.mxu1 %vm1851_vm1, %v1717_v27 }
 0x282   : > { %11262 = vmatmul.mubr.msk.f32.gmra.mxu1 %vm1851_vm1, %v1718_v30 }
 0x283   : > { %11264 = vmatprep.mubr.msk.f32.mxu1 %vm1851_vm1, %v1719_v31 }
 0x286   : > { %11265 = vmatmul.mubr.msk.f32.gmra.mxu1 %vm1851_vm1, %v1720_v32  ;;  %v1728_v32 = vld [vmem:[%s12940_s13 + $0x8] sm:$0xff] }
 0x287   : > { %11267 = vmatprep.mubr.msk.f32.mxu1 %vm1851_vm1, %v1721_v34  ;;  %v13423_v34 = vld [vmem:[%s12985_s24 + $0x18] sm:$0xff] }
 0x289   : > { %993 = vadd.xlane.f32.xlu0 %v992_v35  ;;  %v1729_v35 = vld [vmem:[%s12940_s13 + $0x10] sm:$0xff] }
 0x28a   : > { %11268 = vmatmul.mubr.msk.f32.gmra.mxu1 %vm1851_vm1, %v1722_v36  ;;  %v1801_v36 = vld [vmem:[%s12985_s24 + $0x10] sm:$0xff] }
 0x28b   : > { %11270 = vmatprep.mubr.msk.f32.mxu1 %vm1851_vm1, %v1723_v40  ;;  %v1730_v40 = vld [vmem:[%s12940_s13 + $0x18] sm:$0xff] }
 0x28d   : > { %999 = vadd.xlane.f32.xlu0 %v998_v41  ;;  %v1800_v41 = vld [vmem:[%s12985_s24 + $0x8] sm:$0xff] }
 0x28e   : > { %11271 = vmatmul.mubr.msk.f32.gmra.mxu1 %vm1851_vm1, %v1724_v42  ;;  %v1731_v42 = vld [vmem:[%s12940_s13 + $0x20] sm:$0xff] }
 0x28f   : > { %11273 = vmatprep.mubr.msk.f32.mxu1 %vm1851_vm1, %v1725_v44  ;;  %v1799_v44 = vld [vmem:[%s12985_s24] sm:$0xff] }
 0x291   : > { %1002 = vadd.xlane.f32.xlu0 %v1001_v46  ;;  %v1732_v46 = vld [vmem:[%s12940_s13 + $0x28] sm:$0xff] }
 0x292   : > { %11274 = vmatmul.mubr.msk.f32.gmra.mxu1 %vm1851_vm1, %v1726_v47  ;;  %v1733_v47 = vld [vmem:[%s12940_s13 + $0x30] sm:$0xff] }
 0x293   : > { %11292 = vmatprep.mubr.msk.f32.mxu1 %vm1851_vm1, %v1727_v50  ;;  %v1734_v50 = vld [vmem:[%s12940_s13 + $0x38] sm:$0xff] }
 0x294   : > { %996 = vadd.xlane.f32.xlu1 %v995_v51  ;;  %v1735_v51 = vld [vmem:[%s12940_s13 + $0x40] sm:$0xff] }
 0x295   : > { %1005 = vadd.xlane.f32.xlu0 %v1004_v52  ;;  %v1736_v52 = vld [vmem:[%s12940_s13 + $0x48] sm:$0xff] }
 0x298   : > { %1008 = vadd.xlane.f32.xlu1 %v1007_v54  ;;  %v1737_v54 = vld [vmem:[%s12940_s13 + $0x50] sm:$0xff] }
 0x299   : > { %1011 = vadd.xlane.f32.xlu0 %v1010_v21  ;;  %v1738_v21 = vld [vmem:[%s12940_s13 + $0x58] sm:$0xff] }
 0x29c   : > { %1014 = vadd.xlane.f32.xlu1 %v1013_v57  ;;  %v1739_v57 = vld [vmem:[%s12940_s13 + $0x60] sm:$0xff] }
 0x29d   : > { %1017 = vadd.xlane.f32.xlu0 %v1016_v58  ;;  %v1740_v58 = vld [vmem:[%s12940_s13 + $0x68] sm:$0xff] }
 0x2a0   : > { %1020 = vadd.xlane.f32.xlu1 %v1019_v38  ;;  %v1741_v38 = vld [vmem:[%s12940_s13 + $0x70] sm:$0xff] }
 0x2a1   : > { %1023 = vadd.xlane.f32.xlu0 %v1022_v60  ;;  %v1742_v60 = vld [vmem:[%s12940_s13 + $0x78] sm:$0xff] }
 0x2a4   : > { %1026 = vadd.xlane.f32.xlu1 %v1025_v63  ;;  %v1743_v63 = vld [vmem:[%s12940_s13 + $0x80] sm:$0xff] }
 0x2a5   : > { %1029 = vadd.xlane.f32.xlu0 %v1028_v39  ;;  %v1744_v39 = vld [vmem:[%s12940_s13 + $0x88] sm:$0xff] }
 0x2a8   : > { %1032 = vadd.xlane.f32.xlu1 %v1031_v7 }
 0x2a9   : > { %1035 = vadd.xlane.f32.xlu0 %v1034_v9 }
 0x2ac   : > { %1038 = vadd.xlane.f32.xlu1 %v1037_v5 }
 0x2ad   : > { %1041 = vadd.xlane.f32.xlu0 %v1040_v49 }
 0x2b0   : > { %1044 = vadd.xlane.f32.xlu1 %v1043_v1 }
 0x2b1   : > { %1047 = vadd.xlane.f32.xlu0 %v1046_v2 }
 0x2b4   : > { %1050 = vadd.xlane.f32.xlu1 %v1049_v11 }
 0x2b5   : > { %1053 = vadd.xlane.f32.xlu0 %v1052_v0 }
 0x2b8   : > { %1056 = vadd.xlane.f32.xlu1 %v1055_v16 }
 0x2b9   : > { %1059 = vadd.xlane.f32.xlu0 %v1058_v17 }
 0x2bc   : > { %1062 = vadd.xlane.f32.xlu1 %v1061_v19 }
 0x2d0   : > { %v2082_v22 = vpop.permute.xlu1 %2081 }
 0x2d4   : > { %v2084_v23 = vpop.permute.xlu0 %2083 }
 0x2d5   : > { %11276 = vmatprep.subr.mxu1 %v2084_v23 }
 0x2d6   : > { %v2080_v24 = vpop.permute.xlu1 %2079  ;;  %11277 = vmatpush3.msra.mxu1 %v2084_v23 }
 0x2d7   : > { %11278 = vmatprep.subr.mxu1 %v2082_v22 }
 0x2d8   : > { %11279 = vmatpush3.msra.mxu1 %v2082_v22  ;;  %v2076_v25 = vpop.permute.xlu0 %2075 }
 0x2d9   : > { %11280 = vmatprep.subr.mxu1 %v2080_v24 }
 0x2da   : > { %v2078_v26 = vpop.permute.xlu1 %2077  ;;  %11281 = vmatpush3.msra.mxu1 %v2080_v24 }
 0x2db   : > { %11282 = vmatprep.subr.mxu1 %v2078_v26 }
 0x2dc   : > { %11283 = vmatpush3.msra.mxu1 %v2078_v26  ;;  %v2072_v30 = vpop.permute.xlu0 %2071 }
 0x2dd   : > { %11284 = vmatprep.subr.mxu1 %v2076_v25 }
 0x2de   : > { %v2074_v27 = vpop.permute.xlu1 %2073  ;;  %11285 = vmatpush3.msra.mxu1 %v2076_v25 }
 0x2df   : > { %11286 = vmatprep.subr.mxu1 %v2074_v27 }
 0x2e0   : > { %11287 = vmatpush3.msra.mxu1 %v2074_v27 }
 0x2e1   : > { %11288 = vmatprep.subr.mxu1 %v2072_v30 }
 0x2e2   : > { %v2070_v31 = vpop.permute.xlu1 %2069  ;;  %11289 = vmatpush3.msra.mxu1 %v2072_v30 }
 0x2e3   : > { %11290 = vmatprep.subr.mxu1 %v2070_v31 }
 0x2e4   : > { %11291 = vmatpush3.msra.mxu1 %v2070_v31 }
 0x2e5   : > { %11293 = vmatmul.mubr.msk.f32.vlgmr.msra.gmra.mxu1 %vm1851_vm1, %v1728_v32  ;;  %11362 = vmatprep.subr.mxu1 %v13423_v34 }
 0x2e6   : > { %11295 = vmatprep.mubr.msk.f32.mxu1 %vm1851_vm1, %v1729_v35  ;;  %11363 = vmatpush3.msra.mxu1 %v13423_v34 }
 0x2e7   : > { %11364 = vmatprep.subr.mxu1 %v1801_v36 }
 0x2e8   : > { %11365 = vmatpush3.msra.mxu1 %v1801_v36 }
 0x2e9   : > { %11296 = vmatmul.mubr.msk.f32.gmra.mxu1 %vm1851_vm1, %v1730_v40  ;;  %11366 = vmatprep.subr.mxu1 %v1800_v41 }
 0x2ea   : > { %11298 = vmatprep.mubr.msk.f32.mxu1 %vm1851_vm1, %v1731_v42  ;;  %11367 = vmatpush3.msra.mxu1 %v1800_v41 }
 0x2eb   : > { %11368 = vmatprep.subr.mxu1 %v1799_v44 }
 0x2ec   : > { %11369 = vmatpush3.msra.mxu1 %v1799_v44 }
 0x2ed   : > { %11299 = vmatmul.mubr.msk.f32.gmra.mxu1 %vm1851_vm1, %v1732_v46 }
 0x2ee   : > { %11301 = vmatprep.mubr.msk.f32.mxu1 %vm1851_vm1, %v1733_v47 }
 0x2f1   : > { %11302 = vmatmul.mubr.msk.f32.gmra.mxu1 %vm1851_vm1, %v1734_v50 }
 0x2f2   : > { %11304 = vmatprep.mubr.msk.f32.mxu1 %vm1851_vm1, %v1735_v51 }
 0x2f5   : > { %11305 = vmatmul.mubr.msk.f32.gmra.mxu1 %vm1851_vm1, %v1736_v52 }
 0x2f6   : > { %11307 = vmatprep.mubr.msk.f32.mxu1 %vm1851_vm1, %v1737_v54 }
 0x2f9   : > { %11308 = vmatmul.mubr.msk.f32.gmra.mxu1 %vm1851_vm1, %v1738_v21 }
 0x2fa   : > { %11310 = vmatprep.mubr.msk.f32.mxu1 %vm1851_vm1, %v1739_v57 }
 0x2fd   : > { %11311 = vmatmul.mubr.msk.f32.gmra.mxu1 %vm1851_vm1, %v1740_v58 }
 0x2fe   : > { %11313 = vmatprep.mubr.msk.f32.mxu1 %vm1851_vm1, %v1741_v38 }
 0x301   : > { %11314 = vmatmul.mubr.msk.f32.gmra.mxu1 %vm1851_vm1, %v1742_v60 }
 0x302   : > { %11316 = vmatprep.mubr.msk.f32.mxu1 %vm1851_vm1, %v1743_v63 }
 0x305   : > { %11317 = vmatmul.mubr.msk.f32.gmra.mxu1 %vm1851_vm1, %v1744_v39 }
 0x312   : > { %v994_v7 = vpop.xlane.xlu0 %993 }
 0x313   : > { %v1073_v9 = vmul.f32 0.03125, %v994_v7 }
 0x315   : > { %v13464_v5 = vsub.f32 %v13287_v33, %v1073_v9 }
 0x316   : > { %v1000_v49 = vpop.xlane.xlu0 %999 }
 0x317   : > { %v1075_v1 = vmul.f32 0.03125, %v1000_v49  ;;  %v1137_v2 = vmul.f32 %v13464_v5, %v13464_v5 }
 0x319   : > { %v13469_v11 = vsub.f32 %v13296_v37, %v1075_v1  ;;  %v1185_v0 = vsel %vm967_vm0, %v1137_v2, 0.0 }
 0x31a   : > { %v1003_v16 = vpop.xlane.xlu0 %1002  ;;  %1186 = vadd.xlane.f32.xlu0 %v1185_v0 }
 0x31b   : > { %v1076_v17 = vmul.f32 0.03125, %v1003_v16  ;;  %v1139_v19 = vmul.f32 %v13469_v11, %v13469_v11 }
 0x31d   : > { %v997_v22 = vpop.xlane.xlu1 %996  ;;  %v1191_v33 = vsel %vm967_vm0, %v1139_v19, 0.0  ;;  %v13476_v24 = vsub.f32 %v13305_v43, %v1076_v17 }
 0x31e   : > { %v1074_v23 = vmul.f32 0.03125, %v997_v22  ;;  %1192 = vadd.xlane.f32.xlu0 %v1191_v33  ;;  %v1006_v25 = vpop.xlane.xlu0 %1005 }
 0x31f   : > { %v1077_v26 = vmul.f32 0.03125, %v1006_v25  ;;  %v1140_v32 = vmul.f32 %v13476_v24, %v13476_v24 }
 0x320   : > { %v13479_v37 = vsub.f32 %v13310_v45, %v1074_v23 }
 0x321   : > { %v13482_v27 = vsub.f32 %v13317_v20, %v1077_v26  ;;  %v1009_v30 = vpop.xlane.xlu1 %1008  ;;  %v1194_v46 = vsel %vm967_vm0, %v1140_v32, 0.0 }
 0x322   : > { %v1138_v31 = vmul.f32 %v13479_v37, %v13479_v37  ;;  %v1078_v35 = vmul.f32 0.03125, %v1009_v30  ;;  %v1012_v36 = vpop.xlane.xlu0 %1011 }
 0x323   : > { %v1079_v43 = vmul.f32 0.03125, %v1012_v36  ;;  %v1141_v40 = vmul.f32 %v13482_v27, %v13482_v27 }
 0x324   : > { %v1188_v41 = vsel %vm967_vm0, %v1138_v31, 0.0  ;;  %v13492_v45 = vsub.f32 %v13326_v53, %v1078_v35 }
 0x325   : > { %1189 = vadd.xlane.f32.xlu1 %v1188_v41  ;;  %v13495_v20 = vsub.f32 %v13329_v28, %v1079_v43  ;;  %v1015_v42 = vpop.xlane.xlu1 %1014  ;;  %v1197_v44 = vsel %vm967_vm0, %v1141_v40, 0.0 }
 0x326   : > { %v1080_v47 = vmul.f32 0.03125, %v1015_v42  ;;  %1198 = vadd.xlane.f32.xlu0 %v1197_v44  ;;  %v1018_v50 = vpop.xlane.xlu0 %1017  ;;  %v1142_v51 = vmul.f32 %v13492_v45, %v13492_v45 }
 0x327   : > { %v1081_v52 = vmul.f32 0.03125, %v1018_v50  ;;  %v1143_v53 = vmul.f32 %v13495_v20, %v13495_v20 }
 0x328   : > { %v13504_v54 = vsub.f32 %v13337_v55, %v1080_v47  ;;  %v1200_v58 = vsel %vm967_vm0, %v1142_v51, 0.0 }
 0x329   : > { %1195 = vadd.xlane.f32.xlu1 %v1194_v46  ;;  %v13507_v28 = vsub.f32 %v13340_v56, %v1081_v52  ;;  %v1021_v21 = vpop.xlane.xlu1 %1020  ;;  %v1203_v57 = vsel %vm967_vm0, %v1143_v53, 0.0 }
 0x32a   : > { %v1082_v38 = vmul.f32 0.03125, %v1021_v21  ;;  %1204 = vadd.xlane.f32.xlu0 %v1203_v57  ;;  %v1024_v60 = vpop.xlane.xlu0 %1023  ;;  %v1144_v63 = vmul.f32 %v13504_v54, %v13504_v54 }
 0x32b   : > { %v1083_v39 = vmul.f32 0.03125, %v1024_v60  ;;  %v1145_v55 = vmul.f32 %v13507_v28, %v13507_v28 }
 0x32c   : > { %v13516_v7 = vsub.f32 %v13347_v59, %v1082_v38  ;;  %v1206_v1 = vsel %vm967_vm0, %v1144_v63, 0.0 }
 0x32d   : > { %1201 = vadd.xlane.f32.xlu1 %v1200_v58  ;;  %v13519_v56 = vsub.f32 %v13350_v29, %v1083_v39  ;;  %v1027_v9 = vpop.xlane.xlu1 %1026  ;;  %v1209_v49 = vsel %vm967_vm0, %v1145_v55, 0.0 }
 0x32e   : > { %v1084_v2 = vmul.f32 0.03125, %v1027_v9  ;;  %1210 = vadd.xlane.f32.xlu0 %v1209_v49  ;;  %v1030_v0 = vpop.xlane.xlu0 %1029  ;;  %v1146_v16 = vmul.f32 %v13516_v7, %v13516_v7 }
 0x32f   : > { %v1085_v17 = vmul.f32 0.03125, %v1030_v0  ;;  %v1147_v59 = vmul.f32 %v13519_v56, %v13519_v56 }
 0x330   : > { %v13528_v19 = vsub.f32 %v13357_v61, %v1084_v2  ;;  %v1212_v25 = vsel %vm967_vm0, %v1146_v16, 0.0 }
 0x331   : > { %1207 = vadd.xlane.f32.xlu1 %v1206_v1  ;;  %v13531_v29 = vsub.f32 %v13360_v62, %v1085_v17  ;;  %v1033_v22 = vpop.xlane.xlu1 %1032  ;;  %v1215_v33 = vsel %vm967_vm0, %v1147_v59, 0.0 }
 0x332   : > { %v13534_v23 = vpop.f32.mrf.mxu1  ;;  %v1086_v26 = vmul.f32 0.03125, %v1033_v22  ;;  %1216 = vadd.xlane.f32.xlu0 %v1215_v33  ;;  %v1036_v30 = vpop.xlane.xlu0 %1035  ;;  %v1148_v31 = vmul.f32 %v13528_v19, %v13528_v19 }
 0x333   : > { %v1087_v32 = vmul.f32 0.03125, %v1036_v30  ;;  %v1149_v61 = vmul.f32 %v13531_v29, %v13531_v29 }
 0x334   : > { %v13541_v35 = vpop.f32.mrf.mxu1  ;;  %v13544_v62 = vsub.f32 %v13367_v48, %v1086_v26  ;;  %v1218_v42 = vsel %vm967_vm0, %v1148_v31, 0.0 }
 0x335   : > { %1213 = vadd.xlane.f32.xlu1 %v1212_v25  ;;  %v13547_v36 = vsub.f32 %v13370_v3, %v1087_v32  ;;  %v1039_v43 = vpop.xlane.xlu1 %1038  ;;  %v1221_v40 = vsel %vm967_vm0, %v1149_v61, 0.0 }
 0x336   : > { %v11254_v41 = vpop.f32.mrf.mxu1  ;;  %v1088_v44 = vmul.f32 0.03125, %v1039_v43  ;;  %1222 = vadd.xlane.f32.xlu0 %v1221_v40  ;;  %v1042_v46 = vpop.xlane.xlu0 %1041  ;;  %v1150_v47 = vmul.f32 %v13544_v62, %v13544_v62 }
 0x337   : > { %v1089_v50 = vmul.f32 0.03125, %v1042_v46  ;;  %v1151_v48 = vmul.f32 %v13547_v36, %v13547_v36 }
 0x338   : > { %v1982_v51 = vpop.f32.mrf.mxu1  ;;  %v13556_v3 = vsub.f32 %v13377_v12, %v1088_v44  ;;  %v1224_v58 = vsel %vm967_vm0, %v1150_v47, 0.0  ;;  %v10136_v47 = vld [vmem:[%s12975_s14] ss:$0 sm:$0xff] }
 0x339   : > { %1219 = vadd.xlane.f32.xlu1 %v1218_v42  ;;  %v13559_v52 = vsub.f32 %v13380_v13, %v1089_v50  ;;  %v1045_v53 = vpop.xlane.xlu1 %1044  ;;  %v1227_v21 = vsel %vm967_vm0, %v1151_v48, 0.0  ;;  %v10138_v48 = vld [vmem:[%s12975_s14 + $0x2] ss:$0 sm:$0xff] }
 0x33a   : > { %v11257_v57 = vpop.f32.mrf.mxu1  ;;  %v1090_v38 = vmul.f32 0.03125, %v1045_v53  ;;  %1228 = vadd.xlane.f32.xlu0 %v1227_v21  ;;  %v1048_v60 = vpop.xlane.xlu0 %1047  ;;  %v1152_v63 = vmul.f32 %v13556_v3, %v13556_v3 }
 0x33b   : > { %v1091_v39 = vmul.f32 0.03125, %v1048_v60  ;;  %v1153_v12 = vmul.f32 %v13559_v52, %v13559_v52 }
 0x33c   : > { %v1992_v55 = vpop.f32.mrf.mxu1  ;;  %v13568_v13 = vsub.f32 %v13387_v4, %v1090_v38  ;;  %v1230_v0 = vsel %vm967_vm0, %v1152_v63, 0.0 }
 0x33d   : > { %1225 = vadd.xlane.f32.xlu1 %v1224_v58  ;;  %v13571_v9 = vsub.f32 %v13390_v6, %v1091_v39  ;;  %v1051_v49 = vpop.xlane.xlu1 %1050  ;;  %v1233_v1 = vsel %vm967_vm0, %v1153_v12, 0.0  ;;  %v2535_v12 = vmul.f32 %v10138_v48, %v1992_v55 }
 0x33e   : > { %v11260_v2 = vpop.f32.mrf.mxu1  ;;  %v1092_v16 = vmul.f32 0.03125, %v1051_v49  ;;  %1234 = vadd.xlane.f32.xlu0 %v1233_v1  ;;  %v1054_v17 = vpop.xlane.xlu0 %1053  ;;  %v1154_v59 = vmul.f32 %v13568_v13, %v13568_v13  ;;  %v10139_v49 = vld [vmem:[%s12975_s14 + $0x3] ss:$0 sm:$0xff]  ;;  %v2518_v1 = vmul.f32 %v13534_v23, %v10136_v47 }
 0x33f   : > { %v1093_v22 = vmul.f32 0.03125, %v1054_v17  ;;  %v1155_v4 = vmul.f32 %v13571_v9, %v13571_v9 }
 0x340   : > { %v2002_v33 = vpop.f32.mrf.mxu1  ;;  %v13580_v6 = vsub.f32 %v13397_v8, %v1092_v16  ;;  %v1236_v32 = vsel %vm967_vm0, %v1154_v59, 0.0  ;;  %v10137_v8 = vld [vmem:[%s12975_s14 + $0x1] ss:$0 sm:$0xff] }
 0x341   : > { %1231 = vadd.xlane.f32.xlu1 %v1230_v0  ;;  %v13583_v25 = vsub.f32 %v13400_v10, %v1093_v22  ;;  %v1057_v26 = vpop.xlane.xlu1 %1056  ;;  %v1239_v30 = vsel %vm967_vm0, %v1155_v4, 0.0  ;;  %v2525_v50 = vmul.f32 %v10137_v8, %v1982_v51  ;;  %v2526_v38 = vmul.f32 %v11254_v41, %v10137_v8  ;;  %v10140_v22 = vld [vmem:[%s12975_s14 + $0x4] ss:$0 sm:$0xff] }
 0x342   : > { %v11263_v31 = vpop.f32.mrf.mxu1  ;;  %v1094_v61 = vmul.f32 0.03125, %v1057_v26  ;;  %1240 = vadd.xlane.f32.xlu0 %v1239_v30  ;;  %v1060_v43 = vpop.xlane.xlu0 %1059  ;;  %v1156_v40 = vmul.f32 %v13580_v6, %v13580_v6  ;;  %v2517_v51 = vmul.f32 %v10136_v47, %v13541_v35  ;;  %v2536_v0 = vmul.f32 %v11257_v57, %v10138_v48 }
 0x343   : > { %v1095_v42 = vmul.f32 0.03125, %v1060_v43  ;;  %v1157_v44 = vmul.f32 %v13583_v25, %v13583_v25  ;;  %v2545_v59 = vmul.f32 %v10139_v49, %v2002_v33  ;;  %v2528_v55 = vadd.f32 %v2526_v38, %v2518_v1 }
 0x344   : > { %v2012_v10 = vpop.f32.mrf.mxu1  ;;  %v13593_v46 = vsub.f32 %v13407_v14, %v1094_v61  ;;  %v1242_v63 = vsel %vm967_vm0, %v1156_v40, 0.0  ;;  %v2527_v17 = vadd.f32 %v2525_v50, %v2517_v51  ;;  %v2546_v4 = vmul.f32 %v11260_v2, %v10139_v49 }
 0x345   : > { %1237 = vadd.xlane.f32.xlu1 %v1236_v32  ;;  %v13598_v53 = vsub.f32 %v13410_v15, %v1095_v42  ;;  %v1063_v21 = vpop.xlane.xlu1 %1062  ;;  %v1245_v58 = vsel %vm967_vm0, %v1157_v44, 0.0  ;;  %v10141_v32 = vld [vmem:[%s12975_s14 + $0x5] ss:$0 sm:$0xff]  ;;  %v2538_v61 = vadd.f32 %v2536_v0, %v2528_v55  ;;  %v2556_v33 = vmul.f32 %v11263_v31, %v10140_v22  ;;  %v10142_v42 = vld [vmem:[%s12975_s14 + $0x6] ss:$0 sm:$0xff]  ;;  %v13625_v55 = vld [vmem:[%s12990_s30 + $0x18] sm:$0xff] }
 0x346   : > { %v11266_v60 = vpop.f32.mrf.mxu1  ;;  %v1096_v39 = vmul.f32 0.03125, %v1063_v21  ;;  %1246 = vadd.xlane.f32.xlu0 %v1245_v58  ;;  %v1158_v14 = vmul.f32 %v13593_v46, %v13593_v46  ;;  %v2537_v57 = vadd.f32 %v2535_v12, %v2527_v17  ;;  %v10143_v58 = vld [vmem:[%s12975_s14 + $0x7] ss:$0 sm:$0xff]  ;;  %v10144_v31 = vld [vmem:[%s12975_s14 + $0x8] ss:$0 sm:$0xff]  ;;  %11373 = vmatprep.subr.mxu1 %v13625_v55 }
 0x347   : > { %v1159_v15 = vmul.f32 %v13598_v53, %v13598_v53  ;;  %v2548_v2 = vadd.f32 %v2546_v4, %v2538_v61  ;;  %v2566_v44 = vmul.f32 %v11266_v60, %v10141_v32  ;;  %v13628_v4 = vld [vmem:[%s12990_s30 + $0x10] sm:$0xff]  ;;  %11395 = vmatprep.subr.mxu0 %v13625_v55 }
 0x348   : > { %v2022_v41 = vpop.f32.mrf.mxu1  ;;  %v13610_v16 = vsub.f32 %v13417_v18, %v1096_v39  ;;  %v1248_v30 = vsel %vm967_vm0, %v1158_v14, 0.0  ;;  %v2555_v18 = vmul.f32 %v10140_v22, %v2012_v10  ;;  %v2547_v40 = vadd.f32 %v2545_v59, %v2537_v57 }
 0x349   : > { %1243 = vadd.xlane.f32.xlu1 %v1242_v63  ;;  %v1251_v35 = vsel %vm967_vm0, %v1159_v15, 0.0  ;;  %v2565_v8 = vmul.f32 %v10141_v32, %v2022_v41  ;;  %v2558_v38 = vadd.f32 %v2556_v33, %v2548_v2 }
 0x34a   : > { %v11269_v26 = vpop.f32.mrf.mxu1  ;;  %1252 = vadd.xlane.f32.xlu0 %v1251_v35  ;;  %v1160_v23 = vmul.f32 %v13610_v16, %v13610_v16  ;;  %v2557_v48 = vadd.f32 %v2555_v18, %v2547_v40  ;;  %v10145_v18 = vld [vmem:[%s12980_s19] ss:$0 sm:$0xff] }
 0x34b   : > { %v2576_v63 = vmul.f32 %v11269_v26, %v10142_v42  ;;  %v2568_v51 = vadd.f32 %v2566_v44, %v2558_v38  ;;  %v13636_v26 = vld [vmem:[%s12990_s30 + $0x8] sm:$0xff] }
 0x34c   : > { %v2032_v43 = vpop.f32.mrf.mxu1  ;;  %v1254_v50 = vsel %vm967_vm0, %v1160_v23, 0.0  ;;  %v2567_v39 = vadd.f32 %v2565_v8, %v2557_v48 }
 0x34d   : > { %1249 = vadd.xlane.f32.xlu1 %v1248_v30  ;;  %v2575_v21 = vmul.f32 %v10142_v42, %v2032_v43  ;;  %v2578_v60 = vadd.f32 %v2576_v63, %v2568_v51  ;;  %v13641_v30 = vld [vmem:[%s12990_s30] sm:$0xff] }
 0x34e   : > { %v11272_v47 = vpop.f32.mrf.mxu1  ;;  %v10146_v43 = vld [vmem:[%s12980_s19 + $0x1] ss:$0 sm:$0xff] }
 0x34f   : > { %v2586_v12 = vmul.f32 %v11272_v47, %v10143_v58  ;;  %v2577_v15 = vadd.f32 %v2575_v21, %v2567_v39  ;;  %v10147_v21 = vld [vmem:[%s12980_s19 + $0x2] ss:$0 sm:$0xff] }
 0x350   : > { %v2042_v10 = vpop.f32.mrf.mxu1 }
 0x351   : > { %v2585_v14 = vmul.f32 %v10143_v58, %v2042_v10  ;;  %1255 = vadd.xlane.f32.xlu1 %v1254_v50  ;;  %v2588_v59 = vadd.f32 %v2586_v12, %v2578_v60 }
 0x352   : > { %v11275_v49 = vpop.f32.mrf.mxu1 }
 0x353   : > { %v2596_v1 = vmul.f32 %v11275_v49, %v10144_v31  ;;  %v2587_v41 = vadd.f32 %v2585_v14, %v2577_v15 }
 0x354   : > { %v2052_v0 = vpop.f32.mrf.mxu1 }
 0x355   : > { %v2595_v17 = vmul.f32 %v10144_v31, %v2052_v0  ;;  %v2598_v35 = vadd.f32 %v2596_v1, %v2588_v59  ;;  %v10148_v31 = vld [vmem:[%s12980_s19 + $0x3] ss:$0 sm:$0xff] }
 0x357   : > { %v2597_v22 = vadd.f32 %v2595_v17, %v2587_v41 }
 0x359   : > { %11370 = vmatprep.mubr.msk.f32.mxu1 %vm967_vm0, %v2597_v22 }
 0x35a   : > { %11371 = vmatmul.mubr.msk.f32.vlgmr.msra.gmra.mxu1 %vm967_vm0, %v2598_v35 }
 0x35b   : > { %11374 = vmatpush3.msra.mxu1 %v13625_v55 }
 0x35c   : > { %11375 = vmatprep.subr.mxu1 %v13628_v4 }
 0x35d   : > { %11376 = vmatpush3.msra.mxu1 %v13628_v4 }
 0x35e   : > { %11377 = vmatprep.subr.mxu1 %v13636_v26 }
 0x35f   : > { %11378 = vmatpush3.msra.mxu1 %v13636_v26 }
 0x360   : > { %11379 = vmatprep.subr.mxu1 %v13641_v30 }
 0x361   : > { %11380 = vmatpush3.msra.mxu1 %v13641_v30 }
 0x362   : > { %11384 = vmatprep.subr.mxu1 %v13423_v34 }
 0x3a3   : > { %v1187_v23 = vpop.xlane.xlu0 %1186 }
 0x3a4   : > { %v1265_v57 = vmul.f32 0.03125, %v1187_v23  ;;  %v10149_v23 = vld [vmem:[%s12980_s19 + $0x4] ss:$0 sm:$0xff] }
 0x3a5   : > { %v11294_v32 = vpop.f32.mrf.mxu1 }
 0x3a6   : > { %v1297_v61 = vadd.f32 1e-05, %v1265_v57  ;;  %v2606_v8 = vmul.f32 %v11294_v32, %v10145_v18 }
 0x3a7   : > { %v2213_v33 = vpop.f32.mrf.mxu1  ;;  %v1193_v40 = vpop.xlane.xlu0 %1192 }
 0x3a8   : > { %v1267_v42 = vmul.f32 0.03125, %v1193_v40  ;;  %12281 = vrsqrt.f32 %v1297_v61  ;;  %v2605_v44 = vmul.f32 %v10145_v18, %v2213_v33 }
 0x3a9   : > { %v11297_v2 = vpop.f32.mrf.mxu1 }
 0x3aa   : > { %v2614_v47 = vmul.f32 %v11297_v2, %v10146_v43  ;;  %v1299_v50 = vadd.f32 1e-05, %v1267_v42 }
 0x3ab   : > { %v2223_v48 = vpop.f32.mrf.mxu1 }
 0x3ac   : > { %v2616_v34 = vadd.f32 %v2614_v47, %v2606_v8  ;;  %v2613_v58 = vmul.f32 %v10146_v43, %v2223_v48  ;;  %12283 = vrsqrt.f32 %v1299_v50  ;;  %v10150_v48 = vld [vmem:[%s12980_s19 + $0x5] ss:$0 sm:$0xff] }
 0x3ad   : > { %v11300_v38 = vpop.f32.mrf.mxu1 }
 0x3ae   : > { %v2615_v63 = vadd.f32 %v2613_v58, %v2605_v44  ;;  %v2624_v10 = vmul.f32 %v11300_v38, %v10147_v21  ;;  %v1190_v39 = vpop.xlane.xlu1 %1189 }
 0x3af   : > { %v2233_v14 = vpop.f32.mrf.mxu1  ;;  %v1266_v51 = vmul.f32 0.03125, %v1190_v39  ;;  %v1199_v12 = vpop.xlane.xlu0 %1198 }
 0x3b0   : > { %v2626_v49 = vadd.f32 %v2624_v10, %v2616_v34  ;;  %v2623_v15 = vmul.f32 %v10147_v21, %v2233_v14  ;;  %v1269_v60 = vmul.f32 0.03125, %v1199_v12 }
 0x3b1   : > { %v11303_v1 = vpop.f32.mrf.mxu1  ;;  %v1298_v0 = vadd.f32 1e-05, %v1266_v51 }
 0x3b2   : > { %v2625_v41 = vadd.f32 %v2623_v15, %v2615_v63  ;;  %v2634_v17 = vmul.f32 %v11303_v1, %v10148_v31  ;;  %v1196_v59 = vpop.xlane.xlu1 %1195  ;;  %v1301_v22 = vadd.f32 1e-05, %v1269_v60  ;;  %v10151_v1 = vld [vmem:[%s12980_s19 + $0x6] ss:$0 sm:$0xff] }
 0x3b3   : > { %v2243_v35 = vpop.f32.mrf.mxu1  ;;  %12285 = vrsqrt.f32 %v1298_v0  ;;  %v1268_v57 = vmul.f32 0.03125, %v1196_v59  ;;  %v1205_v18 = vpop.xlane.xlu0 %1204 }
 0x3b4   : > { %v2636_v32 = vadd.f32 %v2634_v17, %v2626_v49  ;;  %v2633_v61 = vmul.f32 %v10148_v31, %v2243_v35  ;;  %12287 = vrsqrt.f32 %v1301_v22  ;;  %v1271_v33 = vmul.f32 0.03125, %v1205_v18 }
 0x3b5   : > { %v11306_v43 = vpop.f32.mrf.mxu1  ;;  %v1300_v40 = vadd.f32 1e-05, %v1268_v57  ;;  %v12282_v8 = vpop.eup %12281 }
 0x3b6   : > { %v2635_v42 = vadd.f32 %v2633_v61, %v2625_v41  ;;  %v2644_v2 = vmul.f32 %v11306_v43, %v10149_v23  ;;  %v1202_v44 = vpop.xlane.xlu1 %1201  ;;  %v1303_v47 = vadd.f32 1e-05, %v1271_v33  ;;  %v1361_v31 = vmul.f32 %v12282_v8, %v13464_v5  ;;  %v13656_v5 = vld [vmem:[%s16156_s25] ss:$0 sm:$0xff]  ;;  %v10152_v8 = vld [vmem:[%s12980_s19 + $0x7] ss:$0 sm:$0xff] }
 0x3b7   : > { %v2253_v50 = vpop.f32.mrf.mxu1  ;;  %12289 = vrsqrt.f32 %v1300_v40  ;;  %v1270_v21 = vmul.f32 0.03125, %v1202_v44  ;;  %v1211_v34 = vpop.xlane.xlu0 %1210  ;;  %s16198_s25 = sld [smem:[#allocation17_spill]] }
 0x3b8   : > { %v2646_v58 = vadd.f32 %v2644_v2, %v2636_v32  ;;  %v2643_v38 = vmul.f32 %v10149_v23, %v2253_v50  ;;  %12291 = vrsqrt.f32 %v1303_v47  ;;  %v1273_v63 = vmul.f32 0.03125, %v1211_v34 }
 0x3b9   : > { %v12284_v10 = vpop.eup %12283  ;;  %v11309_v39 = vpop.f32.mrf.mxu1  ;;  %v1302_v14 = vadd.f32 1e-05, %v1270_v21  ;;  %v1399_v18 = vmul.f32 %v13656_v5, %v1361_v31 }
 0x3ba   : > { %v2645_v51 = vadd.f32 %v2643_v38, %v2635_v42  ;;  %v2654_v12 = vmul.f32 %v11309_v39, %v10150_v48  ;;  %v1208_v49 = vpop.xlane.xlu1 %1207  ;;  %v1305_v15 = vadd.f32 1e-05, %v1273_v63  ;;  %v1363_v17 = vmul.f32 %v12284_v10, %v13469_v11  ;;  %v13663_v63 = vld [vmem:[%s16155_s29] ss:$0 sm:$0xff]  ;;  %s16199_s29 = sld [smem:[#allocation18_spill]] }
 0x3bb   : > { %v2263_v60 = vpop.f32.mrf.mxu1  ;;  %12293 = vrsqrt.f32 %v1302_v14  ;;  %v1272_v0 = vmul.f32 0.03125, %v1208_v49  ;;  %v1217_v41 = vpop.xlane.xlu0 %1216  ;;  %v1437_v10 = vadd.f32 %v13663_v63, %v1399_v18 }
 0x3bc   : > { %v2656_v59 = vadd.f32 %v2654_v12, %v2646_v58  ;;  %v2653_v22 = vmul.f32 %v10150_v48, %v2263_v60  ;;  %12295 = vrsqrt.f32 %v1305_v15  ;;  %v1275_v35 = vmul.f32 0.03125, %v1217_v41  ;;  %v10153_v15 = vld [vmem:[%s12980_s19 + $0x8] ss:$0 sm:$0xff] }
 0x3bd   : > { %v11312_v23 = vpop.f32.mrf.mxu1  ;;  %v1304_v57 = vadd.f32 1e-05, %v1272_v0  ;;  %v1401_v2 = vmul.f32 %v13656_v5, %v1363_v17 }
 0x3be   : > { %v2655_v32 = vadd.f32 %v2653_v22, %v2645_v51  ;;  %v2664_v61 = vmul.f32 %v11312_v23, %v10151_v1  ;;  %v1214_v33 = vpop.xlane.xlu1 %1213  ;;  %v1307_v43 = vadd.f32 1e-05, %v1275_v35 }
 0x3bf   : > { %v2273_v40 = vpop.f32.mrf.mxu1  ;;  %12297 = vrsqrt.f32 %v1304_v57  ;;  %v1274_v42 = vmul.f32 0.03125, %v1214_v33  ;;  %v1223_v11 = vpop.xlane.xlu0 %1222  ;;  %v1439_v0 = vadd.f32 %v13663_v63, %v1401_v2 }
 0x3c0   : > { %v12286_v44 = vpop.eup %12285  ;;  %v2666_v47 = vadd.f32 %v2664_v61, %v2656_v59  ;;  %v2663_v50 = vmul.f32 %v10151_v1, %v2273_v40  ;;  %12299 = vrsqrt.f32 %v1307_v43  ;;  %v1277_v48 = vmul.f32 0.03125, %v1223_v11 }
 0x3c1   : > { %v12288_v21 = vpop.eup %12287  ;;  %v11315_v34 = vpop.f32.mrf.mxu1  ;;  %v1306_v58 = vadd.f32 1e-05, %v1274_v42  ;;  %v1362_v38 = vmul.f32 %v12286_v44, %v13479_v37 }
 0x3c2   : > { %v2665_v39 = vadd.f32 %v2663_v50, %v2655_v32  ;;  %v2674_v14 = vmul.f32 %v11315_v34, %v10152_v8  ;;  %v1220_v31 = vpop.xlane.xlu1 %1219  ;;  %v1309_v51 = vadd.f32 1e-05, %v1277_v48  ;;  %v1365_v12 = vmul.f32 %v12288_v21, %v13482_v27 }
 0x3c3   : > { %v2283_v49 = vpop.f32.mrf.mxu1  ;;  %12301 = vrsqrt.f32 %v1306_v58  ;;  %v1276_v60 = vmul.f32 0.03125, %v1220_v31  ;;  %v1400_v1 = vmul.f32 %v13656_v5, %v1362_v38  ;;  %v1229_v41 = vpop.xlane.xlu0 %1228 }
 0x3c4   : > { %v12290_v37 = vpop.eup %12289  ;;  %v2676_v17 = vadd.f32 %v2674_v14, %v2666_v47  ;;  %v2673_v59 = vmul.f32 %v10152_v8, %v2283_v49  ;;  %12303 = vrsqrt.f32 %v1309_v51  ;;  %v1279_v22 = vmul.f32 0.03125, %v1229_v41 }
 0x3c5   : > { %v12292_v35 = vpop.eup %12291  ;;  %v11318_v23 = vpop.f32.mrf.mxu1  ;;  %v1308_v57 = vadd.f32 1e-05, %v1276_v60  ;;  %v1438_v18 = vadd.f32 %v13663_v63, %v1400_v1  ;;  %v1364_v27 = vmul.f32 %v12290_v37, %v13476_v24  ;;  %v1403_v32 = vmul.f32 %v13656_v5, %v1365_v12 }
 0x3c6   : > { %v2675_v61 = vadd.f32 %v2673_v59, %v2665_v39  ;;  %v2684_v33 = vmul.f32 %v11318_v23, %v10153_v15  ;;  %v1226_v43 = vpop.xlane.xlu1 %1225  ;;  %v1311_v40 = vadd.f32 1e-05, %v1279_v22  ;;  %v1367_v42 = vmul.f32 %v12292_v35, %v13495_v20 }
 0x3c7   : > { %v2293_v11 = vpop.f32.mrf.mxu1  ;;  %12305 = vrsqrt.f32 %v1308_v57  ;;  %v1278_v8 = vmul.f32 0.03125, %v1226_v43  ;;  %v1465_v2 = vpack.c.bf16 %v1438_v18, %v1437_v10  ;;  %v1402_v44 = vmul.f32 %v13656_v5, %v1364_v27  ;;  %v1235_v47 = vpop.xlane.xlu0 %1234 }
 0x3c8   : > { %v12294_v50 = vpop.eup %12293  ;;  %v13675_v48 = vadd.f32 %v2684_v33, %v2676_v17  ;;  %v2683_v21 = vmul.f32 %v10153_v15, %v2293_v11  ;;  %12307 = vrsqrt.f32 %v1311_v40  ;;  %v1281_v24 = vmul.f32 0.03125, %v1235_v47 }
 0x3c9   : > { %v12296_v34 = vpop.eup %12295  ;;  %v1310_v58 = vadd.f32 1e-05, %v1278_v8  ;;  %11209 = vmatprep.mubr.msk.bf16.mxu0 %vm967_vm0, %v1465_v2  ;;  %v1440_v38 = vadd.f32 %v13663_v63, %v1402_v44  ;;  %v1366_v20 = vmul.f32 %v12294_v50, %v13492_v45  ;;  %v1441_v39 = vadd.f32 %v13663_v63, %v1403_v32 }
 0x3ca   : > { %v13681_v10 = vadd.f32 %v2683_v21, %v2675_v61  ;;  %3189 = vrot.lane.b32.xlu1 %v13675_v48, %s16119_s1  ;;  %v1232_v14 = vpop.xlane.xlu1 %1231  ;;  %v1313_v31 = vadd.f32 1e-05, %v1281_v24  ;;  %v1405_v51 = vmul.f32 %v13656_v5, %v1367_v42  ;;  %v1369_v12 = vmul.f32 %v12296_v34, %v13507_v28 }
 0x3cb   : > { %12309 = vrsqrt.f32 %v1310_v58  ;;  %v1466_v49 = vpack.c.bf16 %v1440_v38, %v1439_v0  ;;  %v1280_v15 = vmul.f32 0.03125, %v1232_v14  ;;  %v1241_v60 = vpop.xlane.xlu0 %1240  ;;  %v1404_v1 = vmul.f32 %v13656_v5, %v1366_v20 }
 0x3cc   : > { %v12298_v45 = vpop.eup %12297  ;;  %3187 = vrot.lane.b32.xlu0 %v13681_v10, %s16119_s1  ;;  %12311 = vrsqrt.f32 %v1313_v31  ;;  %v1283_v41 = vmul.f32 0.03125, %v1241_v60  ;;  %v1443_v35 = vadd.f32 %v13663_v63, %v1405_v51  ;;  %v1407_v23 = vmul.f32 %v13656_v5, %v1369_v12  ;;  %s16187_s1 = sld [smem:[#allocation19_spill]] }
 0x3cd   : > { %v12300_v37 = vpop.eup %12299  ;;  %11210 = vmatmul.mubr.msk.bf16.gmra.mxu0 %vm967_vm0, %v1466_v49  ;;  %v1312_v17 = vadd.f32 1e-05, %v1280_v15  ;;  %v1442_v59 = vadd.f32 %v13663_v63, %v1404_v1  ;;  %v1368_v28 = vmul.f32 %v12298_v45, %v13504_v54 }
 0x3ce   : > { %v1238_v22 = vpop.xlane.xlu1 %1237  ;;  %v1315_v0 = vadd.f32 1e-05, %v1283_v41  ;;  %v1371_v57 = vmul.f32 %v12300_v37, %v13519_v56  ;;  %v1445_v56 = vadd.f32 %v13663_v63, %v1407_v23 }
 0x3cf   : > { %12313 = vrsqrt.f32 %v1312_v17  ;;  %v1282_v18 = vmul.f32 0.03125, %v1238_v22  ;;  %v1467_v27 = vpack.c.bf16 %v1442_v59, %v1441_v39  ;;  %v1406_v32 = vmul.f32 %v13656_v5, %v1368_v28  ;;  %v1247_v61 = vpop.xlane.xlu0 %1246 }
 0x3d0   : > { %v12302_v33 = vpop.eup %12301  ;;  %12315 = vrsqrt.f32 %v1315_v0  ;;  %v1285_v43 = vmul.f32 0.03125, %v1247_v61  ;;  %v1409_v44 = vmul.f32 %v13656_v5, %v1371_v57 }
 0x3d1   : > { %v12304_v40 = vpop.eup %12303  ;;  %v1314_v42 = vadd.f32 1e-05, %v1282_v18  ;;  %11213 = vmatprep.mubr.msk.bf16.mxu0 %vm967_vm0, %v1467_v27  ;;  %v1444_v54 = vadd.f32 %v13663_v63, %v1406_v32  ;;  %v1370_v11 = vmul.f32 %v12302_v33, %v13516_v7 }
 0x3d2   : > { %v1244_v8 = vpop.xlane.xlu1 %1243  ;;  %v1317_v2 = vadd.f32 1e-05, %v1285_v43  ;;  %v1373_v47 = vmul.f32 %v12304_v40, %v13531_v29  ;;  %v1447_v29 = vadd.f32 %v13663_v63, %v1409_v44 }
 0x3d3   : > { %12317 = vrsqrt.f32 %v1314_v42  ;;  %v1284_v50 = vmul.f32 0.03125, %v1244_v8  ;;  %v1468_v21 = vpack.c.bf16 %v1444_v54, %v1443_v35  ;;  %v1253_v24 = vpop.xlane.xlu0 %1252  ;;  %v1408_v34 = vmul.f32 %v13656_v5, %v1370_v11 }
 0x3d4   : > { %v12306_v58 = vpop.eup %12305  ;;  %12319 = vrsqrt.f32 %v1317_v2  ;;  %v1287_v38 = vmul.f32 0.03125, %v1253_v24  ;;  %v1411_v12 = vmul.f32 %v13656_v5, %v1373_v47 }
 0x3d5   : > { %v12308_v20 = vpop.eup %12307  ;;  %v1316_v39 = vadd.f32 1e-05, %v1284_v50  ;;  %11214 = vmatmul.mubr.msk.bf16.gmra.mxu0 %vm967_vm0, %v1468_v21  ;;  %v1446_v7 = vadd.f32 %v13663_v63, %v1408_v34  ;;  %v1372_v14 = vmul.f32 %v12306_v58, %v13528_v19 }
 0x3d6   : > { %v1250_v31 = vpop.xlane.xlu1 %1249  ;;  %v1319_v51 = vadd.f32 1e-05, %v1287_v38  ;;  %v1375_v49 = vmul.f32 %v12308_v20, %v13547_v36  ;;  %v1449_v28 = vadd.f32 %v13663_v63, %v1411_v12 }
 0x3d7   : > { %12321 = vrsqrt.f32 %v1316_v39  ;;  %v1286_v15 = vmul.f32 0.03125, %v1250_v31  ;;  %v1469_v60 = vpack.c.bf16 %v1446_v7, %v1445_v56  ;;  %v1410_v1 = vmul.f32 %v13656_v5, %v1372_v14 }
 0x3d8   : > { %v12310_v45 = vpop.eup %12309  ;;  %12323 = vrsqrt.f32 %v1319_v51  ;;  %v1413_v36 = vmul.f32 %v13656_v5, %v1375_v49 }
 0x3d9   : > { %v12312_v41 = vpop.eup %12311  ;;  %v1318_v37 = vadd.f32 1e-05, %v1286_v15  ;;  %11217 = vmatprep.mubr.msk.bf16.mxu0 %vm967_vm0, %v1469_v60  ;;  %v1448_v19 = vadd.f32 %v13663_v63, %v1410_v1  ;;  %v1374_v17 = vmul.f32 %v12310_v45, %v13544_v62 }
 0x3da   : > { %v1256_v59 = vpop.xlane.xlu1 %1255  ;;  %v1377_v22 = vmul.f32 %v12312_v41, %v13559_v52  ;;  %v1451_v61 = vadd.f32 %v13663_v63, %v1413_v36  ;;  %v13799_v36 = vld [vmem:[%s12985_s24] sm:$0xff] }
 0x3db   : > { %12325 = vrsqrt.f32 %v1318_v37  ;;  %v1288_v0 = vmul.f32 0.03125, %v1256_v59  ;;  %v1470_v35 = vpack.c.bf16 %v1448_v19, %v1447_v29  ;;  %v1412_v23 = vmul.f32 %v13656_v5, %v1374_v17  ;;  %v13767_v37 = vld [vmem:[%s12945_s17 + $0x8] sm:$0xff]  ;;  %v13770_v19 = vld [vmem:[%s12985_s24 + $0x18] sm:$0xff]  ;;  %v13776_v17 = vld [vmem:[%s12985_s24 + $0x10] sm:$0xff] }
 0x3dc   : > { %v12314_v57 = vpop.eup %12313  ;;  %v1415_v40 = vmul.f32 %v13656_v5, %v1377_v22  ;;  %v13785_v59 = vld [vmem:[%s12985_s24 + $0x8] sm:$0xff]  ;;  %v13810_v22 = vld [vmem:[%s12945_s17 + $0x20] sm:$0xff] }
 0x3dd   : > { %v12316_v18 = vpop.eup %12315  ;;  %v1320_v27 = vadd.f32 1e-05, %v1288_v0  ;;  %11218 = vmatmul.mubr.msk.bf16.gmra.mxu0 %vm967_vm0, %v1470_v35  ;;  %v1450_v32 = vadd.f32 %v13663_v63, %v1412_v23  ;;  %v1376_v62 = vmul.f32 %v12314_v57, %v13556_v3  ;;  %v13813_v0 = vld [vmem:[%s12945_s17 + $0x28] sm:$0xff]  ;;  %v13828_v35 = vld [vmem:[%s12945_s17 + $0x38] sm:$0xff]  ;;  %v13840_v23 = vld [vmem:[%s12945_s17 + $0x40] sm:$0xff] }
 0x3de   : > { %v1379_v33 = vmul.f32 %v12316_v18, %v13571_v9  ;;  %v1453_v9 = vadd.f32 %v13663_v63, %v1415_v40  ;;  %v13843_v57 = vld [vmem:[%s12945_s17 + $0x48] sm:$0xff]  ;;  %v13853_v18 = vld [vmem:[%s12945_s17 + $0x50] sm:$0xff]  ;;  %v13885_v40 = vld [vmem:[%s12945_s17 + $0x80] sm:$0xff] }
 0x3df   : > { %12327 = vrsqrt.f32 %v1320_v27  ;;  %v1471_v52 = vpack.c.bf16 %v1450_v32, %v1449_v28  ;;  %v1414_v43 = vmul.f32 %v13656_v5, %v1376_v62  ;;  %v13789_v28 = vld [vmem:[%s12945_s17 + $0x10] sm:$0xff]  ;;  %v13856_v27 = vld [vmem:[%s12945_s17 + $0x58] sm:$0xff]  ;;  %v13863_v32 = vld [vmem:[%s12945_s17 + $0x60] sm:$0xff] }
 0x3e0   : > { %v12318_v42 = vpop.eup %12317  ;;  %v1417_v3 = vmul.f32 %v13656_v5, %v1379_v33  ;;  %v13866_v62 = vld [vmem:[%s12945_s17 + $0x68] sm:$0xff] }
 0x3e1   : > { %v12320_v54 = vpop.eup %12319  ;;  %11221 = vmatprep.mubr.msk.bf16.mxu0 %vm967_vm0, %v1471_v52  ;;  %v1452_v11 = vadd.f32 %v13663_v63, %v1414_v43  ;;  %v1378_v8 = vmul.f32 %v12318_v42, %v13568_v13  ;;  %v13875_v52 = vld [vmem:[%s12945_s17 + $0x70] sm:$0xff]  ;;  %v13880_v43 = vld [vmem:[%s12945_s17 + $0x78] sm:$0xff]  ;;  %v13888_v42 = vld [vmem:[%s12945_s17 + $0x88] sm:$0xff] }
 0x3e2   : > { %v1381_v44 = vmul.f32 %v12320_v54, %v13583_v25  ;;  %v1455_v34 = vadd.f32 %v13663_v63, %v1417_v3  ;;  %v1814_v54 = vld [vmem:[%s13025_s20 + $0x38] sm:$0xff]  ;;  %v1811_v3 = vld [vmem:[%s13025_s20 + $0x20] sm:$0xff] }
 0x3e3   : > { %v1472_v2 = vpack.c.bf16 %v1452_v11, %v1451_v61  ;;  %v1416_v56 = vmul.f32 %v13656_v5, %v1378_v8  ;;  %v1813_v11 = vld [vmem:[%s13025_s20 + $0x30] sm:$0xff]  ;;  %v1812_v8 = vld [vmem:[%s13025_s20 + $0x28] sm:$0xff] }
 0x3e4   : > { %v12322_v47 = vpop.eup %12321  ;;  %v1419_v38 = vmul.f32 %v13656_v5, %v1381_v44  ;;  %v1808_v44 = vld [vmem:[%s13025_s20 + $0x8] sm:$0xff] }
 0x3e5   : > { %v12324_v50 = vpop.eup %12323  ;;  %11222 = vmatmul.mubr.msk.bf16.gmra.mxu0 %vm967_vm0, %v1472_v2  ;;  %v1454_v21 = vadd.f32 %v13663_v63, %v1416_v56  ;;  %v1380_v24 = vmul.f32 %v12322_v47, %v13580_v6  ;;  %v16117_v2 = vmov 0.0   ;;  %v1810_v56 = vld [vmem:[%s13025_s20 + $0x18] sm:$0xff]  ;;  %v1807_v47 = vld [vmem:[%s13025_s20] sm:$0xff] }
 0x3e6   : > { %v1383_v20 = vmul.f32 %v12324_v50, %v13598_v53  ;;  %v1457_v6 = vadd.f32 %v13663_v63, %v1419_v38 }
 0x3e7   : > { %v1473_v13 = vpack.c.bf16 %v1454_v21, %v1453_v9  ;;  %v1418_v58 = vmul.f32 %v13656_v5, %v1380_v24  ;;  %v1809_v9 = vld [vmem:[%s13025_s20 + $0x10] sm:$0xff] }
 0x3e8   : > { %v12326_v39 = vpop.eup %12325  ;;  %v1421_v51 = vmul.f32 %v13656_v5, %v1383_v20 }
 0x3e9   : > { %11225 = vmatprep.mubr.msk.bf16.mxu0 %vm967_vm0, %v1473_v13  ;;  %v1456_v25 = vadd.f32 %v13663_v63, %v1418_v58  ;;  %v1382_v7 = vmul.f32 %v12326_v39, %v13593_v46 }
 0x3ea   : > { %v1459_v15 = vadd.f32 %v13663_v63, %v1421_v51  ;;  %v10159_v51 = vld [vmem:[%s16164_s23] ss:$0 sm:$0xff] }
 0x3eb   : > { %v1474_v14 = vpack.c.bf16 %v1456_v25, %v1455_v34  ;;  %v1420_v31 = vmul.f32 %v13656_v5, %v1382_v7 }
 0x3ec   : > { %v12328_v29 = vpop.eup %12327 }
 0x3ed   : > { %11226 = vmatmul.mubr.msk.bf16.gmra.mxu0 %vm967_vm0, %v1474_v14  ;;  %v1458_v53 = vadd.f32 %v13663_v63, %v1420_v31  ;;  %v1384_v12 = vmul.f32 %v12328_v29, %v13610_v16  ;;  %v13921_v31 = vld [vmem:[%s16154_s4 + $0xf8] sm:$0xff] }
 0x3ef   : > { %v1475_v49 = vpack.c.bf16 %v1458_v53, %v1457_v6  ;;  %v1422_v46 = vmul.f32 %v13656_v5, %v1384_v12  ;;  %v10158_v6 = vld [vmem:[%s16163_s11] ss:$0 sm:$0xff] }
 0x3f1   : > { %11229 = vmatprep.mubr.msk.bf16.mxu0 %vm967_vm0, %v1475_v49  ;;  %v1460_v60 = vadd.f32 %v13663_v63, %v1422_v46  ;;  %v13764_v63 = vld [vmem:[%s12945_s17] sm:$0xff] }
 0x3f3   : > { %v1476_v1 = vpack.c.bf16 %v1460_v60, %v1459_v15  ;;  %v1834_v15 = vld [vmem:[%s16154_s4 + $0x78] sm:$0xff]  ;;  %v1849_v60 = vld [vmem:[%s16154_s4 + $0xf0] sm:$0xff] }
 0x3f5   : > { %11230 = vmatmul.mubr.msk.bf16.gmra.mxu0 %vm967_vm0, %v1476_v1  ;;  %v1833_v1 = vld [vmem:[%s16154_s4 + $0x70] sm:$0xff] }
 0x3f6   : > { %11335 = vmatprep.mubr.msk.f32.mxu0 %vm1851_vm1, %v13764_v63 }
 0x3fd   : > { %11336 = vmatmul.mubr.msk.f32.vlgmr.msra.gmra.mxu0 %vm1851_vm1, %v13767_v37 }
 0x3fe   : > { %11396 = vmatpush3.msra.mxu0 %v13625_v55  ;;  %11338 = vmatprep.mubr.msk.f32.mxu0 %vm1851_vm1, %v13789_v28 }
 0x3ff   : > { %11397 = vmatprep.subr.mxu0 %v13628_v4 }
 0x400   : > { %11398 = vmatpush3.msra.mxu0 %v13628_v4 }
 0x401   : > { %11399 = vmatprep.subr.mxu0 %v13636_v26 }
 0x402   : > { %11400 = vmatpush3.msra.mxu0 %v13636_v26 }
 0x403   : > { %11401 = vmatprep.subr.mxu0 %v13641_v30 }
 0x404   : > { %11402 = vmatpush3.msra.mxu0 %v13641_v30 }
 0x405   : > { %11417 = vmatprep.subr.mxu0 %v13625_v55 }
 0x41a   : > { %v13753_v45 = vpop.f32.mrf.mxu1 }
 0x41b   : > { %v2897_v5 = vmul.f32 %v13753_v45, %v13753_v45 }
 0x41c   : > { %v13755_v41 = vpop.f32.mrf.mxu1 }
 0x41d   : > { %v2896_v16 = vmul.f32 %v13755_v41, %v13755_v41 }
 0x41f   : > { %11381 = vmatprep.mubr.msk.f32.mxu1 %vm967_vm0, %v2896_v16  ;;  %v1847_v16 = vld [vmem:[%s16154_s4 + $0xe0] sm:$0xff] }
 0x420   : > { %11382 = vmatmul.mubr.msk.f32.vlgmr.msra.gmra.mxu1 %vm967_vm0, %v2897_v5  ;;  %v1831_v5 = vld [vmem:[%s16154_s4 + $0x60] sm:$0xff] }
 0x421   : > { %11385 = vmatpush3.msra.mxu1 %v13770_v19  ;;  %11392 = vmatprep.mubr.msk.f32.mxu1 %vm967_vm0, %v13681_v10  ;;  %v13793_v10 = vld [vmem:[%s12945_s17 + $0x18] sm:$0xff] }
 0x422   : > { %11386 = vmatprep.subr.mxu1 %v13776_v17  ;;  %11339 = vmatmul.mubr.msk.f32.gmra.mxu0 %vm1851_vm1, %v13793_v10 }
 0x423   : > { %11387 = vmatpush3.msra.mxu1 %v13776_v17  ;;  %11341 = vmatprep.mubr.msk.f32.mxu0 %vm1851_vm1, %v13810_v22 }
 0x424   : > { %11388 = vmatprep.subr.mxu1 %v13785_v59 }
 0x425   : > { %11389 = vmatpush3.msra.mxu1 %v13785_v59 }
 0x426   : > { %11390 = vmatprep.subr.mxu1 %v13799_v36  ;;  %11342 = vmatmul.mubr.msk.f32.gmra.mxu0 %vm1851_vm1, %v13813_v0 }
 0x427   : > { %11391 = vmatpush3.msra.mxu1 %v13799_v36 }
 0x428   : > { %11393 = vmatmul.mubr.msk.f32.vlgmr.msra.gmra.mxu1 %vm967_vm0, %v13675_v48  ;;  %11406 = vmatprep.subr.mxu1 %v13770_v19  ;;  %v13825_v48 = vld [vmem:[%s12945_s17 + $0x30] sm:$0xff] }
 0x429   : > { %11407 = vmatpush3.msra.mxu1 %v13770_v19  ;;  %11344 = vmatprep.mubr.msk.f32.mxu0 %vm1851_vm1, %v13825_v48 }
 0x42a   : > { %11408 = vmatprep.subr.mxu1 %v13776_v17  ;;  %11345 = vmatmul.mubr.msk.f32.gmra.mxu0 %vm1851_vm1, %v13828_v35 }
 0x42b   : > { %11409 = vmatpush3.msra.mxu1 %v13776_v17  ;;  %11347 = vmatprep.mubr.msk.f32.mxu0 %vm1851_vm1, %v13840_v23 }
 0x42c   : > { %11410 = vmatprep.subr.mxu1 %v13785_v59 }
 0x42d   : > { %11411 = vmatpush3.msra.mxu1 %v13785_v59 }
 0x42e   : > { %11412 = vmatprep.subr.mxu1 %v13799_v36  ;;  %11348 = vmatmul.mubr.msk.f32.gmra.mxu0 %vm1851_vm1, %v13843_v57 }
 0x42f   : > { %11413 = vmatpush3.msra.mxu1 %v13799_v36  ;;  %11350 = vmatprep.mubr.msk.f32.mxu0 %vm1851_vm1, %v13853_v18 }
 0x430   : > { %3403 = vmatprep.subr.mxu1 %v1814_v54  ;;  %v1830_v54 = vld [vmem:[%s16154_s4 + $0x58] sm:$0xff] }
 0x432   : > { %11351 = vmatmul.mubr.msk.f32.gmra.mxu0 %vm1851_vm1, %v13856_v27 }
 0x433   : > { %11353 = vmatprep.mubr.msk.f32.mxu0 %vm1851_vm1, %v13863_v32 }
 0x436   : > { %11354 = vmatmul.mubr.msk.f32.gmra.mxu0 %vm1851_vm1, %v13866_v62 }
 0x437   : > { %11356 = vmatprep.mubr.msk.f32.mxu0 %vm1851_vm1, %v13875_v52 }
 0x43a   : > { %11357 = vmatmul.mubr.msk.f32.gmra.mxu0 %vm1851_vm1, %v13880_v43 }
 0x43b   : > { %11359 = vmatprep.mubr.msk.f32.mxu0 %vm1851_vm1, %v13885_v40 }
 0x43c   : > { %v3190_v61 = vpop.permute.xlu1 %3189 }
 0x43e   : > { %v3188_v33 = vpop.permute.xlu0 %3187  ;;  %11360 = vmatmul.mubr.msk.f32.gmra.mxu0 %vm1851_vm1, %v13888_v42 }
 0x43f   : > { %11414 = vmatprep.mubr.msk.f32.mxu1 %vm967_vm0, %v3188_v33 }
 0x440   : > { %11415 = vmatmul.mubr.msk.f32.vlgmr.msra.gmra.mxu1 %vm967_vm0, %v3190_v61  ;;  %v1846_v61 = vld [vmem:[%s16154_s4 + $0xd8] sm:$0xff] }
 0x441   : > { %3443 = vmatprep.mubr.f32.mxu1 %v16117_v2  ;;  %3404 = vmatpush1.msra.mxu1 %v1813_v11  ;;  %v1845_v11 = vld [vmem:[%s16154_s4 + $0xd0] sm:$0xff] }
 0x442   : > { %3405 = vmatprep.subr.mxu1 %v1812_v8  ;;  %v1829_v8 = vld [vmem:[%s16154_s4 + $0x50] sm:$0xff] }
 0x443   : > { %3406 = vmatpush1.msra.mxu1 %v1811_v3  ;;  %v1844_v3 = vld [vmem:[%s16154_s4 + $0xc8] sm:$0xff] }
 0x444   : > { %3407 = vmatprep.subr.mxu1 %v1810_v56 }
 0x445   : > { %3408 = vmatpush1.msra.mxu1 %v1809_v9  ;;  %v1828_v9 = vld [vmem:[%s16154_s4 + $0x48] sm:$0xff] }
 0x446   : > { %3409 = vmatprep.subr.mxu1 %v1808_v44 }
 0x447   : > { %3410 = vmatpush1.msra.mxu1 %v1807_v47 }
 0x48d   : > { %v13960_v33 = vpop.f32.mrf.mxu0 }
 0x48f   : > { %v13966_v56 = vpop.f32.mrf.mxu0 }
 0x491   : > { %v13969_v44 = vpop.f32.mrf.mxu0 }
 0x493   : > { %v13971_v47 = vpop.f32.mrf.mxu0 }
 0x4e0   : > { %v11383_v50 = vpop.f32.mrf.mxu1 }
 0x4e1   : > { %v2976_v21 = vadd.f32 1e-05, %v11383_v50  ;;  %v13973_v50 = vpop.f32.mrf.mxu0 }
 0x4e2   : > { %v2970_v24 = vpop.f32.mrf.mxu1 }
 0x4e3   : > { %12329 = vrsqrt.f32 %v2976_v21  ;;  %v2971_v34 = vadd.f32 1e-05, %v2970_v24  ;;  %v13975_v21 = vpop.f32.mrf.mxu0 }
 0x4e5   : > { %12331 = vrsqrt.f32 %v2971_v34  ;;  %v13977_v24 = vpop.f32.mrf.mxu0 }
 0x4e7   : > { %v13979_v34 = vpop.f32.mrf.mxu0 }
 0x4e8   : > { %v13903_v13 = vpop.f32.mrf.mxu1 }
 0x4e9   : > { %v3083_v20 = vmul.f32 %v13903_v13, %v13903_v13 }
 0x4ea   : > { %v13905_v58 = vpop.f32.mrf.mxu1 }
 0x4eb   : > { %v3082_v38 = vmul.f32 %v13905_v58, %v13905_v58 }
 0x4ed   : > { %11403 = vmatprep.mubr.msk.f32.mxu0 %vm967_vm0, %v3082_v38  ;;  %v13981_v38 = vpop.f32.mrf.mxu0 }
 0x4ee   : > { %11404 = vmatmul.mubr.msk.f32.vlgmr.msra.gmra.mxu0 %vm967_vm0, %v3083_v20  ;;  %v1843_v20 = vld [vmem:[%s16154_s4 + $0xc0] sm:$0xff] }
 0x4ef   : > { %11418 = vmatpush3.msra.mxu0 %v13625_v55 }
 0x4f0   : > { %v12330_v39 = vpop.eup %12329  ;;  %11419 = vmatprep.subr.mxu0 %v13628_v4 }
 0x4f1   : > { %11420 = vmatpush3.msra.mxu0 %v13628_v4  ;;  %v2982_v14 = vmul.f32 %v12330_v39, %v13753_v45  ;;  %v1848_v45 = vld [vmem:[%s16154_s4 + $0xe8] sm:$0xff]  ;;  %v13984_v39 = vpop.f32.mrf.mxu0 }
 0x4f2   : > { %v12332_v25 = vpop.eup %12331  ;;  %11421 = vmatprep.subr.mxu0 %v13636_v26  ;;  %16165 = vst [vmem:[#allocation29_spill] sm:$0xff] %v13984_v39 }
 0x4f3   : > { %v2981_v7 = vmul.f32 %v12332_v25, %v13755_v41  ;;  %11422 = vmatpush3.msra.mxu0 %v13636_v26  ;;  %v2990_v29 = vmul.f32 %v10158_v6, %v2982_v14  ;;  %v1832_v41 = vld [vmem:[%s16154_s4 + $0x68] sm:$0xff]  ;;  %v1827_v25 = vld [vmem:[%s16154_s4 + $0x40] sm:$0xff]  ;;  %v1826_v14 = vld [vmem:[%s16154_s4 + $0x38] sm:$0xff] }
 0x4f4   : > { %11423 = vmatprep.subr.mxu0 %v13641_v30 }
 0x4f5   : > { %v2989_v55 = vmul.f32 %v10158_v6, %v2981_v7  ;;  %11424 = vmatpush3.msra.mxu0 %v13641_v30  ;;  %v13933_v26 = vadd.f32 %v10159_v51, %v2990_v29  ;;  %v1842_v7 = vld [vmem:[%s16154_s4 + $0xb8] sm:$0xff]  ;;  %v1841_v6 = vld [vmem:[%s16154_s4 + $0xb0] sm:$0xff]  ;;  %v1840_v29 = vld [vmem:[%s16154_s4 + $0xa8] sm:$0xff] }
 0x4f6   : > { %10615 = vmatprep.subr.mxu0 %v13921_v31 }
 0x4f7   : > { %v13928_v4 = vadd.f32 %v10159_v51, %v2989_v55  ;;  %v13990_v55 = vpop.f32.mrf.mxu0  ;;  %v1825_v51 = vld [vmem:[%s16154_s4 + $0x30] sm:$0xff] }
 0x4f8   : > { %16166 = vst [vmem:[#allocation30_spill] sm:$0xff] %v13990_v55 }
 0x4f9   : > { %10172 = vmatmul.mubr.msk.f32.vlgmr.msra.gmra.mxu1 %vm967_vm0, %v13928_v4  ;;  %v13936_v30 = vmul.f32 0.25, %v13928_v4 }
 0x4fa   : > { %3449 = vmatprep.mubr.f32.mxu1 %v16117_v2 }
 0x4fd   : > { %10173 = vmatmul.mubr.msk.f32.gmra.mxu1 %vm967_vm0, %v13933_v26 }
 0x4fe   : > { %11432 = vmatprep.mubr.msk.f32.mxu1 %vm3537_vm2, %v13936_v30 }
 0x500   : > { %v13942_v53 = vpop.f32.mrf.mxu1 }
 0x501   : > { %v3271_v12 = vmul.f32 %v13942_v53, %v13942_v53 }
 0x502   : > { %v13946_v49 = vpop.f32.mrf.mxu1 }
 0x503   : > { %v3270_v46 = vmul.f32 %v13946_v49, %v13946_v49 }
 0x505   : > { %11425 = vmatprep.mubr.msk.f32.mxu0 %vm967_vm0, %v3270_v46  ;;  %v1839_v46 = vld [vmem:[%s16154_s4 + $0xa0] sm:$0xff] }
 0x506   : > { %11426 = vmatmul.mubr.msk.f32.vlgmr.msra.gmra.mxu0 %vm967_vm0, %v3271_v12  ;;  %v1824_v12 = vld [vmem:[%s16154_s4 + $0x28] sm:$0xff] }
 0x507   : > { %10616 = vmatpush3.msra.mxu0 %v1834_v15  ;;  %v1823_v15 = vld [vmem:[%s16154_s4 + $0x20] sm:$0xff] }
 0x508   : > { %10617 = vmatprep.subr.mxu0 %v1849_v60  ;;  %v1838_v60 = vld [vmem:[%s16154_s4 + $0x98] sm:$0xff] }
 0x509   : > { %10618 = vmatpush3.msra.mxu0 %v1833_v1  ;;  %v13998_v1 = vpop.f32.mrf.mxu0 }
 0x50a   : > { %10619 = vmatprep.subr.mxu0 %v1848_v45  ;;  %16167 = vst [vmem:[#allocation31_spill] sm:$0xff] %v13998_v1  ;;  %v1822_v45 = vld [vmem:[%s16154_s4 + $0x18] sm:$0xff] }
 0x50b   : > { %10620 = vmatpush3.msra.mxu0 %v1832_v41  ;;  %v1837_v41 = vld [vmem:[%s16154_s4 + $0x90] sm:$0xff] }
 0x50c   : > { %10621 = vmatprep.subr.mxu0 %v1847_v16  ;;  %v14002_v16 = vpop.f32.mrf.mxu0 }
 0x50d   : > { %10622 = vmatpush3.msra.mxu0 %v1831_v5  ;;  %v1821_v5 = vld [vmem:[%s16154_s4 + $0x10] sm:$0xff] }
 0x50e   : > { %10623 = vmatprep.subr.mxu0 %v1846_v61  ;;  %v1836_v61 = vld [vmem:[%s16154_s4 + $0x88] sm:$0xff] }
 0x50f   : > { %10624 = vmatpush3.msra.mxu0 %v1830_v54  ;;  %v1820_v54 = vld [vmem:[%s16154_s4 + $0x8] sm:$0xff] }
 0x510   : > { %10625 = vmatprep.subr.mxu0 %v1845_v11  ;;  %v1835_v11 = vld [vmem:[%s16154_s4 + $0x80] sm:$0xff] }
 0x511   : > { %10626 = vmatpush3.msra.mxu0 %v1829_v8  ;;  %v14008_v8 = vpop.f32.mrf.mxu0 }
 0x512   : > { %10627 = vmatprep.subr.mxu0 %v1844_v3  ;;  %v1819_v3 = vld [vmem:[%s16154_s4] sm:$0xff] }
 0x513   : > { %10628 = vmatpush3.msra.mxu0 %v1828_v9  ;;  %v14011_v9 = vpop.f32.mrf.mxu0 }
 0x514   : > { %10629 = vmatprep.subr.mxu0 %v1843_v20 }
 0x515   : > { %10630 = vmatpush3.msra.mxu0 %v1827_v25  ;;  %v14013_v20 = vpop.f32.mrf.mxu0 }
 0x516   : > { %10631 = vmatprep.subr.mxu0 %v1842_v7  ;;  %16168 = vst [vmem:[#allocation32_spill] sm:$0xff] %v14013_v20 }
 0x517   : > { %10632 = vmatpush3.msra.mxu0 %v1826_v14  ;;  %v14015_v25 = vpop.f32.mrf.mxu0 }
 0x518   : > { %10633 = vmatprep.subr.mxu0 %v1841_v6  ;;  %16169 = vst [vmem:[#allocation33_spill] sm:$0xff] %v14015_v25 }
 0x519   : > { %10634 = vmatpush3.msra.mxu0 %v1825_v51  ;;  %v14017_v7 = vpop.f32.mrf.mxu0 }
 0x51a   : > { %10635 = vmatprep.subr.mxu0 %v1840_v29  ;;  %16170 = vst [vmem:[#allocation34_spill] sm:$0xff] %v14017_v7  ;;  %v1817_v7 = vld [vmem:[%s16187_s1 + $0x10] sm:$0xff] }
 0x51b   : > { %10636 = vmatpush3.msra.mxu0 %v1824_v12  ;;  %v14019_v14 = vpop.f32.mrf.mxu0 }
 0x51c   : > { %10637 = vmatprep.subr.mxu0 %v1839_v46  ;;  %16171 = vst [vmem:[#allocation35_spill] sm:$0xff] %v14019_v14 }
 0x51d   : > { %10638 = vmatpush3.msra.mxu0 %v1823_v15  ;;  %v14021_v6 = vpop.f32.mrf.mxu0 }
 0x51e   : > { %10639 = vmatprep.subr.mxu0 %v1838_v60  ;;  %16172 = vst [vmem:[#allocation36_spill] sm:$0xff] %v14021_v6  ;;  %v14068_v6 = vld [vmem:[%s16187_s1 + $0x8] sm:$0xff] }
 0x51f   : > { %10640 = vmatpush3.msra.mxu0 %v1822_v45  ;;  %v14023_v51 = vpop.f32.mrf.mxu0 }
 0x520   : > { %10641 = vmatprep.subr.mxu0 %v1837_v41  ;;  %16173 = vst [vmem:[#allocation37_spill] sm:$0xff] %v14023_v51 }
 0x521   : > { %10642 = vmatpush3.msra.mxu0 %v1821_v5  ;;  %v14025_v29 = vpop.f32.mrf.mxu0 }
 0x522   : > { %10643 = vmatprep.subr.mxu0 %v1836_v61  ;;  %16174 = vst [vmem:[#allocation38_spill] sm:$0xff] %v14025_v29  ;;  %v14079_v29 = vld [vmem:[%s16197_s5] ss:$0 sm:$0xff] }
 0x523   : > { %10644 = vmatpush3.msra.mxu0 %v1820_v54  ;;  %v14027_v12 = vpop.f32.mrf.mxu0 }
 0x524   : > { %10645 = vmatprep.subr.mxu0 %v1835_v11  ;;  %16175 = vst [vmem:[#allocation39_spill] sm:$0xff] %v14027_v12  ;;  %v12479_v12 = vld [vmem:[%s12940_s13] sm:$0xff] }
 0x525   : > { %10646 = vmatpush3.msra.mxu0 %v1819_v3  ;;  %v14029_v46 = vpop.f32.mrf.mxu0 }
 0x526   : > { %16176 = vst [vmem:[#allocation40_spill] sm:$0xff] %v14029_v46  ;;  %v1818_v46 = vld [vmem:[%s16187_s1 + $0x18] sm:$0xff] }
 0x527   : > { %v14031_v15 = vpop.f32.mrf.mxu0 }
 0x528   : > { %16177 = vst [vmem:[#allocation41_spill] sm:$0xff] %v14031_v15 }
 0x529   : > { %v14033_v60 = vpop.f32.mrf.mxu0 }
 0x52a   : > { %16178 = vst [vmem:[#allocation42_spill] sm:$0xff] %v14033_v60 }
 0x52b   : > { %v14035_v45 = vpop.f32.mrf.mxu0 }
 0x52c   : > { %16179 = vst [vmem:[#allocation43_spill] sm:$0xff] %v14035_v45 }
 0x52d   : > { %v14037_v41 = vpop.f32.mrf.mxu0 }
 0x52e   : > { %16180 = vst [vmem:[#allocation44_spill] sm:$0xff] %v14037_v41 }
 0x52f   : > { %v14039_v5 = vpop.f32.mrf.mxu0 }
 0x530   : > { %16181 = vst [vmem:[#allocation45_spill] sm:$0xff] %v14039_v5 }
 0x531   : > { %v14041_v61 = vpop.f32.mrf.mxu0 }
 0x532   : > { %16182 = vst [vmem:[#allocation46_spill] sm:$0xff] %v14041_v61 }
 0x533   : > { %v14043_v54 = vpop.f32.mrf.mxu0 }
 0x534   : > { %16183 = vst [vmem:[#allocation47_spill] sm:$0xff] %v14043_v54 }
 0x535   : > { %v14045_v11 = vpop.f32.mrf.mxu0 }
 0x536   : > { %16184 = vst [vmem:[#allocation48_spill] sm:$0xff] %v14045_v11 }
 0x537   : > { %v14047_v3 = vpop.f32.mrf.mxu0 }
 0x538   : > { %16185 = vst [vmem:[#allocation49_spill] sm:$0xff] %v14047_v3 }
 0x539   : > { %v14049_v2 = vpop.f32.mrf.mxu0 }
 0x53a   : > { %16186 = vst [vmem:[#allocation50_spill] sm:$0xff] %v14049_v2 }
 0x53b   : > { %v14051_v15 = vpop.f32.mrf.mxu0 }
 0x53c   : > { %16188 = vst [vmem:[#allocation51_spill] sm:$0xff] %v14051_v15 }
 0x53d   : > { %v14053_v60 = vpop.f32.mrf.mxu0 }
 0x53e   : > { %16189 = vst [vmem:[#allocation52_spill] sm:$0xff] %v14053_v60 }
 0x53f   : > { %v14055_v45 = vpop.f32.mrf.mxu0 }
 0x540   : > { %16190 = vst [vmem:[#allocation53_spill] sm:$0xff] %v14055_v45 }
 0x541   : > { %v14057_v41 = vpop.f32.mrf.mxu0 }
 0x542   : > { %16191 = vst [vmem:[#allocation54_spill] sm:$0xff] %v14057_v41 }
 0x543   : > { %v14059_v5 = vpop.f32.mrf.mxu0 }
 0x544   : > { %16192 = vst [vmem:[#allocation55_spill] sm:$0xff] %v14059_v5  ;;  %v1815_v5 = vld [vmem:[%s16187_s1] sm:$0xff] }
 0x545   : > { %v14061_v61 = vpop.f32.mrf.mxu0 }
 0x546   : > { %16193 = vst [vmem:[#allocation56_spill] sm:$0xff] %v14061_v61 }
 0x547   : > { %v14063_v54 = vpop.f32.mrf.mxu0 }
 0x548   : > { %16194 = vst [vmem:[#allocation57_spill] sm:$0xff] %v14063_v54 }
 0x549   : > { %v14065_v3 = vpop.f32.mrf.mxu0 }
 0x54a   : > { %16195 = vst [vmem:[#allocation58_spill] sm:$0xff] %v14065_v3 }
 0x5ae   : > { %v11405_v2 = vpop.f32.mrf.mxu0 }
 0x5af   : > { %v3162_v11 = vadd.f32 1e-05, %v11405_v2  ;;  %v14075_v2 = vld [vmem:[%s16196_s3] ss:$0 sm:$0xff] }
 0x5b0   : > { %v3156_v15 = vpop.f32.mrf.mxu0 }
 0x5b1   : > { %12333 = vrsqrt.f32 %v3162_v11  ;;  %v3157_v60 = vadd.f32 1e-05, %v3156_v15 }
 0x5b3   : > { %12335 = vrsqrt.f32 %v3157_v60 }
 0x5b9   : > { %v3445_v45 = vpop.f32.mrf.mxu1 }
 0x5ba   : > { %v3456_v14 = vmul.f32 %v3445_v45, %v1815_v5 }
 0x5bb   : > { %v3447_v41 = vpop.f32.mrf.mxu1 }
 0x5bc   : > { %v3457_v61 = vmul.f32 %v3447_v41, %v14068_v6 }
 0x5bd   : > { %v3451_v54 = vpop.f32.mrf.mxu1 }
 0x5be   : > { %v12334_v3 = vpop.eup %12333  ;;  %3524 = vmatprep.mubr.f32.mxu0 %v3457_v61  ;;  %v3458_v51 = vmul.f32 %v3451_v54, %v1817_v7 }
 0x5bf   : > { %v3453_v11 = vpop.f32.mrf.mxu1  ;;  %3525 = vmatmul.mubr.f32.vlgmr.msra.gmra.mxu0 %v3456_v14  ;;  %v3168_v15 = vmul.f32 %v12334_v3, %v13903_v13 }
 0x5c0   : > { %v12336_v60 = vpop.eup %12335  ;;  %v3459_v25 = vmul.f32 %v3453_v11, %v1818_v46  ;;  %v10170_v46 = vld [vmem:[%s16198_s25] ss:$0 sm:$0xff] }
 0x5c1   : > { %v3176_v41 = vmul.f32 %v14075_v2, %v3168_v15  ;;  %v3167_v45 = vmul.f32 %v12336_v60, %v13905_v58  ;;  %v10171_v11 = vld [vmem:[%s16199_s29] ss:$0 sm:$0xff] }
 0x5c2   : > { %3529 = vmatprep.mubr.f32.mxu0 %v3459_v25 }
 0x5c3   : > { %3530 = vmatmul.mubr.f32.gmra.mxu0 %v3458_v51  ;;  %v3184_v5 = vadd.f32 %v14079_v29, %v3176_v41  ;;  %v3175_v61 = vmul.f32 %v14075_v2, %v3167_v45  ;;  %v3536_v51 = vmul.f32 0.25, %v13933_v26 }
 0x5c4   : > { %11515 = vmatprep.mubr.msk.f32.mxu0 %vm1851_vm1, %v12479_v12 }
 0x5c5   : > { %11428 = vmatprep.subr.msk.mxu1 %vm3537_vm2, %v3184_v5  ;;  %v3183_v13 = vadd.f32 %v14079_v29, %v3175_v61 }
 0x5c6   : > { %11429 = vmatpush3.xpose.msk.msra.mxu1 %vm3537_vm2, %v3184_v5  ;;  %v11427_v7 = vpop.f32.mrf.mxu0 }
 0x5c7   : > { %v3350_v14 = vadd.f32 1e-05, %v11427_v7  ;;  %11430 = vmatprep.subr.msk.mxu1 %vm3537_vm2, %v3183_v13 }
 0x5c8   : > { %v3344_v58 = vpop.f32.mrf.mxu0 }
 0x5c9   : > { %12337 = vrsqrt.f32 %v3350_v14  ;;  %v3345_v25 = vadd.f32 1e-05, %v3344_v58 }
 0x5ca   : > { %11431 = vmatpush3.xpose.msk.msra.mxu1 %vm3537_vm2, %v3183_v13 }
 0x5cb   : > { %12339 = vrsqrt.f32 %v3345_v25 }
 0x5cd   : > { %11433 = vmatmul.mubr.msk.f32.vlgmr.msra.gmra.mxu1 %vm3537_vm2, %v3536_v51 }
 0x5d6   : > { %v12338_v12 = vpop.eup %12337 }
 0x5d7   : > { %v3356_v54 = vmul.f32 %v12338_v12, %v13942_v53 }
 0x5d8   : > { %v12340_v3 = vpop.eup %12339 }
 0x5d9   : > { %v3364_v15 = vmul.f32 %v10170_v46, %v3356_v54  ;;  %v3355_v60 = vmul.f32 %v12340_v3, %v13946_v49 }
 0x5db   : > { %v14098_v41 = vadd.f32 %v10171_v11, %v3364_v15  ;;  %v3363_v45 = vmul.f32 %v10170_v46, %v3355_v60 }
 0x5dd   : > { %11435 = vmatprep.subr.mxu1 %v14098_v41  ;;  %v14101_v61 = vadd.f32 %v10171_v11, %v3363_v45 }
 0x5de   : > { %11436 = vmatpush3.msra.mxu1 %v14098_v41 }
 0x5df   : > { %11437 = vmatprep.subr.mxu1 %v14101_v61 }
 0x5e0   : > { %11438 = vmatpush3.msra.mxu1 %v14101_v61 }
 0x67f   : > { %v10647_v7 = vpop.f32.mrf.mxu0 }
 0x681   : > { %v10648_v53 = vpop.f32.mrf.mxu0 }
 0x682   : > { %v10649_v49 = vadd.f32 %v10648_v53, %v10647_v7 }
 0x683   : > { %v10650_v14 = vpop.f32.mrf.mxu0 }
 0x685   : > { %v10651_v58 = vpop.f32.mrf.mxu0 }
 0x686   : > { %v10652_v25 = vadd.f32 %v10651_v58, %v10650_v14 }
 0x68d   : > { %v11434_v12 = vpop.f32.mrf.mxu1 }
 0x68e   : > { %v3622_v54 = vadd.f32 %v11434_v12, %v10652_v25 }
 0x68f   : > { %v3616_v3 = vpop.f32.mrf.mxu1 }
 0x690   : > { %v3617_v46 = vadd.f32 %v10649_v49, %v3616_v3  ;;  %v3628_v15 = vsel %vm3537_vm2, %v3622_v54, -inf }
 0x691   : > { %3629 = vmax.xlane.f32.xlu0 %v3628_v15 }
 0x692   : > { %v3625_v11 = vsel %vm3537_vm2, %v3617_v46, -inf }
 0x693   : > { %3626 = vmax.xlane.f32.xlu1 %v3625_v11 }
 0x71a   : > { %v3630_v60 = vpop.xlane.xlu0 %3629 }
 0x71b   : > { %v3632_v45 = vsub.f32 %v3622_v54, %v3630_v60 }
 0x71c   : > { %v3627_v1 = vpop.xlane.xlu1 %3626 }
 0x71d   : > { %v3635_v55 = vmul.f32 1.442695, %v3632_v45  ;;  %v3631_v20 = vsub.f32 %v3617_v46, %v3627_v1 }
 0x71f   : > { %12341 = vpow2.f32 %v3635_v55  ;;  %v3633_v39 = vmul.f32 1.442695, %v3631_v20 }
 0x721   : > { %12343 = vpow2.f32 %v3633_v39 }
 0x72c   : > { %v12342_v14 = vpop.eup %12341 }
 0x72d   : > { %v3640_v7 = vsel %vm3537_vm2, %v12342_v14, 0.0 }
 0x72e   : > { %v12344_v53 = vpop.eup %12343  ;;  %3641 = vadd.xlane.f32.xlu1 %v3640_v7 }
 0x72f   : > { %v3637_v58 = vsel %vm3537_vm2, %v12344_v53, 0.0 }
 0x730   : > { %3638 = vadd.xlane.f32.xlu0 %v3637_v58 }
 0x73f   : > { %3734 = vrot.lane.b32.xlu1 %v3183_v13, %s12916_s2 }
 0x743   : > { %3730 = vrot.lane.b32.xlu1 %v13936_v30, %s12916_s2 }
 0x746   : > { %3736 = vrot.lane.b32.xlu0 %v3184_v5, %s12916_s2 }
 0x747   : > { %3732 = vrot.lane.b32.xlu1 %v3536_v51, %s12916_s2 }
 0x74a   : > { %3740 = vrot.lane.b32.xlu0 %v10649_v49, %s12916_s2 }
 0x74b   : > { %3742 = vrot.lane.b32.xlu1 %v10652_v25, %s12916_s2 }
 0x7b7   : > { %v3642_v39 = vpop.xlane.xlu1 %3641 }
 0x7b8   : > { %12345 = vrcp.f32 %v3642_v39  ;;  %v12480_v39 = vld [vmem:[%s16153_s8] ss:$0 sm:$0xff] }
 0x7b9   : > { %v3639_v55 = vpop.xlane.xlu0 %3638 }
 0x7ba   : > { %12347 = vrcp.f32 %v3639_v55  ;;  %v14135_v55 = vadd.f32 %v12480_v39, %v13977_v24  ;;  %v14155_v24 = vadd.f32 %v12480_v39, %v13966_v56 }
 0x7bb   : > { %v3735_v20 = vpop.permute.xlu1 %3734 }
 0x7bd   : > { %v3737_v1 = vpop.permute.xlu0 %3736 }
 0x7be   : > { %11442 = vmatprep.subr.msk.mxu1 %vm3537_vm2, %v3737_v1 }
 0x7bf   : > { %v3731_v5 = vpop.permute.xlu1 %3730 }
 0x7c1   : > { %v3741_v45 = vpop.permute.xlu0 %3740 }
 0x7c3   : > { %v3733_v51 = vpop.permute.xlu1 %3732 }
 0x7c5   : > { %v12346_v13 = vpop.eup %12345 }
 0x7c6   : > { %v3646_v30 = vmul.f32 %v12346_v13, %v12342_v14 }
 0x7c7   : > { %v12348_v12 = vpop.eup %12347  ;;  %v3743_v15 = vpop.permute.xlu1 %3742 }
 0x7c8   : > { %v3645_v54 = vmul.f32 %v12348_v12, %v12344_v53 }
 0x7ca   : > { %11439 = vmatprep.mubr.msk.f32.mxu1 %vm3537_vm2, %v3645_v54 }
 0x7cb   : > { %11440 = vmatmul.mubr.msk.f32.vlgmr.msra.gmra.mxu1 %vm3537_vm2, %v3646_v30 }
 0x7cc   : > { %11443 = vmatpush3.xpose.msk.msra.mxu1 %vm3537_vm2, %v3737_v1  ;;  %11446 = vmatprep.mubr.msk.f32.mxu1 %vm3537_vm2, %v3731_v5  ;;  %v14140_v1 = vadd.f32 %v12480_v39, %v13973_v50 }
 0x7cd   : > { %11444 = vmatprep.subr.msk.mxu1 %vm3537_vm2, %v3735_v20 }
 0x7d0   : > { %11445 = vmatpush3.xpose.msk.msra.mxu1 %vm3537_vm2, %v3735_v20  ;;  %v14145_v20 = vadd.f32 %v12480_v39, %v13975_v21 }
 0x7d3   : > { %11447 = vmatmul.mubr.msk.f32.vlgmr.msra.gmra.mxu1 %vm3537_vm2, %v3733_v51 }
 0x88b   : > { %v11441_v25 = vpop.f32.mrf.mxu1 }
 0x88c   : > { %v3725_v49 = vadd.f32 %v11441_v25, %v13933_v26 }
 0x88d   : > { %v3719_v3 = vpop.f32.mrf.mxu1 }
 0x88e   : > { %3729 = vst.msk [vmem:[#allocation2 + $0x8] sm:$0xff] %vm3537_vm2, %v3725_v49  ;;  %v3720_v46 = vadd.f32 %v3719_v3, %v13928_v4 }
 0x890   : > { %3728 = vst.msk [vmem:[#allocation2] sm:$0xff] %vm3537_vm2, %v3720_v46  ;;  %v1634_v46 = vadd.f32 %v12480_v39, %v13979_v34 }
 0x893   : > { %v11448_v11 = vpop.f32.mrf.mxu1 }
 0x894   : > { %v3826_v60 = vadd.f32 %v11448_v11, %v3743_v15  ;;  %v1626_v15 = vadd.f32 %v12480_v39, %v13969_v44  ;;  %v14168_v11 = vadd.f32 %v12480_v39, %v13971_v47 }
 0x895   : > { %v3820_v14 = vpop.f32.mrf.mxu1 }
 0x896   : > { %v3821_v7 = vadd.f32 %v3820_v14, %v3741_v45  ;;  %v3832_v53 = vsel %vm3537_vm2, %v3826_v60, -inf }
 0x897   : > { %3833 = vmax.xlane.f32.xlu1 %v3832_v53 }
 0x898   : > { %v3829_v58 = vsel %vm3537_vm2, %v3821_v7, -inf }
 0x899   : > { %3830 = vmax.xlane.f32.xlu0 %v3829_v58 }
 0x8a8   : > { %3853 = vrot.lane.b32.xlu1 %v14101_v61, %s12916_s2  ;;  %v14150_v61 = vadd.f32 %v12480_v39, %v13960_v33 }
 0x8ac   : > { %4134 = vrot.lane.b32.xlu1 %v14135_v55, %s16200_s18 }
 0x8b0   : > { %4132 = vrot.lane.b32.xlu1 %v14140_v1, %s16200_s18 }
 0x8b4   : > { %4128 = vrot.lane.b32.xlu1 %v14145_v20, %s16200_s18 }
 0x8b8   : > { %4124 = vrot.lane.b32.xlu1 %v14150_v61, %s16200_s18 }
 0x8bc   : > { %4120 = vrot.lane.b32.xlu1 %v14155_v24, %s16200_s18 }
 0x920   : > { %v3834_v50 = vpop.xlane.xlu1 %3833 }
 0x921   : > { %v3836_v13 = vsub.f32 %v3826_v60, %v3834_v50 }
 0x922   : > { %v3831_v12 = vpop.xlane.xlu0 %3830 }
 0x923   : > { %v3839_v21 = vmul.f32 1.442695, %v3836_v13  ;;  %v3835_v54 = vsub.f32 %v3821_v7, %v3831_v12  ;;  %v12481_v12 = vld [vmem:[%s12935_s9] sm:$0xff] }
 0x924   : > { %v3854_v30 = vpop.permute.xlu1 %3853 }
 0x925   : > { %12349 = vpow2.f32 %v3839_v21  ;;  %v3837_v5 = vmul.f32 1.442695, %v3835_v54  ;;  %v12482_v21 = vld [vmem:[%s12940_s13 + $0x8] sm:$0xff]  ;;  %v12483_v54 = vld [vmem:[%s12940_s13 + $0x10] sm:$0xff] }
 0x927   : > { %12351 = vpow2.f32 %v3837_v5  ;;  %v12491_v5 = vld [vmem:[%s12940_s13 + $0x40] sm:$0xff] }
 0x928   : > { %v4135_v33 = vpop.permute.xlu1 %4134 }
 0x929   : > { %11499 = vmatprep.subr.mxu0 %v4135_v33 }
 0x92a   : > { %11500 = vmatpush3.msra.mxu0 %v4135_v33  ;;  %v12494_v33 = vld [vmem:[%s12940_s13 + $0x48] sm:$0xff] }
 0x92c   : > { %v4133_v51 = vpop.permute.xlu1 %4132 }
 0x92d   : > { %11501 = vmatprep.subr.mxu0 %v4133_v51 }
 0x92e   : > { %11502 = vmatpush3.msra.mxu0 %v4133_v51  ;;  %v12495_v51 = vld [vmem:[%s12935_s9 + $0x20] sm:$0xff] }
 0x932   : > { %v12350_v56 = vpop.eup %12349 }
 0x933   : > { %v3844_v25 = vsel %vm3537_vm2, %v12350_v56, 0.0 }
 0x934   : > { %v12352_v49 = vpop.eup %12351  ;;  %3845 = vadd.xlane.f32.xlu0 %v3844_v25  ;;  %v14226_v25 = vld [vmem:[%s12990_s30 + $0x18] sm:$0xff] }
 0x935   : > { %v3841_v3 = vsel %vm3537_vm2, %v12352_v49, 0.0 }
 0x938   : > { %3842 = vadd.xlane.f32.xlu0 %v3841_v3  ;;  %v12500_v3 = vld [vmem:[%s12940_s13 + $0x58] sm:$0xff] }
 0x94e   : > { %3855 = vrot.lane.b32.xlu0 %v14098_v41, %s12916_s2  ;;  %v4129_v41 = vpop.permute.xlu1 %4128 }
 0x952   : > { %4130 = vrot.lane.b32.xlu0 %v1634_v46, %s16200_s18  ;;  %v4125_v44 = vpop.permute.xlu1 %4124 }
 0x956   : > { %4126 = vrot.lane.b32.xlu0 %v1626_v15, %s16200_s18  ;;  %v4121_v13 = vpop.permute.xlu1 %4120 }
 0x95a   : > { %4122 = vrot.lane.b32.xlu0 %v14168_v11, %s16200_s18 }
 0x9bd   : > { %v3846_v60 = vpop.xlane.xlu0 %3845 }
 0x9be   : > { %12353 = vrcp.f32 %v3846_v60  ;;  %v12504_v60 = vld [vmem:[%s12935_s9 + $0x38] sm:$0xff] }
 0x9c1   : > { %v3843_v45 = vpop.xlane.xlu0 %3842 }
 0x9c2   : > { %12355 = vrcp.f32 %v3843_v45  ;;  %v12505_v45 = vld [vmem:[%s12940_s13 + $0x68] sm:$0xff] }
 0x9c5   : > { %v3856_v14 = vpop.permute.xlu0 %3855 }
 0x9c6   : > { %11449 = vmatprep.subr.mxu1 %v3856_v14 }
 0x9c7   : > { %11450 = vmatpush3.msra.mxu1 %v3856_v14  ;;  %v12506_v14 = vld [vmem:[%s12935_s9 + $0x40] sm:$0xff] }
 0x9c8   : > { %11451 = vmatprep.subr.mxu1 %v3854_v30 }
 0x9c9   : > { %v4131_v34 = vpop.permute.xlu0 %4130  ;;  %11452 = vmatpush3.msra.mxu1 %v3854_v30  ;;  %v12490_v30 = vld [vmem:[%s12935_s9 + $0x10] sm:$0xff] }
 0x9ca   : > { %11456 = vmatprep.subr.mxu1 %v14135_v55  ;;  %11503 = vmatprep.subr.mxu0 %v4131_v34 }
 0x9cb   : > { %11504 = vmatpush3.msra.mxu0 %v4131_v34  ;;  %v12354_v7 = vpop.eup %12353  ;;  %v12508_v34 = vld [vmem:[%s13132_s28 + $0x60] sm:$0xff] }
 0x9cc   : > { %11505 = vmatprep.subr.mxu0 %v4129_v41  ;;  %v3850_v50 = vmul.f32 %v12354_v7, %v12350_v56  ;;  %v12496_v56 = vld [vmem:[%s12940_s13 + $0x50] sm:$0xff] }
 0x9cd   : > { %v4127_v47 = vpop.permute.xlu0 %4126  ;;  %11506 = vmatpush3.msra.mxu0 %v4129_v41  ;;  %v12507_v41 = vld [vmem:[%s12940_s13 + $0x70] sm:$0xff] }
 0x9ce   : > { %11507 = vmatprep.subr.mxu0 %v4127_v47  ;;  %v12511_v7 = vld [vmem:[%s12935_s9 + $0x50] sm:$0xff] }
 0x9cf   : > { %v12356_v53 = vpop.eup %12355  ;;  %11508 = vmatpush3.msra.mxu0 %v4127_v47  ;;  %v12510_v47 = vld [vmem:[%s12940_s13 + $0x78] sm:$0xff] }
 0x9d0   : > { %11509 = vmatprep.subr.mxu0 %v4125_v44  ;;  %v3849_v58 = vmul.f32 %v12356_v53, %v12352_v49  ;;  %v12499_v49 = vld [vmem:[%s12935_s9 + $0x28] sm:$0xff]  ;;  %v12512_v53 = vld [vmem:[%s12940_s13 + $0x80] sm:$0xff] }
 0x9d1   : > { %v4123_v39 = vpop.permute.xlu0 %4122  ;;  %11510 = vmatpush3.msra.mxu0 %v4125_v44  ;;  %v12509_v44 = vld [vmem:[%s12935_s9 + $0x48] sm:$0xff] }
 0x9d2   : > { %11453 = vmatprep.mubr.msk.f32.mxu1 %vm3537_vm2, %v3849_v58  ;;  %11511 = vmatprep.subr.mxu0 %v4123_v39  ;;  %v12513_v58 = vld [vmem:[%s13132_s28 + $0x58] sm:$0xff] }
 0x9d3   : > { %11454 = vmatmul.mubr.msk.f32.vlgmr.msra.gmra.mxu1 %vm3537_vm2, %v3850_v50  ;;  %11512 = vmatpush3.msra.mxu0 %v4123_v39  ;;  %v12514_v39 = vld [vmem:[%s12935_s9 + $0x58] sm:$0xff]  ;;  %v12515_v50 = vld [vmem:[%s12940_s13 + $0x88] sm:$0xff] }
 0x9d4   : > { %11457 = vmatpush3.msra.mxu1 %v14135_v55  ;;  %11513 = vmatprep.subr.mxu0 %v4121_v13  ;;  %v12484_v55 = vld [vmem:[%s12940_s13 + $0x18] sm:$0xff] }
 0x9d5   : > { %11458 = vmatprep.subr.mxu1 %v14140_v1  ;;  %11514 = vmatpush3.msra.mxu0 %v4121_v13  ;;  %v12516_v13 = vld [vmem:[%s12935_s9 + $0x60] sm:$0xff] }
 0x9d6   : > { %11459 = vmatpush3.msra.mxu1 %v14140_v1  ;;  %11472 = vmatprep.mubr.msk.f32.mxu1 %vm1851_vm1, %v12481_v12  ;;  %v12485_v1 = vld [vmem:[%s12940_s13 + $0x20] sm:$0xff]  ;;  %v12517_v12 = vld [vmem:[%s13132_s28 + $0x50] sm:$0xff] }
 0x9d7   : > { %11460 = vmatprep.subr.mxu1 %v1634_v46  ;;  %11516 = vmatmul.mubr.msk.f32.vlgmr.msra.gmra.mxu0 %vm1851_vm1, %v12482_v21  ;;  %v12518_v21 = vld [vmem:[%s13132_s28 + $0x48] sm:$0xff] }
 0x9d8   : > { %11461 = vmatpush3.msra.mxu1 %v1634_v46  ;;  %11518 = vmatprep.mubr.msk.f32.mxu0 %vm1851_vm1, %v12483_v54  ;;  %v12501_v46 = vld [vmem:[%s12935_s9 + $0x30] sm:$0xff]  ;;  %v12519_v54 = vld [vmem:[%s12935_s9 + $0x68] sm:$0xff] }
 0x9d9   : > { %11462 = vmatprep.subr.mxu1 %v14145_v20  ;;  %11585 = vmatprep.subr.mxu0 %v13770_v19 }
 0x9da   : > { %11463 = vmatpush3.msra.mxu1 %v14145_v20  ;;  %11586 = vmatpush3.msra.mxu0 %v13770_v19  ;;  %v12486_v19 = vld [vmem:[%s12940_s13 + $0x28] sm:$0xff]  ;;  %v12487_v20 = vld [vmem:[%s12940_s13 + $0x30] sm:$0xff] }
 0x9db   : > { %11464 = vmatprep.subr.mxu1 %v1626_v15  ;;  %11519 = vmatmul.mubr.msk.f32.gmra.mxu0 %vm1851_vm1, %v12484_v55  ;;  %v12520_v55 = vld [vmem:[%s12935_s9 + $0x70] sm:$0xff] }
 0x9dc   : > { %11465 = vmatpush3.msra.mxu1 %v1626_v15  ;;  %11521 = vmatprep.mubr.msk.f32.mxu0 %vm1851_vm1, %v12485_v1  ;;  %v12502_v15 = vld [vmem:[%s12940_s13 + $0x60] sm:$0xff] }
 0x9dd   : > { %11466 = vmatprep.subr.mxu1 %v14150_v61  ;;  %11587 = vmatprep.subr.mxu0 %v13776_v17  ;;  %v12521_v1 = vld [vmem:[%s13132_s28 + $0x40] sm:$0xff] }
 0x9de   : > { %11467 = vmatpush3.msra.mxu1 %v14150_v61  ;;  %11588 = vmatpush3.msra.mxu0 %v13776_v17  ;;  %v12488_v17 = vld [vmem:[%s12935_s9 + $0x8] sm:$0xff]  ;;  %v12489_v61 = vld [vmem:[%s12940_s13 + $0x38] sm:$0xff] }
 0x9df   : > { %11468 = vmatprep.subr.mxu1 %v14168_v11  ;;  %11522 = vmatmul.mubr.msk.f32.gmra.mxu0 %vm1851_vm1, %v12486_v19  ;;  %v12522_v19 = vld [vmem:[%s12935_s9 + $0x78] sm:$0xff] }
 0x9e0   : > { %11469 = vmatpush3.msra.mxu1 %v14168_v11  ;;  %11524 = vmatprep.mubr.msk.f32.mxu0 %vm1851_vm1, %v12487_v20  ;;  %v12503_v11 = vld [vmem:[%s13132_s28 + $0x68] sm:$0xff]  ;;  %v12523_v20 = vld [vmem:[%s12935_s9 + $0x80] sm:$0xff] }
 0x9e1   : > { %11470 = vmatprep.subr.mxu1 %v14155_v24  ;;  %11589 = vmatprep.subr.mxu0 %v13785_v59 }
 0x9e2   : > { %11471 = vmatpush3.msra.mxu1 %v14155_v24  ;;  %11590 = vmatpush3.msra.mxu0 %v13785_v59  ;;  %v12492_v59 = vld [vmem:[%s13132_s28 + $0x78] sm:$0xff] }
 0x9e3   : > { %11473 = vmatmul.mubr.msk.f32.vlgmr.msra.gmra.mxu1 %vm1851_vm1, %v12488_v17  ;;  %11525 = vmatmul.mubr.msk.f32.gmra.mxu0 %vm1851_vm1, %v12489_v61  ;;  %v12493_v24 = vld [vmem:[%s12935_s9 + $0x18] sm:$0xff]  ;;  %v12524_v17 = vld [vmem:[%s12935_s9 + $0x88] sm:$0xff]  ;;  %v14285_v61 = vld [vmem:[%s12990_s30 + $0x10] sm:$0xff] }
 0x9e4   : > { %11475 = vmatprep.mubr.msk.f32.mxu1 %vm1851_vm1, %v12490_v30  ;;  %11527 = vmatprep.mubr.msk.f32.mxu0 %vm1851_vm1, %v12491_v5  ;;  %v14292_v30 = vld [vmem:[%s12990_s30 + $0x8] sm:$0xff] }
 0x9e5   : > { %11591 = vmatprep.subr.mxu0 %v13799_v36  ;;  %11542 = vmatprep.subr.mxu1 %v12492_v59 }
 0x9e6   : > { %11592 = vmatpush3.msra.mxu0 %v13799_v36  ;;  %11543 = vmatpush3.msra.mxu1 %v12492_v59  ;;  %v12498_v36 = vld [vmem:[%s13132_s28 + $0x70] sm:$0xff] }
 0x9e7   : > { %11476 = vmatmul.mubr.msk.f32.gmra.mxu1 %vm1851_vm1, %v12493_v24  ;;  %11528 = vmatmul.mubr.msk.f32.gmra.mxu0 %vm1851_vm1, %v12494_v33 }
 0x9e8   : > { %11478 = vmatprep.mubr.msk.f32.mxu1 %vm1851_vm1, %v12495_v51  ;;  %11530 = vmatprep.mubr.msk.f32.mxu0 %vm1851_vm1, %v12496_v56  ;;  %v12531_v56 = vld [vmem:[%s12980_s19 + $0x3] ss:$0 sm:$0xff] }
 0x9e9   : > { %11596 = vmatprep.subr.mxu0 %v14226_v25  ;;  %11544 = vmatprep.subr.mxu1 %v12498_v36 }
 0x9ea   : > { %11545 = vmatpush3.msra.mxu1 %v12498_v36 }
 0x9eb   : > { %11479 = vmatmul.mubr.msk.f32.gmra.mxu1 %vm1851_vm1, %v12499_v49  ;;  %11531 = vmatmul.mubr.msk.f32.gmra.mxu0 %vm1851_vm1, %v12500_v3 }
 0x9ec   : > { %11481 = vmatprep.mubr.msk.f32.mxu1 %vm1851_vm1, %v12501_v46  ;;  %11533 = vmatprep.mubr.msk.f32.mxu0 %vm1851_vm1, %v12502_v15 }
 0x9ed   : > { %11546 = vmatprep.subr.mxu1 %v12503_v11 }
 0x9ee   : > { %11547 = vmatpush3.msra.mxu1 %v12503_v11 }
 0x9ef   : > { %11482 = vmatmul.mubr.msk.f32.gmra.mxu1 %vm1851_vm1, %v12504_v60  ;;  %11534 = vmatmul.mubr.msk.f32.gmra.mxu0 %vm1851_vm1, %v12505_v45 }
 0x9f0   : > { %11484 = vmatprep.mubr.msk.f32.mxu1 %vm1851_vm1, %v12506_v14  ;;  %11536 = vmatprep.mubr.msk.f32.mxu0 %vm1851_vm1, %v12507_v41  ;;  %v12532_v14 = vld [vmem:[%s12980_s19 + $0x4] ss:$0 sm:$0xff] }
 0x9f1   : > { %11548 = vmatprep.subr.mxu1 %v12508_v34 }
 0x9f2   : > { %11549 = vmatpush3.msra.mxu1 %v12508_v34 }
 0x9f3   : > { %11485 = vmatmul.mubr.msk.f32.gmra.mxu1 %vm1851_vm1, %v12509_v44  ;;  %11537 = vmatmul.mubr.msk.f32.gmra.mxu0 %vm1851_vm1, %v12510_v47 }
 0x9f4   : > { %11487 = vmatprep.mubr.msk.f32.mxu1 %vm1851_vm1, %v12511_v7  ;;  %11539 = vmatprep.mubr.msk.f32.mxu0 %vm1851_vm1, %v12512_v53 }
 0x9f5   : > { %11550 = vmatprep.subr.mxu1 %v12513_v58 }
 0x9f6   : > { %11551 = vmatpush3.msra.mxu1 %v12513_v58 }
 0x9f7   : > { %11488 = vmatmul.mubr.msk.f32.gmra.mxu1 %vm1851_vm1, %v12514_v39  ;;  %11540 = vmatmul.mubr.msk.f32.gmra.mxu0 %vm1851_vm1, %v12515_v50  ;;  %v12533_v50 = vld [vmem:[%s12980_s19 + $0x5] ss:$0 sm:$0xff] }
 0x9f8   : > { %11490 = vmatprep.mubr.msk.f32.mxu1 %vm1851_vm1, %v12516_v13  ;;  %11552 = vmatprep.subr.mxu1 %v12517_v12 }
 0x9f9   : > { %11553 = vmatpush3.msra.mxu1 %v12517_v12 }
 0x9fa   : > { %11554 = vmatprep.subr.mxu1 %v12518_v21 }
 0x9fb   : > { %11491 = vmatmul.mubr.msk.f32.gmra.mxu1 %vm1851_vm1, %v12519_v54 }
 0x9fc   : > { %11493 = vmatprep.mubr.msk.f32.mxu1 %vm1851_vm1, %v12520_v55  ;;  %11555 = vmatpush3.msra.mxu1 %v12518_v21 }
 0x9fd   : > { %11556 = vmatprep.subr.mxu1 %v12521_v1 }
 0x9fe   : > { %11557 = vmatpush3.msra.mxu1 %v12521_v1 }
 0x9ff   : > { %11494 = vmatmul.mubr.msk.f32.gmra.mxu1 %vm1851_vm1, %v12522_v19  ;;  %11640 = vmatprep.subr.mxu1 %v14226_v25 }
 0xa00   : > { %11496 = vmatprep.mubr.msk.f32.mxu1 %vm1851_vm1, %v12523_v20 }
 0xa03   : > { %11497 = vmatmul.mubr.msk.f32.gmra.mxu1 %vm1851_vm1, %v12524_v17  ;;  %v12534_v17 = vld [vmem:[%s12980_s19 + $0x6] ss:$0 sm:$0xff] }
 0xa04   : > { %11558 = vmatprep.mubr.msk.f32.mxu1 %vm1851_vm1, %v13764_v63  ;;  %v14299_v63 = vld [vmem:[%s12990_s30] sm:$0xff] }
 0xa07   : > { %11559 = vmatmul.mubr.msk.f32.vlgmr.msra.gmra.mxu1 %vm1851_vm1, %v13767_v37 }
 0xa08   : > { %11641 = vmatpush3.msra.mxu1 %v14226_v25  ;;  %11561 = vmatprep.mubr.msk.f32.mxu1 %vm1851_vm1, %v13789_v28 }
 0xa09   : > { %11642 = vmatprep.subr.mxu1 %v14285_v61 }
 0xa0a   : > { %11643 = vmatpush3.msra.mxu1 %v14285_v61 }
 0xa0b   : > { %11562 = vmatmul.mubr.msk.f32.gmra.mxu1 %vm1851_vm1, %v13793_v10  ;;  %11644 = vmatprep.subr.mxu1 %v14292_v30  ;;  %v12528_v10 = vld [vmem:[%s12980_s19] ss:$0 sm:$0xff] }
 0xa0c   : > { %11564 = vmatprep.mubr.msk.f32.mxu1 %vm1851_vm1, %v13810_v22  ;;  %11645 = vmatpush3.msra.mxu1 %v14292_v30 }
 0xa0d   : > { %11646 = vmatprep.subr.mxu1 %v14299_v63 }
 0xa0e   : > { %11647 = vmatpush3.msra.mxu1 %v14299_v63 }
 0xa0f   : > { %11565 = vmatmul.mubr.msk.f32.gmra.mxu1 %vm1851_vm1, %v13813_v0  ;;  %10783 = vmatprep.subr.mxu1 %v13921_v31 }
 0xa10   : > { %11567 = vmatprep.mubr.msk.f32.mxu1 %vm1851_vm1, %v13825_v48 }
 0xa13   : > { %11568 = vmatmul.mubr.msk.f32.gmra.mxu1 %vm1851_vm1, %v13828_v35  ;;  %v12529_v35 = vld [vmem:[%s12980_s19 + $0x1] ss:$0 sm:$0xff] }
 0xa14   : > { %11570 = vmatprep.mubr.msk.f32.mxu1 %vm1851_vm1, %v13840_v23 }
 0xa17   : > { %11571 = vmatmul.mubr.msk.f32.gmra.mxu1 %vm1851_vm1, %v13843_v57 }
 0xa18   : > { %11573 = vmatprep.mubr.msk.f32.mxu1 %vm1851_vm1, %v13853_v18 }
 0xa1b   : > { %11574 = vmatmul.mubr.msk.f32.gmra.mxu1 %vm1851_vm1, %v13856_v27 }
 0xa1c   : > { %11576 = vmatprep.mubr.msk.f32.mxu1 %vm1851_vm1, %v13863_v32 }
 0xa1f   : > { %11577 = vmatmul.mubr.msk.f32.gmra.mxu1 %vm1851_vm1, %v13866_v62 }
 0xa20   : > { %11579 = vmatprep.mubr.msk.f32.mxu1 %vm1851_vm1, %v13875_v52 }
 0xa23   : > { %11580 = vmatmul.mubr.msk.f32.gmra.mxu1 %vm1851_vm1, %v13880_v43  ;;  %v12530_v43 = vld [vmem:[%s12980_s19 + $0x2] ss:$0 sm:$0xff] }
 0xa24   : > { %11582 = vmatprep.mubr.msk.f32.mxu1 %vm1851_vm1, %v13885_v40 }
 0xa27   : > { %11583 = vmatmul.mubr.msk.f32.gmra.mxu1 %vm1851_vm1, %v13888_v42 }
 0xa93   : > { %v14332_v57 = vpop.f32.mrf.mxu1 }
 0xa94   : > { %16201 = vst [vmem:[#allocation59_spill] sm:$0xff] %v14332_v57 }
 0xa95   : > { %v14335_v31 = vpop.f32.mrf.mxu1 }
 0xa96   : > { %16202 = vst [vmem:[#allocation60_spill] sm:$0xff] %v14335_v31 }
 0xa97   : > { %v11517_v37 = vpop.f32.mrf.mxu0 }
 0xa98   : > { %v4489_v22 = vmul.f32 %v12528_v10, %v11517_v37 }
 0xa99   : > { %v4210_v28 = vpop.f32.mrf.mxu0 }
 0xa9a   : > { %v4488_v48 = vmul.f32 %v12528_v10, %v4210_v28 }
 0xa9b   : > { %v11520_v0 = vpop.f32.mrf.mxu0 }
 0xa9c   : > { %v4491_v23 = vmul.f32 %v12529_v35, %v11520_v0 }
 0xa9d   : > { %v4220_v18 = vpop.f32.mrf.mxu0 }
 0xa9e   : > { %v4493_v27 = vadd.f32 %v4491_v23, %v4489_v22  ;;  %v4490_v32 = vmul.f32 %v12529_v35, %v4220_v18  ;;  %v12535_v18 = vld [vmem:[%s12980_s19 + $0x7] ss:$0 sm:$0xff] }
 0xa9f   : > { %v11523_v62 = vpop.f32.mrf.mxu0 }
 0xaa0   : > { %v4492_v52 = vadd.f32 %v4490_v32, %v4488_v48  ;;  %v4495_v40 = vmul.f32 %v12530_v43, %v11523_v62 }
 0xaa1   : > { %v4230_v42 = vpop.f32.mrf.mxu0 }
 0xaa2   : > { %v4497_v5 = vadd.f32 %v4495_v40, %v4493_v27  ;;  %v4494_v59 = vmul.f32 %v12530_v43, %v4230_v42 }
 0xaa3   : > { %v11474_v24 = vpop.f32.mrf.mxu1  ;;  %v11526_v33 = vpop.f32.mrf.mxu0 }
 0xaa4   : > { %v4496_v51 = vadd.f32 %v4494_v59, %v4492_v52  ;;  %v4499_v36 = vmul.f32 %v12531_v56, %v11526_v33  ;;  %v12536_v52 = vld [vmem:[%s12975_s14 + $0x1] ss:$0 sm:$0xff] }
 0xaa5   : > { %v4023_v49 = vpop.f32.mrf.mxu1  ;;  %v4240_v3 = vpop.f32.mrf.mxu0 }
 0xaa6   : > { %v4501_v46 = vadd.f32 %v4499_v36, %v4497_v5  ;;  %v4498_v15 = vmul.f32 %v12531_v56, %v4240_v3  ;;  %v12538_v36 = vld [vmem:[%s12975_s14 + $0x2] ss:$0 sm:$0xff] }
 0xaa7   : > { %v11477_v11 = vpop.f32.mrf.mxu1  ;;  %v11529_v60 = vpop.f32.mrf.mxu0 }
 0xaa8   : > { %v4500_v45 = vadd.f32 %v4498_v15, %v4496_v51  ;;  %v4503_v41 = vmul.f32 %v12532_v14, %v11529_v60  ;;  %v4457_v5 = vmul.f32 %v12536_v52, %v11477_v11  ;;  %v12537_v51 = vld [vmem:[%s12975_s14] ss:$0 sm:$0xff]  ;;  %v12539_v15 = vld [vmem:[%s12980_s19 + $0x8] ss:$0 sm:$0xff] }
 0xaa9   : > { %v4033_v34 = vpop.f32.mrf.mxu1  ;;  %v4250_v44 = vpop.f32.mrf.mxu0  ;;  %v4454_v56 = vmul.f32 %v12537_v51, %v4023_v49 }
 0xaaa   : > { %v4505_v47 = vadd.f32 %v4503_v41, %v4501_v46  ;;  %v4502_v7 = vmul.f32 %v12532_v14, %v4250_v44  ;;  %v4456_v43 = vmul.f32 %v12536_v52, %v4033_v34  ;;  %v12540_v34 = vld [vmem:[%s12975_s14 + $0x3] ss:$0 sm:$0xff] }
 0xaab   : > { %v11480_v53 = vpop.f32.mrf.mxu1  ;;  %v11532_v58 = vpop.f32.mrf.mxu0 }
 0xaac   : > { %v4504_v39 = vadd.f32 %v4502_v7, %v4500_v45  ;;  %v4507_v13 = vmul.f32 %v12533_v50, %v11532_v58  ;;  %v4455_v45 = vmul.f32 %v12537_v51, %v11474_v24  ;;  %v4461_v14 = vmul.f32 %v12538_v36, %v11480_v53 }
 0xaad   : > { %v4043_v12 = vpop.f32.mrf.mxu1  ;;  %v4260_v21 = vpop.f32.mrf.mxu0 }
 0xaae   : > { %v4509_v54 = vadd.f32 %v4507_v13, %v4505_v47  ;;  %v4506_v55 = vmul.f32 %v12533_v50, %v4260_v21  ;;  %v4460_v3 = vmul.f32 %v12538_v36, %v4043_v12  ;;  %v4458_v47 = vadd.f32 %v4456_v43, %v4454_v56  ;;  %v12541_v12 = vld [vmem:[%s12975_s14 + $0x4] ss:$0 sm:$0xff] }
 0xaaf   : > { %v11483_v1 = vpop.f32.mrf.mxu1  ;;  %v11535_v19 = vpop.f32.mrf.mxu0 }
 0xab0   : > { %v4508_v20 = vadd.f32 %v4506_v55, %v4504_v39  ;;  %v4511_v37 = vmul.f32 %v12534_v17, %v11535_v19  ;;  %v4459_v39 = vadd.f32 %v4457_v5, %v4455_v45  ;;  %v4465_v50 = vmul.f32 %v12540_v34, %v11483_v1  ;;  %v12545_v5 = vld [vmem:[%s12975_s14 + $0x8] ss:$0 sm:$0xff] }
 0xab1   : > { %v4053_v28 = vpop.f32.mrf.mxu1  ;;  %v4270_v10 = vpop.f32.mrf.mxu0  ;;  %v4462_v13 = vadd.f32 %v4460_v3, %v4458_v47  ;;  %v14380_v47 = vld [vmem:[%s12985_s24 + $0x8] sm:$0xff] }
 0xab2   : > { %v4513_v22 = vadd.f32 %v4511_v37, %v4509_v54  ;;  %v4510_v0 = vmul.f32 %v12534_v17, %v4270_v10  ;;  %v4464_v7 = vmul.f32 %v12540_v34, %v4053_v28  ;;  %v4463_v24 = vadd.f32 %v4461_v14, %v4459_v39  ;;  %v14385_v34 = vld [vmem:[%s12985_s24] sm:$0xff] }
 0xab3   : > { %v11486_v48 = vpop.f32.mrf.mxu1  ;;  %v11538_v35 = vpop.f32.mrf.mxu0 }
 0xab4   : > { %v4512_v23 = vadd.f32 %v4510_v0, %v4508_v20  ;;  %v4515_v27 = vmul.f32 %v12535_v18, %v11538_v35  ;;  %v4469_v53 = vmul.f32 %v12541_v12, %v11486_v48  ;;  %v4466_v19 = vadd.f32 %v4464_v7, %v4462_v13  ;;  %v12542_v20 = vld [vmem:[%s12975_s14 + $0x5] ss:$0 sm:$0xff] }
 0xab5   : > { %v4063_v32 = vpop.f32.mrf.mxu1  ;;  %v4280_v62 = vpop.f32.mrf.mxu0  ;;  %v4467_v37 = vadd.f32 %v4465_v50, %v4463_v24  ;;  %v12551_v24 = vld [vmem:[%s13025_s20 + $0x30] sm:$0xff] }
 0xab6   : > { %v4517_v40 = vadd.f32 %v4515_v27, %v4513_v22  ;;  %v4514_v42 = vmul.f32 %v12535_v18, %v4280_v62  ;;  %v4468_v21 = vmul.f32 %v12541_v12, %v4063_v32  ;;  %v12543_v22 = vld [vmem:[%s12975_s14 + $0x6] ss:$0 sm:$0xff]  ;;  %v12544_v32 = vld [vmem:[%s12975_s14 + $0x7] ss:$0 sm:$0xff] }
 0xab7   : > { %v11489_v59 = vpop.f32.mrf.mxu1  ;;  %v11541_v33 = vpop.f32.mrf.mxu0  ;;  %v4471_v35 = vadd.f32 %v4469_v53, %v4467_v37  ;;  %v16203_v53 = vmov 0.0   ;;  %v12553_v37 = vld [vmem:[%s13025_s20 + $0x20] sm:$0xff] }
 0xab8   : > { %v4516_v46 = vadd.f32 %v4514_v42, %v4512_v23  ;;  %v4519_v60 = vmul.f32 %v12539_v15, %v11541_v33  ;;  %v4473_v1 = vmul.f32 %v12542_v20, %v11489_v59  ;;  %v4470_v10 = vadd.f32 %v4468_v21, %v4466_v19  ;;  %v12552_v19 = vld [vmem:[%s13025_s20 + $0x28] sm:$0xff] }
 0xab9   : > { %v4073_v41 = vpop.f32.mrf.mxu1  ;;  %v4290_v44 = vpop.f32.mrf.mxu0 }
 0xaba   : > { %v14347_v58 = vadd.f32 %v4519_v60, %v4517_v40  ;;  %v4518_v11 = vmul.f32 %v12539_v15, %v4290_v44  ;;  %v4472_v17 = vmul.f32 %v12542_v20, %v4073_v41  ;;  %v4475_v62 = vadd.f32 %v4473_v1, %v4471_v35  ;;  %v14367_v15 = vld [vmem:[%s12985_s24 + $0x18] sm:$0xff]  ;;  %v14375_v44 = vld [vmem:[%s12985_s24 + $0x10] sm:$0xff] }
 0xabb   : > { %v11492_v49 = vpop.f32.mrf.mxu1  ;;  %v12554_v1 = vld [vmem:[%s13025_s20 + $0x18] sm:$0xff] }
 0xabc   : > { %v4520_v54 = vadd.f32 %v4518_v11, %v4516_v46  ;;  %4934 = vrot.lane.b32.xlu1 %v14347_v58, %s16200_s18  ;;  %v4477_v23 = vmul.f32 %v12543_v22, %v11492_v49  ;;  %v4474_v27 = vadd.f32 %v4472_v17, %v4470_v10  ;;  %v10245_v10 = vld [vmem:[%s16164_s23] ss:$0 sm:$0xff] }
 0xabd   : > { %v4083_v55 = vpop.f32.mrf.mxu1 }
 0xabe   : > { %4932 = vrot.lane.b32.xlu0 %v4520_v54, %s16200_s18  ;;  %v4476_v0 = vmul.f32 %v12543_v22, %v4083_v55  ;;  %v4479_v42 = vadd.f32 %v4477_v23, %v4475_v62  ;;  %v10244_v55 = vld [vmem:[%s16163_s11] ss:$0 sm:$0xff]  ;;  %v12556_v22 = vld [vmem:[%s13025_s20 + $0x8] sm:$0xff] }
 0xabf   : > { %v11495_v28 = vpop.f32.mrf.mxu1  ;;  %v12557_v23 = vld [vmem:[%s13025_s20] sm:$0xff] }
 0xac0   : > { %v4481_v52 = vmul.f32 %v12544_v32, %v11495_v28  ;;  %v4478_v40 = vadd.f32 %v4476_v0, %v4474_v27  ;;  %v12555_v28 = vld [vmem:[%s13025_s20 + $0x10] sm:$0xff] }
 0xac1   : > { %v4093_v18 = vpop.f32.mrf.mxu1 }
 0xac2   : > { %v4480_v48 = vmul.f32 %v12544_v32, %v4093_v18  ;;  %v4483_v36 = vadd.f32 %v4481_v52, %v4479_v42 }
 0xac3   : > { %v11498_v43 = vpop.f32.mrf.mxu1 }
 0xac4   : > { %v4485_v33 = vmul.f32 %v12545_v5, %v11498_v43  ;;  %v4482_v51 = vadd.f32 %v4480_v48, %v4478_v40 }
 0xac5   : > { %v4103_v59 = vpop.f32.mrf.mxu1 }
 0xac6   : > { %v4484_v56 = vmul.f32 %v12545_v5, %v4103_v59  ;;  %v4487_v46 = vadd.f32 %v4485_v33, %v4483_v36  ;;  %v14455_v33 = vld [vmem:[%s16154_s4 + $0x78] sm:$0xff]  ;;  %v14465_v36 = vld [vmem:[%s16154_s4 + $0x70] sm:$0xff] }
 0xac8   : > { %v4486_v3 = vadd.f32 %v4484_v56, %v4482_v51  ;;  %v14459_v51 = vld [vmem:[%s16154_s4 + $0xf0] sm:$0xff] }
 0xaca   : > { %11593 = vmatprep.mubr.msk.f32.mxu0 %vm967_vm0, %v4486_v3 }
 0xacb   : > { %11594 = vmatmul.mubr.msk.f32.vlgmr.msra.gmra.mxu0 %vm967_vm0, %v4487_v46 }
 0xacc   : > { %11597 = vmatpush3.msra.mxu0 %v14226_v25 }
 0xacd   : > { %11598 = vmatprep.subr.mxu0 %v14285_v61 }
 0xace   : > { %11599 = vmatpush3.msra.mxu0 %v14285_v61 }
 0xacf   : > { %11600 = vmatprep.subr.mxu0 %v14292_v30 }
 0xad0   : > { %11601 = vmatpush3.msra.mxu0 %v14292_v30 }
 0xad1   : > { %11602 = vmatprep.subr.mxu0 %v14299_v63 }
 0xad2   : > { %11603 = vmatpush3.msra.mxu0 %v14299_v63 }
 0xad3   : > { %11607 = vmatprep.subr.mxu0 %v14367_v15 }
 0xb2e   : > { %v4935_v21 = vpop.permute.xlu1 %4934 }
 0xb8b   : > { %v11595_v60 = vpop.f32.mrf.mxu0 }
 0xb8c   : > { %v4642_v41 = vmul.f32 %v11595_v60, %v11595_v60 }
 0xb8d   : > { %v4632_v45 = vpop.f32.mrf.mxu0 }
 0xb8e   : > { %v4641_v14 = vmul.f32 %v4632_v45, %v4632_v45 }
 0xb90   : > { %11604 = vmatprep.mubr.msk.f32.mxu0 %vm967_vm0, %v4641_v14 }
 0xb91   : > { %11605 = vmatmul.mubr.msk.f32.vlgmr.msra.gmra.mxu0 %vm967_vm0, %v4642_v41  ;;  %v14475_v41 = vld [vmem:[%s16154_s4 + $0x68] sm:$0xff] }
 0xb92   : > { %11608 = vmatpush3.msra.mxu0 %v14367_v15  ;;  %11615 = vmatprep.mubr.msk.f32.mxu0 %vm967_vm0, %v4520_v54  ;;  %v12550_v54 = vld [vmem:[%s13025_s20 + $0x38] sm:$0xff] }
 0xb93   : > { %11609 = vmatprep.subr.mxu0 %v14375_v44 }
 0xb94   : > { %11610 = vmatpush3.msra.mxu0 %v14375_v44 }
 0xb95   : > { %11611 = vmatprep.subr.mxu0 %v14380_v47 }
 0xb96   : > { %11612 = vmatpush3.msra.mxu0 %v14380_v47 }
 0xb97   : > { %11613 = vmatprep.subr.mxu0 %v14385_v34 }
 0xb98   : > { %11614 = vmatpush3.msra.mxu0 %v14385_v34 }
 0xb99   : > { %11616 = vmatmul.mubr.msk.f32.vlgmr.msra.gmra.mxu0 %vm967_vm0, %v14347_v58  ;;  %11618 = vmatprep.subr.mxu0 %v14226_v25 }
 0xb9a   : > { %11619 = vmatpush3.msra.mxu0 %v14226_v25 }
 0xb9b   : > { %11620 = vmatprep.subr.mxu0 %v14285_v61 }
 0xb9c   : > { %11621 = vmatpush3.msra.mxu0 %v14285_v61 }
 0xb9d   : > { %11622 = vmatprep.subr.mxu0 %v14292_v30 }
 0xb9e   : > { %11623 = vmatpush3.msra.mxu0 %v14292_v30 }
 0xb9f   : > { %11624 = vmatprep.subr.mxu0 %v14299_v63 }
 0xba0   : > { %11625 = vmatpush3.msra.mxu0 %v14299_v63  ;;  %v4933_v63 = vpop.permute.xlu0 %4932 }
 0xba1   : > { %11629 = vmatprep.subr.mxu0 %v14367_v15 }
 0xc51   : > { %v11606_v7 = vpop.f32.mrf.mxu0 }
 0xc52   : > { %v4721_v39 = vadd.f32 1e-05, %v11606_v7 }
 0xc53   : > { %v4715_v58 = vpop.f32.mrf.mxu0 }
 0xc54   : > { %v4716_v11 = vadd.f32 1e-05, %v4715_v58 }
 0xc56   : > { %12357 = vrsqrt.f32 %v4716_v11  ;;  %v14481_v11 = vld [vmem:[%s16154_s4 + $0xe0] sm:$0xff] }
 0xc57   : > { %12359 = vrsqrt.f32 %v4721_v39  ;;  %v14485_v39 = vld [vmem:[%s16154_s4 + $0x60] sm:$0xff] }
 0xc59   : > { %v14400_v25 = vpop.f32.mrf.mxu0 }
 0xc5a   : > { %v4828_v30 = vmul.f32 %v14400_v25, %v14400_v25 }
 0xc5b   : > { %v14402_v50 = vpop.f32.mrf.mxu0 }
 0xc5c   : > { %v4827_v61 = vmul.f32 %v14402_v50, %v14402_v50 }
 0xc5e   : > { %11626 = vmatprep.mubr.msk.f32.mxu0 %vm967_vm0, %v4827_v61  ;;  %v14493_v61 = vld [vmem:[%s16154_s4 + $0xd8] sm:$0xff] }
 0xc5f   : > { %11627 = vmatmul.mubr.msk.f32.vlgmr.msra.gmra.mxu0 %vm967_vm0, %v4828_v30 }
 0xc60   : > { %11630 = vmatpush3.msra.mxu0 %v14367_v15  ;;  %11637 = vmatprep.mubr.msk.f32.mxu0 %vm967_vm0, %v4933_v63  ;;  %v14506_v63 = vld [vmem:[%s16154_s4 + $0xd0] sm:$0xff] }
 0xc61   : > { %11631 = vmatprep.subr.mxu0 %v14375_v44 }
 0xc62   : > { %11632 = vmatpush3.msra.mxu0 %v14375_v44 }
 0xc63   : > { %v12358_v49 = vpop.eup %12357  ;;  %11633 = vmatprep.subr.mxu0 %v14380_v47 }
 0xc64   : > { %11634 = vmatpush3.msra.mxu0 %v14380_v47  ;;  %v4726_v13 = vmul.f32 %v12358_v49, %v4632_v45  ;;  %v12360_v12 = vpop.eup %12359  ;;  %v14518_v49 = vld [vmem:[%s16154_s4 + $0xc8] sm:$0xff] }
 0xc65   : > { %11635 = vmatprep.subr.mxu0 %v14385_v34  ;;  %v4727_v17 = vmul.f32 %v12360_v12, %v11595_v60  ;;  %v14470_v60 = vld [vmem:[%s16154_s4 + $0xe8] sm:$0xff] }
 0xc66   : > { %11636 = vmatpush3.msra.mxu0 %v14385_v34  ;;  %v4734_v20 = vmul.f32 %v10244_v55, %v4726_v13  ;;  %v14526_v13 = vld [vmem:[%s16154_s4 + $0xc0] sm:$0xff] }
 0xc67   : > { %11638 = vmatmul.mubr.msk.f32.vlgmr.msra.gmra.mxu0 %vm967_vm0, %v4935_v21  ;;  %5148 = vmatprep.subr.mxu0 %v12550_v54  ;;  %v4735_v35 = vmul.f32 %v10244_v55, %v4727_v17  ;;  %v14535_v21 = vld [vmem:[%s16154_s4 + $0x40] sm:$0xff]  ;;  %v14539_v54 = vld [vmem:[%s16154_s4 + $0xb8] sm:$0xff]  ;;  %v14549_v55 = vld [vmem:[%s16154_s4 + $0xb0] sm:$0xff] }
 0xc68   : > { %5149 = vmatpush1.msra.mxu0 %v12551_v24  ;;  %5188 = vmatprep.mubr.f32.mxu0 %v16203_v53  ;;  %v14429_v0 = vadd.f32 %v10245_v10, %v4734_v20  ;;  %v14543_v24 = vld [vmem:[%s16154_s4 + $0x38] sm:$0xff]  ;;  %v14557_v20 = vld [vmem:[%s16154_s4 + $0xa8] sm:$0xff] }
 0xc69   : > { %5150 = vmatprep.subr.mxu0 %v12552_v19  ;;  %v14435_v18 = vadd.f32 %v10245_v10, %v4735_v35  ;;  %v14553_v19 = vld [vmem:[%s16154_s4 + $0x30] sm:$0xff]  ;;  %v14561_v17 = vld [vmem:[%s16154_s4 + $0x28] sm:$0xff]  ;;  %v14573_v10 = vld [vmem:[%s16154_s4 + $0x98] sm:$0xff] }
 0xc6a   : > { %5151 = vmatpush1.msra.mxu0 %v12553_v37  ;;  %v14438_v27 = vmul.f32 0.25, %v14429_v0  ;;  %v14565_v37 = vld [vmem:[%s16154_s4 + $0xa0] sm:$0xff]  ;;  %v14581_v35 = vld [vmem:[%s16154_s4 + $0x90] sm:$0xff] }
 0xc6b   : > { %5152 = vmatprep.subr.mxu0 %v12554_v1  ;;  %v14532_v12 = vmul.f32 0.25, %v14435_v18  ;;  %v14569_v1 = vld [vmem:[%s16154_s4 + $0x20] sm:$0xff] }
 0xc6c   : > { %5153 = vmatpush1.msra.mxu0 %v12555_v28 }
 0xc6d   : > { %5154 = vmatprep.subr.mxu0 %v12556_v22  ;;  %v14577_v22 = vld [vmem:[%s16154_s4 + $0x18] sm:$0xff] }
 0xc6e   : > { %5155 = vmatpush1.msra.mxu0 %v12557_v23  ;;  %v14585_v23 = vld [vmem:[%s16154_s4 + $0x10] sm:$0xff] }
 0xc6f   : > { %10258 = vmatmul.mubr.msk.f32.vlgmr.msra.gmra.mxu0 %vm967_vm0, %v14429_v0 }
 0xc70   : > { %5194 = vmatprep.mubr.f32.mxu0 %v16203_v53 }
 0xc73   : > { %10259 = vmatmul.mubr.msk.f32.gmra.mxu0 %vm967_vm0, %v14435_v18 }
 0xc74   : > { %11655 = vmatprep.mubr.msk.f32.mxu0 %vm3537_vm2, %v14438_v27 }
 0xd1f   : > { %v11628_v32 = vpop.f32.mrf.mxu0 }
 0xd20   : > { %v4907_v48 = vadd.f32 1e-05, %v11628_v32 }
 0xd21   : > { %v4901_v62 = vpop.f32.mrf.mxu0 }
 0xd22   : > { %12361 = vrsqrt.f32 %v4907_v48  ;;  %v4902_v52 = vadd.f32 1e-05, %v4901_v62  ;;  %v14589_v48 = vld [vmem:[%s16154_s4 + $0x88] sm:$0xff] }
 0xd23   : > { %v14593_v62 = vld [vmem:[%s16154_s4 + $0x8] sm:$0xff] }
 0xd24   : > { %12363 = vrsqrt.f32 %v4902_v52  ;;  %v12587_v52 = vld [vmem:[%s16187_s1] sm:$0xff] }
 0xd27   : > { %v14444_v43 = vpop.f32.mrf.mxu0 }
 0xd28   : > { %v5016_v5 = vmul.f32 %v14444_v43, %v14444_v43 }
 0xd29   : > { %v14446_v40 = vpop.f32.mrf.mxu0 }
 0xd2a   : > { %v5015_v42 = vmul.f32 %v14446_v40, %v14446_v40 }
 0xd2c   : > { %11648 = vmatprep.mubr.msk.f32.mxu1 %vm967_vm0, %v5015_v42 }
 0xd2d   : > { %11649 = vmatmul.mubr.msk.f32.vlgmr.msra.gmra.mxu1 %vm967_vm0, %v5016_v5  ;;  %v14599_v5 = vld [vmem:[%s16154_s4 + $0x80] sm:$0xff] }
 0xd2e   : > { %10784 = vmatpush3.msra.mxu1 %v14455_v33 }
 0xd2f   : > { %v12362_v59 = vpop.eup %12361  ;;  %10785 = vmatprep.subr.mxu1 %v14459_v51  ;;  %v14462_v56 = vpop.f32.mrf.mxu0 }
 0xd30   : > { %10786 = vmatpush3.msra.mxu1 %v14465_v36  ;;  %v4913_v3 = vmul.f32 %v12362_v59, %v14400_v25  ;;  %v5201_v42 = vmul.f32 %v12587_v52, %v14462_v56  ;;  %v12589_v59 = vld [vmem:[%s16187_s1 + $0x18] sm:$0xff] }
 0xd31   : > { %v12364_v46 = vpop.eup %12363  ;;  %10787 = vmatprep.subr.mxu1 %v14470_v60  ;;  %v5192_v45 = vpop.f32.mrf.mxu0 }
 0xd32   : > { %v5202_v14 = vmul.f32 %v5192_v45, %v14068_v6  ;;  %10788 = vmatpush3.msra.mxu1 %v14475_v41  ;;  %v4921_v7 = vmul.f32 %v14075_v2, %v4913_v3  ;;  %v4912_v58 = vmul.f32 %v12364_v46, %v14402_v50  ;;  %v14497_v50 = vld [vmem:[%s16154_s4 + $0x58] sm:$0xff]  ;;  %v14604_v46 = vld [vmem:[%s16154_s4] sm:$0xff]  ;;  %v12591_v45 = vld [vmem:[%s16187_s1 + $0x10] sm:$0xff] }
 0xd33   : > { %10789 = vmatprep.subr.mxu1 %v14481_v11  ;;  %v5196_v28 = vpop.f32.mrf.mxu0 }
 0xd34   : > { %10790 = vmatpush3.msra.mxu1 %v14485_v39  ;;  %5269 = vmatprep.mubr.f32.mxu1 %v5202_v14  ;;  %v14489_v6 = vadd.f32 %v14079_v29, %v4921_v7  ;;  %v4920_v25 = vmul.f32 %v14075_v2, %v4912_v58  ;;  %v14512_v2 = vld [vmem:[%s16154_s4 + $0x50] sm:$0xff]  ;;  %v5203_v14 = vmul.f32 %v12591_v45, %v5196_v28  ;;  %v12592_v7 = vld [vmem:[%s12940_s13] sm:$0xff]  ;;  %v14610_v58 = vpop.f32.mrf.mxu1 }
 0xd35   : > { %10791 = vmatprep.subr.mxu1 %v14493_v61  ;;  %v5198_v32 = vpop.f32.mrf.mxu0  ;;  %16204 = vst [vmem:[#allocation61_spill] sm:$0xff] %v14610_v58 }
 0xd36   : > { %10792 = vmatpush3.msra.mxu1 %v14497_v50  ;;  %11651 = vmatprep.subr.msk.mxu0 %vm3537_vm2, %v14489_v6  ;;  %v14503_v30 = vadd.f32 %v14079_v29, %v4920_v25  ;;  %v14522_v29 = vld [vmem:[%s16154_s4 + $0x48] sm:$0xff]  ;;  %v5204_v3 = vmul.f32 %v12589_v59, %v5198_v32  ;;  %v14612_v56 = vpop.f32.mrf.mxu1 }
 0xd37   : > { %10793 = vmatprep.subr.mxu1 %v14506_v63  ;;  %11652 = vmatpush3.xpose.msk.msra.mxu0 %vm3537_vm2, %v14489_v6  ;;  %16205 = vst [vmem:[#allocation62_spill] sm:$0xff] %v14612_v56  ;;  %v10256_v56 = vld [vmem:[%s16198_s25] ss:$0 sm:$0xff] }
 0xd38   : > { %10794 = vmatpush3.msra.mxu1 %v14512_v2  ;;  %11653 = vmatprep.subr.msk.mxu0 %vm3537_vm2, %v14503_v30  ;;  %v14614_v25 = vpop.f32.mrf.mxu1 }
 0xd39   : > { %10795 = vmatprep.subr.mxu1 %v14518_v49  ;;  %16206 = vst [vmem:[#allocation63_spill] sm:$0xff] %v14614_v25 }
 0xd3a   : > { %10796 = vmatpush3.msra.mxu1 %v14522_v29  ;;  %v14616_v52 = vpop.f32.mrf.mxu1 }
 0xd3b   : > { %10797 = vmatprep.subr.mxu1 %v14526_v13  ;;  %11654 = vmatpush3.xpose.msk.msra.mxu0 %vm3537_vm2, %v14503_v30  ;;  %16207 = vst [vmem:[#allocation64_spill] sm:$0xff] %v14616_v52 }
 0xd3c   : > { %10798 = vmatpush3.msra.mxu1 %v14535_v21  ;;  %v14618_v32 = vpop.f32.mrf.mxu1 }
 0xd3d   : > { %10799 = vmatprep.subr.mxu1 %v14539_v54  ;;  %16208 = vst [vmem:[#allocation65_spill] sm:$0xff] %v14618_v32 }
 0xd3e   : > { %10800 = vmatpush3.msra.mxu1 %v14543_v24  ;;  %11656 = vmatmul.mubr.msk.f32.vlgmr.msra.gmra.mxu0 %vm3537_vm2, %v14532_v12  ;;  %v14620_v59 = vpop.f32.mrf.mxu1 }
 0xd3f   : > { %10801 = vmatprep.subr.mxu1 %v14549_v55  ;;  %16209 = vst [vmem:[#allocation66_spill] sm:$0xff] %v14620_v59 }
 0xd40   : > { %10802 = vmatpush3.msra.mxu1 %v14553_v19 }
 0xd41   : > { %10803 = vmatprep.subr.mxu1 %v14557_v20 }
 0xd42   : > { %10804 = vmatpush3.msra.mxu1 %v14561_v17 }
 0xd43   : > { %10805 = vmatprep.subr.mxu1 %v14565_v37 }
 0xd44   : > { %10806 = vmatpush3.msra.mxu1 %v14569_v1 }
 0xd45   : > { %10807 = vmatprep.subr.mxu1 %v14573_v10 }
 0xd46   : > { %10808 = vmatpush3.msra.mxu1 %v14577_v22 }
 0xd47   : > { %10809 = vmatprep.subr.mxu1 %v14581_v35 }
 0xd48   : > { %10810 = vmatpush3.msra.mxu1 %v14585_v23 }
 0xd49   : > { %10811 = vmatprep.subr.mxu1 %v14589_v48 }
 0xd4a   : > { %10812 = vmatpush3.msra.mxu1 %v14593_v62 }
 0xd4b   : > { %10813 = vmatprep.subr.mxu1 %v14599_v5 }
 0xd4c   : > { %10814 = vmatpush3.msra.mxu1 %v14604_v46 }
 0xd4d   : > { %5270 = vmatmul.mubr.f32.vlgmr.msra.gmra.mxu1 %v5201_v42  ;;  %v14622_v42 = vpop.f32.mrf.mxu1 }
 0xd4e   : > { %5274 = vmatprep.mubr.f32.mxu1 %v5204_v3  ;;  %16210 = vst [vmem:[#allocation67_spill] sm:$0xff] %v14622_v42 }
 0xd4f   : > { %v14624_v3 = vpop.f32.mrf.mxu1 }
 0xd50   : > { %16211 = vst [vmem:[#allocation68_spill] sm:$0xff] %v14624_v3 }
 0xd51   : > { %5275 = vmatmul.mubr.f32.gmra.mxu1 %v5203_v14  ;;  %v14626_v28 = vpop.f32.mrf.mxu1 }
 0xd52   : > { %11738 = vmatprep.mubr.msk.f32.mxu1 %vm1851_vm1, %v12592_v7  ;;  %16212 = vst [vmem:[#allocation69_spill] sm:$0xff] %v14626_v28 }
 0xd53   : > { %v14628_v45 = vpop.f32.mrf.mxu1 }
 0xd54   : > { %16213 = vst [vmem:[#allocation70_spill] sm:$0xff] %v14628_v45 }
 0xd55   : > { %v14630_v14 = vpop.f32.mrf.mxu1 }
 0xd56   : > { %16214 = vst [vmem:[#allocation71_spill] sm:$0xff] %v14630_v14 }
 0xd57   : > { %v14632_v7 = vpop.f32.mrf.mxu1 }
 0xd58   : > { %16215 = vst [vmem:[#allocation72_spill] sm:$0xff] %v14632_v7 }
 0xd59   : > { %v14634_v25 = vpop.f32.mrf.mxu1 }
 0xd5a   : > { %16216 = vst [vmem:[#allocation73_spill] sm:$0xff] %v14634_v25 }
 0xd5b   : > { %v14636_v58 = vpop.f32.mrf.mxu1 }
 0xd5c   : > { %16217 = vst [vmem:[#allocation74_spill] sm:$0xff] %v14636_v58  ;;  %v10257_v58 = vld [vmem:[%s16199_s29] ss:$0 sm:$0xff] }
 0xd5d   : > { %v14638_v32 = vpop.f32.mrf.mxu1 }
 0xd5e   : > { %16218 = vst [vmem:[#allocation75_spill] sm:$0xff] %v14638_v32 }
 0xd5f   : > { %v14640_v59 = vpop.f32.mrf.mxu1 }
 0xd60   : > { %16219 = vst [vmem:[#allocation76_spill] sm:$0xff] %v14640_v59 }
 0xd61   : > { %v14642_v42 = vpop.f32.mrf.mxu1 }
 0xd62   : > { %16220 = vst [vmem:[#allocation77_spill] sm:$0xff] %v14642_v42 }
 0xd63   : > { %v14644_v3 = vpop.f32.mrf.mxu1 }
 0xd64   : > { %16221 = vst [vmem:[#allocation78_spill] sm:$0xff] %v14644_v3 }
 0xded   : > { %v11650_v28 = vpop.f32.mrf.mxu1 }
 0xdee   : > { %v5095_v45 = vadd.f32 1e-05, %v11650_v28 }
 0xdef   : > { %v5089_v52 = vpop.f32.mrf.mxu1 }
 0xdf0   : > { %12365 = vrsqrt.f32 %v5095_v45  ;;  %v5090_v14 = vadd.f32 1e-05, %v5089_v52 }
 0xdf2   : > { %12367 = vrsqrt.f32 %v5090_v14 }
 0xdfd   : > { %v12366_v7 = vpop.eup %12365 }
 0xdfe   : > { %v5101_v25 = vmul.f32 %v12366_v7, %v14444_v43  ;;  %v11657_v52 = vpop.f32.mrf.mxu0 }
 0xdff   : > { %v12368_v31 = vpop.eup %12367 }
 0xe00   : > { %v5109_v57 = vmul.f32 %v10256_v56, %v5101_v25  ;;  %v5100_v32 = vmul.f32 %v12368_v31, %v14446_v40  ;;  %v5360_v25 = vpop.f32.mrf.mxu0 }
 0xe02   : > { %v14650_v59 = vadd.f32 %v10257_v58, %v5109_v57  ;;  %v5108_v42 = vmul.f32 %v10256_v56, %v5100_v32 }
 0xe04   : > { %11658 = vmatprep.subr.mxu0 %v14650_v59  ;;  %v14653_v3 = vadd.f32 %v10257_v58, %v5108_v42 }
 0xe05   : > { %11659 = vmatpush3.msra.mxu0 %v14650_v59 }
 0xe06   : > { %11660 = vmatprep.subr.mxu0 %v14653_v3 }
 0xe07   : > { %11661 = vmatpush3.msra.mxu0 %v14653_v3 }
 0xe0d   : > { %v10815_v43 = vpop.f32.mrf.mxu1 }
 0xe0f   : > { %v10816_v28 = vpop.f32.mrf.mxu1 }
 0xe10   : > { %v10817_v45 = vadd.f32 %v10816_v28, %v10815_v43 }
 0xe11   : > { %v10818_v14 = vpop.f32.mrf.mxu1 }
 0xe12   : > { %v5361_v31 = vadd.f32 %v10817_v45, %v5360_v25 }
 0xe13   : > { %v10819_v57 = vpop.f32.mrf.mxu1 }
 0xe14   : > { %v10820_v40 = vadd.f32 %v10819_v57, %v10818_v14  ;;  %v5369_v56 = vsel %vm3537_vm2, %v5361_v31, -inf }
 0xe15   : > { %5370 = vmax.xlane.f32.xlu0 %v5369_v56 }
 0xe16   : > { %v5366_v58 = vadd.f32 %v11657_v52, %v10820_v40 }
 0xe18   : > { %v5372_v32 = vsel %vm3537_vm2, %v5366_v58, -inf }
 0xe19   : > { %5373 = vmax.xlane.f32.xlu1 %v5372_v32 }
 0xe2a   : > { %5478 = vrot.lane.b32.xlu1 %v14503_v30, %s12916_s2 }
 0xe2e   : > { %5474 = vrot.lane.b32.xlu1 %v14438_v27, %s12916_s2 }
 0xe32   : > { %5476 = vrot.lane.b32.xlu1 %v14532_v12, %s12916_s2 }
 0xe36   : > { %5486 = vrot.lane.b32.xlu1 %v10820_v40, %s12916_s2 }
 0xe9e   : > { %v5371_v42 = vpop.xlane.xlu0 %5370 }
 0xe9f   : > { %v5375_v7 = vsub.f32 %v5361_v31, %v5371_v42 }
 0xea1   : > { %v5377_v43 = vmul.f32 1.442695, %v5375_v7 }
 0xea2   : > { %v5374_v28 = vpop.xlane.xlu1 %5373 }
 0xea3   : > { %12369 = vpow2.f32 %v5377_v43  ;;  %v5376_v52 = vsub.f32 %v5366_v58, %v5374_v28 }
 0xea5   : > { %v5379_v25 = vmul.f32 1.442695, %v5376_v52 }
 0xea6   : > { %v5479_v58 = vpop.permute.xlu1 %5478 }
 0xea7   : > { %12371 = vpow2.f32 %v5379_v25 }
 0xeaa   : > { %v5475_v43 = vpop.permute.xlu1 %5474 }
 0xeb0   : > { %v12370_v14 = vpop.eup %12369 }
 0xeb1   : > { %v5381_v57 = vsel %vm3537_vm2, %v12370_v14, 0.0 }
 0xeb2   : > { %5382 = vadd.xlane.f32.xlu0 %v5381_v57 }
 0xeb4   : > { %v12372_v30 = vpop.eup %12371 }
 0xeb5   : > { %v5384_v27 = vsel %vm3537_vm2, %v12372_v30, 0.0 }
 0xeb6   : > { %5385 = vadd.xlane.f32.xlu0 %v5384_v27 }
 0xecc   : > { %5480 = vrot.lane.b32.xlu0 %v14489_v6, %s12916_s2  ;;  %v5477_v6 = vpop.permute.xlu1 %5476 }
 0xed0   : > { %5484 = vrot.lane.b32.xlu0 %v10817_v45, %s12916_s2 }
 0xf3b   : > { %v5383_v12 = vpop.xlane.xlu0 %5382 }
 0xf3c   : > { %12373 = vrcp.f32 %v5383_v12 }
 0xf3f   : > { %v5386_v31 = vpop.xlane.xlu0 %5385 }
 0xf40   : > { %12375 = vrcp.f32 %v5386_v31 }
 0xf43   : > { %v5481_v40 = vpop.permute.xlu0 %5480 }
 0xf44   : > { %11665 = vmatprep.subr.msk.mxu0 %vm3537_vm2, %v5481_v40 }
 0xf47   : > { %v5485_v27 = vpop.permute.xlu0 %5484 }
 0xf49   : > { %v12374_v56 = vpop.eup %12373 }
 0xf4a   : > { %v5389_v32 = vmul.f32 %v12374_v56, %v12370_v14  ;;  %v5487_v14 = vpop.permute.xlu1 %5486 }
 0xf4c   : > { %11662 = vmatprep.mubr.msk.f32.mxu0 %vm3537_vm2, %v5389_v32 }
 0xf4d   : > { %v12376_v42 = vpop.eup %12375 }
 0xf4e   : > { %v5390_v7 = vmul.f32 %v12376_v42, %v12372_v30 }
 0xf50   : > { %11663 = vmatmul.mubr.msk.f32.vlgmr.msra.gmra.mxu0 %vm3537_vm2, %v5390_v7 }
 0xf51   : > { %11666 = vmatpush3.xpose.msk.msra.mxu0 %vm3537_vm2, %v5481_v40  ;;  %11669 = vmatprep.mubr.msk.f32.mxu0 %vm3537_vm2, %v5475_v43 }
 0xf52   : > { %11667 = vmatprep.subr.msk.mxu0 %vm3537_vm2, %v5479_v58 }
 0xf55   : > { %11668 = vmatpush3.xpose.msk.msra.mxu0 %vm3537_vm2, %v5479_v58  ;;  %v12593_v58 = vld [vmem:[%s16153_s8] ss:$0 sm:$0xff] }
 0xf56   : > { %v14690_v32 = vadd.f32 %v12593_v58, %v14011_v9  ;;  %v14695_v42 = vadd.f32 %v12593_v58, %v14002_v16  ;;  %v14700_v7 = vadd.f32 %v12593_v58, %v14008_v8  ;;  %v16222_v9 = vld [vmem:[#allocation29_spill] sm:$0xff] }
 0xf57   : > { %v14710_v43 = vadd.f32 %v12593_v58, %v16222_v9 }
 0xf58   : > { %11670 = vmatmul.mubr.msk.f32.vlgmr.msra.gmra.mxu0 %vm3537_vm2, %v5477_v6 }
0x1010   : > { %v11664_v45 = vpop.f32.mrf.mxu0 }
0x1011   : > { %v5469_v28 = vadd.f32 %v11664_v45, %v14435_v18 }
0x1012   : > { %v5463_v52 = vpop.f32.mrf.mxu0 }
0x1013   : > { %5473 = vst.msk [vmem:[#allocation2 + $0x18] sm:$0xff] %vm3537_vm2, %v5469_v28  ;;  %v5464_v25 = vadd.f32 %v5463_v52, %v14429_v0 }
0x1015   : > { %5472 = vst.msk [vmem:[#allocation2 + $0x10] sm:$0xff] %vm3537_vm2, %v5464_v25 }
0x1018   : > { %v11671_v57 = vpop.f32.mrf.mxu0 }
0x1019   : > { %v5570_v30 = vadd.f32 %v11671_v57, %v5487_v14 }
0x101a   : > { %v5564_v12 = vpop.f32.mrf.mxu0 }
0x101b   : > { %v5565_v31 = vadd.f32 %v5564_v12, %v5485_v27  ;;  %v5576_v40 = vsel %vm3537_vm2, %v5570_v30, -inf }
0x101c   : > { %5577 = vmax.xlane.f32.xlu1 %v5576_v40 }
0x101d   : > { %v5573_v56 = vsel %vm3537_vm2, %v5565_v31, -inf }
0x101e   : > { %5574 = vmax.xlane.f32.xlu0 %v5573_v56  ;;  %v16224_v56 = vld [vmem:[#allocation30_spill] sm:$0xff] }
0x101f   : > { %v1658_v9 = vadd.f32 %v12593_v58, %v16224_v56 }
0x102d   : > { %5597 = vrot.lane.b32.xlu1 %v14653_v3, %s12916_s2  ;;  %v14705_v3 = vadd.f32 %v12593_v58, %v13981_v38 }
0x1031   : > { %5877 = vrot.lane.b32.xlu1 %v14690_v32, %s16200_s18 }
0x1035   : > { %5875 = vrot.lane.b32.xlu1 %v14695_v42, %s16200_s18 }
0x1039   : > { %5871 = vrot.lane.b32.xlu1 %v14700_v7, %s16200_s18 }
0x103d   : > { %5867 = vrot.lane.b32.xlu1 %v14705_v3, %s16200_s18 }
0x1041   : > { %5863 = vrot.lane.b32.xlu1 %v14710_v43, %s16200_s18 }
0x10a5   : > { %v5578_v16 = vpop.xlane.xlu1 %5577 }
0x10a6   : > { %v5580_v6 = vsub.f32 %v5570_v30, %v5578_v16  ;;  %v16225_v16 = vld [vmem:[#allocation31_spill] sm:$0xff] }
0x10a7   : > { %v5575_v45 = vpop.xlane.xlu0 %5574 }
0x10a8   : > { %v5583_v8 = vmul.f32 1.442695, %v5580_v6  ;;  %v5579_v28 = vsub.f32 %v5565_v31, %v5575_v45  ;;  %v16223_v31 = vld [vmem:[#allocation32_spill] sm:$0xff]  ;;  %v14723_v6 = vadd.f32 %v12593_v58, %v16225_v16  ;;  %v12596_v16 = vld [vmem:[%s12940_s13 + $0x10] sm:$0xff] }
0x10a9   : > { %v5598_v52 = vpop.permute.xlu1 %5597  ;;  %v1666_v40 = vadd.f32 %v12593_v58, %v16223_v31 }
0x10aa   : > { %12377 = vpow2.f32 %v5583_v8  ;;  %v5581_v25 = vmul.f32 1.442695, %v5579_v28 }
0x10ac   : > { %12379 = vpow2.f32 %v5581_v25 }
0x10ad   : > { %v5878_v38 = vpop.permute.xlu1 %5877 }
0x10ae   : > { %11722 = vmatprep.subr.mxu1 %v5878_v38 }
0x10af   : > { %11723 = vmatpush3.msra.mxu1 %v5878_v38 }
0x10b1   : > { %v5876_v14 = vpop.permute.xlu1 %5875 }
0x10b2   : > { %11724 = vmatprep.subr.mxu1 %v5876_v14 }
0x10b3   : > { %11725 = vmatpush3.msra.mxu1 %v5876_v14 }
0x10b7   : > { %v12378_v57 = vpop.eup %12377 }
0x10b8   : > { %v5588_v27 = vsel %vm3537_vm2, %v12378_v57, 0.0 }
0x10b9   : > { %v12380_v12 = vpop.eup %12379  ;;  %5589 = vadd.xlane.f32.xlu0 %v5588_v27 }
0x10ba   : > { %v5585_v30 = vsel %vm3537_vm2, %v12380_v12, 0.0 }
0x10bd   : > { %5586 = vadd.xlane.f32.xlu0 %v5585_v30 }
0x10d3   : > { %5599 = vrot.lane.b32.xlu0 %v14650_v59, %s12916_s2  ;;  %v5872_v59 = vpop.permute.xlu1 %5871 }
0x10d7   : > { %5873 = vrot.lane.b32.xlu0 %v1666_v40, %s16200_s18  ;;  %v5868_v58 = vpop.permute.xlu1 %5867 }
0x10db   : > { %5869 = vrot.lane.b32.xlu0 %v1658_v9, %s16200_s18  ;;  %v5864_v56 = vpop.permute.xlu1 %5863 }
0x10df   : > { %5865 = vrot.lane.b32.xlu0 %v14723_v6, %s16200_s18 }
0x1142   : > { %v5590_v45 = vpop.xlane.xlu0 %5589 }
0x1143   : > { %12381 = vrcp.f32 %v5590_v45  ;;  %v12608_v45 = vld [vmem:[%s12935_s9 + $0x20] sm:$0xff] }
0x1146   : > { %v5587_v8 = vpop.xlane.xlu0 %5586 }
0x1147   : > { %12383 = vrcp.f32 %v5587_v8  ;;  %v12609_v8 = vld [vmem:[%s12940_s13 + $0x50] sm:$0xff] }
0x114a   : > { %v5600_v28 = vpop.permute.xlu0 %5599 }
0x114b   : > { %11672 = vmatprep.subr.mxu0 %v5600_v28 }
0x114c   : > { %11673 = vmatpush3.msra.mxu0 %v5600_v28  ;;  %v14781_v28 = vld [vmem:[%s12990_s30 + $0x18] sm:$0xff] }
0x114d   : > { %11674 = vmatprep.subr.mxu0 %v5598_v52 }
0x114e   : > { %11675 = vmatpush3.msra.mxu0 %v5598_v52  ;;  %v5874_v25 = vpop.permute.xlu0 %5873 }
0x114f   : > { %11679 = vmatprep.subr.mxu0 %v14690_v32  ;;  %11726 = vmatprep.subr.mxu1 %v5874_v25 }
0x1150   : > { %11727 = vmatpush3.msra.mxu1 %v5874_v25  ;;  %v12382_v14 = vpop.eup %12381  ;;  %v12613_v25 = vld [vmem:[%s12940_s13 + $0x58] sm:$0xff] }
0x1151   : > { %11728 = vmatprep.subr.mxu1 %v5872_v59  ;;  %v5594_v52 = vmul.f32 %v12382_v14, %v12378_v57  ;;  %v12595_v57 = vld [vmem:[%s12940_s13 + $0x8] sm:$0xff] }
0x1152   : > { %11729 = vmatpush3.msra.mxu1 %v5872_v59  ;;  %v5870_v38 = vpop.permute.xlu0 %5869  ;;  %v12612_v59 = vld [vmem:[%s12935_s9 + $0x28] sm:$0xff] }
0x1153   : > { %11730 = vmatprep.subr.mxu1 %v5870_v38  ;;  %v12616_v14 = vld [vmem:[%s13132_s28 + $0xa8] sm:$0xff] }
0x1154   : > { %v12384_v27 = vpop.eup %12383  ;;  %11731 = vmatpush3.msra.mxu1 %v5870_v38  ;;  %v12615_v38 = vld [vmem:[%s12940_s13 + $0x60] sm:$0xff] }
0x1155   : > { %11732 = vmatprep.subr.mxu1 %v5868_v58  ;;  %v5593_v30 = vmul.f32 %v12384_v27, %v12380_v12  ;;  %v12594_v12 = vld [vmem:[%s12935_s9] sm:$0xff]  ;;  %v12617_v27 = vld [vmem:[%s12935_s9 + $0x38] sm:$0xff] }
0x1156   : > { %11733 = vmatpush3.msra.mxu1 %v5868_v58  ;;  %v5866_v31 = vpop.permute.xlu0 %5865  ;;  %v12614_v58 = vld [vmem:[%s12935_s9 + $0x30] sm:$0xff] }
0x1157   : > { %11676 = vmatprep.mubr.msk.f32.mxu0 %vm3537_vm2, %v5593_v30  ;;  %11734 = vmatprep.subr.mxu1 %v5866_v31  ;;  %v12618_v30 = vld [vmem:[%s12940_s13 + $0x68] sm:$0xff] }
0x1158   : > { %11677 = vmatmul.mubr.msk.f32.vlgmr.msra.gmra.mxu0 %vm3537_vm2, %v5594_v52  ;;  %11735 = vmatpush3.msra.mxu1 %v5866_v31  ;;  %v12619_v31 = vld [vmem:[%s12935_s9 + $0x40] sm:$0xff]  ;;  %v12620_v52 = vld [vmem:[%s12940_s13 + $0x70] sm:$0xff] }
0x1159   : > { %11680 = vmatpush3.msra.mxu0 %v14690_v32  ;;  %11736 = vmatprep.subr.mxu1 %v5864_v56  ;;  %v12597_v32 = vld [vmem:[%s12940_s13 + $0x18] sm:$0xff] }
0x115a   : > { %11681 = vmatprep.subr.mxu0 %v14695_v42  ;;  %11737 = vmatpush3.msra.mxu1 %v5864_v56  ;;  %v12621_v56 = vld [vmem:[%s13132_s28 + $0xa0] sm:$0xff] }
0x115b   : > { %11682 = vmatpush3.msra.mxu0 %v14695_v42  ;;  %11695 = vmatprep.mubr.msk.f32.mxu0 %vm1851_vm1, %v12594_v12  ;;  %v12598_v42 = vld [vmem:[%s12940_s13 + $0x20] sm:$0xff]  ;;  %v12622_v12 = vld [vmem:[%s12935_s9 + $0x48] sm:$0xff] }
0x115c   : > { %11683 = vmatprep.subr.mxu0 %v1666_v40  ;;  %11739 = vmatmul.mubr.msk.f32.vlgmr.msra.gmra.mxu1 %vm1851_vm1, %v12595_v57  ;;  %v12623_v57 = vld [vmem:[%s12940_s13 + $0x78] sm:$0xff] }
0x115d   : > { %11684 = vmatpush3.msra.mxu0 %v1666_v40  ;;  %11741 = vmatprep.mubr.msk.f32.mxu1 %vm1851_vm1, %v12596_v16  ;;  %v12603_v40 = vld [vmem:[%s12935_s9 + $0x10] sm:$0xff] }
0x115e   : > { %11685 = vmatprep.subr.mxu0 %v14700_v7  ;;  %11808 = vmatprep.subr.mxu1 %v14367_v15  ;;  %v12624_v16 = vld [vmem:[%s12935_s9 + $0x50] sm:$0xff] }
0x115f   : > { %11686 = vmatpush3.msra.mxu0 %v14700_v7  ;;  %11809 = vmatpush3.msra.mxu1 %v14367_v15  ;;  %v12599_v15 = vld [vmem:[%s12940_s13 + $0x28] sm:$0xff]  ;;  %v12600_v7 = vld [vmem:[%s12940_s13 + $0x30] sm:$0xff] }
0x1160   : > { %11687 = vmatprep.subr.mxu0 %v1658_v9  ;;  %11742 = vmatmul.mubr.msk.f32.gmra.mxu1 %vm1851_vm1, %v12597_v32  ;;  %v12625_v32 = vld [vmem:[%s12940_s13 + $0x80] sm:$0xff] }
0x1161   : > { %11688 = vmatpush3.msra.mxu0 %v1658_v9  ;;  %11744 = vmatprep.mubr.msk.f32.mxu1 %vm1851_vm1, %v12598_v42  ;;  %v12604_v9 = vld [vmem:[%s12940_s13 + $0x40] sm:$0xff]  ;;  %v12626_v42 = vld [vmem:[%s13132_s28 + $0x98] sm:$0xff] }
0x1162   : > { %11689 = vmatprep.subr.mxu0 %v14705_v3  ;;  %11810 = vmatprep.subr.mxu1 %v14375_v44 }
0x1163   : > { %11690 = vmatpush3.msra.mxu0 %v14705_v3  ;;  %11811 = vmatpush3.msra.mxu1 %v14375_v44  ;;  %v12601_v44 = vld [vmem:[%s12935_s9 + $0x8] sm:$0xff]  ;;  %v12602_v3 = vld [vmem:[%s12940_s13 + $0x38] sm:$0xff] }
0x1164   : > { %11691 = vmatprep.subr.mxu0 %v14723_v6  ;;  %11745 = vmatmul.mubr.msk.f32.gmra.mxu1 %vm1851_vm1, %v12599_v15  ;;  %v12627_v15 = vld [vmem:[%s12935_s9 + $0x58] sm:$0xff] }
0x1165   : > { %11692 = vmatpush3.msra.mxu0 %v14723_v6  ;;  %11747 = vmatprep.mubr.msk.f32.mxu1 %vm1851_vm1, %v12600_v7  ;;  %v12607_v6 = vld [vmem:[%s12940_s13 + $0x48] sm:$0xff] }
0x1166   : > { %11693 = vmatprep.subr.mxu0 %v14710_v43  ;;  %11812 = vmatprep.subr.mxu1 %v14380_v47  ;;  %v12628_v7 = vld [vmem:[%s12940_s13 + $0x88] sm:$0xff] }
0x1167   : > { %11694 = vmatpush3.msra.mxu0 %v14710_v43  ;;  %11813 = vmatpush3.msra.mxu1 %v14380_v47  ;;  %v12605_v47 = vld [vmem:[%s13132_s28 + $0xb8] sm:$0xff] }
0x1168   : > { %11696 = vmatmul.mubr.msk.f32.vlgmr.msra.gmra.mxu0 %vm1851_vm1, %v12601_v44  ;;  %11748 = vmatmul.mubr.msk.f32.gmra.mxu1 %vm1851_vm1, %v12602_v3  ;;  %v12606_v43 = vld [vmem:[%s12935_s9 + $0x18] sm:$0xff]  ;;  %v12629_v44 = vld [vmem:[%s12935_s9 + $0x60] sm:$0xff]  ;;  %v12630_v3 = vld [vmem:[%s13132_s28 + $0x90] sm:$0xff] }
0x1169   : > { %11698 = vmatprep.mubr.msk.f32.mxu0 %vm1851_vm1, %v12603_v40  ;;  %11750 = vmatprep.mubr.msk.f32.mxu1 %vm1851_vm1, %v12604_v9  ;;  %v12631_v40 = vld [vmem:[%s13132_s28 + $0x88] sm:$0xff] }
0x116a   : > { %11814 = vmatprep.subr.mxu1 %v14385_v34  ;;  %11765 = vmatprep.subr.mxu0 %v12605_v47  ;;  %v12632_v9 = vld [vmem:[%s12935_s9 + $0x68] sm:$0xff] }
0x116b   : > { %11815 = vmatpush3.msra.mxu1 %v14385_v34  ;;  %11766 = vmatpush3.msra.mxu0 %v12605_v47  ;;  %v12611_v34 = vld [vmem:[%s13132_s28 + $0xb0] sm:$0xff] }
0x116c   : > { %11699 = vmatmul.mubr.msk.f32.gmra.mxu0 %vm1851_vm1, %v12606_v43  ;;  %11751 = vmatmul.mubr.msk.f32.gmra.mxu1 %vm1851_vm1, %v12607_v6  ;;  %v12633_v47 = vld [vmem:[%s12935_s9 + $0x70] sm:$0xff]  ;;  %v12634_v43 = vld [vmem:[%s13132_s28 + $0x80] sm:$0xff]  ;;  %v12635_v6 = vld [vmem:[%s12935_s9 + $0x78] sm:$0xff] }
0x116d   : > { %11701 = vmatprep.mubr.msk.f32.mxu0 %vm1851_vm1, %v12608_v45  ;;  %11753 = vmatprep.mubr.msk.f32.mxu1 %vm1851_vm1, %v12609_v8  ;;  %v12636_v45 = vld [vmem:[%s16154_s4 + $0xf8] sm:$0xff]  ;;  %v12637_v8 = vld [vmem:[%s12935_s9 + $0x80] sm:$0xff] }
0x116e   : > { %11819 = vmatprep.subr.mxu1 %v14781_v28  ;;  %11767 = vmatprep.subr.mxu0 %v12611_v34 }
0x116f   : > { %11768 = vmatpush3.msra.mxu0 %v12611_v34  ;;  %v12638_v34 = vld [vmem:[%s12935_s9 + $0x88] sm:$0xff] }
0x1170   : > { %11702 = vmatmul.mubr.msk.f32.gmra.mxu0 %vm1851_vm1, %v12612_v59  ;;  %11754 = vmatmul.mubr.msk.f32.gmra.mxu1 %vm1851_vm1, %v12613_v25  ;;  %v12639_v59 = vld [vmem:[%s12945_s17] sm:$0xff]  ;;  %v12640_v25 = vld [vmem:[%s12945_s17 + $0x8] sm:$0xff] }
0x1171   : > { %11704 = vmatprep.mubr.msk.f32.mxu0 %vm1851_vm1, %v12614_v58  ;;  %11756 = vmatprep.mubr.msk.f32.mxu1 %vm1851_vm1, %v12615_v38  ;;  %v12641_v58 = vld [vmem:[%s12945_s17 + $0x10] sm:$0xff]  ;;  %v12642_v38 = vld [vmem:[%s12945_s17 + $0x18] sm:$0xff] }
0x1172   : > { %11769 = vmatprep.subr.mxu0 %v12616_v14 }
0x1173   : > { %11770 = vmatpush3.msra.mxu0 %v12616_v14  ;;  %v12643_v14 = vld [vmem:[%s12945_s17 + $0x20] sm:$0xff] }
0x1174   : > { %11705 = vmatmul.mubr.msk.f32.gmra.mxu0 %vm1851_vm1, %v12617_v27  ;;  %11757 = vmatmul.mubr.msk.f32.gmra.mxu1 %vm1851_vm1, %v12618_v30 }
0x1175   : > { %11707 = vmatprep.mubr.msk.f32.mxu0 %vm1851_vm1, %v12619_v31  ;;  %11759 = vmatprep.mubr.msk.f32.mxu1 %vm1851_vm1, %v12620_v52 }
0x1176   : > { %11771 = vmatprep.subr.mxu0 %v12621_v56 }
0x1177   : > { %11772 = vmatpush3.msra.mxu0 %v12621_v56 }
0x1178   : > { %11708 = vmatmul.mubr.msk.f32.gmra.mxu0 %vm1851_vm1, %v12622_v12  ;;  %11760 = vmatmul.mubr.msk.f32.gmra.mxu1 %vm1851_vm1, %v12623_v57  ;;  %v12660_v12 = vld [vmem:[%s12980_s19 + $0x3] ss:$0 sm:$0xff] }
0x1179   : > { %11710 = vmatprep.mubr.msk.f32.mxu0 %vm1851_vm1, %v12624_v16  ;;  %11762 = vmatprep.mubr.msk.f32.mxu1 %vm1851_vm1, %v12625_v32 }
0x117a   : > { %11773 = vmatprep.subr.mxu0 %v12626_v42 }
0x117b   : > { %11774 = vmatpush3.msra.mxu0 %v12626_v42 }
0x117c   : > { %11711 = vmatmul.mubr.msk.f32.gmra.mxu0 %vm1851_vm1, %v12627_v15  ;;  %11763 = vmatmul.mubr.msk.f32.gmra.mxu1 %vm1851_vm1, %v12628_v7 }
0x117d   : > { %11713 = vmatprep.mubr.msk.f32.mxu0 %vm1851_vm1, %v12629_v44  ;;  %11775 = vmatprep.subr.mxu0 %v12630_v3 }
0x117e   : > { %11776 = vmatpush3.msra.mxu0 %v12630_v3 }
0x117f   : > { %11777 = vmatprep.subr.mxu0 %v12631_v40 }
0x1180   : > { %11714 = vmatmul.mubr.msk.f32.gmra.mxu0 %vm1851_vm1, %v12632_v9 }
0x1181   : > { %11716 = vmatprep.mubr.msk.f32.mxu0 %vm1851_vm1, %v12633_v47  ;;  %11778 = vmatpush3.msra.mxu0 %v12631_v40  ;;  %v12661_v40 = vld [vmem:[%s12980_s19 + $0x4] ss:$0 sm:$0xff] }
0x1182   : > { %11779 = vmatprep.subr.mxu0 %v12634_v43 }
0x1183   : > { %11780 = vmatpush3.msra.mxu0 %v12634_v43 }
0x1184   : > { %11717 = vmatmul.mubr.msk.f32.gmra.mxu0 %vm1851_vm1, %v12635_v6  ;;  %10951 = vmatprep.subr.mxu0 %v12636_v45 }
0x1185   : > { %11719 = vmatprep.mubr.msk.f32.mxu0 %vm1851_vm1, %v12637_v8 }
0x1188   : > { %11720 = vmatmul.mubr.msk.f32.gmra.mxu0 %vm1851_vm1, %v12638_v34 }
0x1189   : > { %11781 = vmatprep.mubr.msk.f32.mxu0 %vm1851_vm1, %v12639_v59 }
0x118c   : > { %11782 = vmatmul.mubr.msk.f32.vlgmr.msra.gmra.mxu0 %vm1851_vm1, %v12640_v25  ;;  %v12662_v25 = vld [vmem:[%s12980_s19 + $0x5] ss:$0 sm:$0xff] }
0x118d   : > { %10952 = vmatpush3.msra.mxu0 %v14455_v33  ;;  %11784 = vmatprep.mubr.msk.f32.mxu0 %vm1851_vm1, %v12641_v58  ;;  %v12644_v33 = vld [vmem:[%s12945_s17 + $0x28] sm:$0xff] }
0x118e   : > { %10953 = vmatprep.subr.mxu0 %v14459_v51  ;;  %v12645_v51 = vld [vmem:[%s12945_s17 + $0x30] sm:$0xff] }
0x118f   : > { %10954 = vmatpush3.msra.mxu0 %v14465_v36  ;;  %v12646_v36 = vld [vmem:[%s12945_s17 + $0x38] sm:$0xff] }
0x1190   : > { %11785 = vmatmul.mubr.msk.f32.gmra.mxu0 %vm1851_vm1, %v12642_v38  ;;  %10955 = vmatprep.subr.mxu0 %v14470_v60  ;;  %v12647_v60 = vld [vmem:[%s12945_s17 + $0x40] sm:$0xff] }
0x1191   : > { %11787 = vmatprep.mubr.msk.f32.mxu0 %vm1851_vm1, %v12643_v14  ;;  %10956 = vmatpush3.msra.mxu0 %v14475_v41  ;;  %v12648_v41 = vld [vmem:[%s12945_s17 + $0x48] sm:$0xff] }
0x1192   : > { %10957 = vmatprep.subr.mxu0 %v14481_v11  ;;  %v12649_v11 = vld [vmem:[%s12945_s17 + $0x50] sm:$0xff] }
0x1193   : > { %10958 = vmatpush3.msra.mxu0 %v14485_v39  ;;  %v12650_v39 = vld [vmem:[%s12945_s17 + $0x58] sm:$0xff] }
0x1194   : > { %11788 = vmatmul.mubr.msk.f32.gmra.mxu0 %vm1851_vm1, %v12644_v33  ;;  %10959 = vmatprep.subr.mxu0 %v14493_v61  ;;  %v12651_v61 = vld [vmem:[%s12945_s17 + $0x60] sm:$0xff] }
0x1195   : > { %11790 = vmatprep.mubr.msk.f32.mxu0 %vm1851_vm1, %v12645_v51  ;;  %10960 = vmatpush3.msra.mxu0 %v14497_v50  ;;  %v12652_v50 = vld [vmem:[%s12945_s17 + $0x68] sm:$0xff] }
0x1196   : > { %10961 = vmatprep.subr.mxu0 %v14506_v63  ;;  %v12653_v63 = vld [vmem:[%s12945_s17 + $0x70] sm:$0xff] }
0x1197   : > { %10962 = vmatpush3.msra.mxu0 %v14512_v2  ;;  %v12654_v2 = vld [vmem:[%s12945_s17 + $0x78] sm:$0xff] }
0x1198   : > { %11791 = vmatmul.mubr.msk.f32.gmra.mxu0 %vm1851_vm1, %v12646_v36  ;;  %10963 = vmatprep.subr.mxu0 %v14518_v49  ;;  %v12655_v49 = vld [vmem:[%s12945_s17 + $0x80] sm:$0xff] }
0x1199   : > { %11793 = vmatprep.mubr.msk.f32.mxu0 %vm1851_vm1, %v12647_v60  ;;  %10964 = vmatpush3.msra.mxu0 %v14522_v29  ;;  %v12656_v29 = vld [vmem:[%s12945_s17 + $0x88] sm:$0xff] }
0x119a   : > { %10965 = vmatprep.subr.mxu0 %v14526_v13 }
0x119b   : > { %10966 = vmatpush3.msra.mxu0 %v14535_v21 }
0x119c   : > { %11794 = vmatmul.mubr.msk.f32.gmra.mxu0 %vm1851_vm1, %v12648_v41  ;;  %10967 = vmatprep.subr.mxu0 %v14539_v54  ;;  %v12657_v54 = vld [vmem:[%s12980_s19] ss:$0 sm:$0xff] }
0x119d   : > { %11796 = vmatprep.mubr.msk.f32.mxu0 %vm1851_vm1, %v12649_v11  ;;  %10968 = vmatpush3.msra.mxu0 %v14543_v24  ;;  %v12663_v11 = vld [vmem:[%s12980_s19 + $0x6] ss:$0 sm:$0xff] }
0x119e   : > { %10969 = vmatprep.subr.mxu0 %v14549_v55 }
0x119f   : > { %10970 = vmatpush3.msra.mxu0 %v14553_v19 }
0x11a0   : > { %11797 = vmatmul.mubr.msk.f32.gmra.mxu0 %vm1851_vm1, %v12650_v39  ;;  %10971 = vmatprep.subr.mxu0 %v14557_v20  ;;  %v12658_v20 = vld [vmem:[%s12980_s19 + $0x1] ss:$0 sm:$0xff] }
0x11a1   : > { %11799 = vmatprep.mubr.msk.f32.mxu0 %vm1851_vm1, %v12651_v61  ;;  %10972 = vmatpush3.msra.mxu0 %v14561_v17 }
0x11a2   : > { %10973 = vmatprep.subr.mxu0 %v14565_v37 }
0x11a3   : > { %10974 = vmatpush3.msra.mxu0 %v14569_v1 }
0x11a4   : > { %11800 = vmatmul.mubr.msk.f32.gmra.mxu0 %vm1851_vm1, %v12652_v50  ;;  %10975 = vmatprep.subr.mxu0 %v14573_v10 }
0x11a5   : > { %11802 = vmatprep.mubr.msk.f32.mxu0 %vm1851_vm1, %v12653_v63  ;;  %10976 = vmatpush3.msra.mxu0 %v14577_v22 }
0x11a6   : > { %10977 = vmatprep.subr.mxu0 %v14581_v35 }
0x11a7   : > { %10978 = vmatpush3.msra.mxu0 %v14585_v23 }
0x11a8   : > { %11803 = vmatmul.mubr.msk.f32.gmra.mxu0 %vm1851_vm1, %v12654_v2  ;;  %10979 = vmatprep.subr.mxu0 %v14589_v48  ;;  %v12659_v48 = vld [vmem:[%s12980_s19 + $0x2] ss:$0 sm:$0xff] }
0x11a9   : > { %11805 = vmatprep.mubr.msk.f32.mxu0 %vm1851_vm1, %v12655_v49  ;;  %10980 = vmatpush3.msra.mxu0 %v14593_v62 }
0x11aa   : > { %10981 = vmatprep.subr.mxu0 %v14599_v5 }
0x11ab   : > { %10982 = vmatpush3.msra.mxu0 %v14604_v46 }
0x11ac   : > { %11806 = vmatmul.mubr.msk.f32.gmra.mxu0 %vm1851_vm1, %v12656_v29 }
0x1218   : > { %v14901_v37 = vpop.f32.mrf.mxu0 }
0x121a   : > { %v14904_v5 = vpop.f32.mrf.mxu0 }
0x121c   : > { %v11740_v13 = vpop.f32.mrf.mxu1 }
0x121d   : > { %v6232_v24 = vmul.f32 %v12657_v54, %v11740_v13 }
0x121e   : > { %v5953_v21 = vpop.f32.mrf.mxu1 }
0x121f   : > { %v6231_v19 = vmul.f32 %v12657_v54, %v5953_v21  ;;  %v12664_v21 = vld [vmem:[%s12980_s19 + $0x7] ss:$0 sm:$0xff] }
0x1220   : > { %v11743_v55 = vpop.f32.mrf.mxu1 }
0x1221   : > { %v6234_v17 = vmul.f32 %v12658_v20, %v11743_v55 }
0x1222   : > { %v5963_v1 = vpop.f32.mrf.mxu1 }
0x1223   : > { %v6236_v10 = vadd.f32 %v6234_v17, %v6232_v24  ;;  %v6233_v22 = vmul.f32 %v12658_v20, %v5963_v1 }
0x1224   : > { %v11746_v35 = vpop.f32.mrf.mxu1 }
0x1225   : > { %v6235_v23 = vadd.f32 %v6233_v22, %v6231_v19  ;;  %v6238_v62 = vmul.f32 %v12659_v48, %v11746_v35  ;;  %v12665_v19 = vld [vmem:[%s12975_s14 + $0x1] ss:$0 sm:$0xff] }
0x1226   : > { %v5973_v46 = vpop.f32.mrf.mxu1 }
0x1227   : > { %v6240_v27 = vadd.f32 %v6238_v62, %v6236_v10  ;;  %v6237_v30 = vmul.f32 %v12659_v48, %v5973_v46  ;;  %v12667_v62 = vld [vmem:[%s12975_s14 + $0x2] ss:$0 sm:$0xff] }
0x1228   : > { %v11697_v31 = vpop.f32.mrf.mxu0  ;;  %v11749_v52 = vpop.f32.mrf.mxu1 }
0x1229   : > { %v6239_v56 = vadd.f32 %v6237_v30, %v6235_v23  ;;  %v6242_v57 = vmul.f32 %v12660_v12, %v11749_v52  ;;  %v12666_v23 = vld [vmem:[%s12975_s14] ss:$0 sm:$0xff]  ;;  %v12668_v30 = vld [vmem:[%s12980_s19 + $0x8] ss:$0 sm:$0xff] }
0x122a   : > { %v5766_v16 = vpop.f32.mrf.mxu0  ;;  %v5983_v32 = vpop.f32.mrf.mxu1 }
0x122b   : > { %v6244_v42 = vadd.f32 %v6242_v57, %v6240_v27  ;;  %v6241_v15 = vmul.f32 %v12660_v12, %v5983_v32  ;;  %v6197_v48 = vmul.f32 %v12666_v23, %v5766_v16 }
0x122c   : > { %v11700_v7 = vpop.f32.mrf.mxu0  ;;  %v11752_v44 = vpop.f32.mrf.mxu1 }
0x122d   : > { %v6243_v3 = vadd.f32 %v6241_v15, %v6239_v56  ;;  %v6246_v9 = vmul.f32 %v12661_v40, %v11752_v44  ;;  %v6200_v10 = vmul.f32 %v12665_v19, %v11700_v7  ;;  %v6198_v56 = vmul.f32 %v12666_v23, %v11697_v31  ;;  %v12669_v15 = vld [vmem:[%s12975_s14 + $0x3] ss:$0 sm:$0xff] }
0x122e   : > { %v5776_v47 = vpop.f32.mrf.mxu0  ;;  %v5993_v43 = vpop.f32.mrf.mxu1  ;;  %v14940_v23 = vld [vmem:[%s12990_s30] sm:$0xff] }
0x122f   : > { %v6248_v6 = vadd.f32 %v6246_v9, %v6244_v42  ;;  %v6245_v45 = vmul.f32 %v12661_v40, %v5993_v43  ;;  %v6199_v20 = vmul.f32 %v12665_v19, %v5776_v47  ;;  %v6202_v40 = vadd.f32 %v6200_v10, %v6198_v56  ;;  %v12670_v43 = vld [vmem:[%s12975_s14 + $0x4] ss:$0 sm:$0xff]  ;;  %v14966_v56 = vld [vmem:[%s12985_s24 + $0x8] sm:$0xff] }
0x1230   : > { %v11703_v8 = vpop.f32.mrf.mxu0  ;;  %v11755_v34 = vpop.f32.mrf.mxu1 }
0x1231   : > { %v6247_v59 = vadd.f32 %v6245_v45, %v6243_v3  ;;  %v6250_v58 = vmul.f32 %v12662_v25, %v11755_v34  ;;  %v6204_v12 = vmul.f32 %v12667_v62, %v11703_v8  ;;  %v6201_v42 = vadd.f32 %v6199_v20, %v6197_v48  ;;  %v14945_v48 = vld [vmem:[%s12985_s24 + $0x18] sm:$0xff] }
0x1232   : > { %v5786_v38 = vpop.f32.mrf.mxu0  ;;  %v6003_v14 = vpop.f32.mrf.mxu1 }
0x1233   : > { %v6252_v33 = vadd.f32 %v6250_v58, %v6248_v6  ;;  %v6249_v51 = vmul.f32 %v12662_v25, %v6003_v14  ;;  %v6203_v46 = vmul.f32 %v12667_v62, %v5786_v38  ;;  %v6206_v31 = vadd.f32 %v6204_v12, %v6202_v40  ;;  %v12671_v25 = vld [vmem:[%s12975_s14 + $0x5] ss:$0 sm:$0xff] }
0x1234   : > { %v11706_v36 = vpop.f32.mrf.mxu0  ;;  %v11758_v60 = vpop.f32.mrf.mxu1  ;;  %v14971_v12 = vld [vmem:[%s12985_s24] sm:$0xff] }
0x1235   : > { %v6251_v41 = vadd.f32 %v6249_v51, %v6247_v59  ;;  %v6254_v39 = vmul.f32 %v12663_v11, %v11758_v60  ;;  %v6208_v9 = vmul.f32 %v12669_v15, %v11706_v36  ;;  %v6205_v47 = vadd.f32 %v6203_v46, %v6201_v42  ;;  %v12672_v36 = vld [vmem:[%s12975_s14 + $0x6] ss:$0 sm:$0xff] }
0x1236   : > { %v5796_v61 = vpop.f32.mrf.mxu0  ;;  %v6013_v50 = vpop.f32.mrf.mxu1 }
0x1237   : > { %v6256_v63 = vadd.f32 %v6254_v39, %v6252_v33  ;;  %v6253_v2 = vmul.f32 %v12663_v11, %v6013_v50  ;;  %v6207_v44 = vmul.f32 %v12669_v15, %v5796_v61  ;;  %v6210_v38 = vadd.f32 %v6208_v9, %v6206_v31  ;;  %v12673_v50 = vld [vmem:[%s12975_s14 + $0x7] ss:$0 sm:$0xff]  ;;  %v12682_v9 = vld [vmem:[%s13025_s20 + $0x38] sm:$0xff] }
0x1238   : > { %v11709_v49 = vpop.f32.mrf.mxu0  ;;  %v11761_v29 = vpop.f32.mrf.mxu1 }
0x1239   : > { %v6255_v13 = vadd.f32 %v6253_v2, %v6251_v41  ;;  %v6258_v54 = vmul.f32 %v12664_v21, %v11761_v29  ;;  %v6212_v8 = vmul.f32 %v12670_v43, %v11709_v49  ;;  %v6209_v59 = vadd.f32 %v6207_v44, %v6205_v47 }
0x123a   : > { %v5806_v24 = vpop.f32.mrf.mxu0  ;;  %v6023_v55 = vpop.f32.mrf.mxu1 }
0x123b   : > { %v6260_v17 = vadd.f32 %v6258_v54, %v6256_v63  ;;  %v6257_v1 = vmul.f32 %v12664_v21, %v6023_v55  ;;  %v6211_v6 = vmul.f32 %v12670_v43, %v5806_v24  ;;  %v6214_v41 = vadd.f32 %v6212_v8, %v6210_v38  ;;  %v12674_v54 = vld [vmem:[%s12975_s14 + $0x8] ss:$0 sm:$0xff] }
0x123c   : > { %v11712_v22 = vpop.f32.mrf.mxu0  ;;  %v11764_v35 = vpop.f32.mrf.mxu1 }
0x123d   : > { %v6259_v27 = vadd.f32 %v6257_v1, %v6255_v13  ;;  %v6262_v52 = vmul.f32 %v12668_v30, %v11764_v35  ;;  %v6216_v14 = vmul.f32 %v12671_v25, %v11712_v22  ;;  %v6213_v51 = vadd.f32 %v6211_v6, %v6209_v59  ;;  %v14930_v22 = vld [vmem:[%s12990_s30 + $0x10] sm:$0xff]  ;;  %v14935_v35 = vld [vmem:[%s12990_s30 + $0x8] sm:$0xff] }
0x123e   : > { %v5816_v57 = vpop.f32.mrf.mxu0  ;;  %v6033_v32 = vpop.f32.mrf.mxu1 }
0x123f   : > { %v14916_v3 = vadd.f32 %v6262_v52, %v6260_v17  ;;  %v6261_v7 = vmul.f32 %v12668_v30, %v6033_v32  ;;  %v6215_v58 = vmul.f32 %v12671_v25, %v5816_v57  ;;  %v6218_v2 = vadd.f32 %v6216_v14, %v6214_v41  ;;  %v14961_v52 = vld [vmem:[%s12985_s24 + $0x10] sm:$0xff]  ;;  %v15029_v41 = vld [vmem:[%s13025_s20 + $0x28] sm:$0xff] }
0x1240   : > { %v11715_v16 = vpop.f32.mrf.mxu0  ;;  %v15022_v14 = vld [vmem:[%s13025_s20 + $0x30] sm:$0xff] }
0x1241   : > { %v6263_v45 = vadd.f32 %v6261_v7, %v6259_v27  ;;  %6677 = vrot.lane.b32.xlu1 %v14916_v3, %s16200_s18  ;;  %v6220_v11 = vmul.f32 %v12672_v36, %v11715_v16  ;;  %v6217_v61 = vadd.f32 %v6215_v58, %v6213_v51 }
0x1242   : > { %v5826_v34 = vpop.f32.mrf.mxu0 }
0x1243   : > { %6675 = vrot.lane.b32.xlu0 %v6263_v45, %s16200_s18  ;;  %v6219_v60 = vmul.f32 %v12672_v36, %v5826_v34  ;;  %v6222_v21 = vadd.f32 %v6220_v11, %v6218_v2  ;;  %v12684_v36 = vld [vmem:[%s16163_s11] ss:$0 sm:$0xff] }
0x1244   : > { %v11718_v33 = vpop.f32.mrf.mxu0  ;;  %v10336_v11 = vld [vmem:[%s16196_s3] ss:$0 sm:$0xff] }
0x1245   : > { %v6224_v49 = vmul.f32 %v12673_v50, %v11718_v33  ;;  %v6221_v13 = vadd.f32 %v6219_v60, %v6217_v61  ;;  %v10337_v2 = vld [vmem:[%s16197_s5] ss:$0 sm:$0xff] }
0x1246   : > { %v5836_v39 = vpop.f32.mrf.mxu0 }
0x1247   : > { %v6223_v63 = vmul.f32 %v12673_v50, %v5836_v39  ;;  %v6226_v17 = vadd.f32 %v6224_v49, %v6222_v21  ;;  %v15034_v39 = vld [vmem:[%s13025_s20 + $0x20] sm:$0xff]  ;;  %v15043_v49 = vld [vmem:[%s13025_s20 + $0x10] sm:$0xff] }
0x1248   : > { %v11721_v29 = vpop.f32.mrf.mxu0 }
0x1249   : > { %v6228_v24 = vmul.f32 %v12674_v54, %v11721_v29  ;;  %v6225_v19 = vadd.f32 %v6223_v63, %v6221_v13  ;;  %v15038_v63 = vld [vmem:[%s13025_s20 + $0x18] sm:$0xff]  ;;  %v15047_v29 = vld [vmem:[%s16164_s23] ss:$0 sm:$0xff] }
0x124a   : > { %v5846_v55 = vpop.f32.mrf.mxu0 }
0x124b   : > { %v6227_v20 = vmul.f32 %v12674_v54, %v5846_v55  ;;  %v6230_v10 = vadd.f32 %v6228_v24, %v6226_v17  ;;  %v15051_v54 = vld [vmem:[%s13025_s20 + $0x8] sm:$0xff] }
0x124d   : > { %v6229_v1 = vadd.f32 %v6227_v20, %v6225_v19  ;;  %v15058_v19 = vld [vmem:[%s13025_s20] sm:$0xff] }
0x124f   : > { %11816 = vmatprep.mubr.msk.f32.mxu1 %vm967_vm0, %v6229_v1 }
0x1250   : > { %11817 = vmatmul.mubr.msk.f32.vlgmr.msra.gmra.mxu1 %vm967_vm0, %v6230_v10 }
0x1251   : > { %11820 = vmatpush3.msra.mxu1 %v14781_v28 }
0x1252   : > { %11821 = vmatprep.subr.mxu1 %v14930_v22 }
0x1253   : > { %11822 = vmatpush3.msra.mxu1 %v14930_v22 }
0x1254   : > { %11823 = vmatprep.subr.mxu1 %v14935_v35 }
0x1255   : > { %11824 = vmatpush3.msra.mxu1 %v14935_v35 }
0x1256   : > { %11825 = vmatprep.subr.mxu1 %v14940_v23 }
0x1257   : > { %11826 = vmatpush3.msra.mxu1 %v14940_v23 }
0x1258   : > { %11830 = vmatprep.subr.mxu1 %v14945_v48 }
0x12b3   : > { %v6678_v40 = vpop.permute.xlu1 %6677 }
0x12b5   : > { %v6676_v7 = vpop.permute.xlu0 %6675 }
0x1310   : > { %v14948_v62 = vpop.f32.mrf.mxu1 }
0x1311   : > { %v6385_v30 = vmul.f32 %v14948_v62, %v14948_v62 }
0x1312   : > { %v14950_v46 = vpop.f32.mrf.mxu1 }
0x1313   : > { %v6384_v27 = vmul.f32 %v14950_v46, %v14950_v46 }
0x1315   : > { %11827 = vmatprep.mubr.msk.f32.mxu1 %vm967_vm0, %v6384_v27 }
0x1316   : > { %11828 = vmatmul.mubr.msk.f32.vlgmr.msra.gmra.mxu1 %vm967_vm0, %v6385_v30 }
0x1317   : > { %11831 = vmatpush3.msra.mxu1 %v14945_v48  ;;  %11838 = vmatprep.mubr.msk.f32.mxu1 %vm967_vm0, %v6263_v45 }
0x1318   : > { %11832 = vmatprep.subr.mxu1 %v14961_v52 }
0x1319   : > { %11833 = vmatpush3.msra.mxu1 %v14961_v52 }
0x131a   : > { %11834 = vmatprep.subr.mxu1 %v14966_v56 }
0x131b   : > { %11835 = vmatpush3.msra.mxu1 %v14966_v56 }
0x131c   : > { %11836 = vmatprep.subr.mxu1 %v14971_v12 }
0x131d   : > { %11837 = vmatpush3.msra.mxu1 %v14971_v12 }
0x131e   : > { %11839 = vmatmul.mubr.msk.f32.vlgmr.msra.gmra.mxu1 %vm967_vm0, %v14916_v3  ;;  %11841 = vmatprep.subr.mxu1 %v14781_v28 }
0x131f   : > { %11842 = vmatpush3.msra.mxu1 %v14781_v28 }
0x1320   : > { %11843 = vmatprep.subr.mxu1 %v14930_v22 }
0x1321   : > { %11844 = vmatpush3.msra.mxu1 %v14930_v22 }
0x1322   : > { %11845 = vmatprep.subr.mxu1 %v14935_v35 }
0x1323   : > { %11846 = vmatpush3.msra.mxu1 %v14935_v35 }
0x1324   : > { %11847 = vmatprep.subr.mxu1 %v14940_v23 }
0x1325   : > { %11848 = vmatpush3.msra.mxu1 %v14940_v23 }
0x1326   : > { %11852 = vmatprep.subr.mxu1 %v14945_v48 }
0x13d6   : > { %v11829_v57 = vpop.f32.mrf.mxu1 }
0x13d7   : > { %v6464_v47 = vadd.f32 1e-05, %v11829_v57 }
0x13d8   : > { %v6458_v32 = vpop.f32.mrf.mxu1 }
0x13d9   : > { %v6459_v16 = vadd.f32 1e-05, %v6458_v32 }
0x13db   : > { %12385 = vrsqrt.f32 %v6459_v16 }
0x13dc   : > { %12387 = vrsqrt.f32 %v6464_v47  ;;  %v12693_v47 = vld [vmem:[%s16187_s1 + $0x18] sm:$0xff] }
0x13de   : > { %v11840_v42 = vpop.f32.mrf.mxu1 }
0x13df   : > { %v6571_v3 = vmul.f32 %v11840_v42, %v11840_v42 }
0x13e0   : > { %v14986_v15 = vpop.f32.mrf.mxu1 }
0x13e1   : > { %v6570_v44 = vmul.f32 %v14986_v15, %v14986_v15 }
0x13e3   : > { %11849 = vmatprep.mubr.msk.f32.mxu1 %vm967_vm0, %v6570_v44  ;;  %v15092_v44 = vld [vmem:[%s16187_s1 + $0x8] sm:$0xff] }
0x13e4   : > { %11850 = vmatmul.mubr.msk.f32.vlgmr.msra.gmra.mxu1 %vm967_vm0, %v6571_v3 }
0x13e5   : > { %11853 = vmatpush3.msra.mxu1 %v14945_v48  ;;  %11860 = vmatprep.mubr.msk.f32.mxu1 %vm967_vm0, %v6676_v7  ;;  %v12692_v7 = vld [vmem:[%s16187_s1] sm:$0xff] }
0x13e6   : > { %11854 = vmatprep.subr.mxu1 %v14961_v52 }
0x13e7   : > { %11855 = vmatpush3.msra.mxu1 %v14961_v52 }
0x13e8   : > { %11856 = vmatprep.subr.mxu1 %v14966_v56  ;;  %v12386_v8 = vpop.eup %12385 }
0x13e9   : > { %11857 = vmatpush3.msra.mxu1 %v14966_v56  ;;  %v6469_v25 = vmul.f32 %v12386_v8, %v14950_v46  ;;  %v12388_v38 = vpop.eup %12387 }
0x13ea   : > { %11858 = vmatprep.subr.mxu1 %v14971_v12  ;;  %v6470_v51 = vmul.f32 %v12388_v38, %v14948_v62 }
0x13eb   : > { %11859 = vmatpush3.msra.mxu1 %v14971_v12  ;;  %v6477_v60 = vmul.f32 %v12684_v36, %v6469_v25  ;;  %v12695_v25 = vld [vmem:[%s16198_s25] ss:$0 sm:$0xff] }
0x13ec   : > { %11861 = vmatmul.mubr.msk.f32.vlgmr.msra.gmra.mxu1 %vm967_vm0, %v6678_v40  ;;  %11863 = vmatprep.subr.mxu1 %v14781_v28  ;;  %v6478_v55 = vmul.f32 %v12684_v36, %v6470_v51  ;;  %v12697_v51 = vld [vmem:[%s16199_s29] ss:$0 sm:$0xff] }
0x13ed   : > { %11864 = vmatpush3.msra.mxu1 %v14781_v28  ;;  %v15055_v24 = vadd.f32 %v15047_v29, %v6477_v60 }
0x13ee   : > { %11865 = vmatprep.subr.mxu1 %v14930_v22  ;;  %v15071_v10 = vadd.f32 %v15047_v29, %v6478_v55 }
0x13ef   : > { %11866 = vmatpush3.msra.mxu1 %v14930_v22  ;;  %v15078_v62 = vmul.f32 0.25, %v15055_v24 }
0x13f0   : > { %11867 = vmatprep.subr.mxu1 %v14935_v35  ;;  %v15087_v46 = vmul.f32 0.25, %v15071_v10 }
0x13f1   : > { %11868 = vmatpush3.msra.mxu1 %v14935_v35 }
0x13f2   : > { %11869 = vmatprep.subr.mxu1 %v14940_v23 }
0x13f3   : > { %11870 = vmatpush3.msra.mxu1 %v14940_v23 }
0x13f4   : > { %6891 = vmatprep.subr.mxu1 %v12682_v9 }
0x14a4   : > { %v11851_v28 = vpop.f32.mrf.mxu1 }
0x14a5   : > { %v6650_v43 = vadd.f32 1e-05, %v11851_v28 }
0x14a6   : > { %v6644_v6 = vpop.f32.mrf.mxu1 }
0x14a7   : > { %12389 = vrsqrt.f32 %v6650_v43  ;;  %v6645_v45 = vadd.f32 1e-05, %v6644_v6  ;;  %v12694_v6 = vld [vmem:[%s16187_s1 + $0x10] sm:$0xff] }
0x14a9   : > { %12391 = vrsqrt.f32 %v6645_v45 }
0x14ac   : > { %v15010_v31 = vpop.f32.mrf.mxu1 }
0x14ad   : > { %v6759_v58 = vmul.f32 %v15010_v31, %v15010_v31 }
0x14ae   : > { %v15012_v34 = vpop.f32.mrf.mxu1 }
0x14af   : > { %v6758_v59 = vmul.f32 %v15012_v34, %v15012_v34 }
0x14b1   : > { %11871 = vmatprep.mubr.msk.f32.mxu1 %vm967_vm0, %v6758_v59 }
0x14b2   : > { %11872 = vmatmul.mubr.msk.f32.vlgmr.msra.gmra.mxu1 %vm967_vm0, %v6759_v58 }
0x14b3   : > { %6892 = vmatpush1.msra.mxu1 %v15022_v14  ;;  %6931 = vmatprep.mubr.f32.mxu1 %v16203_v53 }
0x14b4   : > { %v12390_v33 = vpop.eup %12389  ;;  %6893 = vmatprep.subr.mxu1 %v15029_v41 }
0x14b5   : > { %6894 = vmatpush1.msra.mxu1 %v15034_v39  ;;  %v6656_v61 = vmul.f32 %v12390_v33, %v11840_v42  ;;  %v12696_v33 = vld [vmem:[%s12940_s13] sm:$0xff] }
0x14b6   : > { %v12392_v50 = vpop.eup %12391  ;;  %6895 = vmatprep.subr.mxu1 %v15038_v63 }
0x14b7   : > { %6896 = vmatpush1.msra.mxu1 %v15043_v49  ;;  %v6664_v13 = vmul.f32 %v10336_v11, %v6656_v61  ;;  %v6655_v21 = vmul.f32 %v12392_v50, %v14986_v15 }
0x14b8   : > { %6897 = vmatprep.subr.mxu1 %v15051_v54 }
0x14b9   : > { %6898 = vmatpush1.msra.mxu1 %v15058_v19  ;;  %v15061_v20 = vadd.f32 %v10337_v2, %v6664_v13  ;;  %v6663_v17 = vmul.f32 %v10336_v11, %v6655_v21 }
0x14ba   : > { %10344 = vmatmul.mubr.msk.f32.vlgmr.msra.gmra.mxu1 %vm967_vm0, %v15055_v24 }
0x14bb   : > { %6937 = vmatprep.mubr.f32.mxu1 %v16203_v53  ;;  %11874 = vmatprep.subr.msk.mxu1 %vm3537_vm2, %v15061_v20  ;;  %v15068_v1 = vadd.f32 %v10337_v2, %v6663_v17 }
0x14bc   : > { %11875 = vmatpush3.xpose.msk.msra.mxu1 %vm3537_vm2, %v15061_v20 }
0x14bd   : > { %11876 = vmatprep.subr.msk.mxu1 %vm3537_vm2, %v15068_v1 }
0x14be   : > { %10345 = vmatmul.mubr.msk.f32.gmra.mxu1 %vm967_vm0, %v15071_v10 }
0x14bf   : > { %11878 = vmatprep.mubr.msk.f32.mxu1 %vm3537_vm2, %v15078_v62 }
0x14c0   : > { %11877 = vmatpush3.xpose.msk.msra.mxu1 %vm3537_vm2, %v15068_v1 }
0x14c3   : > { %11879 = vmatmul.mubr.msk.f32.vlgmr.msra.gmra.mxu1 %vm3537_vm2, %v15087_v46 }
0x1572   : > { %v11873_v27 = vpop.f32.mrf.mxu1 }
0x1573   : > { %v6838_v30 = vadd.f32 1e-05, %v11873_v27 }
0x1574   : > { %v6832_v57 = vpop.f32.mrf.mxu1 }
0x1575   : > { %12393 = vrsqrt.f32 %v6838_v30  ;;  %v6833_v32 = vadd.f32 1e-05, %v6832_v57 }
0x1577   : > { %12395 = vrsqrt.f32 %v6833_v32 }
0x157a   : > { %v6933_v42 = vpop.f32.mrf.mxu1 }
0x157b   : > { %v6944_v40 = vmul.f32 %v12692_v7, %v6933_v42 }
0x157c   : > { %v6935_v15 = vpop.f32.mrf.mxu1 }
0x157d   : > { %v6945_v3 = vmul.f32 %v15092_v44, %v6935_v15 }
0x157e   : > { %v6939_v9 = vpop.f32.mrf.mxu1 }
0x157f   : > { %7012 = vmatprep.mubr.f32.mxu0 %v6945_v3  ;;  %v6946_v45 = vmul.f32 %v12694_v6, %v6939_v9 }
0x1580   : > { %v6941_v16 = vpop.f32.mrf.mxu1  ;;  %7013 = vmatmul.mubr.f32.vlgmr.msra.gmra.mxu0 %v6944_v40 }
0x1581   : > { %v6947_v28 = vmul.f32 %v12693_v47, %v6941_v16 }
0x1582   : > { %v12394_v43 = vpop.eup %12393 }
0x1583   : > { %7017 = vmatprep.mubr.f32.mxu0 %v6947_v28  ;;  %v6844_v8 = vmul.f32 %v12394_v43, %v15010_v31  ;;  %v15112_v31 = vpop.f32.mrf.mxu0  ;;  %v11880_v9 = vpop.f32.mrf.mxu1 }
0x1584   : > { %v12396_v59 = vpop.eup %12395  ;;  %7018 = vmatmul.mubr.f32.gmra.mxu0 %v6946_v45 }
0x1585   : > { %v6852_v58 = vmul.f32 %v12695_v25, %v6844_v8  ;;  %v6843_v38 = vmul.f32 %v12396_v59, %v15012_v34  ;;  %11961 = vmatprep.mubr.msk.f32.mxu0 %vm1851_vm1, %v12696_v33  ;;  %v15114_v34 = vpop.f32.mrf.mxu0  ;;  %v7103_v43 = vpop.f32.mrf.mxu1 }
0x1587   : > { %v15104_v36 = vadd.f32 %v12697_v51, %v6852_v58  ;;  %v6851_v60 = vmul.f32 %v12695_v25, %v6843_v38  ;;  %v15116_v61 = vpop.f32.mrf.mxu0 }
0x1589   : > { %11881 = vmatprep.subr.mxu1 %v15104_v36  ;;  %v15107_v11 = vadd.f32 %v12697_v51, %v6851_v60  ;;  %v15118_v50 = vpop.f32.mrf.mxu0 }
0x158a   : > { %11882 = vmatpush3.msra.mxu1 %v15104_v36 }
0x158b   : > { %11883 = vmatprep.subr.mxu1 %v15107_v11  ;;  %v15120_v2 = vpop.f32.mrf.mxu0 }
0x158c   : > { %11884 = vmatpush3.msra.mxu1 %v15107_v11 }
0x158d   : > { %v15122_v13 = vpop.f32.mrf.mxu0 }
0x158f   : > { %v15124_v21 = vpop.f32.mrf.mxu0 }
0x1591   : > { %v15126_v55 = vpop.f32.mrf.mxu0 }
0x1593   : > { %v15128_v17 = vpop.f32.mrf.mxu0 }
0x1594   : > { %16226 = vst [vmem:[#allocation29_spill] sm:$0xff] %v15128_v17 }
0x1595   : > { %v15130_v27 = vpop.f32.mrf.mxu0 }
0x1597   : > { %v15132_v30 = vpop.f32.mrf.mxu0 }
0x1598   : > { %16227 = vst [vmem:[#allocation32_spill] sm:$0xff] %v15132_v30 }
0x1599   : > { %v15134_v57 = vpop.f32.mrf.mxu0 }
0x159a   : > { %16228 = vst [vmem:[#allocation30_spill] sm:$0xff] %v15134_v57 }
0x159b   : > { %v15136_v32 = vpop.f32.mrf.mxu0 }
0x159c   : > { %16229 = vst [vmem:[#allocation31_spill] sm:$0xff] %v15136_v32 }
0x159d   : > { %v15138_v42 = vpop.f32.mrf.mxu0 }
0x159e   : > { %16230 = vst [vmem:[#allocation79_spill] sm:$0xff] %v15138_v42 }
0x159f   : > { %v15140_v15 = vpop.f32.mrf.mxu0 }
0x15a0   : > { %16231 = vst [vmem:[#allocation80_spill] sm:$0xff] %v15140_v15 }
0x15a1   : > { %v15142_v3 = vpop.f32.mrf.mxu0 }
0x15a2   : > { %16232 = vst [vmem:[#allocation81_spill] sm:$0xff] %v15142_v3 }
0x15a3   : > { %v15144_v7 = vpop.f32.mrf.mxu0 }
0x15a4   : > { %16233 = vst [vmem:[#allocation82_spill] sm:$0xff] %v15144_v7 }
0x15a5   : > { %v15146_v40 = vpop.f32.mrf.mxu0 }
0x15a6   : > { %16234 = vst [vmem:[#allocation83_spill] sm:$0xff] %v15146_v40 }
0x1640   : > { %v10983_v16 = vpop.f32.mrf.mxu0 }
0x1642   : > { %v10984_v47 = vpop.f32.mrf.mxu0 }
0x1643   : > { %v10985_v28 = vadd.f32 %v10984_v47, %v10983_v16 }
0x1644   : > { %v10986_v6 = vpop.f32.mrf.mxu0 }
0x1645   : > { %v7104_v45 = vadd.f32 %v10985_v28, %v7103_v43 }
0x1646   : > { %v10987_v8 = vpop.f32.mrf.mxu0 }
0x1647   : > { %v10988_v59 = vadd.f32 %v10987_v8, %v10986_v6  ;;  %v7112_v25 = vsel %vm3537_vm2, %v7104_v45, -inf }
0x1648   : > { %7113 = vmax.xlane.f32.xlu0 %v7112_v25 }
0x1649   : > { %v7109_v58 = vadd.f32 %v11880_v9, %v10988_v59 }
0x164b   : > { %v7115_v38 = vsel %vm3537_vm2, %v7109_v58, -inf }
0x164c   : > { %7116 = vmax.xlane.f32.xlu1 %v7115_v38 }
0x165d   : > { %7221 = vrot.lane.b32.xlu1 %v15068_v1, %s12916_s2 }
0x1661   : > { %7217 = vrot.lane.b32.xlu1 %v15078_v62, %s12916_s2 }
0x1665   : > { %7219 = vrot.lane.b32.xlu1 %v15087_v46, %s12916_s2 }
0x1669   : > { %7229 = vrot.lane.b32.xlu1 %v10988_v59, %s12916_s2 }
0x16d1   : > { %v7114_v33 = vpop.xlane.xlu0 %7113 }
0x16d2   : > { %v7118_v51 = vsub.f32 %v7104_v45, %v7114_v33 }
0x16d4   : > { %v7120_v60 = vmul.f32 1.442695, %v7118_v51 }
0x16d5   : > { %v7117_v16 = vpop.xlane.xlu1 %7116 }
0x16d6   : > { %12397 = vpow2.f32 %v7120_v60  ;;  %v7119_v9 = vsub.f32 %v7109_v58, %v7117_v16 }
0x16d8   : > { %v7122_v47 = vmul.f32 1.442695, %v7119_v9 }
0x16d9   : > { %v7222_v25 = vpop.permute.xlu1 %7221 }
0x16da   : > { %12399 = vpow2.f32 %v7122_v47 }
0x16dd   : > { %v7218_v51 = vpop.permute.xlu1 %7217 }
0x16e3   : > { %v12398_v43 = vpop.eup %12397 }
0x16e4   : > { %v7124_v6 = vsel %vm3537_vm2, %v12398_v43, 0.0 }
0x16e5   : > { %7125 = vadd.xlane.f32.xlu0 %v7124_v6 }
0x16e7   : > { %v12400_v1 = vpop.eup %12399 }
0x16e8   : > { %v7127_v62 = vsel %vm3537_vm2, %v12400_v1, 0.0 }
0x16e9   : > { %7128 = vadd.xlane.f32.xlu0 %v7127_v62 }
0x16ff   : > { %7223 = vrot.lane.b32.xlu0 %v15061_v20, %s12916_s2  ;;  %v7220_v20 = vpop.permute.xlu1 %7219 }
0x1703   : > { %7227 = vrot.lane.b32.xlu0 %v10985_v28, %s12916_s2  ;;  %v7230_v47 = vpop.permute.xlu1 %7229 }
0x176e   : > { %v7126_v46 = vpop.xlane.xlu0 %7125 }
0x176f   : > { %12401 = vrcp.f32 %v7126_v46 }
0x1772   : > { %v7129_v45 = vpop.xlane.xlu0 %7128 }
0x1773   : > { %12403 = vrcp.f32 %v7129_v45 }
0x1776   : > { %v7224_v8 = vpop.permute.xlu0 %7223 }
0x1777   : > { %11888 = vmatprep.subr.msk.mxu1 %vm3537_vm2, %v7224_v8 }
0x177c   : > { %v12402_v59 = vpop.eup %12401 }
0x177d   : > { %v7132_v58 = vmul.f32 %v12402_v59, %v12398_v43  ;;  %v12698_v59 = vld [vmem:[%s16153_s8] ss:$0 sm:$0xff] }
0x177f   : > { %11885 = vmatprep.mubr.msk.f32.mxu1 %vm3537_vm2, %v7132_v58 }
0x1780   : > { %v12404_v38 = vpop.eup %12403 }
0x1781   : > { %v7133_v33 = vmul.f32 %v12404_v38, %v12400_v1  ;;  %v7228_v1 = vpop.permute.xlu0 %7227  ;;  %v16236_v38 = vld [vmem:[#allocation37_spill] sm:$0xff] }
0x1783   : > { %11886 = vmatmul.mubr.msk.f32.vlgmr.msra.gmra.mxu1 %vm3537_vm2, %v7133_v33  ;;  %v15185_v33 = vadd.f32 %v12698_v59, %v16236_v38 }
0x1784   : > { %11889 = vmatpush3.xpose.msk.msra.mxu1 %vm3537_vm2, %v7224_v8  ;;  %11892 = vmatprep.mubr.msk.f32.mxu1 %vm3537_vm2, %v7218_v51  ;;  %v16237_v51 = vld [vmem:[#allocation38_spill] sm:$0xff] }
0x1785   : > { %11890 = vmatprep.subr.msk.mxu1 %vm3537_vm2, %v7222_v25 }
0x1788   : > { %11891 = vmatpush3.xpose.msk.msra.mxu1 %vm3537_vm2, %v7222_v25  ;;  %v16235_v25 = vld [vmem:[#allocation39_spill] sm:$0xff] }
0x1789   : > { %v15180_v58 = vadd.f32 %v12698_v59, %v16235_v25 }
0x178b   : > { %11893 = vmatmul.mubr.msk.f32.vlgmr.msra.gmra.mxu1 %vm3537_vm2, %v7220_v20  ;;  %v15190_v20 = vadd.f32 %v12698_v59, %v16237_v51 }
0x1843   : > { %v11887_v28 = vpop.f32.mrf.mxu1 }
0x1844   : > { %v7212_v60 = vadd.f32 %v11887_v28, %v15071_v10 }
0x1845   : > { %v7206_v16 = vpop.f32.mrf.mxu1 }
0x1846   : > { %7216 = vst.msk [vmem:[#allocation2 + $0x28] sm:$0xff] %vm3537_vm2, %v7212_v60  ;;  %v7207_v9 = vadd.f32 %v7206_v16, %v15055_v24  ;;  %v16239_v60 = vld [vmem:[#allocation34_spill] sm:$0xff] }
0x1847   : > { %v15200_v16 = vadd.f32 %v12698_v59, %v16239_v60 }
0x1848   : > { %7215 = vst.msk [vmem:[#allocation2 + $0x20] sm:$0xff] %vm3537_vm2, %v7207_v9 }
0x184b   : > { %v11894_v43 = vpop.f32.mrf.mxu1 }
0x184c   : > { %v7313_v6 = vadd.f32 %v11894_v43, %v7230_v47 }
0x184d   : > { %v7307_v62 = vpop.f32.mrf.mxu1 }
0x184e   : > { %v7308_v46 = vadd.f32 %v7307_v62, %v7228_v1  ;;  %v7319_v45 = vsel %vm3537_vm2, %v7313_v6, -inf }
0x184f   : > { %7320 = vmax.xlane.f32.xlu1 %v7319_v45 }
0x1850   : > { %v7316_v8 = vsel %vm3537_vm2, %v7308_v46, -inf }
0x1851   : > { %7317 = vmax.xlane.f32.xlu0 %v7316_v8 }
0x1860   : > { %7340 = vrot.lane.b32.xlu1 %v15107_v11, %s12916_s2  ;;  %v16238_v11 = vld [vmem:[#allocation33_spill] sm:$0xff] }
0x1861   : > { %v15195_v28 = vadd.f32 %v12698_v59, %v16238_v11 }
0x1864   : > { %7620 = vrot.lane.b32.xlu1 %v15180_v58, %s16200_s18 }
0x1868   : > { %7618 = vrot.lane.b32.xlu1 %v15185_v33, %s16200_s18 }
0x186c   : > { %7614 = vrot.lane.b32.xlu1 %v15190_v20, %s16200_s18 }
0x1870   : > { %7610 = vrot.lane.b32.xlu1 %v15195_v28, %s16200_s18 }
0x1874   : > { %7606 = vrot.lane.b32.xlu1 %v15200_v16, %s16200_s18 }
0x18d8   : > { %v7321_v9 = vpop.xlane.xlu1 %7320 }
0x18d9   : > { %v7323_v47 = vsub.f32 %v7313_v6, %v7321_v9 }
0x18da   : > { %v7318_v43 = vpop.xlane.xlu0 %7317 }
0x18db   : > { %v7326_v1 = vmul.f32 1.442695, %v7323_v47  ;;  %v7322_v62 = vsub.f32 %v7308_v46, %v7318_v43  ;;  %v16240_v46 = vld [vmem:[#allocation40_spill] sm:$0xff]  ;;  %v16241_v47 = vld [vmem:[#allocation35_spill] sm:$0xff] }
0x18dc   : > { %v7341_v45 = vpop.permute.xlu1 %7340  ;;  %v1698_v9 = vadd.f32 %v12698_v59, %v16240_v46  ;;  %v1690_v43 = vadd.f32 %v12698_v59, %v16241_v47 }
0x18dd   : > { %12405 = vpow2.f32 %v7326_v1  ;;  %v7324_v8 = vmul.f32 1.442695, %v7322_v62  ;;  %v16242_v1 = vld [vmem:[#allocation36_spill] sm:$0xff] }
0x18de   : > { %v15213_v62 = vadd.f32 %v12698_v59, %v16242_v1 }
0x18df   : > { %12407 = vpow2.f32 %v7324_v8 }
0x18e0   : > { %v7621_v25 = vpop.permute.xlu1 %7620 }
0x18e1   : > { %11945 = vmatprep.subr.mxu0 %v7621_v25 }
0x18e2   : > { %11946 = vmatpush3.msra.mxu0 %v7621_v25 }
0x18e4   : > { %v7619_v38 = vpop.permute.xlu1 %7618 }
0x18e5   : > { %11947 = vmatprep.subr.mxu0 %v7619_v38 }
0x18e6   : > { %11948 = vmatpush3.msra.mxu0 %v7619_v38 }
0x18ea   : > { %v12406_v51 = vpop.eup %12405 }
0x18eb   : > { %v7331_v11 = vsel %vm3537_vm2, %v12406_v51, 0.0 }
0x18ec   : > { %v12408_v60 = vpop.eup %12407  ;;  %7332 = vadd.xlane.f32.xlu0 %v7331_v11 }
0x18ed   : > { %v7328_v6 = vsel %vm3537_vm2, %v12408_v60, 0.0 }
0x18f0   : > { %7329 = vadd.xlane.f32.xlu0 %v7328_v6 }
0x1906   : > { %7342 = vrot.lane.b32.xlu0 %v15104_v36, %s12916_s2  ;;  %v7615_v36 = vpop.permute.xlu1 %7614 }
0x190a   : > { %7616 = vrot.lane.b32.xlu0 %v1698_v9, %s16200_s18  ;;  %v7611_v59 = vpop.permute.xlu1 %7610 }
0x190e   : > { %7612 = vrot.lane.b32.xlu0 %v1690_v43, %s16200_s18 }
0x1912   : > { %7608 = vrot.lane.b32.xlu0 %v15213_v62, %s16200_s18 }
0x1975   : > { %v7333_v8 = vpop.xlane.xlu0 %7332 }
0x1976   : > { %12409 = vrcp.f32 %v7333_v8 }
0x1979   : > { %v7330_v25 = vpop.xlane.xlu0 %7329 }
0x197a   : > { %12411 = vrcp.f32 %v7330_v25  ;;  %v7607_v25 = vpop.permute.xlu1 %7606 }
0x197d   : > { %v7343_v38 = vpop.permute.xlu0 %7342 }
0x197e   : > { %11895 = vmatprep.subr.mxu1 %v7343_v38 }
0x197f   : > { %11896 = vmatpush3.msra.mxu1 %v7343_v38  ;;  %v12701_v38 = vld [vmem:[%s12940_s13 + $0x10] sm:$0xff] }
0x1980   : > { %11897 = vmatprep.subr.mxu1 %v7341_v45 }
0x1981   : > { %11898 = vmatpush3.msra.mxu1 %v7341_v45  ;;  %v7617_v11 = vpop.permute.xlu0 %7616 }
0x1982   : > { %11902 = vmatprep.subr.mxu1 %v15180_v58  ;;  %11949 = vmatprep.subr.mxu0 %v7617_v11 }
0x1983   : > { %11950 = vmatpush3.msra.mxu0 %v7617_v11  ;;  %v12410_v46 = vpop.eup %12409  ;;  %v12714_v11 = vld [vmem:[%s12940_s13 + $0x50] sm:$0xff] }
0x1984   : > { %11951 = vmatprep.subr.mxu0 %v7615_v36  ;;  %v7337_v8 = vmul.f32 %v12410_v46, %v12406_v51  ;;  %v12699_v51 = vld [vmem:[%s12935_s9] sm:$0xff]  ;;  %v12718_v46 = vld [vmem:[%s12940_s13 + $0x58] sm:$0xff] }
0x1985   : > { %11952 = vmatpush3.msra.mxu0 %v7615_v36  ;;  %v7613_v6 = vpop.permute.xlu0 %7612  ;;  %v12713_v36 = vld [vmem:[%s12935_s9 + $0x20] sm:$0xff] }
0x1986   : > { %11953 = vmatprep.subr.mxu0 %v7613_v6 }
0x1987   : > { %v12412_v47 = vpop.eup %12411  ;;  %11954 = vmatpush3.msra.mxu0 %v7613_v6  ;;  %v12717_v6 = vld [vmem:[%s12935_s9 + $0x28] sm:$0xff] }
0x1988   : > { %11955 = vmatprep.subr.mxu0 %v7611_v59  ;;  %v7336_v1 = vmul.f32 %v12412_v47, %v12408_v60  ;;  %v12700_v60 = vld [vmem:[%s12940_s13 + $0x8] sm:$0xff]  ;;  %v12719_v47 = vld [vmem:[%s12935_s9 + $0x30] sm:$0xff] }
0x1989   : > { %11956 = vmatpush3.msra.mxu0 %v7611_v59  ;;  %v7609_v45 = vpop.permute.xlu0 %7608  ;;  %v15271_v59 = vld [vmem:[%s12990_s30 + $0x18] sm:$0xff] }
0x198a   : > { %11899 = vmatprep.mubr.msk.f32.mxu1 %vm3537_vm2, %v7336_v1  ;;  %11957 = vmatprep.subr.mxu0 %v7609_v45  ;;  %v12720_v1 = vld [vmem:[%s12940_s13 + $0x60] sm:$0xff] }
0x198b   : > { %11900 = vmatmul.mubr.msk.f32.vlgmr.msra.gmra.mxu1 %vm3537_vm2, %v7337_v8  ;;  %11958 = vmatpush3.msra.mxu0 %v7609_v45  ;;  %v12721_v8 = vld [vmem:[%s13132_s28 + $0xe8] sm:$0xff]  ;;  %v12722_v45 = vld [vmem:[%s12935_s9 + $0x38] sm:$0xff] }
0x198c   : > { %11903 = vmatpush3.msra.mxu1 %v15180_v58  ;;  %11959 = vmatprep.subr.mxu0 %v7607_v25  ;;  %v12702_v58 = vld [vmem:[%s12940_s13 + $0x18] sm:$0xff] }
0x198d   : > { %11904 = vmatprep.subr.mxu1 %v15185_v33  ;;  %11960 = vmatpush3.msra.mxu0 %v7607_v25  ;;  %v12723_v25 = vld [vmem:[%s12940_s13 + $0x68] sm:$0xff] }
0x198e   : > { %11905 = vmatpush3.msra.mxu1 %v15185_v33  ;;  %11918 = vmatprep.mubr.msk.f32.mxu1 %vm1851_vm1, %v12699_v51  ;;  %v12703_v33 = vld [vmem:[%s12940_s13 + $0x20] sm:$0xff] }
0x198f   : > { %11906 = vmatprep.subr.mxu1 %v1698_v9  ;;  %11962 = vmatmul.mubr.msk.f32.vlgmr.msra.gmra.mxu0 %vm1851_vm1, %v12700_v60  ;;  %v12724_v51 = vld [vmem:[%s12935_s9 + $0x40] sm:$0xff]  ;;  %v12725_v60 = vld [vmem:[%s12940_s13 + $0x70] sm:$0xff] }
0x1990   : > { %11907 = vmatpush3.msra.mxu1 %v1698_v9  ;;  %11964 = vmatprep.mubr.msk.f32.mxu0 %vm1851_vm1, %v12701_v38  ;;  %v12708_v9 = vld [vmem:[%s12935_s9 + $0x10] sm:$0xff]  ;;  %v12726_v38 = vld [vmem:[%s13132_s28 + $0xe0] sm:$0xff] }
0x1991   : > { %11908 = vmatprep.subr.mxu1 %v15190_v20  ;;  %12031 = vmatprep.subr.mxu0 %v14945_v48 }
0x1992   : > { %11909 = vmatpush3.msra.mxu1 %v15190_v20  ;;  %12032 = vmatpush3.msra.mxu0 %v14945_v48  ;;  %v12704_v48 = vld [vmem:[%s12940_s13 + $0x28] sm:$0xff]  ;;  %v12705_v20 = vld [vmem:[%s12940_s13 + $0x30] sm:$0xff] }
0x1993   : > { %11910 = vmatprep.subr.mxu1 %v1690_v43  ;;  %11965 = vmatmul.mubr.msk.f32.gmra.mxu0 %vm1851_vm1, %v12702_v58  ;;  %v12727_v58 = vld [vmem:[%s12935_s9 + $0x48] sm:$0xff] }
0x1994   : > { %11911 = vmatpush3.msra.mxu1 %v1690_v43  ;;  %11967 = vmatprep.mubr.msk.f32.mxu0 %vm1851_vm1, %v12703_v33  ;;  %v12709_v43 = vld [vmem:[%s12940_s13 + $0x40] sm:$0xff]  ;;  %v12728_v33 = vld [vmem:[%s12940_s13 + $0x78] sm:$0xff] }
0x1995   : > { %11912 = vmatprep.subr.mxu1 %v15195_v28  ;;  %12033 = vmatprep.subr.mxu0 %v14961_v52 }
0x1996   : > { %11913 = vmatpush3.msra.mxu1 %v15195_v28  ;;  %12034 = vmatpush3.msra.mxu0 %v14961_v52  ;;  %v12706_v52 = vld [vmem:[%s12935_s9 + $0x8] sm:$0xff]  ;;  %v12707_v28 = vld [vmem:[%s12940_s13 + $0x38] sm:$0xff] }
0x1997   : > { %11914 = vmatprep.subr.mxu1 %v15213_v62  ;;  %11968 = vmatmul.mubr.msk.f32.gmra.mxu0 %vm1851_vm1, %v12704_v48  ;;  %v12729_v48 = vld [vmem:[%s12935_s9 + $0x50] sm:$0xff] }
0x1998   : > { %11915 = vmatpush3.msra.mxu1 %v15213_v62  ;;  %11970 = vmatprep.mubr.msk.f32.mxu0 %vm1851_vm1, %v12705_v20  ;;  %v12712_v62 = vld [vmem:[%s12940_s13 + $0x48] sm:$0xff]  ;;  %v12730_v20 = vld [vmem:[%s12940_s13 + $0x80] sm:$0xff] }
0x1999   : > { %11916 = vmatprep.subr.mxu1 %v15200_v16  ;;  %12035 = vmatprep.subr.mxu0 %v14966_v56 }
0x199a   : > { %11917 = vmatpush3.msra.mxu1 %v15200_v16  ;;  %12036 = vmatpush3.msra.mxu0 %v14966_v56  ;;  %v12710_v56 = vld [vmem:[%s13132_s28 + $0xf8] sm:$0xff] }
0x199b   : > { %11919 = vmatmul.mubr.msk.f32.vlgmr.msra.gmra.mxu1 %vm1851_vm1, %v12706_v52  ;;  %11971 = vmatmul.mubr.msk.f32.gmra.mxu0 %vm1851_vm1, %v12707_v28  ;;  %v12711_v16 = vld [vmem:[%s12935_s9 + $0x18] sm:$0xff] }
0x199c   : > { %11921 = vmatprep.mubr.msk.f32.mxu1 %vm1851_vm1, %v12708_v9  ;;  %11973 = vmatprep.mubr.msk.f32.mxu0 %vm1851_vm1, %v12709_v43  ;;  %v12731_v52 = vld [vmem:[%s13132_s28 + $0xd8] sm:$0xff]  ;;  %v12733_v9 = vld [vmem:[%s12940_s13 + $0x88] sm:$0xff]  ;;  %v12734_v43 = vld [vmem:[%s12935_s9 + $0x60] sm:$0xff] }
0x199d   : > { %12037 = vmatprep.subr.mxu0 %v14971_v12  ;;  %11988 = vmatprep.subr.mxu1 %v12710_v56  ;;  %v12732_v28 = vld [vmem:[%s12935_s9 + $0x58] sm:$0xff] }
0x199e   : > { %12038 = vmatpush3.msra.mxu0 %v14971_v12  ;;  %11989 = vmatpush3.msra.mxu1 %v12710_v56  ;;  %v12716_v12 = vld [vmem:[%s13132_s28 + $0xf0] sm:$0xff] }
0x199f   : > { %11922 = vmatmul.mubr.msk.f32.gmra.mxu1 %vm1851_vm1, %v12711_v16  ;;  %11974 = vmatmul.mubr.msk.f32.gmra.mxu0 %vm1851_vm1, %v12712_v62  ;;  %v12735_v56 = vld [vmem:[%s13132_s28 + $0xd0] sm:$0xff]  ;;  %v12736_v16 = vld [vmem:[%s13132_s28 + $0xc8] sm:$0xff] }
0x19a0   : > { %11924 = vmatprep.mubr.msk.f32.mxu1 %vm1851_vm1, %v12713_v36  ;;  %11976 = vmatprep.mubr.msk.f32.mxu0 %vm1851_vm1, %v12714_v11  ;;  %v12737_v62 = vld [vmem:[%s12935_s9 + $0x68] sm:$0xff]  ;;  %v12738_v36 = vld [vmem:[%s12935_s9 + $0x70] sm:$0xff]  ;;  %v12739_v11 = vld [vmem:[%s13132_s28 + $0xc0] sm:$0xff]  ;;  %s16245_s28 = sld [smem:[#allocation21_spill]] }
0x19a1   : > { %12042 = vmatprep.subr.mxu0 %v15271_v59  ;;  %11990 = vmatprep.subr.mxu1 %v12716_v12 }
0x19a2   : > { %11991 = vmatpush3.msra.mxu1 %v12716_v12  ;;  %v12740_v12 = vld [vmem:[%s12935_s9 + $0x78] sm:$0xff] }
0x19a3   : > { %11925 = vmatmul.mubr.msk.f32.gmra.mxu1 %vm1851_vm1, %v12717_v6  ;;  %11977 = vmatmul.mubr.msk.f32.gmra.mxu0 %vm1851_vm1, %v12718_v46  ;;  %v12741_v6 = vld [vmem:[%s12935_s9 + $0x80] sm:$0xff]  ;;  %v12742_v46 = vld [vmem:[%s12935_s9 + $0x88] sm:$0xff] }
0x19a4   : > { %11927 = vmatprep.mubr.msk.f32.mxu1 %vm1851_vm1, %v12719_v47  ;;  %11979 = vmatprep.mubr.msk.f32.mxu0 %vm1851_vm1, %v12720_v1  ;;  %v12743_v47 = vld [vmem:[%s12945_s17] sm:$0xff]  ;;  %v12744_v1 = vld [vmem:[%s12945_s17 + $0x8] sm:$0xff] }
0x19a5   : > { %11992 = vmatprep.subr.mxu1 %v12721_v8 }
0x19a6   : > { %11993 = vmatpush3.msra.mxu1 %v12721_v8  ;;  %v12745_v8 = vld [vmem:[%s12945_s17 + $0x10] sm:$0xff] }
0x19a7   : > { %11928 = vmatmul.mubr.msk.f32.gmra.mxu1 %vm1851_vm1, %v12722_v45  ;;  %11980 = vmatmul.mubr.msk.f32.gmra.mxu0 %vm1851_vm1, %v12723_v25  ;;  %v12746_v45 = vld [vmem:[%s12945_s17 + $0x18] sm:$0xff]  ;;  %v12747_v25 = vld [vmem:[%s12945_s17 + $0x20] sm:$0xff] }
0x19a8   : > { %11930 = vmatprep.mubr.msk.f32.mxu1 %vm1851_vm1, %v12724_v51  ;;  %11982 = vmatprep.mubr.msk.f32.mxu0 %vm1851_vm1, %v12725_v60  ;;  %v12748_v51 = vld [vmem:[%s12945_s17 + $0x28] sm:$0xff]  ;;  %v12750_v60 = vld [vmem:[%s12945_s17 + $0x30] sm:$0xff] }
0x19a9   : > { %11994 = vmatprep.subr.mxu1 %v12726_v38 }
0x19aa   : > { %11995 = vmatpush3.msra.mxu1 %v12726_v38  ;;  %v12751_v38 = vld [vmem:[%s12945_s17 + $0x38] sm:$0xff] }
0x19ab   : > { %11931 = vmatmul.mubr.msk.f32.gmra.mxu1 %vm1851_vm1, %v12727_v58  ;;  %11983 = vmatmul.mubr.msk.f32.gmra.mxu0 %vm1851_vm1, %v12728_v33  ;;  %v12754_v58 = vld [vmem:[%s12945_s17 + $0x50] sm:$0xff]  ;;  %v12755_v33 = vld [vmem:[%s12945_s17 + $0x58] sm:$0xff] }
0x19ac   : > { %11933 = vmatprep.mubr.msk.f32.mxu1 %vm1851_vm1, %v12729_v48  ;;  %11985 = vmatprep.mubr.msk.f32.mxu0 %vm1851_vm1, %v12730_v20  ;;  %v12756_v48 = vld [vmem:[%s12945_s17 + $0x60] sm:$0xff]  ;;  %v12757_v20 = vld [vmem:[%s12945_s17 + $0x68] sm:$0xff] }
0x19ad   : > { %11996 = vmatprep.subr.mxu1 %v12731_v52 }
0x19ae   : > { %11997 = vmatpush3.msra.mxu1 %v12731_v52  ;;  %v12758_v52 = vld [vmem:[%s12945_s17 + $0x70] sm:$0xff] }
0x19af   : > { %11934 = vmatmul.mubr.msk.f32.gmra.mxu1 %vm1851_vm1, %v12732_v28  ;;  %11986 = vmatmul.mubr.msk.f32.gmra.mxu0 %vm1851_vm1, %v12733_v9  ;;  %v12759_v28 = vld [vmem:[%s12945_s17 + $0x78] sm:$0xff]  ;;  %v12760_v9 = vld [vmem:[%s12945_s17 + $0x80] sm:$0xff] }
0x19b0   : > { %11936 = vmatprep.mubr.msk.f32.mxu1 %vm1851_vm1, %v12734_v43  ;;  %11998 = vmatprep.subr.mxu1 %v12735_v56  ;;  %v12761_v43 = vld [vmem:[%s12945_s17 + $0x88] sm:$0xff] }
0x19b1   : > { %11999 = vmatpush3.msra.mxu1 %v12735_v56 }
0x19b2   : > { %12000 = vmatprep.subr.mxu1 %v12736_v16 }
0x19b3   : > { %11937 = vmatmul.mubr.msk.f32.gmra.mxu1 %vm1851_vm1, %v12737_v62  ;;  %v12762_v62 = vld [vmem:[%s12980_s19] ss:$0 sm:$0xff] }
0x19b4   : > { %11939 = vmatprep.mubr.msk.f32.mxu1 %vm1851_vm1, %v12738_v36  ;;  %12001 = vmatpush3.msra.mxu1 %v12736_v16 }
0x19b5   : > { %12002 = vmatprep.subr.mxu1 %v12739_v11 }
0x19b6   : > { %12003 = vmatpush3.msra.mxu1 %v12739_v11 }
0x19b7   : > { %11940 = vmatmul.mubr.msk.f32.gmra.mxu1 %vm1851_vm1, %v12740_v12  ;;  %12086 = vmatprep.subr.mxu1 %v15271_v59 }
0x19b8   : > { %11942 = vmatprep.mubr.msk.f32.mxu1 %vm1851_vm1, %v12741_v6  ;;  %v12763_v6 = vld [vmem:[%s12980_s19 + $0x1] ss:$0 sm:$0xff] }
0x19bb   : > { %11943 = vmatmul.mubr.msk.f32.gmra.mxu1 %vm1851_vm1, %v12742_v46 }
0x19bc   : > { %12004 = vmatprep.mubr.msk.f32.mxu1 %vm1851_vm1, %v12743_v47 }
0x19bf   : > { %12005 = vmatmul.mubr.msk.f32.vlgmr.msra.gmra.mxu1 %vm1851_vm1, %v12744_v1 }
0x19c0   : > { %12087 = vmatpush3.msra.mxu1 %v15271_v59  ;;  %12007 = vmatprep.mubr.msk.f32.mxu1 %vm1851_vm1, %v12745_v8 }
0x19c1   : > { %12088 = vmatprep.subr.mxu1 %v14930_v22 }
0x19c2   : > { %12089 = vmatpush3.msra.mxu1 %v14930_v22  ;;  %v12749_v22 = vld [vmem:[%s16154_s4 + $0xf8] sm:$0xff] }
0x19c3   : > { %12008 = vmatmul.mubr.msk.f32.gmra.mxu1 %vm1851_vm1, %v12746_v45  ;;  %12090 = vmatprep.subr.mxu1 %v14935_v35 }
0x19c4   : > { %12010 = vmatprep.mubr.msk.f32.mxu1 %vm1851_vm1, %v12747_v25  ;;  %12091 = vmatpush3.msra.mxu1 %v14935_v35  ;;  %v12752_v35 = vld [vmem:[%s12945_s17 + $0x40] sm:$0xff] }
0x19c5   : > { %12092 = vmatprep.subr.mxu1 %v14940_v23 }
0x19c6   : > { %12093 = vmatpush3.msra.mxu1 %v14940_v23  ;;  %v12753_v23 = vld [vmem:[%s12945_s17 + $0x48] sm:$0xff] }
0x19c7   : > { %12011 = vmatmul.mubr.msk.f32.gmra.mxu1 %vm1851_vm1, %v12748_v51  ;;  %11119 = vmatprep.subr.mxu1 %v12749_v22  ;;  %v12764_v22 = vld [vmem:[%s12980_s19 + $0x2] ss:$0 sm:$0xff] }
0x19c8   : > { %12013 = vmatprep.mubr.msk.f32.mxu1 %vm1851_vm1, %v12750_v60 }
0x19cb   : > { %12014 = vmatmul.mubr.msk.f32.gmra.mxu1 %vm1851_vm1, %v12751_v38 }
0x19cc   : > { %12016 = vmatprep.mubr.msk.f32.mxu1 %vm1851_vm1, %v12752_v35 }
0x19cf   : > { %12017 = vmatmul.mubr.msk.f32.gmra.mxu1 %vm1851_vm1, %v12753_v23 }
0x19d0   : > { %12019 = vmatprep.mubr.msk.f32.mxu1 %vm1851_vm1, %v12754_v58 }
0x19d3   : > { %12020 = vmatmul.mubr.msk.f32.gmra.mxu1 %vm1851_vm1, %v12755_v33 }
0x19d4   : > { %12022 = vmatprep.mubr.msk.f32.mxu1 %vm1851_vm1, %v12756_v48 }
0x19d7   : > { %12023 = vmatmul.mubr.msk.f32.gmra.mxu1 %vm1851_vm1, %v12757_v20 }
0x19d8   : > { %12025 = vmatprep.mubr.msk.f32.mxu1 %vm1851_vm1, %v12758_v52  ;;  %v12765_v52 = vld [vmem:[%s12980_s19 + $0x3] ss:$0 sm:$0xff] }
0x19db   : > { %12026 = vmatmul.mubr.msk.f32.gmra.mxu1 %vm1851_vm1, %v12759_v28 }
0x19dc   : > { %12028 = vmatprep.mubr.msk.f32.mxu1 %vm1851_vm1, %v12760_v9 }
0x19df   : > { %12029 = vmatmul.mubr.msk.f32.gmra.mxu1 %vm1851_vm1, %v12761_v43 }
0x1a4b   : > { %v15368_v47 = vpop.f32.mrf.mxu1 }
0x1a4d   : > { %v15371_v38 = vpop.f32.mrf.mxu1 }
0x1a4f   : > { %v11963_v56 = vpop.f32.mrf.mxu0 }
0x1a50   : > { %v7975_v36 = vmul.f32 %v12762_v62, %v11963_v56 }
0x1a51   : > { %v7696_v16 = vpop.f32.mrf.mxu0 }
0x1a52   : > { %v7974_v12 = vmul.f32 %v12762_v62, %v7696_v16 }
0x1a53   : > { %v11966_v11 = vpop.f32.mrf.mxu0 }
0x1a54   : > { %v7977_v46 = vmul.f32 %v12763_v6, %v11966_v11 }
0x1a55   : > { %v7706_v1 = vpop.f32.mrf.mxu0 }
0x1a56   : > { %v7979_v8 = vadd.f32 %v7977_v46, %v7975_v36  ;;  %v7976_v45 = vmul.f32 %v12763_v6, %v7706_v1 }
0x1a57   : > { %v11969_v25 = vpop.f32.mrf.mxu0 }
0x1a58   : > { %v7978_v51 = vadd.f32 %v7976_v45, %v7974_v12  ;;  %v7981_v60 = vmul.f32 %v12764_v22, %v11969_v25  ;;  %v12766_v12 = vld [vmem:[%s12980_s19 + $0x4] ss:$0 sm:$0xff] }
0x1a59   : > { %v7716_v35 = vpop.f32.mrf.mxu0 }
0x1a5a   : > { %v7983_v23 = vadd.f32 %v7981_v60, %v7979_v8  ;;  %v7980_v58 = vmul.f32 %v12764_v22, %v7716_v35  ;;  %v12767_v60 = vld [vmem:[%s12980_s19 + $0x5] ss:$0 sm:$0xff] }
0x1a5b   : > { %v11920_v33 = vpop.f32.mrf.mxu1  ;;  %v11972_v48 = vpop.f32.mrf.mxu0 }
0x1a5c   : > { %v7982_v20 = vadd.f32 %v7980_v58, %v7978_v51  ;;  %v7985_v28 = vmul.f32 %v12765_v52, %v11972_v48 }
0x1a5d   : > { %v7509_v9 = vpop.f32.mrf.mxu1  ;;  %v7726_v43 = vpop.f32.mrf.mxu0 }
0x1a5e   : > { %v7987_v56 = vadd.f32 %v7985_v28, %v7983_v23  ;;  %v7984_v16 = vmul.f32 %v12765_v52, %v7726_v43 }
0x1a5f   : > { %v11923_v62 = vpop.f32.mrf.mxu1  ;;  %v11975_v36 = vpop.f32.mrf.mxu0 }
0x1a60   : > { %v7986_v11 = vadd.f32 %v7984_v16, %v7982_v20  ;;  %v7989_v6 = vmul.f32 %v12766_v12, %v11975_v36  ;;  %v12768_v16 = vld [vmem:[%s12980_s19 + $0x6] ss:$0 sm:$0xff] }
0x1a61   : > { %v7519_v46 = vpop.f32.mrf.mxu1  ;;  %v7736_v1 = vpop.f32.mrf.mxu0 }
0x1a62   : > { %v7991_v8 = vadd.f32 %v7989_v6, %v7987_v56  ;;  %v7988_v45 = vmul.f32 %v12766_v12, %v7736_v1 }
0x1a63   : > { %v11926_v25 = vpop.f32.mrf.mxu1  ;;  %v11978_v22 = vpop.f32.mrf.mxu0 }
0x1a64   : > { %v7990_v51 = vadd.f32 %v7988_v45, %v7986_v11  ;;  %v7993_v35 = vmul.f32 %v12767_v60, %v11978_v22  ;;  %v12769_v45 = vld [vmem:[%s12980_s19 + $0x7] ss:$0 sm:$0xff] }
0x1a65   : > { %v7529_v58 = vpop.f32.mrf.mxu1  ;;  %v7746_v48 = vpop.f32.mrf.mxu0 }
0x1a66   : > { %v7995_v23 = vadd.f32 %v7993_v35, %v7991_v8  ;;  %v7992_v52 = vmul.f32 %v12767_v60, %v7746_v48  ;;  %v12770_v35 = vld [vmem:[%s12975_s14 + $0x1] ss:$0 sm:$0xff] }
0x1a67   : > { %v11929_v28 = vpop.f32.mrf.mxu1  ;;  %v11981_v20 = vpop.f32.mrf.mxu0  ;;  %v7942_v48 = vmul.f32 %v12770_v35, %v7519_v46  ;;  %v12774_v46 = vld [vmem:[%s12975_s14 + $0x3] ss:$0 sm:$0xff] }
0x1a68   : > { %v7994_v43 = vadd.f32 %v7992_v52, %v7990_v51  ;;  %v7997_v36 = vmul.f32 %v12768_v16, %v11981_v20  ;;  %v7943_v52 = vmul.f32 %v12770_v35, %v11923_v62 }
0x1a69   : > { %v7539_v7 = vpop.f32.mrf.mxu1  ;;  %v7756_v40 = vpop.f32.mrf.mxu0 }
0x1a6a   : > { %v7999_v56 = vadd.f32 %v7997_v36, %v7995_v23  ;;  %v7996_v12 = vmul.f32 %v12768_v16, %v7756_v40  ;;  %v12771_v23 = vld [vmem:[%s12975_s14] ss:$0 sm:$0xff]  ;;  %v12772_v40 = vld [vmem:[%s12975_s14 + $0x2] ss:$0 sm:$0xff] }
0x1a6b   : > { %v11932_v6 = vpop.f32.mrf.mxu1  ;;  %v11984_v11 = vpop.f32.mrf.mxu0  ;;  %v7940_v36 = vmul.f32 %v12771_v23, %v7509_v9  ;;  %v7946_v16 = vmul.f32 %v12772_v40, %v7529_v58  ;;  %v7941_v42 = vmul.f32 %v12771_v23, %v11920_v33  ;;  %v12775_v58 = vld [vmem:[%s12975_s14 + $0x4] ss:$0 sm:$0xff] }
0x1a6c   : > { %v7998_v1 = vadd.f32 %v7996_v12, %v7994_v43  ;;  %v8001_v22 = vmul.f32 %v12769_v45, %v11984_v11  ;;  %v12773_v43 = vld [vmem:[%s12980_s19 + $0x8] ss:$0 sm:$0xff]  ;;  %v7947_v11 = vmul.f32 %v12772_v40, %v11926_v25  ;;  %v7955_v33 = vmul.f32 %v12775_v58, %v11932_v6 }
0x1a6d   : > { %v7549_v8 = vpop.f32.mrf.mxu1  ;;  %v7766_v60 = vpop.f32.mrf.mxu0  ;;  %v7944_v17 = vadd.f32 %v7942_v48, %v7940_v36 }
0x1a6e   : > { %v8003_v15 = vadd.f32 %v8001_v22, %v7999_v56  ;;  %v8000_v51 = vmul.f32 %v12769_v45, %v7766_v60  ;;  %v7950_v56 = vmul.f32 %v12774_v46, %v7539_v7  ;;  %v7945_v22 = vadd.f32 %v7943_v52, %v7941_v42  ;;  %v12776_v7 = vld [vmem:[%s12975_s14 + $0x5] ss:$0 sm:$0xff]  ;;  %v12777_v52 = vld [vmem:[%s12975_s14 + $0x6] ss:$0 sm:$0xff] }
0x1a6f   : > { %v11935_v20 = vpop.f32.mrf.mxu1  ;;  %v11987_v3 = vpop.f32.mrf.mxu0  ;;  %v7951_v60 = vmul.f32 %v12774_v46, %v11929_v28  ;;  %v7948_v35 = vadd.f32 %v7946_v16, %v7944_v17  ;;  %v12778_v16 = vld [vmem:[%s12975_s14 + $0x7] ss:$0 sm:$0xff] }
0x1a70   : > { %v8002_v32 = vadd.f32 %v8000_v51, %v7998_v1  ;;  %v8005_v12 = vmul.f32 %v12773_v43, %v11987_v3  ;;  %v7954_v1 = vmul.f32 %v12775_v58, %v7549_v8  ;;  %v7949_v3 = vadd.f32 %v7947_v11, %v7945_v22 }
0x1a71   : > { %v7559_v30 = vpop.f32.mrf.mxu1  ;;  %v7776_v57 = vpop.f32.mrf.mxu0  ;;  %v7952_v48 = vadd.f32 %v7950_v56, %v7948_v35  ;;  %v7959_v42 = vmul.f32 %v12776_v7, %v11935_v20  ;;  %v12779_v56 = vld [vmem:[%s12975_s14 + $0x8] ss:$0 sm:$0xff] }
0x1a72   : > { %v15383_v45 = vadd.f32 %v8005_v12, %v8003_v15  ;;  %v8004_v62 = vmul.f32 %v12773_v43, %v7776_v57  ;;  %v7958_v15 = vmul.f32 %v12776_v7, %v7559_v30  ;;  %v7953_v57 = vadd.f32 %v7951_v60, %v7949_v3  ;;  %v12781_v3 = vld [vmem:[%s12990_s30 + $0x8] sm:$0xff] }
0x1a73   : > { %v11938_v9 = vpop.f32.mrf.mxu1  ;;  %v7956_v28 = vadd.f32 %v7954_v1, %v7952_v48  ;;  %v12780_v1 = vld [vmem:[%s12990_s30 + $0x10] sm:$0xff] }
0x1a74   : > { %v8006_v51 = vadd.f32 %v8004_v62, %v8002_v32  ;;  %8420 = vrot.lane.b32.xlu1 %v15383_v45, %s16200_s18  ;;  %v7957_v32 = vadd.f32 %v7955_v33, %v7953_v57  ;;  %v7963_v23 = vmul.f32 %v12777_v52, %v11938_v9  ;;  %v12782_v33 = vld [vmem:[%s12990_s30] sm:$0xff] }
0x1a75   : > { %v7569_v25 = vpop.f32.mrf.mxu1  ;;  %v7960_v40 = vadd.f32 %v7958_v15, %v7956_v28  ;;  %v12786_v28 = vld [vmem:[%s12985_s24] sm:$0xff] }
0x1a76   : > { %8418 = vrot.lane.b32.xlu0 %v8006_v51, %s16200_s18  ;;  %v7962_v8 = vmul.f32 %v12777_v52, %v7569_v25  ;;  %v7961_v43 = vadd.f32 %v7959_v42, %v7957_v32  ;;  %v12783_v25 = vld [vmem:[%s12985_s24 + $0x18] sm:$0xff]  ;;  %v12784_v42 = vld [vmem:[%s12985_s24 + $0x10] sm:$0xff]  ;;  %s12917_s18 = smov 16  }
0x1a77   : > { %v11941_v17 = vpop.f32.mrf.mxu1 }
0x1a78   : > { %v7967_v12 = vmul.f32 %v12778_v16, %v11941_v17  ;;  %v7964_v30 = vadd.f32 %v7962_v8, %v7960_v40  ;;  %v7965_v46 = vadd.f32 %v7963_v23, %v7961_v43  ;;  %v12785_v17 = vld [vmem:[%s12985_s24 + $0x8] sm:$0xff] }
0x1a79   : > { %v7579_v36 = vpop.f32.mrf.mxu1 }
0x1a7a   : > { %v7966_v6 = vmul.f32 %v12778_v16, %v7579_v36  ;;  %v7969_v35 = vadd.f32 %v7967_v12, %v7965_v46 }
0x1a7b   : > { %v11944_v11 = vpop.f32.mrf.mxu1 }
0x1a7c   : > { %v7971_v20 = vmul.f32 %v12779_v56, %v11944_v11  ;;  %v7968_v22 = vadd.f32 %v7966_v6, %v7964_v30  ;;  %v12787_v11 = vld [vmem:[%s13025_s20 + $0x38] sm:$0xff]  ;;  %v10416_v30 = vld [vmem:[%s16163_s11] ss:$0 sm:$0xff] }
0x1a7d   : > { %v7589_v62 = vpop.f32.mrf.mxu1 }
0x1a7e   : > { %v7970_v60 = vmul.f32 %v12779_v56, %v7589_v62  ;;  %v7973_v58 = vadd.f32 %v7971_v20, %v7969_v35 }
0x1a80   : > { %v7972_v9 = vadd.f32 %v7970_v60, %v7968_v22  ;;  %v12788_v60 = vld [vmem:[%s16154_s4 + $0x78] sm:$0xff] }
0x1a82   : > { %12039 = vmatprep.mubr.msk.f32.mxu0 %vm967_vm0, %v7972_v9  ;;  %v12789_v9 = vld [vmem:[%s16154_s4 + $0xf0] sm:$0xff] }
0x1a83   : > { %12040 = vmatmul.mubr.msk.f32.vlgmr.msra.gmra.mxu0 %vm967_vm0, %v7973_v58 }
0x1a84   : > { %12043 = vmatpush3.msra.mxu0 %v15271_v59 }
0x1a85   : > { %12044 = vmatprep.subr.mxu0 %v12780_v1 }
0x1a86   : > { %12045 = vmatpush3.msra.mxu0 %v12780_v1 }
0x1a87   : > { %12046 = vmatprep.subr.mxu0 %v12781_v3 }
0x1a88   : > { %12047 = vmatpush3.msra.mxu0 %v12781_v3 }
0x1a89   : > { %12048 = vmatprep.subr.mxu0 %v12782_v33 }
0x1a8a   : > { %12049 = vmatpush3.msra.mxu0 %v12782_v33 }
0x1a8b   : > { %12053 = vmatprep.subr.mxu0 %v12783_v25 }
0x1ae6   : > { %v8421_v12 = vpop.permute.xlu1 %8420 }
0x1ae8   : > { %v8419_v40 = vpop.permute.xlu0 %8418 }
0x1b43   : > { %v12041_v48 = vpop.f32.mrf.mxu0 }
0x1b44   : > { %v8128_v57 = vmul.f32 %v12041_v48, %v12041_v48 }
0x1b45   : > { %v8118_v7 = vpop.f32.mrf.mxu0 }
0x1b46   : > { %v8127_v15 = vmul.f32 %v8118_v7, %v8118_v7 }
0x1b48   : > { %12050 = vmatprep.mubr.msk.f32.mxu0 %vm967_vm0, %v8127_v15  ;;  %v10423_v15 = vld [vmem:[%s16197_s5] ss:$0 sm:$0xff] }
0x1b49   : > { %12051 = vmatmul.mubr.msk.f32.vlgmr.msra.gmra.mxu0 %vm967_vm0, %v8128_v57 }
0x1b4a   : > { %12054 = vmatpush3.msra.mxu0 %v12783_v25  ;;  %12061 = vmatprep.mubr.msk.f32.mxu0 %vm967_vm0, %v8006_v51 }
0x1b4b   : > { %12055 = vmatprep.subr.mxu0 %v12784_v42 }
0x1b4c   : > { %12056 = vmatpush3.msra.mxu0 %v12784_v42 }
0x1b4d   : > { %12057 = vmatprep.subr.mxu0 %v12785_v17 }
0x1b4e   : > { %12058 = vmatpush3.msra.mxu0 %v12785_v17 }
0x1b4f   : > { %12059 = vmatprep.subr.mxu0 %v12786_v28 }
0x1b50   : > { %12060 = vmatpush3.msra.mxu0 %v12786_v28 }
0x1b51   : > { %12062 = vmatmul.mubr.msk.f32.vlgmr.msra.gmra.mxu0 %vm967_vm0, %v15383_v45  ;;  %12064 = vmatprep.subr.mxu0 %v15271_v59 }
0x1b52   : > { %12065 = vmatpush3.msra.mxu0 %v15271_v59 }
0x1b53   : > { %12066 = vmatprep.subr.mxu0 %v12780_v1 }
0x1b54   : > { %12067 = vmatpush3.msra.mxu0 %v12780_v1  ;;  %v10422_v1 = vld [vmem:[%s16196_s3] ss:$0 sm:$0xff] }
0x1b55   : > { %12068 = vmatprep.subr.mxu0 %v12781_v3 }
0x1b56   : > { %12069 = vmatpush3.msra.mxu0 %v12781_v3  ;;  %v12790_v3 = vld [vmem:[%s16154_s4 + $0x70] sm:$0xff] }
0x1b57   : > { %12070 = vmatprep.subr.mxu0 %v12782_v33 }
0x1b58   : > { %12071 = vmatpush3.msra.mxu0 %v12782_v33 }
0x1b59   : > { %12075 = vmatprep.subr.mxu0 %v12783_v25 }
0x1c09   : > { %v12052_v51 = vpop.f32.mrf.mxu0 }
0x1c0a   : > { %v8207_v32 = vadd.f32 1e-05, %v12052_v51  ;;  %v12793_v51 = vld [vmem:[%s16154_s4 + $0xe0] sm:$0xff] }
0x1c0b   : > { %v8201_v52 = vpop.f32.mrf.mxu0 }
0x1c0c   : > { %v8202_v8 = vadd.f32 1e-05, %v8201_v52  ;;  %v12794_v52 = vld [vmem:[%s16154_s4 + $0x60] sm:$0xff] }
0x1c0e   : > { %12413 = vrsqrt.f32 %v8202_v8 }
0x1c0f   : > { %12415 = vrsqrt.f32 %v8207_v32 }
0x1c11   : > { %v12063_v23 = vpop.f32.mrf.mxu0 }
0x1c12   : > { %v8314_v59 = vmul.f32 %v12063_v23, %v12063_v23 }
0x1c13   : > { %v15410_v36 = vpop.f32.mrf.mxu0 }
0x1c14   : > { %v8313_v45 = vmul.f32 %v15410_v36, %v15410_v36 }
0x1c16   : > { %12072 = vmatprep.mubr.msk.f32.mxu0 %vm967_vm0, %v8313_v45  ;;  %v12797_v45 = vld [vmem:[%s16154_s4 + $0xd0] sm:$0xff] }
0x1c17   : > { %12073 = vmatmul.mubr.msk.f32.vlgmr.msra.gmra.mxu0 %vm967_vm0, %v8314_v59  ;;  %v12798_v59 = vld [vmem:[%s16154_s4 + $0x50] sm:$0xff] }
0x1c18   : > { %12076 = vmatpush3.msra.mxu0 %v12783_v25  ;;  %12083 = vmatprep.mubr.msk.f32.mxu0 %vm967_vm0, %v8419_v40  ;;  %v12799_v40 = vld [vmem:[%s16154_s4 + $0xc8] sm:$0xff] }
0x1c19   : > { %12077 = vmatprep.subr.mxu0 %v12784_v42 }
0x1c1a   : > { %12078 = vmatpush3.msra.mxu0 %v12784_v42  ;;  %v12792_v42 = vld [vmem:[%s16154_s4 + $0x68] sm:$0xff] }
0x1c1b   : > { %v12414_v16 = vpop.eup %12413  ;;  %12079 = vmatprep.subr.mxu0 %v12785_v17 }
0x1c1c   : > { %12080 = vmatpush3.msra.mxu0 %v12785_v17  ;;  %v8212_v6 = vmul.f32 %v12414_v16, %v8118_v7  ;;  %v12416_v43 = vpop.eup %12415  ;;  %v12800_v16 = vld [vmem:[%s16154_s4 + $0x48] sm:$0xff] }
0x1c1d   : > { %12081 = vmatprep.subr.mxu0 %v12786_v28  ;;  %v8213_v46 = vmul.f32 %v12416_v43, %v12041_v48  ;;  %v12791_v48 = vld [vmem:[%s16154_s4 + $0xe8] sm:$0xff] }
0x1c1e   : > { %12082 = vmatpush3.msra.mxu0 %v12786_v28  ;;  %v8220_v56 = vmul.f32 %v10416_v30, %v8212_v6  ;;  %v12801_v6 = vld [vmem:[%s16154_s4 + $0xc0] sm:$0xff] }
0x1c1f   : > { %12084 = vmatmul.mubr.msk.f32.vlgmr.msra.gmra.mxu0 %vm967_vm0, %v8421_v12  ;;  %8634 = vmatprep.subr.mxu0 %v12787_v11  ;;  %v8221_v62 = vmul.f32 %v10416_v30, %v8213_v46  ;;  %v12802_v12 = vld [vmem:[%s16154_s4 + $0x40] sm:$0xff]  ;;  %v12803_v11 = vld [vmem:[%s16154_s4 + $0xb8] sm:$0xff]  ;;  %v12805_v46 = vld [vmem:[%s16154_s4 + $0xb0] sm:$0xff] }
0x1c20   : > { %8635 = vmatpush1.msra.mxu0 %v15022_v14  ;;  %8674 = vmatprep.mubr.f32.mxu0 %v16203_v53  ;;  %v15428_v20 = vadd.f32 %v15047_v29, %v8220_v56  ;;  %v12804_v30 = vld [vmem:[%s16154_s4 + $0x38] sm:$0xff]  ;;  %v12806_v56 = vld [vmem:[%s16154_s4 + $0x30] sm:$0xff] }
0x1c21   : > { %8636 = vmatprep.subr.mxu0 %v15029_v41  ;;  %v15435_v14 = vadd.f32 %v15047_v29, %v8221_v62  ;;  %v12807_v62 = vld [vmem:[%s16154_s4 + $0xa8] sm:$0xff] }
0x1c22   : > { %8637 = vmatpush1.msra.mxu0 %v15034_v39  ;;  %v15438_v41 = vmul.f32 0.25, %v15428_v20 }
0x1c23   : > { %8638 = vmatprep.subr.mxu0 %v15038_v63  ;;  %v15487_v43 = vmul.f32 0.25, %v15435_v14 }
0x1c24   : > { %8639 = vmatpush1.msra.mxu0 %v15043_v49 }
0x1c25   : > { %8640 = vmatprep.subr.mxu0 %v15051_v54 }
0x1c26   : > { %8641 = vmatpush1.msra.mxu0 %v15058_v19 }
0x1c27   : > { %10430 = vmatmul.mubr.msk.f32.vlgmr.msra.gmra.mxu0 %vm967_vm0, %v15428_v20 }
0x1c28   : > { %8680 = vmatprep.mubr.f32.mxu0 %v16203_v53 }
0x1c2b   : > { %10431 = vmatmul.mubr.msk.f32.gmra.mxu0 %vm967_vm0, %v15435_v14 }
0x1c2c   : > { %12101 = vmatprep.mubr.msk.f32.mxu0 %vm3537_vm2, %v15438_v41 }
0x1cd7   : > { %v12074_v39 = vpop.f32.mrf.mxu0 }
0x1cd8   : > { %v8393_v63 = vadd.f32 1e-05, %v12074_v39  ;;  %v12808_v39 = vld [vmem:[%s16154_s4 + $0x28] sm:$0xff] }
0x1cd9   : > { %v8387_v49 = vpop.f32.mrf.mxu0 }
0x1cda   : > { %12417 = vrsqrt.f32 %v8393_v63  ;;  %v8388_v53 = vadd.f32 1e-05, %v8387_v49  ;;  %v12809_v63 = vld [vmem:[%s16154_s4 + $0xa0] sm:$0xff] }
0x1cdb   : > { %v12810_v49 = vld [vmem:[%s16154_s4 + $0x20] sm:$0xff] }
0x1cdc   : > { %12419 = vrsqrt.f32 %v8388_v53 }
0x1cdf   : > { %v15444_v29 = vpop.f32.mrf.mxu0 }
0x1ce0   : > { %v8502_v22 = vmul.f32 %v15444_v29, %v15444_v29 }
0x1ce1   : > { %v15446_v54 = vpop.f32.mrf.mxu0 }
0x1ce2   : > { %v8501_v19 = vmul.f32 %v15446_v54, %v15446_v54 }
0x1ce4   : > { %12094 = vmatprep.mubr.msk.f32.mxu1 %vm967_vm0, %v8501_v19  ;;  %v12811_v19 = vld [vmem:[%s16154_s4 + $0x98] sm:$0xff] }
0x1ce5   : > { %12095 = vmatmul.mubr.msk.f32.vlgmr.msra.gmra.mxu1 %vm967_vm0, %v8502_v22  ;;  %v12812_v22 = vld [vmem:[%s16154_s4 + $0x18] sm:$0xff] }
0x1ce6   : > { %11120 = vmatpush3.msra.mxu1 %v12788_v60  ;;  %v12813_v60 = vld [vmem:[%s16154_s4 + $0x90] sm:$0xff] }
0x1ce7   : > { %v12418_v35 = vpop.eup %12417  ;;  %11121 = vmatprep.subr.mxu1 %v12789_v9  ;;  %v15456_v58 = vpop.f32.mrf.mxu0 }
0x1ce8   : > { %11122 = vmatpush3.msra.mxu1 %v12790_v3  ;;  %v8399_v33 = vmul.f32 %v12418_v35, %v12063_v23  ;;  %v12795_v23 = vld [vmem:[%s16154_s4 + $0xd8] sm:$0xff]  ;;  %v12814_v35 = vld [vmem:[%s16154_s4 + $0x10] sm:$0xff]  ;;  %v12816_v3 = vld [vmem:[%s16154_s4 + $0x8] sm:$0xff] }
0x1ce9   : > { %v12420_v25 = vpop.eup %12419  ;;  %11123 = vmatprep.subr.mxu1 %v12791_v48  ;;  %v8678_v7 = vpop.f32.mrf.mxu0  ;;  %v12818_v48 = vld [vmem:[%s16154_s4 + $0x80] sm:$0xff] }
0x1cea   : > { %v8688_v57 = vmul.f32 %v15092_v44, %v8678_v7  ;;  %11124 = vmatpush3.msra.mxu1 %v12792_v42  ;;  %v8407_v17 = vmul.f32 %v10422_v1, %v8399_v33  ;;  %v8398_v28 = vmul.f32 %v12420_v25, %v15410_v36  ;;  %v12796_v44 = vld [vmem:[%s16154_s4 + $0x58] sm:$0xff]  ;;  %v12817_v33 = vld [vmem:[%s16187_s1] sm:$0xff]  ;;  %v12821_v42 = vld [vmem:[%s16187_s1 + $0x10] sm:$0xff] }
0x1ceb   : > { %11125 = vmatprep.subr.mxu1 %v12793_v51  ;;  %v8682_v53 = vpop.f32.mrf.mxu0  ;;  %v8687_v25 = vmul.f32 %v12817_v33, %v15456_v58  ;;  %v12819_v7 = vld [vmem:[%s16187_s1 + $0x18] sm:$0xff] }
0x1cec   : > { %11126 = vmatpush3.msra.mxu1 %v12794_v52  ;;  %8755 = vmatprep.mubr.f32.mxu1 %v8688_v57  ;;  %v15467_v8 = vadd.f32 %v10423_v15, %v8407_v17  ;;  %v8406_v32 = vmul.f32 %v10422_v1, %v8398_v28  ;;  %v12815_v1 = vld [vmem:[%s16154_s4 + $0x88] sm:$0xff]  ;;  %v12820_v57 = vld [vmem:[%s16154_s4] sm:$0xff]  ;;  %v8689_v17 = vmul.f32 %v12821_v42, %v8682_v53  ;;  %v15512_v28 = vpop.f32.mrf.mxu1 }
0x1ced   : > { %11127 = vmatprep.subr.mxu1 %v12795_v23  ;;  %v8684_v9 = vpop.f32.mrf.mxu0 }
0x1cee   : > { %11128 = vmatpush3.msra.mxu1 %v12796_v44  ;;  %12097 = vmatprep.subr.msk.mxu0 %vm3537_vm2, %v15467_v8  ;;  %v15473_v36 = vadd.f32 %v10423_v15, %v8406_v32  ;;  %v8690_v15 = vmul.f32 %v12819_v7, %v8684_v9  ;;  %v15514_v51 = vpop.f32.mrf.mxu1  ;;  %v10429_v9 = vld [vmem:[%s16199_s29] ss:$0 sm:$0xff] }
0x1cef   : > { %11129 = vmatprep.subr.mxu1 %v12797_v45  ;;  %12098 = vmatpush3.xpose.msk.msra.mxu0 %vm3537_vm2, %v15467_v8 }
0x1cf0   : > { %11130 = vmatpush3.msra.mxu1 %v12798_v59  ;;  %12099 = vmatprep.subr.msk.mxu0 %vm3537_vm2, %v15473_v36  ;;  %v15516_v52 = vpop.f32.mrf.mxu1 }
0x1cf1   : > { %11131 = vmatprep.subr.mxu1 %v12799_v40 }
0x1cf2   : > { %11132 = vmatpush3.msra.mxu1 %v12800_v16  ;;  %v15518_v32 = vpop.f32.mrf.mxu1 }
0x1cf3   : > { %11133 = vmatprep.subr.mxu1 %v12801_v6  ;;  %12100 = vmatpush3.xpose.msk.msra.mxu0 %vm3537_vm2, %v15473_v36 }
0x1cf4   : > { %11134 = vmatpush3.msra.mxu1 %v12802_v12  ;;  %v15520_v58 = vpop.f32.mrf.mxu1 }
0x1cf5   : > { %11135 = vmatprep.subr.mxu1 %v12803_v11 }
0x1cf6   : > { %11136 = vmatpush3.msra.mxu1 %v12804_v30  ;;  %12102 = vmatmul.mubr.msk.f32.vlgmr.msra.gmra.mxu0 %vm3537_vm2, %v15487_v43  ;;  %v15522_v23 = vpop.f32.mrf.mxu1 }
0x1cf7   : > { %11137 = vmatprep.subr.mxu1 %v12805_v46 }
0x1cf8   : > { %11138 = vmatpush3.msra.mxu1 %v12806_v56  ;;  %v15524_v44 = vpop.f32.mrf.mxu1 }
0x1cf9   : > { %11139 = vmatprep.subr.mxu1 %v12807_v62 }
0x1cfa   : > { %11140 = vmatpush3.msra.mxu1 %v12808_v39  ;;  %v15526_v45 = vpop.f32.mrf.mxu1 }
0x1cfb   : > { %11141 = vmatprep.subr.mxu1 %v12809_v63 }
0x1cfc   : > { %11142 = vmatpush3.msra.mxu1 %v12810_v49  ;;  %v15528_v59 = vpop.f32.mrf.mxu1 }
0x1cfd   : > { %11143 = vmatprep.subr.mxu1 %v12811_v19 }
0x1cfe   : > { %11144 = vmatpush3.msra.mxu1 %v12812_v22  ;;  %v15530_v40 = vpop.f32.mrf.mxu1  ;;  %v10428_v22 = vld [vmem:[%s16198_s25] ss:$0 sm:$0xff] }
0x1cff   : > { %11145 = vmatprep.subr.mxu1 %v12813_v60 }
0x1d00   : > { %11146 = vmatpush3.msra.mxu1 %v12814_v35  ;;  %v15532_v16 = vpop.f32.mrf.mxu1 }
0x1d01   : > { %11147 = vmatprep.subr.mxu1 %v12815_v1 }
0x1d02   : > { %11148 = vmatpush3.msra.mxu1 %v12816_v3  ;;  %v15534_v6 = vpop.f32.mrf.mxu1 }
0x1d03   : > { %11149 = vmatprep.subr.mxu1 %v12818_v48 }
0x1d04   : > { %11150 = vmatpush3.msra.mxu1 %v12820_v57  ;;  %v15536_v12 = vpop.f32.mrf.mxu1 }
0x1d05   : > { %8756 = vmatmul.mubr.f32.vlgmr.msra.gmra.mxu1 %v8687_v25 }
0x1d06   : > { %8760 = vmatprep.mubr.f32.mxu1 %v8690_v15  ;;  %v15538_v11 = vpop.f32.mrf.mxu1 }
0x1d08   : > { %v15540_v30 = vpop.f32.mrf.mxu1 }
0x1d09   : > { %8761 = vmatmul.mubr.f32.gmra.mxu1 %v8689_v17 }
0x1d0a   : > { %v15542_v46 = vpop.f32.mrf.mxu1 }
0x1d0c   : > { %v15544_v56 = vpop.f32.mrf.mxu1 }
0x1d0e   : > { %v15546_v62 = vpop.f32.mrf.mxu1 }
0x1da5   : > { %v12096_v39 = vpop.f32.mrf.mxu1 }
0x1da6   : > { %v8581_v63 = vadd.f32 1e-05, %v12096_v39 }
0x1da7   : > { %v8575_v49 = vpop.f32.mrf.mxu1 }
0x1da8   : > { %12421 = vrsqrt.f32 %v8581_v63  ;;  %v8576_v53 = vadd.f32 1e-05, %v8575_v49 }
0x1daa   : > { %12423 = vrsqrt.f32 %v8576_v53 }
0x1db5   : > { %v12422_v19 = vpop.eup %12421 }
0x1db6   : > { %v8587_v60 = vmul.f32 %v12422_v19, %v15444_v29  ;;  %v12103_v7 = vpop.f32.mrf.mxu0 }
0x1db7   : > { %v12424_v35 = vpop.eup %12423 }
0x1db8   : > { %v8595_v1 = vmul.f32 %v10428_v22, %v8587_v60  ;;  %v8586_v3 = vmul.f32 %v12424_v35, %v15446_v54  ;;  %v8846_v42 = vpop.f32.mrf.mxu0 }
0x1dba   : > { %v15552_v33 = vadd.f32 %v10429_v9, %v8595_v1  ;;  %v8594_v25 = vmul.f32 %v10428_v22, %v8586_v3 }
0x1dbc   : > { %12104 = vmatprep.subr.mxu0 %v15552_v33  ;;  %v15555_v48 = vadd.f32 %v10429_v9, %v8594_v25 }
0x1dbd   : > { %12105 = vmatpush3.msra.mxu0 %v15552_v33 }
0x1dbe   : > { %12106 = vmatprep.subr.mxu0 %v15555_v48 }
0x1dbf   : > { %12107 = vmatpush3.msra.mxu0 %v15555_v48 }
0x1dc5   : > { %v11151_v29 = vpop.f32.mrf.mxu1 }
0x1dc7   : > { %v11152_v15 = vpop.f32.mrf.mxu1 }
0x1dc8   : > { %v11153_v57 = vadd.f32 %v11152_v15, %v11151_v29 }
0x1dc9   : > { %v11154_v17 = vpop.f32.mrf.mxu1 }
0x1dca   : > { %v8847_v54 = vadd.f32 %v11153_v57, %v8846_v42 }
0x1dcb   : > { %v11155_v39 = vpop.f32.mrf.mxu1 }
0x1dcc   : > { %v11156_v63 = vadd.f32 %v11155_v39, %v11154_v17  ;;  %v8855_v49 = vsel %vm3537_vm2, %v8847_v54, -inf }
0x1dcd   : > { %8856 = vmax.xlane.f32.xlu0 %v8855_v49 }
0x1dce   : > { %v8852_v53 = vadd.f32 %v12103_v7, %v11156_v63 }
0x1dd0   : > { %v8858_v19 = vsel %vm3537_vm2, %v8852_v53, -inf }
0x1dd1   : > { %8859 = vmax.xlane.f32.xlu1 %v8858_v19 }
0x1de2   : > { %8964 = vrot.lane.b32.xlu1 %v15473_v36, %s12916_s2 }
0x1de6   : > { %8960 = vrot.lane.b32.xlu1 %v15438_v41, %s12916_s2 }
0x1dea   : > { %8962 = vrot.lane.b32.xlu1 %v15487_v43, %s12916_s2 }
0x1dee   : > { %8972 = vrot.lane.b32.xlu1 %v11156_v63, %s12916_s2 }
0x1e56   : > { %v8857_v22 = vpop.xlane.xlu0 %8856 }
0x1e57   : > { %v8861_v60 = vsub.f32 %v8847_v54, %v8857_v22 }
0x1e59   : > { %v8863_v35 = vmul.f32 1.442695, %v8861_v60 }
0x1e5a   : > { %v8860_v9 = vpop.xlane.xlu1 %8859 }
0x1e5b   : > { %12425 = vpow2.f32 %v8863_v35  ;;  %v8862_v1 = vsub.f32 %v8852_v53, %v8860_v9 }
0x1e5d   : > { %v8865_v3 = vmul.f32 1.442695, %v8862_v1 }
0x1e5e   : > { %v8965_v17 = vpop.permute.xlu1 %8964 }
0x1e5f   : > { %12427 = vpow2.f32 %v8865_v3 }
0x1e62   : > { %v8961_v49 = vpop.permute.xlu1 %8960 }
0x1e68   : > { %v12426_v25 = vpop.eup %12425 }
0x1e69   : > { %v8867_v7 = vsel %vm3537_vm2, %v12426_v25, 0.0 }
0x1e6a   : > { %8868 = vadd.xlane.f32.xlu0 %v8867_v7 }
0x1e6c   : > { %v12428_v36 = vpop.eup %12427 }
0x1e6d   : > { %v8870_v41 = vsel %vm3537_vm2, %v12428_v36, 0.0 }
0x1e6e   : > { %8871 = vadd.xlane.f32.xlu0 %v8870_v41 }
0x1e84   : > { %8966 = vrot.lane.b32.xlu0 %v15467_v8, %s12916_s2  ;;  %v8963_v8 = vpop.permute.xlu1 %8962 }
0x1e88   : > { %8970 = vrot.lane.b32.xlu0 %v11153_v57, %s12916_s2  ;;  %v8973_v60 = vpop.permute.xlu1 %8972 }
0x1ef3   : > { %v8869_v43 = vpop.xlane.xlu0 %8868 }
0x1ef4   : > { %12429 = vrcp.f32 %v8869_v43 }
0x1ef7   : > { %v8872_v29 = vpop.xlane.xlu0 %8871 }
0x1ef8   : > { %12431 = vrcp.f32 %v8872_v29 }
0x1efb   : > { %v8967_v15 = vpop.permute.xlu0 %8966 }
0x1efc   : > { %12111 = vmatprep.subr.msk.mxu0 %vm3537_vm2, %v8967_v15 }
0x1eff   : > { %v8971_v1 = vpop.permute.xlu0 %8970 }
0x1f01   : > { %v12430_v42 = vpop.eup %12429 }
0x1f02   : > { %v8875_v54 = vmul.f32 %v12430_v42, %v12426_v25 }
0x1f04   : > { %12108 = vmatprep.mubr.msk.f32.mxu0 %vm3537_vm2, %v8875_v54  ;;  %v16243_v54 = vld [vmem:[#allocation59_spill] sm:$0xff] }
0x1f05   : > { %v12432_v39 = vpop.eup %12431 }
0x1f06   : > { %v8876_v63 = vmul.f32 %v12432_v39, %v12428_v36 }
0x1f08   : > { %12109 = vmatmul.mubr.msk.f32.vlgmr.msra.gmra.mxu0 %vm3537_vm2, %v8876_v63 }
0x1f09   : > { %12112 = vmatpush3.xpose.msk.msra.mxu0 %vm3537_vm2, %v8967_v15  ;;  %12115 = vmatprep.mubr.msk.f32.mxu0 %vm3537_vm2, %v8961_v49 }
0x1f0a   : > { %12113 = vmatprep.subr.msk.mxu0 %vm3537_vm2, %v8965_v17 }
0x1f0d   : > { %12114 = vmatpush3.xpose.msk.msra.mxu0 %vm3537_vm2, %v8965_v17 }
0x1f10   : > { %12116 = vmatmul.mubr.msk.f32.vlgmr.msra.gmra.mxu0 %vm3537_vm2, %v8963_v8 }
0x1fc8   : > { %v12110_v57 = vpop.f32.mrf.mxu0 }
0x1fc9   : > { %v8955_v53 = vadd.f32 %v12110_v57, %v15435_v14 }
0x1fca   : > { %v8949_v19 = vpop.f32.mrf.mxu0 }
0x1fcb   : > { %8959 = vst.msk [vmem:[#allocation2 + $0x38] sm:$0xff] %vm3537_vm2, %v8955_v53  ;;  %v8950_v22 = vadd.f32 %v8949_v19, %v15428_v20 }
0x1fcd   : > { %8958 = vst.msk [vmem:[#allocation2 + $0x30] sm:$0xff] %vm3537_vm2, %v8950_v22 }
0x1fd0   : > { %v12117_v35 = vpop.f32.mrf.mxu0 }
0x1fd1   : > { %v9056_v9 = vadd.f32 %v12117_v35, %v8973_v60  ;;  %v12253_v35 = vld [vmem:[%s16245_s28 + $0x8] sm:$0xff]  }
0x1fd2   : > { %v9050_v3 = vpop.f32.mrf.mxu0 }
0x1fd3   : > { %v9051_v25 = vadd.f32 %v9050_v3, %v8971_v1  ;;  %v9062_v7 = vsel %vm3537_vm2, %v9056_v9, -inf }
0x1fd4   : > { %9063 = vmax.xlane.f32.xlu1 %v9062_v7 }
0x1fd5   : > { %v9059_v36 = vsel %vm3537_vm2, %v9051_v25, -inf }
0x1fd6   : > { %9060 = vmax.xlane.f32.xlu0 %v9059_v36 }
0x1fe5   : > { %9083 = vrot.lane.b32.xlu1 %v15555_v48, %s12916_s2 }
0x1fe9   : > { %3859 = vrot.lane.b32.xlu1 %v13928_v4, %s12916_s2 }
0x1fed   : > { %3861 = vrot.lane.b32.xlu1 %v13933_v26, %s12916_s2 }
0x1ff1   : > { %5605 = vrot.lane.b32.xlu1 %v14435_v18, %s12916_s2 }
0x1ff5   : > { %7348 = vrot.lane.b32.xlu1 %v15071_v10, %s12916_s2 }
0x1ff9   : > { %9091 = vrot.lane.b32.xlu1 %v15435_v14, %s12916_s2 }
0x205d   : > { %v9064_v41 = vpop.xlane.xlu1 %9063 }
0x205e   : > { %v9066_v43 = vsub.f32 %v9056_v9, %v9064_v41 }
0x205f   : > { %v9061_v29 = vpop.xlane.xlu0 %9060 }
0x2060   : > { %v9069_v15 = vmul.f32 1.442695, %v9066_v43  ;;  %v9065_v48 = vsub.f32 %v9051_v25, %v9061_v29 }
0x2061   : > { %v9084_v42 = vpop.permute.xlu1 %9083 }
0x2062   : > { %12433 = vpow2.f32 %v9069_v15  ;;  %v9067_v4 = vmul.f32 1.442695, %v9065_v48  ;;  %v12254_v15 = vld [vmem:[%s16245_s28] sm:$0xff]  }
0x2064   : > { %12435 = vpow2.f32 %v9067_v4  ;;  %v12918_v4 = vmov 0  }
0x2065   : > { %v3860_v17 = vpop.permute.xlu1 %3859  ;;  %12250 = vset.pattern.permute.xlu1 %v12918_v4  ;;  %12249 = vset.pattern.permute.xlu0 %v12918_v4 }
0x2069   : > { %v3862_v26 = vpop.permute.xlu1 %3861 }
0x206a   : > { %v3943_v39 = vadd.f32 %v16243_v54, %v3862_v26 }
0x206c   : > { %3950 = vrot.lane.b32.xlu1 %v3943_v39, %s12917_s18 }
0x206d   : > { %v5606_v18 = vpop.permute.xlu1 %5605 }
0x206e   : > { %v5687_v10 = vadd.f32 %v14901_v37, %v5606_v18  ;;  %v16244_v37 = vld [vmem:[#allocation60_spill] sm:$0xff] }
0x206f   : > { %v12434_v14 = vpop.eup %12433  ;;  %v3938_v19 = vadd.f32 %v16244_v37, %v3860_v17 }
0x2070   : > { %5694 = vrot.lane.b32.xlu1 %v5687_v10, %s12917_s18  ;;  %v9074_v63 = vsel %vm3537_vm2, %v12434_v14, 0.0 }
0x2071   : > { %v12436_v49 = vpop.eup %12435  ;;  %v7349_v8 = vpop.permute.xlu1 %7348  ;;  %9075 = vadd.xlane.f32.xlu0 %v9074_v63 }
0x2072   : > { %v7430_v57 = vadd.f32 %v15368_v47, %v7349_v8  ;;  %v9071_v53 = vsel %vm3537_vm2, %v12436_v49, 0.0 }
0x2074   : > { %7437 = vrot.lane.b32.xlu1 %v7430_v57, %s12917_s18 }
0x2075   : > { %9072 = vadd.xlane.f32.xlu0 %v9071_v53  ;;  %v9092_v47 = vpop.permute.xlu1 %9091 }
0x208b   : > { %9085 = vrot.lane.b32.xlu0 %v15552_v33, %s12916_s2 }
0x208f   : > { %5603 = vrot.lane.b32.xlu0 %v14429_v0, %s12916_s2 }
0x2093   : > { %7346 = vrot.lane.b32.xlu0 %v15055_v24, %s12916_s2 }
0x2097   : > { %9089 = vrot.lane.b32.xlu0 %v15428_v20, %s12916_s2  ;;  %s16246_s2 = sld [smem:[#allocation8_spill]] }
0x209b   : > { %3948 = vrot.lane.b32.xlu0 %v3938_v19, %s12917_s18 }
0x209d   : > { %v1782_v37 = vld [vmem:[%s16246_s2 + $0x8] sm:$0xff]  ;;  %v1781_v19 = vld [vmem:[%s16246_s2] sm:$0xff] }
0x20de   : > { %v3951_v22 = vpop.permute.xlu1 %3950 }
0x20df   : > { %3956 = vst.msk [vmem:[#allocation2 + $0x8] sm:$0xff] %vm3954_vm3, %v3951_v22  ;;  %v1783_v22 = vld [vmem:[%s16246_s2 + $0x10] sm:$0xff] }
0x20e2   : > { %v5695_v33 = vpop.permute.xlu1 %5694 }
0x20e3   : > { %5699 = vst.msk [vmem:[#allocation2 + $0x18] sm:$0xff] %vm3954_vm3, %v5695_v33  ;;  %v1784_v33 = vld [vmem:[%s16246_s2 + $0x18] sm:$0xff] }
0x20e6   : > { %v7438_v0 = vpop.permute.xlu1 %7437 }
0x20e7   : > { %7442 = vst.msk [vmem:[#allocation2 + $0x28] sm:$0xff] %vm3954_vm3, %v7438_v0  ;;  %v1786_v0 = vld [vmem:[%s16246_s2 + $0x28] sm:$0xff] }
0x20ea   : > { %v9189_v39 = vld [vmem:[#allocation2 + $0x18] sm:$0xff] }
0x20fa   : > { %v9076_v24 = vpop.xlane.xlu0 %9075 }
0x20fb   : > { %12437 = vrcp.f32 %v9076_v24  ;;  %v1787_v24 = vld [vmem:[%s16246_s2 + $0x30] sm:$0xff] }
0x20fe   : > { %v9073_v60 = vpop.xlane.xlu0 %9072 }
0x20ff   : > { %12439 = vrcp.f32 %v9073_v60  ;;  %v1788_v60 = vld [vmem:[%s16246_s2 + $0x38] sm:$0xff] }
0x2102   : > { %v9086_v20 = vpop.permute.xlu0 %9085 }
0x2103   : > { %12118 = vmatprep.subr.mxu0 %v9086_v20 }
0x2104   : > { %12119 = vmatpush3.msra.mxu0 %v9086_v20  ;;  %v1789_v20 = vld [vmem:[%s16246_s2 + $0x40] sm:$0xff] }
0x2105   : > { %12120 = vmatprep.subr.mxu0 %v9084_v42 }
0x2106   : > { %12121 = vmatpush3.msra.mxu0 %v9084_v42  ;;  %v5604_v9 = vpop.permute.xlu0 %5603  ;;  %v9187_v42 = vld [vmem:[#allocation2 + $0x8] sm:$0xff] }
0x2107   : > { %v5682_v1 = vadd.f32 %v14904_v5, %v5604_v9  ;;  %12125 = vmatprep.subr.bf16.mxu0 %v12253_v35  ;;  %v1791_v9 = vld [vmem:[%s16246_s2 + $0x50] sm:$0xff] }
0x2108   : > { %v12438_v25 = vpop.eup %12437 }
0x2109   : > { %5692 = vrot.lane.b32.xlu0 %v5682_v1, %s12917_s18  ;;  %v9080_v43 = vmul.f32 %v12438_v25, %v12434_v14  ;;  %v9191_v14 = vld [vmem:[#allocation2 + $0x28] sm:$0xff]  ;;  %v1792_v1 = vld [vmem:[%s16246_s2 + $0x58] sm:$0xff] }
0x210a   : > { %v7347_v3 = vpop.permute.xlu0 %7346  ;;  %v1794_v25 = vld [vmem:[%s16246_s2 + $0x68] sm:$0xff] }
0x210b   : > { %v7425_v7 = vadd.f32 %v15371_v38, %v7347_v3  ;;  %v1793_v3 = vld [vmem:[%s16246_s2 + $0x60] sm:$0xff] }
0x210c   : > { %v12440_v36 = vpop.eup %12439 }
0x210d   : > { %7435 = vrot.lane.b32.xlu0 %v7425_v7, %s12917_s18  ;;  %v9079_v41 = vmul.f32 %v12440_v36, %v12436_v49  ;;  %v1795_v7 = vld [vmem:[%s16246_s2 + $0x70] sm:$0xff]  ;;  %v1796_v36 = vld [vmem:[%s16246_s2 + $0x78] sm:$0xff] }
0x210e   : > { %v9090_v29 = vpop.permute.xlu0 %9089 }
0x210f   : > { %12122 = vmatprep.mubr.msk.f32.mxu0 %vm3537_vm2, %v9079_v41  ;;  %v1797_v41 = vld [vmem:[%s16246_s2 + $0x80] sm:$0xff] }
0x2110   : > { %12123 = vmatmul.mubr.msk.f32.vlgmr.msra.gmra.mxu0 %vm3537_vm2, %v9080_v43  ;;  %v1798_v43 = vld [vmem:[%s16246_s2 + $0x88] sm:$0xff] }
0x2111   : > { %12126 = vmatpush3.bf16.msra.mxu0 %v12253_v35  ;;  %v1790_v35 = vld [vmem:[%s16246_s2 + $0x48] sm:$0xff] }
0x2112   : > { %v3949_v5 = vpop.permute.xlu0 %3948  ;;  %12127 = vmatprep.subr.bf16.mxu0 %v12254_v15 }
0x2113   : > { %3955 = vst.msk [vmem:[#allocation2] sm:$0xff] %vm3954_vm3, %v3949_v5 }
0x2115   : > { %12128 = vmatpush3.bf16.msra.mxu0 %v12254_v15 }
0x211a   : > { %v9186_v48 = vld [vmem:[#allocation2] sm:$0xff] }
0x211b   : > { %v9194_v38 = vpack.c.bf16 %v9187_v42, %v9186_v48 }
0x211d   : > { %12129 = vmatprep.mubr.msk.bf16.mxu0 %vm967_vm0, %v9194_v38 }
0x217b   : > { %v5693_v17 = vpop.permute.xlu0 %5692 }
0x217c   : > { %5698 = vst.msk [vmem:[#allocation2 + $0x10] sm:$0xff] %vm3954_vm3, %v5693_v17  ;;  %v16247_v17 = vld [vmem:[#allocation42_spill] sm:$0xff] }
0x217f   : > { %v7436_v26 = vpop.permute.xlu0 %7435 }
0x2180   : > { %7441 = vst.msk [vmem:[#allocation2 + $0x20] sm:$0xff] %vm3954_vm3, %v7436_v26 }
0x2183   : > { %v9188_v54 = vld [vmem:[#allocation2 + $0x10] sm:$0xff] }
0x2184   : > { %v9195_v18 = vpack.c.bf16 %v9189_v39, %v9188_v54  ;;  %v16248_v54 = vld [vmem:[#allocation62_spill] sm:$0xff] }
0x2186   : > { %12130 = vmatmul.mubr.msk.bf16.vlgmr.msra.gmra.mxu0 %vm967_vm0, %v9195_v18 }
0x2187   : > { %v9190_v10 = vld [vmem:[#allocation2 + $0x20] sm:$0xff] }
0x2188   : > { %v9196_v63 = vpack.c.bf16 %v9191_v14, %v9190_v10 }
0x218a   : > { %12133 = vmatprep.mubr.msk.bf16.mxu0 %vm967_vm0, %v9196_v63  ;;  %v16249_v63 = vld [vmem:[#allocation44_spill] sm:$0xff] }
0x21d0   : > { %v12124_v49 = vpop.f32.mrf.mxu0 }
0x21d1   : > { %v9173_v8 = vadd.f32 %v12124_v49, %v9092_v47  ;;  %v1785_v47 = vld [vmem:[%s16246_s2 + $0x20] sm:$0xff] }
0x21d2   : > { %v9167_v57 = vpop.f32.mrf.mxu0 }
0x21d3   : > { %v9168_v53 = vadd.f32 %v9167_v57, %v9090_v29  ;;  %9180 = vrot.lane.b32.xlu1 %v9173_v8, %s12917_s18  ;;  %v16250_v8 = vld [vmem:[#allocation64_spill] sm:$0xff] }
0x21d5   : > { %9178 = vrot.lane.b32.xlu0 %v9168_v53, %s12917_s18  ;;  %s16289_s18 = sld [smem:[#allocation22_spill]] }
0x21d7   : > { %2694 = vperm.xlu1 %12250, %v1782_v37  }
0x21d9   : > { %2689 = vperm.xlu0 %12249, %v1781_v19   ;;  %v16251_v19 = vld [vmem:[#allocation41_spill] sm:$0xff] }
0x21db   : > { %2701 = vperm.xlu1 %12250, %v1783_v22  }
0x21dd   : > { %2706 = vperm.xlu0 %12249, %v1784_v33   ;;  %v16252_v33 = vld [vmem:[#allocation61_spill] sm:$0xff] }
0x21df   : > { %2715 = vperm.xlu1 %12250, %v1785_v47  }
0x21e1   : > { %2720 = vperm.xlu0 %12249, %v1786_v0  }
0x21e3   : > { %2729 = vperm.xlu1 %12250, %v1787_v24  }
0x21e5   : > { %2734 = vperm.xlu0 %12249, %v1788_v60  }
0x21e7   : > { %2743 = vperm.xlu1 %12250, %v1789_v20  }
0x21e9   : > { %2748 = vperm.xlu0 %12249, %v1790_v35  }
0x21eb   : > { %2757 = vperm.xlu1 %12250, %v1791_v9   ;;  %v16253_v9 = vld [vmem:[#allocation43_spill] sm:$0xff] }
0x21ed   : > { %2762 = vperm.xlu0 %12249, %v1792_v1  }
0x21ef   : > { %2771 = vperm.xlu1 %12250, %v1793_v3   ;;  %v16254_v3 = vld [vmem:[#allocation63_spill] sm:$0xff] }
0x21f1   : > { %2776 = vperm.xlu0 %12249, %v1794_v25  }
0x21f3   : > { %2785 = vperm.xlu1 %12250, %v1795_v7  }
0x21f5   : > { %2790 = vperm.xlu0 %12249, %v1796_v36   ;;  %v16255_v36 = vld [vmem:[#allocation46_spill] sm:$0xff] }
0x21f7   : > { %2799 = vperm.xlu1 %12250, %v1797_v41  }
0x21f9   : > { %2804 = vperm.xlu0 %12249, %v1798_v43   ;;  %v16256_v43 = vld [vmem:[#allocation66_spill] sm:$0xff] }
0x2245   : > { %v9181_v29 = vpop.permute.xlu1 %9180 }
0x2246   : > { %9185 = vst.msk [vmem:[#allocation2 + $0x38] sm:$0xff] %vm3954_vm3, %v9181_v29 }
0x2247   : > { %v9179_v15 = vpop.permute.xlu0 %9178 }
0x2248   : > { %9184 = vst.msk [vmem:[#allocation2 + $0x30] sm:$0xff] %vm3954_vm3, %v9179_v15 }
0x224d   : > { %v9193_v48 = vld [vmem:[#allocation2 + $0x38] sm:$0xff] }
0x224f   : > { %v9192_v5 = vld [vmem:[#allocation2 + $0x30] sm:$0xff] }
0x2250   : > { %v9197_v42 = vpack.c.bf16 %v9193_v48, %v9192_v5 }
0x2252   : > { %v2695_v38 = vpop.permute.xlu1 %2694  ;;  %12134 = vmatmul.mubr.msk.bf16.gmra.mxu0 %vm967_vm0, %v9197_v42 }
0x2253   : > { %v2698_v22 = vadd.f32 %v16251_v19, %v2695_v38  ;;  %v4523_v47 = vadd.f32 %v16252_v33, %v2695_v38  ;;  %v6266_v0 = vadd.f32 %v15112_v31, %v2695_v38  ;;  %v8009_v24 = vadd.f32 %v15512_v28, %v2695_v38 }
0x2254   : > { %v2690_v4 = vpop.permute.xlu0 %2689 }
0x2255   : > { %v2697_v26 = vadd.f32 %v2690_v4, %v16247_v17  ;;  %v4522_v39 = vadd.f32 %v16248_v54, %v2690_v4  ;;  %v6265_v18 = vadd.f32 %v15114_v34, %v2690_v4  ;;  %v8008_v10 = vadd.f32 %v15514_v51, %v2690_v4  ;;  %v16257_v54 = vld [vmem:[#allocation45_spill] sm:$0xff] }
0x2256   : > { %v2702_v14 = vpop.permute.xlu1 %2701 }
0x2257   : > { %v2709_v49 = vadd.f32 %v2702_v14, %v16249_v63  ;;  %v4524_v57 = vadd.f32 %v16250_v8, %v2702_v14  ;;  %v6267_v53 = vadd.f32 %v15118_v50, %v2702_v14  ;;  %v8010_v37 = vadd.f32 %v15518_v32, %v2702_v14  ;;  %v16259_v63 = vld [vmem:[#allocation48_spill] sm:$0xff] }
0x2258   : > { %v2707_v34 = vpop.permute.xlu0 %2706 }
0x2259   : > { %v2711_v60 = vmax.f32 %v2697_v26, %v2709_v49  ;;  %v4526_v51 = vmax.f32 %v4522_v39, %v4524_v57  ;;  %v6269_v20 = vmax.f32 %v6265_v18, %v6267_v53  ;;  %v8012_v35 = vmax.f32 %v8008_v10, %v8010_v37  ;;  %v16258_v39 = vld [vmem:[#allocation65_spill] sm:$0xff]  ;;  %v16260_v49 = vld [vmem:[#allocation68_spill] sm:$0xff] }
0x225a   : > { %v2710_v1 = vadd.f32 %v16253_v9, %v2707_v34  ;;  %v4525_v25 = vadd.f32 %v16254_v3, %v2707_v34  ;;  %v6268_v50 = vadd.f32 %v15116_v61, %v2707_v34  ;;  %v8011_v32 = vadd.f32 %v15516_v52, %v2707_v34  ;;  %v2716_v7 = vpop.permute.xlu1 %2715  ;;  %v16264_v3 = vld [vmem:[#allocation70_spill] sm:$0xff] }
0x225b   : > { %v2723_v41 = vadd.f32 %v2716_v7, %v16255_v36  ;;  %v4528_v31 = vadd.f32 %v16256_v43, %v2716_v7  ;;  %v6271_v28 = vadd.f32 %v15122_v13, %v2716_v7  ;;  %v8014_v29 = vadd.f32 %v15522_v23, %v2716_v7 }
0x225c   : > { %v2712_v15 = vmax.f32 %v2698_v22, %v2710_v1  ;;  %v4527_v5 = vmax.f32 %v4523_v47, %v4525_v25  ;;  %v6270_v48 = vmax.f32 %v6266_v0, %v6268_v50  ;;  %v8013_v42 = vmax.f32 %v8009_v24, %v8011_v32  ;;  %v2721_v38 = vpop.permute.xlu0 %2720  ;;  %v16263_v1 = vld [vmem:[#allocation50_spill] sm:$0xff] }
0x225d   : > { %v2725_v4 = vmax.f32 %v2711_v60, %v2723_v41  ;;  %v4530_v17 = vmax.f32 %v4526_v51, %v4528_v31  ;;  %v6273_v26 = vmax.f32 %v6269_v20, %v6271_v28  ;;  %v8016_v61 = vmax.f32 %v8012_v35, %v8014_v29  ;;  %v16261_v60 = vld [vmem:[#allocation47_spill] sm:$0xff] }
0x225e   : > { %v2724_v52 = vadd.f32 %v16257_v54, %v2721_v38  ;;  %v4529_v18 = vadd.f32 %v16258_v39, %v2721_v38  ;;  %v6272_v10 = vadd.f32 %v15120_v2, %v2721_v38  ;;  %v8015_v14 = vadd.f32 %v15520_v58, %v2721_v38  ;;  %v2730_v13 = vpop.permute.xlu1 %2729  ;;  %v16262_v51 = vld [vmem:[#allocation67_spill] sm:$0xff]  ;;  %v16267_v38 = vld [vmem:[#allocation29_spill] sm:$0xff] }
0x225f   : > { %v2737_v23 = vadd.f32 %v2730_v13, %v16259_v63  ;;  %v4532_v8 = vadd.f32 %v16260_v49, %v2730_v13  ;;  %v6275_v57 = vadd.f32 %v15126_v55, %v2730_v13  ;;  %v8018_v53 = vadd.f32 %v15526_v45, %v2730_v13 }
0x2260   : > { %v2726_v37 = vmax.f32 %v2712_v15, %v2724_v52  ;;  %v4531_v19 = vmax.f32 %v4527_v5, %v4529_v18  ;;  %v6274_v22 = vmax.f32 %v6270_v48, %v6272_v10  ;;  %v8017_v33 = vmax.f32 %v8013_v42, %v8015_v14  ;;  %v2735_v47 = vpop.permute.xlu0 %2734  ;;  %v16265_v5 = vld [vmem:[#allocation49_spill] sm:$0xff]  ;;  %v16270_v52 = vld [vmem:[#allocation30_spill] sm:$0xff] }
0x2261   : > { %v2739_v0 = vmax.f32 %v2725_v4, %v2737_v23  ;;  %v4534_v24 = vmax.f32 %v4530_v17, %v4532_v8  ;;  %v6277_v34 = vmax.f32 %v6273_v26, %v6275_v57  ;;  %v8020_v2 = vmax.f32 %v8016_v61, %v8018_v53  ;;  %v16266_v48 = vld [vmem:[#allocation69_spill] sm:$0xff]  ;;  %v16268_v26 = vld [vmem:[#allocation52_spill] sm:$0xff] }
0x2262   : > { %v2738_v58 = vadd.f32 %v16261_v60, %v2735_v47  ;;  %v4533_v20 = vadd.f32 %v16262_v51, %v2735_v47  ;;  %v6276_v35 = vadd.f32 %v15124_v21, %v2735_v47  ;;  %v8019_v9 = vadd.f32 %v15524_v44, %v2735_v47  ;;  %v2744_v55 = vpop.permute.xlu1 %2743  ;;  %v16269_v61 = vld [vmem:[#allocation72_spill] sm:$0xff] }
0x2263   : > { %v2751_v45 = vadd.f32 %v2744_v55, %v16263_v1  ;;  %v4536_v25 = vadd.f32 %v16264_v3, %v2744_v55  ;;  %v6279_v50 = vadd.f32 %v15130_v27, %v2744_v55  ;;  %v8022_v32 = vadd.f32 %v15530_v40, %v2744_v55 }
0x2264   : > { %v2740_v7 = vmax.f32 %v2726_v37, %v2738_v58  ;;  %v4535_v36 = vmax.f32 %v4531_v19, %v4533_v20  ;;  %v6278_v41 = vmax.f32 %v6274_v22, %v6276_v35  ;;  %v8021_v43 = vmax.f32 %v8017_v33, %v8019_v9  ;;  %v2749_v31 = vpop.permute.xlu0 %2748  ;;  %v16271_v37 = vld [vmem:[#allocation51_spill] sm:$0xff]  ;;  %v16273_v33 = vld [vmem:[#allocation32_spill] sm:$0xff] }
0x2265   : > { %v2753_v28 = vmax.f32 %v2739_v0, %v2751_v45  ;;  %v4538_v29 = vmax.f32 %v4534_v24, %v4536_v25  ;;  %v6281_v15 = vmax.f32 %v6277_v34, %v6279_v50  ;;  %v8024_v21 = vmax.f32 %v8020_v2, %v8022_v32  ;;  %v16272_v19 = vld [vmem:[#allocation71_spill] sm:$0xff]  ;;  %v16274_v34 = vld [vmem:[#allocation54_spill] sm:$0xff] }
0x2266   : > { %v2752_v44 = vadd.f32 %v16265_v5, %v2749_v31  ;;  %v4537_v42 = vadd.f32 %v16266_v48, %v2749_v31  ;;  %v6280_v4 = vadd.f32 %v16267_v38, %v2749_v31  ;;  %v8023_v17 = vadd.f32 %v15528_v59, %v2749_v31  ;;  %v2758_v27 = vpop.permute.xlu1 %2757  ;;  %v16275_v2 = vld [vmem:[#allocation74_spill] sm:$0xff]  ;;  %v16276_v58 = vld [vmem:[#allocation79_spill] sm:$0xff] }
0x2267   : > { %v2765_v40 = vadd.f32 %v2758_v27, %v16268_v26  ;;  %v4540_v54 = vadd.f32 %v16269_v61, %v2758_v27  ;;  %v6283_v39 = vadd.f32 %v16270_v52, %v2758_v27  ;;  %v8026_v18 = vadd.f32 %v15534_v6, %v2758_v27 }
0x2268   : > { %v2754_v10 = vmax.f32 %v2740_v7, %v2752_v44  ;;  %v4539_v14 = vmax.f32 %v4535_v36, %v4537_v42  ;;  %v6282_v13 = vmax.f32 %v6278_v41, %v6280_v4  ;;  %v8025_v63 = vmax.f32 %v8021_v43, %v8023_v17  ;;  %v2763_v23 = vpop.permute.xlu0 %2762  ;;  %v16277_v7 = vld [vmem:[#allocation53_spill] sm:$0xff]  ;;  %v16279_v43 = vld [vmem:[#allocation31_spill] sm:$0xff] }
0x2269   : > { %v2767_v49 = vmax.f32 %v2753_v28, %v2765_v40  ;;  %v4542_v8 = vmax.f32 %v4538_v29, %v4540_v54  ;;  %v6285_v57 = vmax.f32 %v6281_v15, %v6283_v39  ;;  %v8028_v53 = vmax.f32 %v8024_v21, %v8026_v18  ;;  %v16278_v36 = vld [vmem:[#allocation73_spill] sm:$0xff]  ;;  %v16280_v15 = vld [vmem:[#allocation56_spill] sm:$0xff]  ;;  %v12131_v40 = vpop.f32.mrf.mxu0 }
0x226a   : > { %v2766_v59 = vadd.f32 %v16271_v37, %v2763_v23  ;;  %v4541_v22 = vadd.f32 %v16272_v19, %v2763_v23  ;;  %v6284_v47 = vadd.f32 %v16273_v33, %v2763_v23  ;;  %v8027_v0 = vadd.f32 %v15532_v16, %v2763_v23  ;;  %v2772_v24 = vpop.permute.xlu1 %2771  ;;  %v16281_v21 = vld [vmem:[#allocation76_spill] sm:$0xff]  ;;  %v16282_v44 = vld [vmem:[#allocation81_spill] sm:$0xff]  ;;  %v16288_v37 = vld [vmem:[#allocation83_spill] sm:$0xff] }
0x226b   : > { %v2779_v6 = vadd.f32 %v2772_v24, %v16274_v34  ;;  %v4544_v60 = vadd.f32 %v16275_v2, %v2772_v24  ;;  %v6287_v51 = vadd.f32 %v16276_v58, %v2772_v24  ;;  %v8030_v20 = vadd.f32 %v15538_v11, %v2772_v24  ;;  %v9267_v34 = vpop.f32.mrf.mxu0  ;;  %v16290_v58 = vld [vmem:[#allocation57_spill] sm:$0xff] }
0x226c   : > { %v2768_v35 = vmax.f32 %v2754_v10, %v2766_v59  ;;  %v4543_v9 = vmax.f32 %v4539_v14, %v4541_v22  ;;  %v6286_v55 = vmax.f32 %v6282_v13, %v6284_v47  ;;  %v8029_v1 = vmax.f32 %v8025_v63, %v8027_v0  ;;  %v2777_v45 = vpop.permute.xlu0 %2776  ;;  %v16284_v10 = vld [vmem:[#allocation75_spill] sm:$0xff]  ;;  %v16285_v13 = vld [vmem:[#allocation80_spill] sm:$0xff] }
0x226d   : > { %v2781_v3 = vmax.f32 %v2767_v49, %v2779_v6  ;;  %v4546_v25 = vmax.f32 %v4542_v8, %v4544_v60  ;;  %v6289_v50 = vmax.f32 %v6285_v57, %v6287_v51  ;;  %v8032_v32 = vmax.f32 %v8028_v53, %v8030_v20  ;;  %v16287_v57 = vld [vmem:[#allocation78_spill] sm:$0xff]  ;;  %v16291_v20 = vld [vmem:[#allocation77_spill] sm:$0xff] }
0x226e   : > { %v2780_v16 = vadd.f32 %v16277_v7, %v2777_v45  ;;  %v4545_v41 = vadd.f32 %v16278_v36, %v2777_v45  ;;  %v6288_v31 = vadd.f32 %v16279_v43, %v2777_v45  ;;  %v8031_v28 = vadd.f32 %v15536_v12, %v2777_v45  ;;  %v2786_v29 = vpop.permute.xlu1 %2785  ;;  %v16283_v12 = vld [vmem:[#allocation55_spill] sm:$0xff] }
0x226f   : > { %v2793_v11 = vadd.f32 %v2786_v29, %v16280_v15  ;;  %v4548_v5 = vadd.f32 %v16281_v21, %v2786_v29  ;;  %v6291_v48 = vadd.f32 %v16282_v44, %v2786_v29  ;;  %v8034_v42 = vadd.f32 %v15542_v46, %v2786_v29  ;;  %v16286_v46 = vld [vmem:[#allocation58_spill] sm:$0xff] }
0x2270   : > { %v2782_v38 = vmax.f32 %v2768_v35, %v2780_v16  ;;  %v4547_v4 = vmax.f32 %v4543_v9, %v4545_v41  ;;  %v6290_v17 = vmax.f32 %v6286_v55, %v6288_v31  ;;  %v8033_v27 = vmax.f32 %v8029_v1, %v8031_v28  ;;  %v2791_v26 = vpop.permute.xlu0 %2790  ;;  %v16292_v9 = vld [vmem:[#allocation82_spill] sm:$0xff] }
0x2271   : > { %v2795_v61 = vmax.f32 %v2781_v3, %v2793_v11  ;;  %v4550_v54 = vmax.f32 %v4546_v25, %v4548_v5  ;;  %v6293_v52 = vmax.f32 %v6289_v50, %v6291_v48  ;;  %v8036_v39 = vmax.f32 %v8032_v32, %v8034_v42  ;;  %v12132_v50 = vpop.f32.mrf.mxu0  ;;  %v10444_v32 = vld [vmem:[%s16289_s18] ss:$0 sm:$0xff]  ;;  %s16293_s18 = sld [smem:[#allocation25_spill]] }
0x2272   : > { %v2794_v18 = vadd.f32 %v16283_v12, %v2791_v26  ;;  %v4549_v14 = vadd.f32 %v16284_v10, %v2791_v26  ;;  %v6292_v63 = vadd.f32 %v16285_v13, %v2791_v26  ;;  %v8035_v23 = vadd.f32 %v15540_v30, %v2791_v26  ;;  %v2800_v49 = vpop.permute.xlu1 %2799 }
0x2273   : > { %v2807_v8 = vadd.f32 %v2800_v49, %v16286_v46  ;;  %v4552_v53 = vadd.f32 %v16287_v57, %v2800_v49  ;;  %v6295_v59 = vadd.f32 %v16288_v37, %v2800_v49  ;;  %v8038_v19 = vadd.f32 %v15546_v62, %v2800_v49  ;;  %v9270_v16 = vpop.f32.mrf.mxu0 }
0x2274   : > { %v2796_v22 = vmax.f32 %v2782_v38, %v2794_v18  ;;  %v4551_v33 = vmax.f32 %v4547_v4, %v4549_v14  ;;  %v6294_v47 = vmax.f32 %v6290_v17, %v6292_v63  ;;  %v8037_v0 = vmax.f32 %v8033_v27, %v8035_v23  ;;  %v2805_v24 = vpop.permute.xlu0 %2804 }
0x2275   : > { %v2809_v6 = vmax.f32 %v2795_v61, %v2807_v8  ;;  %v4554_v2 = vmax.f32 %v4550_v54, %v4552_v53  ;;  %v6297_v60 = vmax.f32 %v6293_v52, %v6295_v59  ;;  %v8040_v30 = vmax.f32 %v8036_v39, %v8038_v19 }
0x2276   : > { %v2808_v51 = vadd.f32 %v16290_v58, %v2805_v24  ;;  %v4553_v35 = vadd.f32 %v16291_v20, %v2805_v24  ;;  %v6296_v55 = vadd.f32 %v16292_v9, %v2805_v24  ;;  %v8039_v1 = vadd.f32 %v15544_v56, %v2805_v24 }
0x2277   : > { %2811 = vst.msk [vmem:[#allocation3] sm:$0xff] %vm967_vm0, %v2809_v6  ;;  %4556 = vst.msk [vmem:[#allocation3 + $0x10] sm:$0xff] %vm967_vm0, %v4554_v2  ;;  %v9276_v56 = vadd.f32 %v12131_v40, %v10444_v32  ;;  %v9268_v7 = vadd.f32 %v10444_v32, %v9267_v34  ;;  %v9271_v28 = vadd.f32 %v10444_v32, %v9270_v16  ;;  %s16294_s1 = smov %s16293_s18 }
0x2278   : > { %6299 = vst.msk [vmem:[#allocation3 + $0x20] sm:$0xff] %vm967_vm0, %v6297_v60  ;;  %8042 = vst.msk [vmem:[#allocation3 + $0x30] sm:$0xff] %vm967_vm0, %v8040_v30  ;;  %v2810_v62 = vmax.f32 %v2796_v22, %v2808_v51  ;;  %v4555_v45 = vmax.f32 %v4551_v33, %v4553_v35  ;;  %v6298_v3 = vmax.f32 %v6294_v47, %v6296_v55 }
0x2279   : > { %v8041_v25 = vmax.f32 %v8037_v0, %v8039_v1  ;;  %v9279_v44 = vadd.f32 %v12132_v50, %v10444_v32  ;;  %v12255_v1 = vld [vmem:[%s16293_s18 + $0x8] sm:$0xff]   ;;  %s16295_s18 = sld [smem:[#allocation23_spill]] }
0x227a   : > { %2812 = vst.msk [vmem:[#allocation3 + $0x8] sm:$0xff] %vm967_vm0, %v2810_v62  ;;  %4557 = vst.msk [vmem:[#allocation3 + $0x18] sm:$0xff] %vm967_vm0, %v4555_v45  ;;  %12137 = vmatprep.subr.bf16.mxu1 %v12255_v1  ;;  %v12256_v62 = vld [vmem:[%s16294_s1] sm:$0xff]   ;;  %s16296_s1 = sld [smem:[#allocation24_spill]] }
0x227b   : > { %6300 = vst.msk [vmem:[#allocation3 + $0x28] sm:$0xff] %vm967_vm0, %v6298_v3  ;;  %8043 = vst.msk [vmem:[#allocation3 + $0x38] sm:$0xff] %vm967_vm0, %v8041_v25  ;;  %12138 = vmatpush3.bf16.msra.mxu1 %v12255_v1 }
0x227c   : > { %12139 = vmatprep.subr.bf16.mxu1 %v12256_v62 }
0x227e   : > { %v9298_v36 = vld [vmem:[#allocation3] sm:$0xff]  ;;  %v9300_v41 = vld [vmem:[#allocation3 + $0x10] sm:$0xff] }
0x227f   : > { %v15739_v43 = vadd.f32 %v9298_v36, %v9268_v7  ;;  %v15741_v31 = vadd.f32 %v9300_v41, %v9276_v56  ;;  %v9302_v39 = vld [vmem:[#allocation3 + $0x20] sm:$0xff]  ;;  %v9304_v63 = vld [vmem:[#allocation3 + $0x30] sm:$0xff]  ;;  %12140 = vmatpush3.bf16.msra.mxu1 %v12256_v62  ;;  %v12259_v62 = vld [vmem:[%s13070_s27 + $0x28] sm:$0xff]  }
0x2281   : > { %v9316_v29 = vsel %vm967_vm0, %v15739_v43, 0.0  ;;  %v9322_v15 = vsel %vm967_vm0, %v15741_v31, 0.0  ;;  %v9299_v11 = vld [vmem:[#allocation3 + $0x8] sm:$0xff]  ;;  %v9301_v5 = vld [vmem:[#allocation3 + $0x18] sm:$0xff] }
0x2282   : > { %9317 = vadd.xlane.f32.xlu1 %v9316_v29  ;;  %9323 = vadd.xlane.f32.xlu0 %v9322_v15  ;;  %v15747_v21 = vadd.f32 %v9299_v11, %v9271_v28  ;;  %v15751_v42 = vadd.f32 %v9301_v5, %v9279_v44  ;;  %v9303_v37 = vld [vmem:[#allocation3 + $0x28] sm:$0xff]  ;;  %v9305_v33 = vld [vmem:[#allocation3 + $0x38] sm:$0xff] }
0x2284   : > { %v9319_v48 = vsel %vm967_vm0, %v15747_v21, 0.0  ;;  %v9325_v38 = vsel %vm967_vm0, %v15751_v42, 0.0 }
0x2286   : > { %9320 = vadd.xlane.f32.xlu0 %v9319_v48 }
0x228a   : > { %9326 = vadd.xlane.f32.xlu0 %v9325_v38 }
0x230b   : > { %v9324_v4 = vpop.xlane.xlu0 %9323  ;;  %v9318_v17 = vpop.xlane.xlu1 %9317 }
0x230c   : > { %v9340_v26 = vmul.f32 0.03125, %v9318_v17  ;;  %v9342_v14 = vmul.f32 0.03125, %v9324_v4 }
0x230e   : > { %v15758_v10 = vsub.f32 %v15739_v43, %v9340_v26  ;;  %v15767_v19 = vsub.f32 %v15741_v31, %v9342_v14 }
0x230f   : > { %v9321_v40 = vpop.xlane.xlu0 %9320 }
0x2310   : > { %v9341_v13 = vmul.f32 0.03125, %v9321_v40  ;;  %v9356_v47 = vmul.f32 %v15758_v10, %v15758_v10  ;;  %v9358_v2 = vmul.f32 %v15767_v19, %v15767_v19 }
0x2312   : > { %v12135_v27 = vpop.f32.mrf.mxu0  ;;  %v15770_v22 = vsub.f32 %v15747_v21, %v9341_v13  ;;  %v9364_v30 = vsel %vm967_vm0, %v9356_v47, 0.0  ;;  %v9370_v20 = vsel %vm967_vm0, %v9358_v2, 0.0 }
0x2313   : > { %v9292_v54 = vadd.f32 %v12135_v27, %v10444_v32  ;;  %v9327_v53 = vpop.xlane.xlu0 %9326 }
0x2314   : > { %v9283_v61 = vpop.f32.mrf.mxu0  ;;  %v9343_v0 = vmul.f32 0.03125, %v9327_v53  ;;  %v9357_v51 = vmul.f32 %v15770_v22, %v15770_v22 }
0x2315   : > { %v9284_v52 = vadd.f32 %v10444_v32, %v9283_v61  ;;  %v15760_v49 = vadd.f32 %v9304_v63, %v9292_v54 }
0x2316   : > { %v12136_v12 = vpop.f32.mrf.mxu0  ;;  %v15783_v60 = vsub.f32 %v15751_v42, %v9343_v0  ;;  %v9367_v35 = vsel %vm967_vm0, %v9357_v51, 0.0 }
0x2317   : > { %v15755_v18 = vadd.f32 %v9302_v39, %v9284_v52  ;;  %v9295_v46 = vadd.f32 %v12136_v12, %v10444_v32  ;;  %v9334_v34 = vsel %vm967_vm0, %v15760_v49, 0.0 }
0x2318   : > { %v9286_v23 = vpop.f32.mrf.mxu0  ;;  %v9359_v9 = vmul.f32 %v15783_v60, %v15783_v60 }
0x2319   : > { %v9287_v8 = vadd.f32 %v10444_v32, %v9286_v23  ;;  %v9328_v57 = vsel %vm967_vm0, %v15755_v18, 0.0  ;;  %v15774_v24 = vadd.f32 %v9305_v33, %v9295_v46 }
0x231a   : > { %9329 = vadd.xlane.f32.xlu1 %v9328_v57  ;;  %v9373_v55 = vsel %vm967_vm0, %v9359_v9, 0.0  ;;  %v15823_v57 = vld [vmem:[%s16295_s18] ss:$0 sm:$0xff] }
0x231b   : > { %v15764_v59 = vadd.f32 %v9303_v37, %v9287_v8  ;;  %v9337_v58 = vsel %vm967_vm0, %v15774_v24, 0.0 }
0x231d   : > { %v9331_v6 = vsel %vm967_vm0, %v15764_v59, 0.0 }
0x231e   : > { %9335 = vadd.xlane.f32.xlu1 %v9334_v34  ;;  %9332 = vadd.xlane.f32.xlu0 %v9331_v6  ;;  %v15829_v34 = vld [vmem:[%s16296_s1] ss:$0 sm:$0xff]  ;;  %s16128_s1 = sand.u32 1, %s12874_s16  }
0x231f   : > { %s10058_s18 = sshll.u32 %s16128_s1, 6 }
0x2320   : > { %s924_s2 = scalar_lea.vmem [#allocation4], %s10058_s18  ;;  %s10482_s18 = sshll.u32 %s13103_s0, 10 }
0x2321   : > { %s9962_s1 = sshll.u32 %s924_s2, 4  ;;  %s16061_s3 = scalar_lea.hbm %s13080_s21, %s10482_s18  ;;  %s16063_s1 = int_to_ptr.vmem [resolvable:$true] %s9962_s1 }
0x2322   : > { %9365 = vadd.xlane.f32.xlu1 %v9364_v30  ;;  %9338 = vadd.xlane.f32.xlu0 %v9337_v58  ;;  %s16298_s0 = sand.u32 1, %s12874_s16   ;;  %s12822_s5 = scalar_lea.vmem %s16063_s1, 1024 }
0x2323   : > { %s16070_s4 = scalar_lea.sflag [#allocation5], %s16298_s0  ;;  %p12823_p11 = scmp.ne.s32.totalorder %s16063_s1, %s12822_s5 }
0x2324   : > { %s12919_s18 = smov [#allocation4]  }
0x2325   : > { %p12824_p12 = pnand %p12823_p11, %p13120_p5 }
0x2326   : > { %9371 = vadd.xlane.f32.xlu1 %v9370_v20  ;;  %9368 = vadd.xlane.f32.xlu0 %v9367_v35 }
0x2327   : > { %p12825_p13 = pneg %p12824_p12 }
0x232a   : > { %9374 = vadd.xlane.f32.xlu0 %v9373_v55  ;;  %v12257_v55 = vld [vmem:[%s13070_s27 + $0x38] sm:$0xff]  }
0x232b   : > { %12149 = vmatprep.subr.bf16.mxu0 %v12257_v55 }
0x232c   : > { %12150 = vmatpush3.bf16.msra.mxu0 %v12257_v55 }
0x23a3   : > { %v9330_v45 = vpop.xlane.xlu1 %9329 }
0x23a4   : > { %v9344_v3 = vmul.f32 0.03125, %v9330_v45 }
0x23a6   : > { %v15798_v25 = vsub.f32 %v15755_v18, %v9344_v3 }
0x23a7   : > { %v9336_v50 = vpop.xlane.xlu1 %9335  ;;  %v9333_v32 = vpop.xlane.xlu0 %9332 }
0x23a8   : > { %v9346_v56 = vmul.f32 0.03125, %v9336_v50  ;;  %v9345_v7 = vmul.f32 0.03125, %v9333_v32  ;;  %v9360_v16 = vmul.f32 %v15798_v25, %v15798_v25 }
0x23aa   : > { %v15803_v36 = vsub.f32 %v15760_v49, %v9346_v56  ;;  %v15806_v41 = vsub.f32 %v15764_v59, %v9345_v7  ;;  %v9376_v28 = vsel %vm967_vm0, %v9360_v16, 0.0  ;;  %v12260_v56 = vld [vmem:[%s13070_s27 + $0x20] sm:$0xff]  }
0x23ab   : > { %v9366_v29 = vpop.xlane.xlu1 %9365  ;;  %9377 = vadd.xlane.f32.xlu1 %v9376_v28  ;;  %v9339_v15 = vpop.xlane.xlu0 %9338 }
0x23ac   : > { %v9388_v11 = vmul.f32 0.03125, %v9366_v29  ;;  %v9347_v5 = vmul.f32 0.03125, %v9339_v15  ;;  %v9362_v44 = vmul.f32 %v15803_v36, %v15803_v36  ;;  %v9361_v48 = vmul.f32 %v15806_v41, %v15806_v41 }
0x23ae   : > { %v9396_v38 = vadd.f32 1e-05, %v9388_v11  ;;  %v15814_v4 = vsub.f32 %v15774_v24, %v9347_v5  ;;  %v9382_v17 = vsel %vm967_vm0, %v9362_v44, 0.0  ;;  %v9379_v27 = vsel %vm967_vm0, %v9361_v48, 0.0  ;;  %v12261_v11 = vld [vmem:[%s13070_s27 + $0x18] sm:$0xff]   ;;  %v12262_v48 = vld [vmem:[%s13070_s27 + $0x10] sm:$0xff]  }
0x23af   : > { %9383 = vadd.xlane.f32.xlu1 %v9382_v17  ;;  %v9372_v26 = vpop.xlane.xlu1 %9371  ;;  %9380 = vadd.xlane.f32.xlu0 %v9379_v27  ;;  %v9369_v40 = vpop.xlane.xlu0 %9368 }
0x23b0   : > { %12441 = vrsqrt.f32 %v9396_v38  ;;  %v9390_v61 = vmul.f32 0.03125, %v9372_v26  ;;  %v9389_v54 = vmul.f32 0.03125, %v9369_v40  ;;  %v9363_v52 = vmul.f32 %v15814_v4, %v15814_v4  ;;  %v12263_v38 = vld [vmem:[%s13070_s27 + $0x8] sm:$0xff]   ;;  %v12264_v26 = vld [vmem:[%s13070_s27] sm:$0xff]  }
0x23b2   : > { %v9398_v39 = vadd.f32 1e-05, %v9390_v61  ;;  %v9397_v12 = vadd.f32 1e-05, %v9389_v54  ;;  %v9385_v14 = vsel %vm967_vm0, %v9363_v52, 0.0 }
0x23b3   : > { %9386 = vadd.xlane.f32.xlu0 %v9385_v14  ;;  %v9375_v13 = vpop.xlane.xlu0 %9374 }
0x23b4   : > { %12443 = vrsqrt.f32 %v9398_v39  ;;  %v9391_v63 = vmul.f32 0.03125, %v9375_v13 }
0x23b5   : > { %12445 = vrsqrt.f32 %v9397_v12 }
0x23b6   : > { %v9399_v23 = vadd.f32 1e-05, %v9391_v63 }
0x23b8   : > { %12447 = vrsqrt.f32 %v9399_v23 }
0x23bd   : > { %v12442_v46 = vpop.eup %12441 }
0x23be   : > { %v9412_v8 = vmul.f32 %v12442_v46, %v15758_v10 }
0x23c0   : > { %v9426_v0 = vmul.f32 %v15823_v57, %v9412_v8 }
0x23c1   : > { %v12444_v53 = vpop.eup %12443 }
0x23c2   : > { %v12446_v37 = vpop.eup %12445  ;;  %v9414_v33 = vmul.f32 %v12444_v53, %v15767_v19  ;;  %v9440_v58 = vadd.f32 %v15829_v34, %v9426_v0 }
0x23c3   : > { %v9413_v47 = vmul.f32 %v12446_v37, %v15770_v22  ;;  %v15864_v37 = vld [vmem:[%s13065_s12] ss:$0 sm:$0xff] }
0x23c4   : > { %v9428_v30 = vmul.f32 %v15823_v57, %v9414_v33 }
0x23c5   : > { %v12448_v6 = vpop.eup %12447  ;;  %v9427_v2 = vmul.f32 %v15823_v57, %v9413_v47 }
0x23c6   : > { %v9415_v10 = vmul.f32 %v12448_v6, %v15783_v60  ;;  %v9442_v20 = vadd.f32 %v15829_v34, %v9428_v30  ;;  %v12258_v60 = vld [vmem:[%s13070_s27 + $0x30] sm:$0xff]  }
0x23c7   : > { %v9441_v19 = vadd.f32 %v15829_v34, %v9427_v2  ;;  %12151 = vmatprep.subr.bf16.mxu0 %v12258_v60 }
0x23c8   : > { %v9429_v22 = vmul.f32 %v15823_v57, %v9415_v10  ;;  %12152 = vmatpush3.bf16.msra.mxu0 %v12258_v60 }
0x23c9   : > { %v9448_v51 = vpack.c.bf16 %v9441_v19, %v9440_v58  ;;  %12153 = vmatprep.subr.bf16.mxu0 %v12259_v62 }
0x23ca   : > { %v9443_v35 = vadd.f32 %v15829_v34, %v9429_v22 }
0x23cb   : > { %12141 = vmatprep.mubr.msk.bf16.mxu1 %vm967_vm0, %v9448_v51 }
0x23cc   : > { %v9449_v9 = vpack.c.bf16 %v9443_v35, %v9442_v20  ;;  %12154 = vmatpush3.bf16.msra.mxu0 %v12259_v62 }
0x23cd   : > { %12155 = vmatprep.subr.bf16.mxu0 %v12260_v56 }
0x23ce   : > { %12142 = vmatmul.mubr.msk.bf16.vlgmr.msra.gmra.mxu1 %vm967_vm0, %v9449_v9 }
0x23d0   : > { %12156 = vmatpush3.bf16.msra.mxu0 %v12260_v56 }
0x23d1   : > { %12157 = vmatprep.subr.bf16.mxu0 %v12261_v11 }
0x23d4   : > { %12158 = vmatpush3.bf16.msra.mxu0 %v12261_v11 }
0x23d5   : > { %12159 = vmatprep.subr.bf16.mxu0 %v12262_v48 }
0x23d8   : > { %12160 = vmatpush3.bf16.msra.mxu0 %v12262_v48 }
0x23d9   : > { %12161 = vmatprep.subr.bf16.mxu0 %v12263_v38 }
0x23dc   : > { %12162 = vmatpush3.bf16.msra.mxu0 %v12263_v38 }
0x23dd   : > { %12163 = vmatprep.subr.bf16.mxu0 %v12264_v26 }
0x23e0   : > { %12164 = vmatpush3.bf16.msra.mxu0 %v12264_v26 }
0x2434   : > { %v9378_v1 = vpop.xlane.xlu1 %9377 }
0x2435   : > { %v9392_v45 = vmul.f32 0.03125, %v9378_v1 }
0x2437   : > { %v9400_v3 = vadd.f32 1e-05, %v9392_v45 }
0x2438   : > { %v9384_v50 = vpop.xlane.xlu1 %9383  ;;  %v9381_v32 = vpop.xlane.xlu0 %9380 }
0x2439   : > { %12449 = vrsqrt.f32 %v9400_v3  ;;  %v9394_v7 = vmul.f32 0.03125, %v9384_v50  ;;  %v9393_v16 = vmul.f32 0.03125, %v9381_v32 }
0x243b   : > { %v9402_v28 = vadd.f32 1e-05, %v9394_v7  ;;  %v9401_v29 = vadd.f32 1e-05, %v9393_v16 }
0x243c   : > { %v9387_v15 = vpop.xlane.xlu0 %9386 }
0x243d   : > { %12451 = vrsqrt.f32 %v9402_v28  ;;  %v9395_v5 = vmul.f32 0.03125, %v9387_v15 }
0x243e   : > { %12453 = vrsqrt.f32 %v9401_v29 }
0x243f   : > { %v9403_v44 = vadd.f32 1e-05, %v9395_v5 }
0x2441   : > { %12455 = vrsqrt.f32 %v9403_v44 }
0x2446   : > { %v12450_v17 = vpop.eup %12449 }
0x2447   : > { %v9416_v27 = vmul.f32 %v12450_v17, %v15798_v25 }
0x2449   : > { %v9430_v39 = vmul.f32 %v15823_v57, %v9416_v27 }
0x244a   : > { %v12452_v40 = vpop.eup %12451 }
0x244b   : > { %v12454_v61 = vpop.eup %12453  ;;  %v9418_v54 = vmul.f32 %v12452_v40, %v15803_v36  ;;  %v9444_v25 = vadd.f32 %v15829_v34, %v9430_v39 }
0x244c   : > { %v9417_v52 = vmul.f32 %v12454_v61, %v15806_v41 }
0x244d   : > { %v9432_v63 = vmul.f32 %v15823_v57, %v9418_v54 }
0x244e   : > { %v12456_v12 = vpop.eup %12455  ;;  %v9431_v14 = vmul.f32 %v15823_v57, %v9417_v52 }
0x244f   : > { %v9419_v13 = vmul.f32 %v12456_v12, %v15814_v4  ;;  %v9446_v8 = vadd.f32 %v15829_v34, %v9432_v63 }
0x2450   : > { %v9445_v23 = vadd.f32 %v15829_v34, %v9431_v14 }
0x2451   : > { %v9433_v46 = vmul.f32 %v15823_v57, %v9419_v13 }
0x2452   : > { %v9450_v36 = vpack.c.bf16 %v9445_v23, %v9444_v25 }
0x2453   : > { %v9447_v41 = vadd.f32 %v15829_v34, %v9433_v46 }
0x2454   : > { %12145 = vmatprep.mubr.msk.bf16.mxu1 %vm967_vm0, %v9450_v36 }
0x2455   : > { %v9451_v53 = vpack.c.bf16 %v9447_v41, %v9446_v8 }
0x2457   : > { %12146 = vmatmul.mubr.msk.bf16.gmra.mxu1 %vm967_vm0, %v9451_v53 }
0x248e   : > { %v12143_v4 = vpop.f32.mrf.mxu1 }
0x248f   : > { %v15867_v33 = vadd.f32 %v12143_v4, %v15864_v37 }
0x2490   : > { %v9521_v47 = vpop.f32.mrf.mxu1 }
0x2491   : > { %v9562_v0 = vmul.f32 0.70710677, %v15867_v33  ;;  %v15871_v57 = vadd.f32 %v15864_v37, %v9521_v47 }
0x2492   : > { %v12144_v6 = vpop.f32.mrf.mxu1 }
0x2493   : > { %v15873_v2 = vclamps-f32 %v9562_v0, 4.0  ;;  %v9560_v34 = vmul.f32 0.70710677, %v15871_v57  ;;  %v15877_v30 = vadd.f32 %v12144_v6, %v15864_v37 }
0x2494   : > { %v9524_v10 = vpop.f32.mrf.mxu1 }
0x2495   : > { %v15881_v58 = vmul.f32 %v15873_v2, %v15873_v2  ;;  %v15883_v19 = vclamps-f32 %v9560_v34, 4.0  ;;  %v9563_v22 = vmul.f32 0.70710677, %v15877_v30  ;;  %v15887_v51 = vadd.f32 %v15864_v37, %v9524_v10 }
0x2497   : > { %v9658_v20 = vmul.f32 -1.1791603e-07, %v15881_v58  ;;  %v15892_v35 = vmul.f32 %v15883_v19, %v15883_v19  ;;  %v15894_v9 = vclamps-f32 %v9563_v22, 4.0  ;;  %v9561_v55 = vmul.f32 0.70710677, %v15887_v51 }
0x2498   : > { %v9594_v11 = vmul.f32 0.00022905065, %v15881_v58 }
0x2499   : > { %v9666_v60 = vadd.f32 2.3547966e-05, %v9658_v20  ;;  %v15899_v1 = vmul.f32 %v15894_v9, %v15894_v9  ;;  %v9656_v62 = vmul.f32 -1.1791603e-07, %v15892_v35  ;;  %v15902_v45 = vclamps-f32 %v9561_v55, 4.0 }
0x249a   : > { %v9592_v16 = vmul.f32 0.00022905065, %v15892_v35  ;;  %v9602_v39 = vadd.f32 0.003408291, %v9594_v11 }
0x249b   : > { %v9674_v3 = vmul.f32 %v9666_v60, %v15881_v58  ;;  %v9664_v50 = vadd.f32 2.3547966e-05, %v9656_v62  ;;  %v9659_v32 = vmul.f32 -1.1791603e-07, %v15899_v1  ;;  %v15908_v56 = vmul.f32 %v15902_v45, %v15902_v45 }
0x249c   : > { %v9595_v48 = vmul.f32 0.00022905065, %v15899_v1  ;;  %v9600_v26 = vadd.f32 0.003408291, %v9592_v16  ;;  %v9610_v4 = vmul.f32 %v9602_v39, %v15881_v58 }
0x249d   : > { %v9682_v7 = vadd.f32 0.0010179626, %v9674_v3  ;;  %v9672_v28 = vmul.f32 %v9664_v50, %v15892_v35  ;;  %v9667_v29 = vadd.f32 2.3547966e-05, %v9659_v32  ;;  %v9657_v15 = vmul.f32 -1.1791603e-07, %v15908_v56 }
0x249e   : > { %v9593_v54 = vmul.f32 0.00022905065, %v15908_v56  ;;  %v9603_v13 = vadd.f32 0.003408291, %v9595_v48  ;;  %v9608_v46 = vmul.f32 %v9600_v26, %v15892_v35  ;;  %v9618_v50 = vadd.f32 0.050955694, %v9610_v4 }
0x249f   : > { %v9690_v5 = vmul.f32 %v9682_v7, %v15881_v58  ;;  %v9680_v44 = vadd.f32 0.0010179626, %v9672_v28  ;;  %v9675_v38 = vmul.f32 %v9667_v29, %v15899_v1  ;;  %v9665_v17 = vadd.f32 2.3547966e-05, %v9657_v15 }
0x24a0   : > { %v9601_v41 = vadd.f32 0.003408291, %v9593_v54  ;;  %v9611_v6 = vmul.f32 %v9603_v13, %v15899_v1  ;;  %v9616_v20 = vadd.f32 0.050955694, %v9608_v46 }
0x24a1   : > { %v9698_v27 = vadd.f32 0.01407047, %v9690_v5  ;;  %v9688_v40 = vmul.f32 %v9680_v44, %v15892_v35  ;;  %v9683_v61 = vadd.f32 0.0010179626, %v9675_v38  ;;  %v9673_v52 = vmul.f32 %v9665_v17, %v15908_v56 }
0x24a2   : > { %v9609_v62 = vmul.f32 %v9601_v41, %v15908_v56  ;;  %v9619_v16 = vadd.f32 0.050955694, %v9611_v6  ;;  %v9624_v11 = vmul.f32 %v9616_v20, %v15892_v35  ;;  %v9626_v17 = vmul.f32 %v9618_v50, %v15881_v58 }
0x24a3   : > { %v9706_v12 = vmul.f32 %v9698_v27, %v15881_v58  ;;  %v9696_v14 = vadd.f32 0.01407047, %v9688_v40  ;;  %v9691_v63 = vmul.f32 %v9683_v61, %v15899_v1  ;;  %v9681_v25 = vadd.f32 0.0010179626, %v9673_v52 }
0x24a4   : > { %v9617_v48 = vadd.f32 0.050955694, %v9609_v62  ;;  %v9627_v26 = vmul.f32 %v9619_v16, %v15899_v1  ;;  %v9632_v54 = vadd.f32 0.18520832, %v9624_v11  ;;  %v9554_v16 = vmul.f32 0.5, %v15867_v33 }
0x24a5   : > { %v9714_v23 = vadd.f32 0.11098505, %v9706_v12  ;;  %v9704_v36 = vmul.f32 %v9696_v14, %v15892_v35  ;;  %v9699_v8 = vadd.f32 0.01407047, %v9691_v63  ;;  %v9689_v53 = vmul.f32 %v9681_v25, %v15908_v56 }
0x24a6   : > { %v9625_v39 = vmul.f32 %v9617_v48, %v15908_v56  ;;  %v9634_v14 = vadd.f32 0.18520832, %v9626_v17  ;;  %v9635_v13 = vadd.f32 0.18520832, %v9627_v26  ;;  %v9640_v25 = vmul.f32 %v9632_v54, %v15892_v35 }
0x24a7   : > { %v9722_v47 = vmul.f32 %v9714_v23, %v15881_v58  ;;  %v9712_v0 = vadd.f32 0.11098505, %v9704_v36  ;;  %v9707_v34 = vmul.f32 %v9699_v8, %v15899_v1  ;;  %v9697_v10 = vadd.f32 0.01407047, %v9689_v53 }
0x24a8   : > { %v9633_v23 = vadd.f32 0.18520832, %v9625_v39  ;;  %v9642_v46 = vmul.f32 %v9634_v14, %v15881_v58  ;;  %v9643_v36 = vmul.f32 %v9635_v13, %v15899_v1  ;;  %v9648_v8 = vadd.f32 1.1283791, %v9640_v25 }
0x24a9   : > { %v9730_v22 = vadd.f32 0.49746925, %v9722_v47  ;;  %v9720_v55 = vmul.f32 %v9712_v0, %v15892_v35  ;;  %v9715_v60 = vadd.f32 0.11098505, %v9707_v34  ;;  %v9705_v3 = vmul.f32 %v9697_v10, %v15908_v56 }
0x24aa   : > { %v9641_v41 = vmul.f32 %v9633_v23, %v15908_v56  ;;  %v9650_v53 = vadd.f32 1.1283791, %v9642_v46  ;;  %v9651_v4 = vadd.f32 1.1283791, %v9643_v36  ;;  %v9752_v0 = vmul.f32 %v15883_v19, %v9648_v8 }
0x24ab   : > { %v9738_v32 = vmul.f32 %v9730_v22, %v15881_v58  ;;  %v9728_v7 = vadd.f32 0.49746925, %v9720_v55  ;;  %v9723_v28 = vmul.f32 %v9715_v60, %v15899_v1  ;;  %v9713_v29 = vadd.f32 0.11098505, %v9705_v3 }
0x24ac   : > { %v9649_v6 = vadd.f32 1.1283791, %v9641_v41  ;;  %v9754_v10 = vmul.f32 %v15873_v2, %v9650_v53  ;;  %v9552_v19 = vmul.f32 0.5, %v15871_v57 }
0x24ad   : > { %v9746_v15 = vadd.f32 1.0, %v9738_v32  ;;  %v9736_v5 = vmul.f32 %v9728_v7, %v15892_v35  ;;  %v9731_v44 = vadd.f32 0.49746925, %v9723_v28  ;;  %v9721_v38 = vmul.f32 %v9713_v29, %v15908_v56 }
0x24ae   : > { %v9755_v35 = vmul.f32 %v15894_v9, %v9651_v4  ;;  %v9555_v32 = vmul.f32 0.5, %v15877_v30  ;;  %v9553_v7 = vmul.f32 0.5, %v15887_v51 }
0x24af   : > { %v9744_v27 = vadd.f32 1.0, %v9736_v5  ;;  %v9739_v40 = vmul.f32 %v9731_v44, %v15899_v1  ;;  %v9729_v61 = vadd.f32 0.49746925, %v9721_v38  ;;  %12457 = vrcp.f32 %v9746_v15 }
0x24b0   : > { %v9753_v1 = vmul.f32 %v15902_v45, %v9649_v6 }
0x24b1   : > { %12459 = vrcp.f32 %v9744_v27  ;;  %v9747_v52 = vadd.f32 1.0, %v9739_v40  ;;  %v9737_v12 = vmul.f32 %v9729_v61, %v15908_v56 }
0x24b3   : > { %12461 = vrcp.f32 %v9747_v52  ;;  %v9745_v63 = vadd.f32 1.0, %v9737_v12 }
0x24b5   : > { %12463 = vrcp.f32 %v9745_v63 }
0x24bc   : > { %v12458_v47 = vpop.eup %12457 }
0x24bd   : > { %v9770_v55 = vmul.f32 %v12458_v47, %v9754_v10 }
0x24be   : > { %v12460_v34 = vpop.eup %12459 }
0x24bf   : > { %v9768_v22 = vmul.f32 %v12460_v34, %v9752_v0  ;;  %v9778_v50 = vadd.f32 1.0, %v9770_v55 }
0x24c0   : > { %v12462_v20 = vpop.eup %12461 }
0x24c1   : > { %v9771_v58 = vmul.f32 %v12462_v20, %v9755_v35  ;;  %v9776_v62 = vadd.f32 1.0, %v9768_v22  ;;  %v9786_v15 = vmul.f32 %v9778_v50, %v9554_v16 }
0x24c2   : > { %v12464_v60 = vpop.eup %12463 }
0x24c3   : > { %v9779_v56 = vadd.f32 1.0, %v9771_v58  ;;  %v9769_v3 = vmul.f32 %v12464_v60, %v9753_v1  ;;  %v9784_v28 = vmul.f32 %v9776_v62, %v9552_v19 }
0x24c5   : > { %v9777_v2 = vadd.f32 1.0, %v9769_v3  ;;  %v9787_v9 = vmul.f32 %v9779_v56, %v9555_v32 }
0x24c7   : > { %v9785_v29 = vmul.f32 %v9777_v2, %v9553_v7  ;;  %v9793_v45 = vpack.c.bf16 %v9787_v9, %v9786_v15 }
0x24c9   : > { %v9792_v11 = vpack.c.bf16 %v9785_v29, %v9784_v28 }
0x24cb   : > { %12165 = vmatprep.mubr.bf16.mxu0 %v9792_v11 }
0x24cc   : > { %12166 = vmatmul.mubr.bf16.vlgmr.msra.gmra.mxu0 %v9793_v45 }
0x2517   : > { %v12147_v5 = vpop.f32.mrf.mxu1 }
0x2518   : > { %v15955_v44 = vadd.f32 %v12147_v5, %v15864_v37 }
0x2519   : > { %v9537_v30 = vpop.f32.mrf.mxu1 }
0x251a   : > { %v9566_v57 = vmul.f32 0.70710677, %v15955_v44  ;;  %v15959_v51 = vadd.f32 %v15864_v37, %v9537_v30 }
0x251b   : > { %v12148_v48 = vpop.f32.mrf.mxu1 }
0x251c   : > { %v15961_v33 = vclamps-f32 %v9566_v57, 4.0  ;;  %v9564_v38 = vmul.f32 0.70710677, %v15959_v51  ;;  %v15965_v17 = vadd.f32 %v12148_v48, %v15864_v37 }
0x251d   : > { %v9540_v27 = vpop.f32.mrf.mxu1 }
0x251e   : > { %v15969_v26 = vmul.f32 %v15961_v33, %v15961_v33  ;;  %v15971_v40 = vclamps-f32 %v9564_v38, 4.0  ;;  %v9567_v61 = vmul.f32 0.70710677, %v15965_v17  ;;  %v15975_v54 = vadd.f32 %v15864_v37, %v9540_v27 }
0x2520   : > { %v9662_v52 = vmul.f32 -1.1791603e-07, %v15969_v26  ;;  %v15980_v39 = vmul.f32 %v15971_v40, %v15971_v40  ;;  %v15982_v12 = vclamps-f32 %v9567_v61, 4.0  ;;  %v9565_v14 = vmul.f32 0.70710677, %v15975_v54 }
0x2521   : > { %v9598_v6 = vmul.f32 0.00022905065, %v15969_v26 }
0x2522   : > { %v9670_v13 = vadd.f32 2.3547966e-05, %v9662_v52  ;;  %v15987_v63 = vmul.f32 %v15982_v12, %v15982_v12  ;;  %v9660_v25 = vmul.f32 -1.1791603e-07, %v15980_v39  ;;  %v15990_v23 = vclamps-f32 %v9565_v14, 4.0 }
0x2523   : > { %v9596_v53 = vmul.f32 0.00022905065, %v15980_v39  ;;  %v9606_v3 = vadd.f32 0.003408291, %v9598_v6 }
0x2524   : > { %v9678_v37 = vmul.f32 %v9670_v13, %v15969_v26  ;;  %v9668_v46 = vadd.f32 2.3547966e-05, %v9660_v25  ;;  %v9663_v36 = vmul.f32 -1.1791603e-07, %v15987_v63  ;;  %v15996_v8 = vmul.f32 %v15990_v23, %v15990_v23 }
0x2525   : > { %v9599_v22 = vmul.f32 0.00022905065, %v15987_v63  ;;  %v9604_v58 = vadd.f32 0.003408291, %v9596_v53  ;;  %v9614_v45 = vmul.f32 %v9606_v3, %v15969_v26 }
0x2526   : > { %v9686_v41 = vadd.f32 0.0010179626, %v9678_v37  ;;  %v9676_v4 = vmul.f32 %v9668_v46, %v15980_v39  ;;  %v9671_v47 = vadd.f32 2.3547966e-05, %v9663_v36  ;;  %v9661_v0 = vmul.f32 -1.1791603e-07, %v15996_v8 }
0x2527   : > { %v9597_v62 = vmul.f32 0.00022905065, %v15996_v8  ;;  %v9607_v19 = vadd.f32 0.003408291, %v9599_v22  ;;  %v9612_v9 = vmul.f32 %v9604_v58, %v15980_v39  ;;  %v9622_v37 = vadd.f32 0.050955694, %v9614_v45 }
0x2528   : > { %v9694_v34 = vmul.f32 %v9686_v41, %v15969_v26  ;;  %v9684_v10 = vadd.f32 0.0010179626, %v9676_v4  ;;  %v9679_v35 = vmul.f32 %v9671_v47, %v15987_v63  ;;  %v9669_v20 = vadd.f32 2.3547966e-05, %v9661_v0 }
0x2529   : > { %v9605_v15 = vadd.f32 0.003408291, %v9597_v62  ;;  %v9615_v57 = vmul.f32 %v9607_v19, %v15987_v63  ;;  %v9620_v61 = vadd.f32 0.050955694, %v9612_v9 }
0x252a   : > { %v9702_v55 = vadd.f32 0.01407047, %v9694_v34  ;;  %v9692_v1 = vmul.f32 %v9684_v10, %v15980_v39  ;;  %v9687_v60 = vadd.f32 0.0010179626, %v9679_v35  ;;  %v9677_v56 = vmul.f32 %v9669_v20, %v15996_v8 }
0x252b   : > { %v9613_v13 = vmul.f32 %v9605_v15, %v15996_v8  ;;  %v9623_v41 = vadd.f32 0.050955694, %v9615_v57  ;;  %v9628_v0 = vmul.f32 %v9620_v61, %v15980_v39  ;;  %v9630_v35 = vmul.f32 %v9622_v37, %v15969_v26 }
0x252c   : > { %v9710_v50 = vmul.f32 %v9702_v55, %v15969_v26  ;;  %v9700_v32 = vadd.f32 0.01407047, %v9692_v1  ;;  %v9695_v7 = vmul.f32 %v9687_v60, %v15987_v63  ;;  %v9685_v2 = vadd.f32 0.0010179626, %v9677_v56 }
0x252d   : > { %v9621_v10 = vadd.f32 0.050955694, %v9613_v13  ;;  %v9631_v55 = vmul.f32 %v9623_v41, %v15987_v63  ;;  %v9636_v60 = vadd.f32 0.18520832, %v9628_v0  ;;  %v9557_v37 = vmul.f32 0.5, %v15975_v54 }
0x252e   : > { %v9718_v16 = vadd.f32 0.11098505, %v9710_v50  ;;  %v9708_v28 = vmul.f32 %v9700_v32, %v15980_v39  ;;  %v9703_v29 = vadd.f32 0.01407047, %v9695_v7  ;;  %v9693_v11 = vmul.f32 %v9685_v2, %v15996_v8  ;;  %v10468_v0 = vld [vmem:[%s16297_s6] ss:$0 sm:$0xff] }
0x252f   : > { %v9629_v56 = vmul.f32 %v9621_v10, %v15996_v8  ;;  %v9638_v50 = vadd.f32 0.18520832, %v9630_v35  ;;  %v9639_v32 = vadd.f32 0.18520832, %v9631_v55  ;;  %v9644_v7 = vmul.f32 %v9636_v60, %v15980_v39  ;;  %s12826_s6 = sshll.u32 %s12919_s18, 4  ;;  %s12827_s6 = int_to_ptr.vmem [resolvable:$false] %s12826_s6 }
0x2530   : > { %v9726_v5 = vmul.f32 %v9718_v16, %v15969_v26  ;;  %v9716_v30 = vadd.f32 0.11098505, %v9708_v28  ;;  %v9711_v48 = vmul.f32 %v9703_v29, %v15987_v63  ;;  %v9701_v38 = vadd.f32 0.01407047, %v9693_v11  ;;  %s12828_s8 = scalar_lea.vmem %s12827_s6, 2048  ;;  %p12829_p0 = scmp.lt.s32.totalorder %s16063_s1, %s12827_s6 }
0x2531   : > { %v9637_v2 = vadd.f32 0.18520832, %v9629_v56  ;;  %v9646_v16 = vmul.f32 %v9638_v50, %v15969_v26  ;;  %v9647_v9 = vmul.f32 %v9639_v32, %v15987_v63  ;;  %v9652_v28 = vadd.f32 1.1283791, %v9644_v7  ;;  %p12830_p1 = scmp.lt.s32.totalorder %s12828_s8, %s12822_s5 }
0x2532   : > { %v9734_v27 = vadd.f32 0.49746925, %v9726_v5  ;;  %v9724_v52 = vmul.f32 %v9716_v30, %v15980_v39  ;;  %v9719_v14 = vadd.f32 0.11098505, %v9711_v48  ;;  %v9709_v25 = vmul.f32 %v9701_v38, %v15996_v8 }
0x2533   : > { %v9645_v29 = vmul.f32 %v9637_v2, %v15996_v8  ;;  %v9654_v15 = vadd.f32 1.1283791, %v9646_v16  ;;  %v9655_v11 = vadd.f32 1.1283791, %v9647_v9  ;;  %v9756_v5 = vmul.f32 %v15971_v40, %v9652_v28  ;;  %p12831_p2 = por %p12830_p1, %p12829_p0 }
0x2534   : > { %v9742_v46 = vmul.f32 %v9734_v27, %v15969_v26  ;;  %v9732_v36 = vadd.f32 0.49746925, %v9724_v52  ;;  %v9727_v53 = vmul.f32 %v9719_v14, %v15987_v63  ;;  %v9717_v4 = vadd.f32 0.11098505, %v9709_v25 }
0x2535   : > { %v9653_v30 = vadd.f32 1.1283791, %v9645_v29  ;;  %v9758_v48 = vmul.f32 %v15961_v33, %v9654_v15  ;;  %v9559_v40 = vmul.f32 0.5, %v15965_v17  ;;  %v9556_v33 = vmul.f32 0.5, %v15959_v51  ;;  %p12832_p3 = pnand %p12831_p2, %p12825_p13 }
0x2536   : > { %v9750_v47 = vadd.f32 1.0, %v9742_v46  ;;  %v9740_v6 = vmul.f32 %v9732_v36, %v15980_v39  ;;  %v9735_v34 = vadd.f32 0.49746925, %v9727_v53  ;;  %v9725_v22 = vmul.f32 %v9717_v4, %v15996_v8 }
0x2537   : > { %v9759_v39 = vmul.f32 %v15982_v12, %v9655_v11  ;;  %v9558_v46 = vmul.f32 0.5, %v15955_v44 }
0x2538   : > { %v9748_v20 = vadd.f32 1.0, %v9740_v6  ;;  %v9743_v58 = vmul.f32 %v9735_v34, %v15987_v63  ;;  %v9733_v1 = vadd.f32 0.49746925, %v9725_v22  ;;  %12465 = vrcp.f32 %v9750_v47 }
0x2539   : > { %v9757_v63 = vmul.f32 %v15990_v23, %v9653_v30 }
0x253a   : > { %12467 = vrcp.f32 %v9748_v20  ;;  %v9751_v62 = vadd.f32 1.0, %v9743_v58  ;;  %v9741_v3 = vmul.f32 %v9733_v1, %v15996_v8 }
0x253c   : > { %12469 = vrcp.f32 %v9751_v62  ;;  %v9749_v19 = vadd.f32 1.0, %v9741_v3 }
0x253e   : > { %12471 = vrcp.f32 %v9749_v19 }
0x2545   : > { %v12466_v45 = vpop.eup %12465 }
0x2546   : > { %v9774_v61 = vmul.f32 %v12466_v45, %v9758_v48 }
0x2547   : > { %v12468_v57 = vpop.eup %12467 }
0x2548   : > { %v9772_v38 = vmul.f32 %v12468_v57, %v9756_v5  ;;  %v9782_v25 = vadd.f32 1.0, %v9774_v61 }
0x2549   : > { %v12470_v27 = vpop.eup %12469 }
0x254a   : > { %v9775_v26 = vmul.f32 %v12470_v27, %v9759_v39  ;;  %v9780_v14 = vadd.f32 1.0, %v9772_v38  ;;  %v9790_v53 = vmul.f32 %v9782_v25, %v9558_v46 }
0x254b   : > { %v12472_v52 = vpop.eup %12471 }
0x254c   : > { %v9783_v8 = vadd.f32 1.0, %v9775_v26  ;;  %v9773_v13 = vmul.f32 %v12472_v52, %v9757_v63  ;;  %v9788_v41 = vmul.f32 %v9780_v14, %v9556_v33 }
0x254e   : > { %v9781_v12 = vadd.f32 1.0, %v9773_v13  ;;  %v9791_v36 = vmul.f32 %v9783_v8, %v9559_v40 }
0x2550   : > { %v9789_v23 = vmul.f32 %v9781_v12, %v9557_v37  ;;  %v9795_v47 = vpack.c.bf16 %v9791_v36, %v9790_v53 }
0x2552   : > { %v9794_v4 = vpack.c.bf16 %v9789_v23, %v9788_v41 }
0x2554   : > { %12169 = vmatprep.mubr.bf16.mxu0 %v9794_v4 }
0x2555   : > { %12170 = vmatmul.mubr.bf16.gmra.mxu0 %v9795_v47 }
0x258c   : > { %v12167_v17 = vpop.f32.mrf.mxu0 }
0x258d   : > { %v9910_v6 = vadd.f32 %v12167_v17, %v10468_v0 }
0x258e   : > { %v9901_v51 = vpop.f32.mrf.mxu0 }
0x258f   : > { %v9934_v54 = vadd.f32 %v9910_v6, %v15741_v31  ;;  %v9902_v34 = vadd.f32 %v10468_v0, %v9901_v51 }
0x2590   : > { %v12168_v10 = vpop.f32.mrf.mxu0 }
0x2591   : > { %9942 = vst.msk [vmem:[%s924_s2 + $0x10] sm:$0xff] %vm967_vm0, %v9934_v54  ;;  %v9932_v44 = vadd.f32 %v9902_v34, %v15739_v43  ;;  %v9913_v22 = vadd.f32 %v12168_v10, %v10468_v0 }
0x2592   : > { %v9904_v35 = vpop.f32.mrf.mxu0 }
0x2593   : > { %9940 = vst.msk [vmem:[%s924_s2] sm:$0xff] %vm967_vm0, %v9932_v44  ;;  %v9935_v20 = vadd.f32 %v9913_v22, %v15751_v42  ;;  %v9905_v55 = vadd.f32 %v10468_v0, %v9904_v35 }
0x2595   : > { %9943 = vst.msk [vmem:[%s924_s2 + $0x18] sm:$0xff] %vm967_vm0, %v9935_v20  ;;  %v9933_v58 = vadd.f32 %v9905_v55, %v15747_v21 }
0x2597   : > { %9941 = vst.msk [vmem:[%s924_s2 + $0x8] sm:$0xff] %vm967_vm0, %v9933_v58 }
0x2615   : > { %v12171_v31 = vpop.f32.mrf.mxu0 }
0x2616   : > { %v9926_v1 = vadd.f32 %v12171_v31, %v10468_v0 }
0x2617   : > { %v9917_v60 = vpop.f32.mrf.mxu0 }
0x2618   : > { %v9938_v43 = vadd.f32 %v9926_v1, %v15760_v49  ;;  %v9918_v62 = vadd.f32 %v10468_v0, %v9917_v60 }
0x2619   : > { %v12172_v56 = vpop.f32.mrf.mxu0 }
0x261a   : > { %9946 = vst.msk [vmem:[%s924_s2 + $0x30] sm:$0xff] %vm967_vm0, %v9938_v43  ;;  %v9936_v42 = vadd.f32 %v9918_v62, %v15755_v18  ;;  %v9929_v3 = vadd.f32 %v12172_v56, %v10468_v0 }
0x261b   : > { %v9920_v21 = vpop.f32.mrf.mxu0 }
0x261c   : > { %9944 = vst.msk [vmem:[%s924_s2 + $0x20] sm:$0xff] %vm967_vm0, %v9936_v42  ;;  %v9939_v50 = vadd.f32 %v9929_v3, %v15774_v24  ;;  %v9921_v32 = vadd.f32 %v10468_v0, %v9920_v21 }
0x261e   : > { %9947 = vst.msk [vmem:[%s924_s2 + $0x38] sm:$0xff] %vm967_vm0, %v9939_v50  ;;  %v9937_v18 = vadd.f32 %v9921_v32, %v15764_v59 }
0x2620   : > { %9945 = vst.msk [vmem:[%s924_s2 + $0x28] sm:$0xff] %vm967_vm0, %v9937_v18 }
0x2621   : > { %12835 = shalt.err (!%p12832_p3)
}
0x2622   : > { %s12836_s2 = scalar_lea.hbm %s16061_s3, 1024  ;;  %s12840_s0 = scalar_lea.hbm %s13080_s21, 2048 }
0x2623   : > { %p12837_p4 = scmp.ne.s32.totalorder %s16061_s3, %s12836_s2  ;;  %p12841_p9 = scmp.lt.s32.totalorder %s16061_s3, %s13080_s21 }
0x2624   : > { %p12842_p10 = scmp.lt.s32.totalorder %s12840_s0, %s12836_s2 }
0x2625   : > { %p12838_p7 = pnand %p12837_p4, %p13120_p5 }
0x2626   : > { %p12843_p11 = por %p12842_p10, %p12841_p9 }
0x2627   : > { %p12839_p8 = pneg %p12838_p7 }
0x2629   : > { %p12844_p12 = pnand %p12843_p11, %p12839_p8 }
0x262b   : > { %12847 = shalt.err (!%p12844_p12)
}
0x262c   : > { %s12920_s5 = smov 128   ;;  %s12921_s8 = smov 8  }
0x262d   : > { %12173 = dma.vmem_to_hbm [thread:$0]  (%p13120_p5), %s16063_s1, 1024, %s16061_s3, %s16070_s4, %s12920_s5, %s12920_s5, %s12921_s8  }
0x262e PF: > { %p12179_p13 = scmp.ge.s32.totalorder %s12882_s22, 2  ;;  %s9977_s6 = sand.u32 1, %s12870_s15  }
0x262f   : > { %s9978_s18 = scalar_lea.sflag [#allocation5], %s9977_s6 }
0x2630   : > { %p12176_p0 = pnand %p12179_p13, %p13124_p6 }
0x2632   : > { %p12177_p1 = pneg %p12176_p0 }
0x2634   : > { %12865 = dma.done.wait (%p12177_p1), %s9978_s18, 1024  }
0x2635   : > { %12867 = vsyncadd (%p12177_p1), %s9978_s18, 4294966272  ;;  %s16299_s2 = sld [smem:[#allocation27_spill]]  ;;  %p71_p2 = scmp.ge.s32.totalorder %s13107_s26, 4  }
0x2636   : > { %s16300_s18 = sld [smem:[#allocation28_spill]]  ;;  %s16301_s15 = smov %s12874_s16 }
0x2637   : > { %s16303_s22 = smov %s13107_s26  ;;  %73 = sbr.rel (!%p71_p2) target bundleno = 57 (0x39), region = 205 }
0x263b   : > { %s16302_s16 = smov %s16299_s2 }
0x263c   :  { %9983 = vsyncpa [#allocation5], 1 }
0x263d   :  { %9985 = vsyncpa [#allocation5 + $0x1], 1 }

</bundles_post_ra>
